<compile_context>
chip_gen: v7x
topology: tpu7x:2x2x1
jax: 0.10.0
libtpu: 0.0.40
codegen_flags: <defaults>
</compile_context>

<pallas_src>
import functools

import jax
import jax.numpy as jnp
from jax.experimental import pallas as pl
from jax.experimental.pallas import tpu as pltpu

JOINT_NUM = 57
OUT_CHANNEL = 4                      # 'Quaternion'
HIDDEN = 1024
NEG_SLOPE = 0.01                     # nn.LeakyReLU() default

IN_DIM = JOINT_NUM * 3               # 171
OUT_DIM = OUT_CHANNEL * JOINT_NUM    # 228
K_PAD = 256                          # padded input features  (multiple of 128)
N_PAD = 256                          # padded output features (multiple of 128)


def _round_up(x, m):
    return (x + m - 1) // m * m


def _pick_act_dtype():
    """bf16 activations on chips with bf16 VALUs (v6e/v7x); f32 otherwise."""
    try:
        kind = jax.devices()[0].device_kind.lower()
    except Exception:
        return jnp.float32
    if ("v6" in kind) or ("v7" in kind) or ("7x" in kind):
        return jnp.bfloat16
    return jnp.float32


# --------------------------------------------------------------------------
# Kernel: fused 4-layer MLP  (256 -> 1024 -> 1024 -> 1024 -> 256)
#   - bf16 weights, f32 MXU accumulation, f32 biases
#   - LeakyReLU as maximum(); activations in act_dtype (bf16 on v6e/v7x)
# --------------------------------------------------------------------------
def mlp_kernel(x_ref, w1_ref, b1_ref, w2_ref, b2_ref, w3_ref, b3_ref,
               w4_ref, b4_ref, o_ref, *, act_dtype):
    slope = jnp.asarray(NEG_SLOPE, act_dtype)

    def layer(h, w_ref, b_ref):
        z = jnp.dot(h.astype(jnp.bfloat16), w_ref[...],
                    preferred_element_type=jnp.float32)
        z = (z + b_ref[...]).astype(act_dtype)
        return jnp.maximum(z, slope * z)          # LeakyReLU

    h = layer(x_ref[...], w1_ref, b1_ref)
    h = layer(h, w2_ref, b2_ref)
    h = layer(h, w3_ref, b3_ref)
    o_ref[...] = jnp.dot(h.astype(jnp.bfloat16), w4_ref[...],
                         preferred_element_type=jnp.float32) + b4_ref[...]


def run_mlp(x_flat, params, act_dtype):
    """x_flat: (batch, IN_DIM) f32 -> (batch, OUT_DIM) f32."""
    batch = x_flat.shape[0]

    # Batch tile: large enough to amortize per-step pipeline overhead and fill
    # the 256-wide MXU (v6e/v7x), capped at 512; chosen so the grid has >= 2
    # programs whenever batch allows (v7x megacore sharding). Tiny batches pad
    # to a single 8-row (sublane aligned) tile.
    tm = min(512, max(8, _round_up(pl.cdiv(batch, 2), 8)))
    bp = _round_up(batch, tm)

    x_pad = jnp.pad(x_flat, ((0, bp - batch), (0, K_PAD - IN_DIM)))

    # Weights never change across the grid -> constant index_map + single
    # buffering (halves their resident VMEM footprint).
    def w_spec(shape):
        return pl.BlockSpec(shape, lambda i: (0, 0),
                            pipeline_mode=pl.Buffered(1))

    in_specs = [
        pl.BlockSpec((tm, K_PAD), lambda i: (i, 0)),   # x tile
        w_spec((K_PAD, HIDDEN)), w_spec((1, HIDDEN)),
        w_spec((HIDDEN, HIDDEN)), w_spec((1, HIDDEN)),
        w_spec((HIDDEN, HIDDEN)), w_spec((1, HIDDEN)),
        w_spec((HIDDEN, N_PAD)), w_spec((1, N_PAD)),
    ]
    out_spec = pl.BlockSpec((tm, N_PAD), lambda i: (i, 0))

    out = pl.pallas_call(
        functools.partial(mlp_kernel, act_dtype=act_dtype),
        out_shape=jax.ShapeDtypeStruct((bp, N_PAD), jnp.float32),
        grid=(bp // tm,),
        in_specs=in_specs,
        out_specs=out_spec,
        compiler_params=pltpu.CompilerParams(
            dimension_semantics=("parallel",),
            vmem_limit_bytes=32 << 20),
    )(x_pad, params["w1"], params["b1"], params["w2"], params["b2"],
      params["w3"], params["b3"], params["w4"], params["b4"])

    return out[:batch, :OUT_DIM]


# --------------------------------------------------------------------------
# quaternion -> 3x3 rotation matrix
# (tools.compute_rotation_matrix_from_quaternion); tiny elementwise math,
# left to XLA fusion.
# --------------------------------------------------------------------------
def quat_to_rot33(quats):
    qw, qx, qy, qz = quats[:, 0], quats[:, 1], quats[:, 2], quats[:, 3]
    inv = jax.lax.rsqrt(jnp.maximum(qw * qw + qx * qx + qy * qy + qz * qz, 1e-16))
    qw, qx, qy, qz = qw * inv, qx * inv, qy * inv, qz * inv

    xx, yy, zz = qx * qx, qy * qy, qz * qz
    xy, xz, yz = qx * qy, qx * qz, qy * qz
    xw, yw, zw = qx * qw, qy * qw, qz * qw

    r00 = 1.0 - 2.0 * yy - 2.0 * zz
    r01 = 2.0 * xy - 2.0 * zw
    r02 = 2.0 * xz + 2.0 * yw
    r10 = 2.0 * xy + 2.0 * zw
    r11 = 1.0 - 2.0 * xx - 2.0 * zz
    r12 = 2.0 * yz - 2.0 * xw
    r20 = 2.0 * xz - 2.0 * yw
    r21 = 2.0 * yz + 2.0 * xw
    r22 = 1.0 - 2.0 * xx - 2.0 * yy

    rows = jnp.stack([r00, r01, r02, r10, r11, r12, r20, r21, r22], axis=-1)
    return rows.reshape(-1, 3, 3)


def get_44_from_33(rot33):
    n = rot33.shape[0]
    rot44 = jnp.zeros((n, 4, 4), jnp.float32)
    rot44 = rot44.at[:, 0:3, 0:3].set(rot33)
    rot44 = rot44.at[:, 3, 3].set(1.0)
    return rot44


# --------------------------------------------------------------------------
# Forward factory: parent indices are a compile-time constant, so FK is either
# an associative_scan (pure chain, ~log2(J) batched matmul steps) or a
# statically unrolled tree (parents must precede children).
# TODO(synk): FK.compute_global_positions / read_bvh skeleton files are not
# available; this is a standard homogeneous-transform chain FK
# (global_j = global_parent @ [R_j | offset_j]) over a synthetic skeleton.
# --------------------------------------------------------------------------
def make_forward(parent_index, act_dtype):
    parent_index = tuple(int(p) for p in parent_index)
    is_chain = all(p == j - 1 for j, p in enumerate(parent_index))

    def fk_global_positions(offsets_batch, rot44):
        # local transform [R_j | offset_j]
        local = rot44.at[:, :, 0:3, 3].set(offsets_batch)
        if is_chain:
            glob = jax.lax.associative_scan(
                lambda a, b: jnp.einsum('...ik,...kj->...ij', a, b),
                local, axis=1)
        else:
            gs = [None] * len(parent_index)
            for j, p in enumerate(parent_index):
                lj = local[:, j]
                gs[j] = lj if p < 0 else jnp.einsum('bik,bkj->bij', gs[p], lj)
            glob = jnp.stack(gs, axis=1)
        return glob[:, :, 0:3, 3]                  # (B, J, 3)

    @jax.jit
    def forward(in_seq, params, joint_offsets):
        batch = in_seq.shape[0]
        x = in_seq.reshape(batch, -1)                       # (batch, 171)
        out_r = run_mlp(x, params, act_dtype)               # (batch, 228)
        quats = out_r.reshape(-1, OUT_CHANNEL)              # (batch*57, 4)
        rot33 = quat_to_rot33(quats)                        # (batch*57, 3, 3)
        rot44 = get_44_from_33(rot33).reshape(batch, JOINT_NUM, 4, 4)
        offsets_batch = jnp.broadcast_to(joint_offsets[None],
                                         (batch, JOINT_NUM, 3))
        out_poses = fk_global_positions(offsets_batch, rot44)
        return out_poses, rot44

    return forward


# --------------------------------------------------------------------------
# Deterministic parameters (PyTorch nn.Linear default init), then pad + bf16
# --------------------------------------------------------------------------
def make_params(key):
    dims = [(IN_DIM, HIDDEN), (HIDDEN, HIDDEN), (HIDDEN, HIDDEN), (HIDDEN, OUT_DIM)]
    params = {}
    for li, (fan_in, fan_out) in enumerate(dims, start=1):
        key, kw, kb = jax.random.split(key, 3)
        bound = 1.0 / float(fan_in) ** 0.5
        params[f"w{li}"] = jax.random.uniform(
            kw, (fan_in, fan_out), jnp.float32, -bound, bound)
        params[f"b{li}"] = jax.random.uniform(
            kb, (1, fan_out), jnp.float32, -bound, bound)
    return params, key


def prepare_params(params):
    """Pad K/N to 256 (zeros) and cast weights to bf16; biases stay f32."""
    w1 = jnp.zeros((K_PAD, HIDDEN), jnp.float32).at[:IN_DIM, :].set(params["w1"])
    w4 = jnp.zeros((HIDDEN, N_PAD), jnp.float32).at[:, :OUT_DIM].set(params["w4"])
    b4 = jnp.zeros((1, N_PAD), jnp.float32).at[:, :OUT_DIM].set(params["b4"])
    return {
        "w1": w1.astype(jnp.bfloat16), "b1": params["b1"],
        "w2": params["w2"].astype(jnp.bfloat16), "b2": params["b2"],
        "w3": params["w3"].astype(jnp.bfloat16), "b3": params["b3"],
        "w4": w4.astype(jnp.bfloat16), "b4": b4,
    }


if __name__ == "__main__":
    key = jax.random.PRNGKey(0)
    params, key = make_params(key)
    prepared = prepare_params(params)

    batch = 2
    key, k_in, k_off = jax.random.split(key, 3)
    in_seq = jax.random.normal(k_in, (batch, JOINT_NUM, 3), jnp.float32)

    # synthetic deterministic skeleton: chain hierarchy, small offsets (*0.01)
    joint_offsets = 0.01 * jax.random.uniform(
        k_off, (JOINT_NUM, 3), jnp.float32, -1.0, 1.0)
    parent_index = [-1] + list(range(JOINT_NUM - 1))

    act_dtype = _pick_act_dtype()
    forward = make_forward(parent_index, act_dtype)

    out_poses, out_rot44 = forward(in_seq, prepared, joint_offsets)
    jax.block_until_ready((out_poses, out_rot44))

    assert out_poses.shape == (batch, JOINT_NUM, 3)
    assert out_rot44.shape == (batch, JOINT_NUM, 4, 4)
    assert bool(jnp.all(jnp.isfinite(out_poses)))
    assert bool(jnp.all(jnp.isfinite(out_rot44)))
    print("KERNEL_OK")
</pallas_src>

<mosaic_0001>
module attributes {stable_mosaic.version = 11 : i64} {
  func.func @mlp_kernel(%arg0: i32, %arg1: memref<8x256xf32, #tpu.memory_space<vmem>>, %arg2: memref<256x1024xbf16, #tpu.memory_space<vmem>>, %arg3: memref<1x1024xf32, #tpu.memory_space<vmem>>, %arg4: memref<1024x1024xbf16, #tpu.memory_space<vmem>>, %arg5: memref<1x1024xf32, #tpu.memory_space<vmem>>, %arg6: memref<1024x1024xbf16, #tpu.memory_space<vmem>>, %arg7: memref<1x1024xf32, #tpu.memory_space<vmem>>, %arg8: memref<1024x256xbf16, #tpu.memory_space<vmem>>, %arg9: memref<1x256xf32, #tpu.memory_space<vmem>>, %arg10: memref<8x256xf32, #tpu.memory_space<vmem>>) attributes {dimension_semantics = [#tpu.dimension_semantics<parallel>], iteration_bounds = array<i64: 1>, scalar_prefetch = 0 : i64, scratch_operands = 0 : i64, tpu.core_type = #tpu.core_type<tc>, window_params = [{transform_indices = @transform_0, window_bounds = array<i64: 8, 256>}, {pipeline_mode = #tpu.pipeline_mode<synchronous>, transform_indices = @transform_1, window_bounds = array<i64: 256, 1024>}, {pipeline_mode = #tpu.pipeline_mode<synchronous>, transform_indices = @transform_2, window_bounds = array<i64: 1, 1024>}, {pipeline_mode = #tpu.pipeline_mode<synchronous>, transform_indices = @transform_3, window_bounds = array<i64: 1024, 1024>}, {pipeline_mode = #tpu.pipeline_mode<synchronous>, transform_indices = @transform_4, window_bounds = array<i64: 1, 1024>}, {pipeline_mode = #tpu.pipeline_mode<synchronous>, transform_indices = @transform_5, window_bounds = array<i64: 1024, 1024>}, {pipeline_mode = #tpu.pipeline_mode<synchronous>, transform_indices = @transform_6, window_bounds = array<i64: 1, 1024>}, {pipeline_mode = #tpu.pipeline_mode<synchronous>, transform_indices = @transform_7, window_bounds = array<i64: 1024, 256>}, {pipeline_mode = #tpu.pipeline_mode<synchronous>, transform_indices = @transform_8, window_bounds = array<i64: 1, 256>}, {transform_indices = @transform_9, window_bounds = array<i64: 8, 256>}]} {
    %c0 = arith.constant 0 : index
    %c0_0 = arith.constant 0 : index
    %0 = vector.load %arg1[%c0, %c0_0] : memref<8x256xf32, #tpu.memory_space<vmem>>, vector<8x256xf32>
    %1 = arith.truncf %0 : vector<8x256xf32> to vector<8x256xbf16>
    %c0_1 = arith.constant 0 : index
    %c0_2 = arith.constant 0 : index
    %2 = vector.load %arg2[%c0_1, %c0_2] : memref<256x1024xbf16, #tpu.memory_space<vmem>>, vector<256x1024xbf16>
    %cst = arith.constant dense<0.000000e+00> : vector<8x1024xf32>
    %3 = tpu.matmul %1, %2, %cst {dimension_numbers = #tpu.dot_dimension_numbers<[1], [0], [0], [1], [0, 0, 1, 1], [], []>} : vector<8x256xbf16>, vector<256x1024xbf16>, vector<8x1024xf32> -> vector<8x1024xf32>
    %c0_3 = arith.constant 0 : index
    %c0_4 = arith.constant 0 : index
    %4 = vector.load %arg3[%c0_3, %c0_4] : memref<1x1024xf32, #tpu.memory_space<vmem>>, vector<1x1024xf32>
    %5 = vector.broadcast %4 : vector<1x1024xf32> to vector<8x1024xf32>
    %6 = arith.addf %3, %5 : vector<8x1024xf32>
    %cst_5 = arith.constant 0.00999999977 : f32
    %7 = vector.broadcast %cst_5 : f32 to vector<8x1024xf32>
    %8 = arith.mulf %7, %6 : vector<8x1024xf32>
    %9 = arith.maximumf %6, %8 : vector<8x1024xf32>
    %10 = arith.truncf %9 : vector<8x1024xf32> to vector<8x1024xbf16>
    %c0_6 = arith.constant 0 : index
    %c0_7 = arith.constant 0 : index
    %11 = vector.load %arg4[%c0_6, %c0_7] : memref<1024x1024xbf16, #tpu.memory_space<vmem>>, vector<1024x1024xbf16>
    %cst_8 = arith.constant dense<0.000000e+00> : vector<8x1024xf32>
    %12 = tpu.matmul %10, %11, %cst_8 {dimension_numbers = #tpu.dot_dimension_numbers<[1], [0], [0], [1], [0, 0, 1, 1], [], []>} : vector<8x1024xbf16>, vector<1024x1024xbf16>, vector<8x1024xf32> -> vector<8x1024xf32>
    %c0_9 = arith.constant 0 : index
    %c0_10 = arith.constant 0 : index
    %13 = vector.load %arg5[%c0_9, %c0_10] : memref<1x1024xf32, #tpu.memory_space<vmem>>, vector<1x1024xf32>
    %14 = vector.broadcast %13 : vector<1x1024xf32> to vector<8x1024xf32>
    %15 = arith.addf %12, %14 : vector<8x1024xf32>
    %cst_11 = arith.constant 0.00999999977 : f32
    %16 = vector.broadcast %cst_11 : f32 to vector<8x1024xf32>
    %17 = arith.mulf %16, %15 : vector<8x1024xf32>
    %18 = arith.maximumf %15, %17 : vector<8x1024xf32>
    %19 = arith.truncf %18 : vector<8x1024xf32> to vector<8x1024xbf16>
    %c0_12 = arith.constant 0 : index
    %c0_13 = arith.constant 0 : index
    %20 = vector.load %arg6[%c0_12, %c0_13] : memref<1024x1024xbf16, #tpu.memory_space<vmem>>, vector<1024x1024xbf16>
    %cst_14 = arith.constant dense<0.000000e+00> : vector<8x1024xf32>
    %21 = tpu.matmul %19, %20, %cst_14 {dimension_numbers = #tpu.dot_dimension_numbers<[1], [0], [0], [1], [0, 0, 1, 1], [], []>} : vector<8x1024xbf16>, vector<1024x1024xbf16>, vector<8x1024xf32> -> vector<8x1024xf32>
    %c0_15 = arith.constant 0 : index
    %c0_16 = arith.constant 0 : index
    %22 = vector.load %arg7[%c0_15, %c0_16] : memref<1x1024xf32, #tpu.memory_space<vmem>>, vector<1x1024xf32>
    %23 = vector.broadcast %22 : vector<1x1024xf32> to vector<8x1024xf32>
    %24 = arith.addf %21, %23 : vector<8x1024xf32>
    %cst_17 = arith.constant 0.00999999977 : f32
    %25 = vector.broadcast %cst_17 : f32 to vector<8x1024xf32>
    %26 = arith.mulf %25, %24 : vector<8x1024xf32>
    %27 = arith.maximumf %24, %26 : vector<8x1024xf32>
    %28 = arith.truncf %27 : vector<8x1024xf32> to vector<8x1024xbf16>
    %c0_18 = arith.constant 0 : index
    %c0_19 = arith.constant 0 : index
    %29 = vector.load %arg8[%c0_18, %c0_19] : memref<1024x256xbf16, #tpu.memory_space<vmem>>, vector<1024x256xbf16>
    %cst_20 = arith.constant dense<0.000000e+00> : vector<8x256xf32>
    %30 = tpu.matmul %28, %29, %cst_20 {dimension_numbers = #tpu.dot_dimension_numbers<[1], [0], [0], [1], [0, 0, 1, 1], [], []>} : vector<8x1024xbf16>, vector<1024x256xbf16>, vector<8x256xf32> -> vector<8x256xf32>
    %c0_21 = arith.constant 0 : index
    %c0_22 = arith.constant 0 : index
    %31 = vector.load %arg9[%c0_21, %c0_22] : memref<1x256xf32, #tpu.memory_space<vmem>>, vector<1x256xf32>
    %32 = vector.broadcast %31 : vector<1x256xf32> to vector<8x256xf32>
    %33 = arith.addf %30, %32 : vector<8x256xf32>
    %c0_23 = arith.constant 0 : index
    %c0_24 = arith.constant 0 : index
    %34 = vector.load %arg10[%c0_23, %c0_24] : memref<8x256xf32, #tpu.memory_space<vmem>>, vector<8x256xf32>
    tpu.vector_store %arg10[%c0_23, %c0_24], %33 {strides = array<i32>} : memref<8x256xf32, #tpu.memory_space<vmem>>, vector<8x256xf32>,
    return
  }
  func.func @transform_0(%arg0: i32) -> (i32, i32) {
    %c0_i32 = arith.constant 0 : i32
    %c0_i32_0 = arith.constant 0 : i32
    return %arg0, %c0_i32 : i32, i32
  }
  func.func @transform_1(%arg0: i32) -> (i32, i32) {
    %c0_i32 = arith.constant 0 : i32
    %c0_i32_0 = arith.constant 0 : i32
    %c0_i32_1 = arith.constant 0 : i32
    return %c0_i32, %c0_i32_0 : i32, i32
  }
  func.func @transform_2(%arg0: i32) -> (i32, i32) {
    %c0_i32 = arith.constant 0 : i32
    %c0_i32_0 = arith.constant 0 : i32
    %c0_i32_1 = arith.constant 0 : i32
    return %c0_i32, %c0_i32_0 : i32, i32
  }
  func.func @transform_3(%arg0: i32) -> (i32, i32) {
    %c0_i32 = arith.constant 0 : i32
    %c0_i32_0 = arith.constant 0 : i32
    %c0_i32_1 = arith.constant 0 : i32
    return %c0_i32, %c0_i32_0 : i32, i32
  }
  func.func @transform_4(%arg0: i32) -> (i32, i32) {
    %c0_i32 = arith.constant 0 : i32
    %c0_i32_0 = arith.constant 0 : i32
    %c0_i32_1 = arith.constant 0 : i32
    return %c0_i32, %c0_i32_0 : i32, i32
  }
  func.func @transform_5(%arg0: i32) -> (i32, i32) {
    %c0_i32 = arith.constant 0 : i32
    %c0_i32_0 = arith.constant 0 : i32
    %c0_i32_1 = arith.constant 0 : i32
    return %c0_i32, %c0_i32_0 : i32, i32
  }
  func.func @transform_6(%arg0: i32) -> (i32, i32) {
    %c0_i32 = arith.constant 0 : i32
    %c0_i32_0 = arith.constant 0 : i32
    %c0_i32_1 = arith.constant 0 : i32
    return %c0_i32, %c0_i32_0 : i32, i32
  }
  func.func @transform_7(%arg0: i32) -> (i32, i32) {
    %c0_i32 = arith.constant 0 : i32
    %c0_i32_0 = arith.constant 0 : i32
    %c0_i32_1 = arith.constant 0 : i32
    return %c0_i32, %c0_i32_0 : i32, i32
  }
  func.func @transform_8(%arg0: i32) -> (i32, i32) {
    %c0_i32 = arith.constant 0 : i32
    %c0_i32_0 = arith.constant 0 : i32
    %c0_i32_1 = arith.constant 0 : i32
    return %c0_i32, %c0_i32_0 : i32, i32
  }
  func.func @transform_9(%arg0: i32) -> (i32, i32) {
    %c0_i32 = arith.constant 0 : i32
    %c0_i32_0 = arith.constant 0 : i32
    return %arg0, %c0_i32 : i32, i32
  }
}

</mosaic_0001>

<bundles_post_ra>
// kernel: forward.1
= control target key start
LH: loop header
LB: loop body
LE: loop exit
PB: predicated region body
PF: predicated region fallthrough
CT: control target
= control target key end

     0   :  { %14 = vsyncpa [#allocation3], 0  ;;  %s11908_s0 = inlined_call_operand.vmem [shape: f32[8,256], index: 0, kind: input, shape index: {}]   ;;  %s11909_s1 = inlined_call_operand.hbm [shape: bf16[256,1024], index: 1, kind: input, shape index: {}]   ;;  %s11910_s2 = inlined_call_operand.hbm [shape: f32[1,1024], index: 2, kind: input, shape index: {}]   ;;  %s11911_s3 = inlined_call_operand.hbm [shape: bf16[1024,1024], index: 3, kind: input, shape index: {}]   ;;  %s11912_s4 = inlined_call_operand.hbm [shape: f32[1,1024], index: 4, kind: input, shape index: {}]   ;;  %s11913_s5 = inlined_call_operand.hbm [shape: bf16[1024,1024], index: 5, kind: input, shape index: {}]   ;;  %s11914_s6 = inlined_call_operand.hbm [shape: f32[1,1024], index: 6, kind: input, shape index: {}]   ;;  %s11915_s7 = inlined_call_operand.hbm [shape: bf16[1024,256], index: 7, kind: input, shape index: {}]   ;;  %s11916_s8 = inlined_call_operand.hbm [shape: f32[1,256], index: 8, kind: input, shape index: {}]   ;;  %s11917_s9 = inlined_call_operand.vmem [shape: f32[8,256], index: 9, kind: output, shape index: {}]  }
   0x1   :  { %15 = vsyncpa [#allocation5], 0 }
   0x2   :  { %16 = vsyncpa [#allocation8], 0 }
   0x3   :  { %17 = vsyncpa [#allocation11], 0 }
   0x4   :  { %18 = vsyncpa [#allocation14], 0  ;;  %s11476_s30 = smov [#allocation4]   ;;  %s11477_s11 = smov [#allocation7]  }
   0x5   :  { %s39_s10 = sshll.u32 %s11476_s30, 4  ;;  %s61_s12 = sshll.u32 %s11477_s11, 4  ;;  %s40_s10 = int_to_ptr.vmem [resolvable:$true] %s39_s10  ;;  %s62_s12 = int_to_ptr.vmem [resolvable:$true] %s61_s12 }
   0x6   :  { %s11290_s15 = scalar_lea.hbm %s11910_s2, 128 }
   0x7   :  { %p11291_p0 = scmp.ne.s32.totalorder %s11910_s2, %s11290_s15  ;;  %p11294_p1 = scmp.lt.u32.totalorder %s11290_s15, %s11910_s2 }
   0x9   :  { %p11296_p2 = pnand %p11294_p1, %p11291_p0 }
   0xb   :  { %11299 = shalt.err (!%p11296_p2)
}
   0xc   :  { %s11300_s20 = scalar_lea.vmem %s40_s10, 128  ;;  %p11305_p4 = scmp.lt.s32.totalorder %s40_s10, %s40_s10 }
   0xd   :  { %p11301_p3 = scmp.ne.s32.totalorder %s40_s10, %s11300_s20  ;;  %p11306_p5 = scmp.lt.s32.totalorder %s11300_s20, %s11300_s20 }
   0xf   :  { %p11307_p6 = por %p11306_p5, %p11305_p4 }
  0x11   :  { %p11308_p7 = pnand %p11307_p6, %p11301_p3 }
  0x13   :  { %11311 = shalt.err (!%p11308_p7)
}
  0x14   :  { %42 = dma.hbm_to_vmem [thread:$0]  %s11910_s2, 128, %s40_s10, [#allocation5]  }
  0x15   :  { %s11312_s25 = scalar_lea.hbm %s11912_s4, 128 }
  0x16   :  { %p11313_p8 = scmp.ne.s32.totalorder %s11912_s4, %s11312_s25  ;;  %p11316_p9 = scmp.lt.u32.totalorder %s11312_s25, %s11912_s4 }
  0x18   :  { %p11318_p10 = pnand %p11316_p9, %p11313_p8 }
  0x1a   :  { %11321 = shalt.err (!%p11318_p10)
}
  0x1b   :  { %s11322_s30 = scalar_lea.vmem %s62_s12, 128  ;;  %p11327_p12 = scmp.lt.s32.totalorder %s62_s12, %s62_s12 }
  0x1c   :  { %p11323_p11 = scmp.ne.s32.totalorder %s62_s12, %s11322_s30  ;;  %p11328_p13 = scmp.lt.s32.totalorder %s11322_s30, %s11322_s30 }
  0x1e   :  { %p11329_p0 = por %p11328_p13, %p11327_p12 }
  0x20   :  { %p11330_p1 = pnand %p11329_p0, %p11323_p11 }
  0x22   :  { %11333 = shalt.err (!%p11330_p1)
}
  0x23   :  { %64 = dma.hbm_to_vmem [thread:$0]  %s11912_s4, 128, %s62_s12, [#allocation8]  }
  0x24   :  { %s11478_s11 = smov [#allocation10]   ;;  %s11479_s14 = smov [#allocation2]  }
  0x25   :  { %s83_s13 = sshll.u32 %s11478_s11, 4  ;;  %s26_s15 = sshll.u32 %s11479_s14, 4  ;;  %s84_s13 = int_to_ptr.vmem [resolvable:$true] %s83_s13  ;;  %s11562_s15 = int_to_ptr.vmem [resolvable:$true] %s26_s15 }
  0x26   :  { %s11334_s18 = scalar_lea.hbm %s11914_s6, 128 }
  0x27   :  { %p11335_p2 = scmp.ne.s32.totalorder %s11914_s6, %s11334_s18  ;;  %p11338_p3 = scmp.lt.u32.totalorder %s11334_s18, %s11914_s6 }
  0x29   :  { %p11340_p4 = pnand %p11338_p3, %p11335_p2 }
  0x2b   :  { %11343 = shalt.err (!%p11340_p4)
}
  0x2c   :  { %s11344_s4 = scalar_lea.vmem %s84_s13, 128  ;;  %p11349_p6 = scmp.lt.s32.totalorder %s84_s13, %s84_s13 }
  0x2d   :  { %p11345_p5 = scmp.ne.s32.totalorder %s84_s13, %s11344_s4  ;;  %p11350_p7 = scmp.lt.s32.totalorder %s11344_s4, %s11344_s4 }
  0x2f   :  { %p11351_p8 = por %p11350_p7, %p11349_p6 }
  0x31   :  { %p11352_p9 = pnand %p11351_p8, %p11345_p5 }
  0x33   :  { %11355 = shalt.err (!%p11352_p9)
}
  0x34   :  { %86 = dma.hbm_to_vmem [thread:$0]  %s11914_s6, 128, %s84_s13, [#allocation11]  }
  0x35   :  { %s11356_s26 = scalar_lea.hbm %s11909_s1, 16384 }
  0x36   :  { %p11357_p10 = scmp.ne.s32.totalorder %s11909_s1, %s11356_s26  ;;  %p11360_p11 = scmp.lt.u32.totalorder %s11356_s26, %s11909_s1 }
  0x38   :  { %p11362_p12 = pnand %p11360_p11, %p11357_p10 }
  0x3a   :  { %11365 = shalt.err (!%p11362_p12)
}
  0x3b   :  { %s11366_s2 = scalar_lea.vmem %s11562_s15, 16384  ;;  %p11371_p0 = scmp.lt.s32.totalorder %s11562_s15, %s11562_s15 }
  0x3c   :  { %p11367_p13 = scmp.ne.s32.totalorder %s11562_s15, %s11366_s2  ;;  %p11372_p1 = scmp.lt.s32.totalorder %s11366_s2, %s11366_s2 }
  0x3e   :  { %p11373_p2 = por %p11372_p1, %p11371_p0 }
  0x40   :  { %p11374_p3 = pnand %p11373_p2, %p11367_p13 }
  0x42   :  { %11377 = shalt.err (!%p11374_p3)
}
  0x43   :  { %s11480_s6 = smov 512   ;;  %s11481_s10 = smov 32  }
  0x44   :  { %32 = dma.hbm_to_vmem [thread:$0]  %s11909_s1, 16384, %s11562_s15, [#allocation3], %s11480_s6, %s11480_s6, %s11481_s10  }
  0x45   :  { %s11482_s14 = smov [#allocation6]   ;;  %s11483_s17 = smov [#allocation9]  }
  0x46   :  { %s48_s16 = sshll.u32 %s11482_s14, 4  ;;  %s70_s18 = sshll.u32 %s11483_s17, 4  ;;  %s49_s16 = int_to_ptr.vmem [resolvable:$true] %s48_s16  ;;  %s11596_s18 = int_to_ptr.vmem [resolvable:$true] %s70_s18 }
  0x47   :  { %s11378_s21 = scalar_lea.hbm %s11911_s3, 65536 }
  0x48   :  { %p11379_p4 = scmp.ne.s32.totalorder %s11911_s3, %s11378_s21  ;;  %p11382_p5 = scmp.lt.u32.totalorder %s11378_s21, %s11911_s3 }
  0x4a   :  { %p11384_p6 = pnand %p11382_p5, %p11379_p4 }
  0x4c   :  { %11387 = shalt.err (!%p11384_p6)
}
  0x4d   :  { %s11388_s1 = scalar_lea.vmem %s49_s16, 65536  ;;  %p11393_p8 = scmp.lt.s32.totalorder %s49_s16, %s49_s16 }
  0x4e   :  { %p11389_p7 = scmp.ne.s32.totalorder %s49_s16, %s11388_s1  ;;  %p11394_p9 = scmp.lt.s32.totalorder %s11388_s1, %s11388_s1 }
  0x50   :  { %p11395_p10 = por %p11394_p9, %p11393_p8 }
  0x52   :  { %p11396_p11 = pnand %p11395_p10, %p11389_p7 }
  0x54   :  { %11399 = shalt.err (!%p11396_p11)
}
  0x55   :  { %54 = dma.hbm_to_vmem [thread:$0]  %s11911_s3, 65536, %s49_s16, [#allocation5], %s11480_s6, %s11480_s6, %s11481_s10  }
  0x56   :  { %s11400_s27 = scalar_lea.hbm %s11913_s5, 65536 }
  0x57   :  { %p11401_p12 = scmp.ne.s32.totalorder %s11913_s5, %s11400_s27  ;;  %p11404_p13 = scmp.lt.u32.totalorder %s11400_s27, %s11913_s5 }
  0x59   :  { %p11406_p0 = pnand %p11404_p13, %p11401_p12 }
  0x5b   :  { %11409 = shalt.err (!%p11406_p0)
}
  0x5c   :  { %s11410_s11 = scalar_lea.vmem %s11596_s18, 65536  ;;  %p11415_p2 = scmp.lt.s32.totalorder %s11596_s18, %s11596_s18 }
  0x5d   :  { %p11411_p1 = scmp.ne.s32.totalorder %s11596_s18, %s11410_s11  ;;  %p11416_p3 = scmp.lt.s32.totalorder %s11410_s11, %s11410_s11 }
  0x5f   :  { %p11417_p4 = por %p11416_p3, %p11415_p2 }
  0x61   :  { %p11418_p5 = pnand %p11417_p4, %p11411_p1 }
  0x63   :  { %11421 = shalt.err (!%p11418_p5)
}
  0x64   :  { %76 = dma.hbm_to_vmem [thread:$0]  %s11913_s5, 65536, %s11596_s18, [#allocation8], %s11480_s6, %s11480_s6, %s11481_s10  }
  0x65   :  { %s11484_s14 = smov [#allocation12]   ;;  %s11422_s20 = scalar_lea.hbm %s11915_s7, 16384 }
  0x66   :  { %s92_s16 = sshll.u32 %s11484_s14, 4  ;;  %p11423_p6 = scmp.ne.s32.totalorder %s11915_s7, %s11422_s20  ;;  %s93_s16 = int_to_ptr.vmem [resolvable:$true] %s92_s16 }
  0x67   :  { %p11426_p7 = scmp.lt.u32.totalorder %s11422_s20, %s11915_s7 }
  0x69   :  { %p11428_p8 = pnand %p11426_p7, %p11423_p6 }
  0x6b   :  { %11431 = shalt.err (!%p11428_p8)
}
  0x6c   :  { %s11432_s23 = scalar_lea.vmem %s93_s16, 16384  ;;  %p11437_p10 = scmp.lt.s32.totalorder %s93_s16, %s93_s16 }
  0x6d   :  { %p11433_p9 = scmp.ne.s32.totalorder %s93_s16, %s11432_s23  ;;  %p11438_p11 = scmp.lt.s32.totalorder %s11432_s23, %s11432_s23 }
  0x6f   :  { %p11439_p12 = por %p11438_p11, %p11437_p10 }
  0x71   :  { %p11440_p13 = pnand %p11439_p12, %p11433_p9 }
  0x73   :  { %11443 = shalt.err (!%p11440_p13)
}
  0x74   :  { %s11485_s5 = smov 128   ;;  %s11486_s6 = smov 8  }
  0x75   :  { %98 = dma.hbm_to_vmem [thread:$0]  %s11915_s7, 16384, %s93_s16, [#allocation11], %s11485_s5, %s11485_s5, %s11486_s6  }
  0x76   :  { %s11487_s1 = smov [#allocation13]   ;;  %s11444_s26 = scalar_lea.hbm %s11916_s8, 32 }
  0x77   :  { %s105_s15 = sshll.u32 %s11487_s1, 4  ;;  %p11445_p0 = scmp.ne.s32.totalorder %s11916_s8, %s11444_s26  ;;  %s106_s15 = int_to_ptr.vmem [resolvable:$true] %s105_s15 }
  0x78   :  { %p11448_p1 = scmp.lt.u32.totalorder %s11444_s26, %s11916_s8 }
  0x7a   :  { %p11450_p2 = pnand %p11448_p1, %p11445_p0 }
  0x7c   :  { %11453 = shalt.err (!%p11450_p2)
}
  0x7d   :  { %s11454_s2 = scalar_lea.vmem %s106_s15, 32  ;;  %p11459_p4 = scmp.lt.s32.totalorder %s106_s15, %s106_s15 }
  0x7e   :  { %p11455_p3 = scmp.ne.s32.totalorder %s106_s15, %s11454_s2  ;;  %p11460_p5 = scmp.lt.s32.totalorder %s11454_s2, %s11454_s2 }
  0x80   :  { %p11461_p6 = por %p11460_p5, %p11459_p4 }
  0x82   :  { %p11462_p7 = pnand %p11461_p6, %p11455_p3 }
  0x84   :  { %11465 = shalt.err (!%p11462_p7)
}
  0x85   :  { %108 = dma.hbm_to_vmem [thread:$0]  %s11916_s8, 32, %s106_s15, [#allocation14]  }
  0x86   :  { %11466 = dma.done.wait [#allocation3], 16384  }
  0x87   :  { %11467 = vsyncadd [#allocation3], 4294950912 }
  0x88   :  { %11468 = dma.done.wait [#allocation5], 65664  }
  0x89   :  { %11469 = vsyncadd [#allocation5], 4294901632 }
  0x8a   :  { %11470 = dma.done.wait [#allocation8], 65664  }
  0x8b   :  { %11471 = vsyncadd [#allocation8], 4294901632 }
  0x8c   :  { %11472 = dma.done.wait [#allocation11], 16512  }
  0x8d   :  { %11473 = vsyncadd [#allocation11], 4294950784 }
  0x8e   :  { %11474 = dma.done.wait [#allocation14], 32  }
  0x8f   :  { %11475 = vsyncadd [#allocation14], 4294967264  ;;  %v137_v0 = vld [vmem:[#allocation2] sm:$0xff]  ;;  %v134_v17 = vld [vmem:[%s11908_s0 + $0x8] sm:$0xff] }
  0x90   :  { %v141_v1 = vld [vmem:[#allocation2 + $0x20] sm:$0xff]  ;;  %v11660_v18 = vpack.c.bf16 %v134_v17, %v134_v17 }
  0x91   :  { %v145_v2 = vld [vmem:[#allocation2 + $0x40] sm:$0xff]  ;;  %v9679_v3 = vcombine.high %v137_v0, %v141_v1  ;;  %v9678_v4 = vcombine.low %v137_v0, %v141_v1  ;;  %v138_v0 = vld [vmem:[#allocation2 + $0x8] sm:$0xff] }
  0x92   :  { %v149_v5 = vld [vmem:[#allocation2 + $0x60] sm:$0xff]  ;;  %979 = vmatprep.mubr.bf16.mxu1 %v11660_v18  ;;  %v142_v1 = vld [vmem:[#allocation2 + $0x28] sm:$0xff] }
  0x93   :  { %v9687_v6 = vcombine.high %v145_v2, %v149_v5  ;;  %v153_v7 = vld [vmem:[#allocation2 + $0x80] sm:$0xff]  ;;  %947 = vmatprep.subr.bf16.mxu1 %v9679_v3  ;;  %v9686_v9 = vcombine.low %v145_v2, %v149_v5  ;;  %v146_v5 = vld [vmem:[#allocation2 + $0x48] sm:$0xff] }
  0x94   :  { %v157_v8 = vld [vmem:[#allocation2 + $0xa0] sm:$0xff]  ;;  %948 = vmatpush1.bf16.msra.mxu1 %v9678_v4 }
  0x95   :  { %949 = vmatprep.subr.bf16.mxu1 %v9687_v6  ;;  %v9695_v10 = vcombine.high %v153_v7, %v157_v8  ;;  %v161_v11 = vld [vmem:[#allocation2 + $0xc0] sm:$0xff]  ;;  %v9694_v13 = vcombine.low %v153_v7, %v157_v8  ;;  %v150_v6 = vld [vmem:[#allocation2 + $0x68] sm:$0xff]  ;;  %v9681_v7 = vcombine.high %v138_v0, %v142_v1 }
  0x96   :  { %v165_v12 = vld [vmem:[#allocation2 + $0xe0] sm:$0xff] }
  0x97   :  { %v9703_v14 = vcombine.high %v161_v11, %v165_v12  ;;  %v169_v15 = vld [vmem:[#allocation2 + $0x100] sm:$0xff]  ;;  %v9702_v19 = vcombine.low %v161_v11, %v165_v12  ;;  %v158_v11 = vld [vmem:[#allocation2 + $0xa8] sm:$0xff]  ;;  %v9689_v12 = vcombine.high %v146_v5, %v150_v6 }
  0x98   :  { %950 = vmatpush1.bf16.msra.mxu1 %v9686_v9  ;;  %v173_v16 = vld [vmem:[#allocation2 + $0x120] sm:$0xff]  ;;  %v9680_v9 = vcombine.low %v138_v0, %v142_v1  ;;  %v1159_v0 = vld [vmem:[#allocation6 + $0xc0] sm:$0xff] }
  0x99   :  { %951 = vmatprep.subr.bf16.mxu1 %v9695_v10  ;;  %v9711_v20 = vcombine.high %v169_v15, %v173_v16  ;;  %v177_v21 = vld [vmem:[#allocation2 + $0x140] sm:$0xff]  ;;  %v9710_v23 = vcombine.low %v169_v15, %v173_v16  ;;  %v154_v10 = vld [vmem:[#allocation2 + $0x88] sm:$0xff] }
  0x9a   :  { %v181_v22 = vld [vmem:[#allocation2 + $0x160] sm:$0xff]  ;;  %v166_v15 = vld [vmem:[#allocation2 + $0xe8] sm:$0xff]  ;;  %v9697_v16 = vcombine.high %v154_v10, %v158_v11  ;;  %v9696_v17 = vcombine.low %v154_v10, %v158_v11 }
  0x9b   :  { %v9719_v24 = vcombine.high %v177_v21, %v181_v22  ;;  %v185_v25 = vld [vmem:[#allocation2 + $0x180] sm:$0xff]  ;;  %v9718_v27 = vcombine.low %v177_v21, %v181_v22  ;;  %v1163_v1 = vld [vmem:[#allocation6 + $0xe0] sm:$0xff] }
  0x9c   :  { %952 = vmatpush1.bf16.msra.mxu1 %v9694_v13  ;;  %v189_v26 = vld [vmem:[#allocation2 + $0x1a0] sm:$0xff]  ;;  %v9688_v13 = vcombine.low %v146_v5, %v150_v6  ;;  %v9830_v5 = vcombine.low %v1159_v0, %v1163_v1  ;;  %v1171_v10 = vld [vmem:[#allocation6 + $0x120] sm:$0xff] }
  0x9d   :  { %953 = vmatprep.subr.bf16.mxu1 %v9703_v14  ;;  %v9727_v28 = vcombine.high %v185_v25, %v189_v26  ;;  %v193_v29 = vld [vmem:[#allocation2 + $0x1c0] sm:$0xff]  ;;  %v9726_v31 = vcombine.low %v185_v25, %v189_v26  ;;  %v162_v14 = vld [vmem:[#allocation2 + $0xc8] sm:$0xff] }
  0x9e   :  { %v197_v30 = vld [vmem:[#allocation2 + $0x1e0] sm:$0xff]  ;;  %v9705_v21 = vcombine.high %v162_v14, %v166_v15  ;;  %v9704_v22 = vcombine.low %v162_v14, %v166_v15  ;;  %v182_v25 = vld [vmem:[#allocation2 + $0x168] sm:$0xff] }
  0x9f   :  { %v9735_v32 = vcombine.high %v193_v29, %v197_v30  ;;  %v201_v33 = vld [vmem:[#allocation2 + $0x200] sm:$0xff]  ;;  %v9734_v35 = vcombine.low %v193_v29, %v197_v30  ;;  %v190_v29 = vld [vmem:[#allocation2 + $0x1a8] sm:$0xff] }
  0xa0   :  { %954 = vmatpush1.bf16.msra.mxu1 %v9702_v19  ;;  %v205_v34 = vld [vmem:[#allocation2 + $0x220] sm:$0xff]  ;;  %v170_v19 = vld [vmem:[#allocation2 + $0x108] sm:$0xff] }
  0xa1   :  { %955 = vmatprep.subr.bf16.mxu1 %v9711_v20  ;;  %v209_v36 = vld [vmem:[#allocation2 + $0x240] sm:$0xff]  ;;  %v9743_v38 = vcombine.high %v201_v33, %v205_v34  ;;  %v9742_v39 = vcombine.low %v201_v33, %v205_v34  ;;  %v174_v20 = vld [vmem:[#allocation2 + $0x128] sm:$0xff] }
  0xa2   :  { %v213_v37 = vld [vmem:[#allocation2 + $0x260] sm:$0xff]  ;;  %v9712_v26 = vcombine.low %v170_v19, %v174_v20  ;;  %v198_v33 = vld [vmem:[#allocation2 + $0x1e8] sm:$0xff] }
  0xa3   :  { %v217_v40 = vld [vmem:[#allocation2 + $0x280] sm:$0xff]  ;;  %v9751_v42 = vcombine.high %v209_v36, %v213_v37  ;;  %v9750_v43 = vcombine.low %v209_v36, %v213_v37  ;;  %v202_v36 = vld [vmem:[#allocation2 + $0x208] sm:$0xff] }
  0xa4   :  { %956 = vmatpush1.bf16.msra.mxu1 %v9710_v23  ;;  %v221_v41 = vld [vmem:[#allocation2 + $0x2a0] sm:$0xff]  ;;  %v9713_v23 = vcombine.high %v170_v19, %v174_v20  ;;  %v206_v37 = vld [vmem:[#allocation2 + $0x228] sm:$0xff] }
  0xa5   :  { %957 = vmatprep.subr.bf16.mxu1 %v9719_v24  ;;  %v225_v44 = vld [vmem:[#allocation2 + $0x2c0] sm:$0xff]  ;;  %v9759_v46 = vcombine.high %v217_v40, %v221_v41  ;;  %v9758_v47 = vcombine.low %v217_v40, %v221_v41  ;;  %v178_v24 = vld [vmem:[#allocation2 + $0x148] sm:$0xff] }
  0xa6   :  { %v229_v45 = vld [vmem:[#allocation2 + $0x2e0] sm:$0xff]  ;;  %v9720_v30 = vcombine.low %v178_v24, %v182_v25  ;;  %v1135_v40 = vld [vmem:[#allocation6] sm:$0xff] }
  0xa7   :  { %v233_v48 = vld [vmem:[#allocation2 + $0x300] sm:$0xff]  ;;  %v9767_v50 = vcombine.high %v225_v44, %v229_v45  ;;  %v9766_v51 = vcombine.low %v225_v44, %v229_v45  ;;  %v1139_v41 = vld [vmem:[#allocation6 + $0x20] sm:$0xff] }
  0xa8   :  { %958 = vmatpush1.bf16.msra.mxu1 %v9718_v27  ;;  %v237_v49 = vld [vmem:[#allocation2 + $0x320] sm:$0xff]  ;;  %v9721_v27 = vcombine.high %v178_v24, %v182_v25  ;;  %v9807_v44 = vcombine.high %v1135_v40, %v1139_v41  ;;  %v9806_v45 = vcombine.low %v1135_v40, %v1139_v41  ;;  %v242_v11 = vld [vmem:[#allocation2 + $0x348] sm:$0xff] }
  0xa9   :  { %959 = vmatprep.subr.bf16.mxu1 %v9727_v28  ;;  %v241_v52 = vld [vmem:[#allocation2 + $0x340] sm:$0xff]  ;;  %v9775_v54 = vcombine.high %v233_v48, %v237_v49  ;;  %v9774_v55 = vcombine.low %v233_v48, %v237_v49  ;;  %v186_v28 = vld [vmem:[#allocation2 + $0x188] sm:$0xff] }
  0xaa   :  { %v245_v53 = vld [vmem:[#allocation2 + $0x360] sm:$0xff]  ;;  %v9728_v34 = vcombine.low %v186_v28, %v190_v29  ;;  %4249 = vmatprep.subr.bf16.mxu0 %v9807_v44  ;;  %v1143_v48 = vld [vmem:[#allocation6 + $0x40] sm:$0xff]  ;;  %v147_v44 = vld [vmem:[#allocation2 + $0x50] sm:$0xff] }
  0xab   :  { %v249_v56 = vld [vmem:[#allocation2 + $0x380] sm:$0xff]  ;;  %v9783_v58 = vcombine.high %v241_v52, %v245_v53  ;;  %v9782_v59 = vcombine.low %v241_v52, %v245_v53  ;;  %4250 = vmatpush1.bf16.msra.mxu0 %v9806_v45  ;;  %v1147_v49 = vld [vmem:[#allocation6 + $0x60] sm:$0xff]  ;;  %v151_v45 = vld [vmem:[#allocation2 + $0x70] sm:$0xff] }
  0xac   :  { %960 = vmatpush1.bf16.msra.mxu1 %v9726_v31  ;;  %v253_v57 = vld [vmem:[#allocation2 + $0x3a0] sm:$0xff]  ;;  %v9729_v31 = vcombine.high %v186_v28, %v190_v29  ;;  %v9815_v52 = vcombine.high %v1143_v48, %v1147_v49  ;;  %v9814_v53 = vcombine.low %v1143_v48, %v1147_v49  ;;  %v1179_v19 = vld [vmem:[#allocation6 + $0x160] sm:$0xff]  ;;  %v9691_v49 = vcombine.high %v147_v44, %v151_v45 }
  0xad   :  { %961 = vmatprep.subr.bf16.mxu1 %v9735_v32  ;;  %v257_v60 = vld [vmem:[#allocation2 + $0x3c0] sm:$0xff]  ;;  %v9791_v62 = vcombine.high %v249_v56, %v253_v57  ;;  %v9790_v63 = vcombine.low %v249_v56, %v253_v57  ;;  %v194_v32 = vld [vmem:[#allocation2 + $0x1c8] sm:$0xff] }
  0xae   :  { %v261_v61 = vld [vmem:[#allocation2 + $0x3e0] sm:$0xff]  ;;  %4251 = vmatprep.subr.bf16.mxu0 %v9815_v52  ;;  %v1151_v56 = vld [vmem:[#allocation6 + $0x80] sm:$0xff]  ;;  %v155_v52 = vld [vmem:[#allocation2 + $0x90] sm:$0xff] }
  0xaf   :  { %v9799_v2 = vcombine.high %v257_v60, %v261_v61  ;;  %v133_v3 = vld [vmem:[%s11908_s0] sm:$0xff]  ;;  %v9798_v4 = vcombine.low %v257_v60, %v261_v61  ;;  %4252 = vmatpush1.bf16.msra.mxu0 %v9814_v53  ;;  %v1155_v57 = vld [vmem:[#allocation6 + $0xa0] sm:$0xff]  ;;  %v159_v53 = vld [vmem:[#allocation2 + $0xb0] sm:$0xff] }
  0xb0   :  { %962 = vmatpush1.bf16.msra.mxu1 %v9734_v35  ;;  %v11666_v8 = vpack.c.bf16 %v133_v3, %v133_v3  ;;  %v9737_v35 = vcombine.high %v194_v32, %v198_v33  ;;  %v9823_v60 = vcombine.high %v1151_v56, %v1155_v57  ;;  %v9822_v61 = vcombine.low %v1151_v56, %v1155_v57  ;;  %v238_v3 = vld [vmem:[#allocation2 + $0x328] sm:$0xff] }
  0xb1   :  { %963 = vmatprep.subr.bf16.mxu1 %v9743_v38  ;;  %v9736_v38 = vcombine.low %v194_v32, %v198_v33  ;;  %v250_v20 = vld [vmem:[#allocation2 + $0x388] sm:$0xff]  ;;  %v9690_v56 = vcombine.low %v147_v44, %v151_v45  ;;  %v9699_v57 = vcombine.high %v155_v52, %v159_v53 }
  0xb2   :  { %4253 = vmatprep.subr.bf16.mxu0 %v9823_v60  ;;  %v258_v28 = vld [vmem:[#allocation2 + $0x3c8] sm:$0xff]  ;;  %v163_v60 = vld [vmem:[#allocation2 + $0xd0] sm:$0xff] }
  0xb3   :  { %4254 = vmatpush1.bf16.msra.mxu0 %v9822_v61  ;;  %v262_v29 = vld [vmem:[#allocation2 + $0x3e8] sm:$0xff]  ;;  %v167_v61 = vld [vmem:[#allocation2 + $0xf0] sm:$0xff] }
  0xb4   :  { %964 = vmatpush1.bf16.msra.mxu1 %v9742_v39  ;;  %v9745_v39 = vcombine.high %v202_v36, %v206_v37  ;;  %v9801_v33 = vcombine.high %v258_v28, %v262_v29  ;;  %v9800_v40 = vcombine.low %v258_v28, %v262_v29  ;;  %v1247_v28 = vld [vmem:[#allocation6 + $0x380] sm:$0xff] }
  0xb5   :  { %965 = vmatprep.subr.bf16.mxu1 %v9751_v42  ;;  %v210_v42 = vld [vmem:[#allocation2 + $0x248] sm:$0xff] }
  0xb6   :  { %v1251_v29 = vld [vmem:[#allocation6 + $0x3a0] sm:$0xff] }
  0xb7   :  { %v11672_v44 = vld [vmem:[#allocation6 + $0x400] sm:$0xff] }
  0xb8   :  { %966 = vmatpush1.bf16.msra.mxu1 %v9750_v43  ;;  %v214_v43 = vld [vmem:[#allocation2 + $0x268] sm:$0xff] }
  0xb9   :  { %967 = vmatprep.subr.bf16.mxu1 %v9759_v46  ;;  %v9744_v46 = vcombine.low %v202_v36, %v206_v37  ;;  %v139_v36 = vld [vmem:[#allocation2 + $0x10] sm:$0xff]  ;;  %v11674_v45 = vld [vmem:[#allocation6 + $0x420] sm:$0xff] }
  0xba   :  { %v143_v37 = vld [vmem:[#allocation2 + $0x30] sm:$0xff] }
  0xbb   :  { %v9683_v41 = vcombine.high %v139_v36, %v143_v37  ;;  %v9682_v48 = vcombine.low %v139_v36, %v143_v37  ;;  %v1255_v36 = vld [vmem:[#allocation6 + $0x3c0] sm:$0xff] }
  0xbc   :  { %968 = vmatpush1.bf16.msra.mxu1 %v9758_v47  ;;  %v9753_v47 = vcombine.high %v210_v42, %v214_v43  ;;  %v1259_v37 = vld [vmem:[#allocation6 + $0x3e0] sm:$0xff] }
  0xbd   :  { %969 = vmatprep.subr.bf16.mxu1 %v9767_v50  ;;  %v218_v50 = vld [vmem:[#allocation2 + $0x288] sm:$0xff] }
  0xc0   :  { %970 = vmatpush1.bf16.msra.mxu1 %v9766_v51  ;;  %v222_v51 = vld [vmem:[#allocation2 + $0x2a8] sm:$0xff] }
  0xc1   :  { %971 = vmatprep.subr.bf16.mxu1 %v9775_v54  ;;  %v9752_v54 = vcombine.low %v210_v42, %v214_v43  ;;  %v1199_v42 = vld [vmem:[#allocation6 + $0x200] sm:$0xff] }
  0xc2   :  { %v1203_v43 = vld [vmem:[#allocation6 + $0x220] sm:$0xff] }
  0xc4   :  { %972 = vmatpush1.bf16.msra.mxu1 %v9774_v55  ;;  %v9761_v55 = vcombine.high %v218_v50, %v222_v51 }
  0xc5   :  { %973 = vmatprep.subr.bf16.mxu1 %v9783_v58  ;;  %v226_v58 = vld [vmem:[#allocation2 + $0x2c8] sm:$0xff] }
  0xc8   :  { %974 = vmatpush1.bf16.msra.mxu1 %v9782_v59  ;;  %v230_v59 = vld [vmem:[#allocation2 + $0x2e8] sm:$0xff] }
  0xc9   :  { %975 = vmatprep.subr.bf16.mxu1 %v9791_v62  ;;  %v9760_v62 = vcombine.low %v218_v50, %v222_v51  ;;  %v9768_v6 = vcombine.low %v226_v58, %v230_v59  ;;  %v1207_v50 = vld [vmem:[#allocation6 + $0x240] sm:$0xff] }
  0xca   :  { %v1211_v51 = vld [vmem:[#allocation6 + $0x260] sm:$0xff] }
  0xcc   :  { %976 = vmatpush1.bf16.msra.mxu1 %v9790_v63  ;;  %v9769_v63 = vcombine.high %v226_v58, %v230_v59  ;;  %v1215_v58 = vld [vmem:[#allocation6 + $0x280] sm:$0xff] }
  0xcd   :  { %977 = vmatprep.subr.bf16.mxu1 %v9799_v2  ;;  %v234_v2 = vld [vmem:[#allocation2 + $0x308] sm:$0xff] }
  0xce   :  { %v9776_v15 = vcombine.low %v234_v2, %v238_v3  ;;  %v1219_v59 = vld [vmem:[#allocation6 + $0x2a0] sm:$0xff] }
  0xd0   :  { %978 = vmatpush1.bf16.msra.mxu1 %v9798_v4  ;;  %v9831_v4 = vcombine.high %v1159_v0, %v1163_v1  ;;  %v9698_v0 = vcombine.low %v155_v52, %v159_v53  ;;  %v9707_v1 = vcombine.high %v163_v60, %v167_v61  ;;  %v219_v52 = vld [vmem:[#allocation2 + $0x290] sm:$0xff] }
  0xd1   :  { %988 = vmatprep.subr.bf16.mxu1 %v9681_v7  ;;  %v9777_v7 = vcombine.high %v234_v2, %v238_v3  ;;  %v1223_v2 = vld [vmem:[#allocation6 + $0x2c0] sm:$0xff]  ;;  %v223_v53 = vld [vmem:[#allocation2 + $0x2b0] sm:$0xff] }
  0xd2   :  { %4255 = vmatprep.subr.bf16.mxu0 %v9831_v4  ;;  %v1227_v3 = vld [vmem:[#allocation6 + $0x2e0] sm:$0xff]  ;;  %v171_v4 = vld [vmem:[#allocation2 + $0x110] sm:$0xff] }
  0xd3   :  { %980 = vmatmul.mubr.bf16.vlgmr.msra.gmra.mrb[0].mxu1 %v11666_v8  ;;  %4256 = vmatpush1.bf16.msra.mxu0 %v9830_v5  ;;  %v175_v5 = vld [vmem:[#allocation2 + $0x130] sm:$0xff] }
  0xd4   :  { %989 = vmatpush1.bf16.msra.mxu1 %v9680_v9  ;;  %1020 = vmatprep.mubr.bf16.mxu1 %v11660_v18  ;;  %v1167_v9 = vld [vmem:[#allocation6 + $0x100] sm:$0xff] }
  0xd5   :  { %990 = vmatprep.subr.bf16.mxu1 %v9689_v12  ;;  %v246_v12 = vld [vmem:[#allocation2 + $0x368] sm:$0xff]  ;;  %v9838_v14 = vcombine.low %v1167_v9, %v1171_v10 }
  0xd6   :  { %v9784_v24 = vcombine.low %v242_v11, %v246_v12 }
  0xd8   :  { %991 = vmatpush1.bf16.msra.mxu1 %v9688_v13  ;;  %v9839_v13 = vcombine.high %v1167_v9, %v1171_v10  ;;  %v9706_v9 = vcombine.low %v163_v60, %v167_v61  ;;  %v9715_v10 = vcombine.high %v171_v4, %v175_v5  ;;  %v235_v60 = vld [vmem:[#allocation2 + $0x310] sm:$0xff] }
  0xd9   :  { %992 = vmatprep.subr.bf16.mxu1 %v9697_v16  ;;  %v9785_v16 = vcombine.high %v242_v11, %v246_v12  ;;  %v1231_v11 = vld [vmem:[#allocation6 + $0x300] sm:$0xff]  ;;  %v239_v61 = vld [vmem:[#allocation2 + $0x330] sm:$0xff] }
  0xda   :  { %4257 = vmatprep.subr.bf16.mxu0 %v9839_v13  ;;  %v1235_v12 = vld [vmem:[#allocation6 + $0x320] sm:$0xff]  ;;  %v179_v13 = vld [vmem:[#allocation2 + $0x150] sm:$0xff] }
  0xdb   :  { %4258 = vmatpush1.bf16.msra.mxu0 %v9838_v14  ;;  %v183_v14 = vld [vmem:[#allocation2 + $0x170] sm:$0xff] }
  0xdc   :  { %993 = vmatpush1.bf16.msra.mxu1 %v9696_v17  ;;  %v1175_v17 = vld [vmem:[#allocation6 + $0x140] sm:$0xff] }
  0xdd   :  { %994 = vmatprep.subr.bf16.mxu1 %v9705_v21  ;;  %v254_v21 = vld [vmem:[#allocation2 + $0x3a8] sm:$0xff] }
  0xde   :  { %v9793_v25 = vcombine.high %v250_v20, %v254_v21  ;;  %v9792_v32 = vcombine.low %v250_v20, %v254_v21  ;;  %v1239_v20 = vld [vmem:[#allocation6 + $0x340] sm:$0xff] }
  0xdf   :  { %v1243_v21 = vld [vmem:[#allocation6 + $0x360] sm:$0xff] }
  0xe0   :  { %995 = vmatpush1.bf16.msra.mxu1 %v9704_v22  ;;  %v9847_v22 = vcombine.high %v1175_v17, %v1179_v19 }
  0xe1   :  { %996 = vmatprep.subr.bf16.mxu1 %v9713_v23  ;;  %v9846_v23 = vcombine.low %v1175_v17, %v1179_v19  ;;  %v9714_v17 = vcombine.low %v171_v4, %v175_v5  ;;  %v9723_v19 = vcombine.high %v179_v13, %v183_v14  ;;  %v251_v4 = vld [vmem:[#allocation2 + $0x390] sm:$0xff] }
  0xe2   :  { %4259 = vmatprep.subr.bf16.mxu0 %v9847_v22  ;;  %v187_v22 = vld [vmem:[#allocation2 + $0x190] sm:$0xff] }
  0xe3   :  { %4260 = vmatpush1.bf16.msra.mxu0 %v9846_v23  ;;  %v191_v23 = vld [vmem:[#allocation2 + $0x1b0] sm:$0xff] }
  0xe4   :  { %997 = vmatpush1.bf16.msra.mxu1 %v9712_v26  ;;  %v1183_v26 = vld [vmem:[#allocation6 + $0x180] sm:$0xff]  ;;  %v255_v5 = vld [vmem:[#allocation2 + $0x3b0] sm:$0xff] }
  0xe5   :  { %998 = vmatprep.subr.bf16.mxu1 %v9721_v27  ;;  %v1187_v27 = vld [vmem:[#allocation6 + $0x1a0] sm:$0xff] }
  0xe8   :  { %999 = vmatpush1.bf16.msra.mxu1 %v9720_v30  ;;  %v9855_v30 = vcombine.high %v1183_v26, %v1187_v27 }
  0xe9   :  { %1000 = vmatprep.subr.bf16.mxu1 %v9729_v31  ;;  %v9854_v31 = vcombine.low %v1183_v26, %v1187_v27  ;;  %v9722_v26 = vcombine.low %v179_v13, %v183_v14  ;;  %v9731_v27 = vcombine.high %v187_v22, %v191_v23  ;;  %v140_v13 = vld [vmem:[#allocation2 + $0x18] sm:$0xff] }
  0xea   :  { %4261 = vmatprep.subr.bf16.mxu0 %v9855_v30  ;;  %v195_v30 = vld [vmem:[#allocation2 + $0x1d0] sm:$0xff]  ;;  %v144_v14 = vld [vmem:[#allocation2 + $0x38] sm:$0xff] }
  0xeb   :  { %4262 = vmatpush1.bf16.msra.mxu0 %v9854_v31  ;;  %v199_v31 = vld [vmem:[#allocation2 + $0x1f0] sm:$0xff] }
  0xec   :  { %1001 = vmatpush1.bf16.msra.mxu1 %v9728_v34  ;;  %v1191_v34 = vld [vmem:[#allocation6 + $0x1c0] sm:$0xff] }
  0xed   :  { %1002 = vmatprep.subr.bf16.mxu1 %v9737_v35  ;;  %v1195_v35 = vld [vmem:[#allocation6 + $0x1e0] sm:$0xff] }
  0xf0   :  { %1003 = vmatpush1.bf16.msra.mxu1 %v9736_v38  ;;  %v9863_v38 = vcombine.high %v1191_v34, %v1195_v35 }
  0xf1   :  { %1004 = vmatprep.subr.bf16.mxu1 %v9745_v39  ;;  %v9862_v39 = vcombine.low %v1191_v34, %v1195_v35  ;;  %v9730_v34 = vcombine.low %v187_v22, %v191_v23  ;;  %v9739_v35 = vcombine.high %v195_v30, %v199_v31  ;;  %v156_v22 = vld [vmem:[#allocation2 + $0x98] sm:$0xff] }
  0xf2   :  { %4263 = vmatprep.subr.bf16.mxu0 %v9863_v38  ;;  %v203_v38 = vld [vmem:[#allocation2 + $0x210] sm:$0xff]  ;;  %v160_v23 = vld [vmem:[#allocation2 + $0xb8] sm:$0xff] }
  0xf3   :  { %4264 = vmatpush1.bf16.msra.mxu0 %v9862_v39  ;;  %v207_v39 = vld [vmem:[#allocation2 + $0x230] sm:$0xff] }
  0xf4   :  { %1005 = vmatpush1.bf16.msra.mxu1 %v9744_v46  ;;  %v9871_v46 = vcombine.high %v1199_v42, %v1203_v43 }
  0xf5   :  { %1006 = vmatprep.subr.bf16.mxu1 %v9753_v47  ;;  %v9870_v47 = vcombine.low %v1199_v42, %v1203_v43  ;;  %v9738_v42 = vcombine.low %v195_v30, %v199_v31  ;;  %v9747_v43 = vcombine.high %v203_v38, %v207_v39  ;;  %v172_v30 = vld [vmem:[#allocation2 + $0x118] sm:$0xff] }
  0xf6   :  { %4265 = vmatprep.subr.bf16.mxu0 %v9871_v46  ;;  %v211_v46 = vld [vmem:[#allocation2 + $0x250] sm:$0xff]  ;;  %v176_v31 = vld [vmem:[#allocation2 + $0x138] sm:$0xff] }
  0xf7   :  { %4266 = vmatpush1.bf16.msra.mxu0 %v9870_v47  ;;  %v215_v47 = vld [vmem:[#allocation2 + $0x270] sm:$0xff] }
  0xf8   :  { %1007 = vmatpush1.bf16.msra.mxu1 %v9752_v54  ;;  %v9879_v54 = vcombine.high %v1207_v50, %v1211_v51 }
  0xf9   :  { %1008 = vmatprep.subr.bf16.mxu1 %v9761_v55  ;;  %v9878_v55 = vcombine.low %v1207_v50, %v1211_v51  ;;  %v9746_v50 = vcombine.low %v203_v38, %v207_v39  ;;  %v9755_v51 = vcombine.high %v211_v46, %v215_v47  ;;  %v192_v38 = vld [vmem:[#allocation2 + $0x1b8] sm:$0xff] }
  0xfa   :  { %4267 = vmatprep.subr.bf16.mxu0 %v9879_v54  ;;  %v9754_v54 = vcombine.low %v211_v46, %v215_v47  ;;  %v204_v47 = vld [vmem:[#allocation2 + $0x218] sm:$0xff] }
  0xfb   :  { %4268 = vmatpush1.bf16.msra.mxu0 %v9878_v55  ;;  %v9763_v55 = vcombine.high %v219_v52, %v223_v53 }
  0xfc   :  { %1009 = vmatpush1.bf16.msra.mxu1 %v9760_v62  ;;  %v9887_v62 = vcombine.high %v1215_v58, %v1219_v59 }
  0xfd   :  { %1010 = vmatprep.subr.bf16.mxu1 %v9769_v63  ;;  %v9886_v63 = vcombine.low %v1215_v58, %v1219_v59  ;;  %v9762_v58 = vcombine.low %v219_v52, %v223_v53  ;;  %v212_v52 = vld [vmem:[#allocation2 + $0x258] sm:$0xff] }
  0xfe   :  { %4269 = vmatprep.subr.bf16.mxu0 %v9887_v62  ;;  %v216_v53 = vld [vmem:[#allocation2 + $0x278] sm:$0xff] }
  0xff   :  { %4270 = vmatpush1.bf16.msra.mxu0 %v9886_v63  ;;  %v9779_v63 = vcombine.high %v235_v60, %v239_v61 }
 0x100   :  { %1011 = vmatpush1.bf16.msra.mxu1 %v9768_v6  ;;  %v9895_v6 = vcombine.high %v1223_v2, %v1227_v3 }
 0x101   :  { %1012 = vmatprep.subr.bf16.mxu1 %v9777_v7  ;;  %v9894_v7 = vcombine.low %v1223_v2, %v1227_v3  ;;  %v9778_v2 = vcombine.low %v235_v60, %v239_v61  ;;  %v228_v60 = vld [vmem:[#allocation2 + $0x2d8] sm:$0xff] }
 0x102   :  { %4271 = vmatprep.subr.bf16.mxu0 %v9895_v6  ;;  %v232_v61 = vld [vmem:[#allocation2 + $0x2f8] sm:$0xff] }
 0x103   :  { %4272 = vmatpush1.bf16.msra.mxu0 %v9894_v7  ;;  %v9795_v7 = vcombine.high %v251_v4, %v255_v5 }
 0x104   :  { %1013 = vmatpush1.bf16.msra.mxu1 %v9776_v15  ;;  %v9903_v15 = vcombine.high %v1231_v11, %v1235_v12 }
 0x105   :  { %1014 = vmatprep.subr.bf16.mxu1 %v9785_v16  ;;  %v9902_v16 = vcombine.low %v1231_v11, %v1235_v12  ;;  %v9794_v11 = vcombine.low %v251_v4, %v255_v5  ;;  %v244_v4 = vld [vmem:[#allocation2 + $0x358] sm:$0xff] }
 0x106   :  { %4273 = vmatprep.subr.bf16.mxu0 %v9903_v15  ;;  %v248_v5 = vld [vmem:[#allocation2 + $0x378] sm:$0xff] }
 0x107   :  { %4274 = vmatpush1.bf16.msra.mxu0 %v9902_v16  ;;  %v9685_v16 = vcombine.high %v140_v13, %v144_v14 }
 0x108   :  { %1015 = vmatpush1.bf16.msra.mxu1 %v9784_v24  ;;  %v9911_v24 = vcombine.high %v1239_v20, %v1243_v21 }
 0x109   :  { %1016 = vmatprep.subr.bf16.mxu1 %v9793_v25  ;;  %v9910_v25 = vcombine.low %v1239_v20, %v1243_v21  ;;  %v9684_v20 = vcombine.low %v140_v13, %v144_v14  ;;  %v260_v13 = vld [vmem:[#allocation2 + $0x3d8] sm:$0xff] }
 0x10a   :  { %4275 = vmatprep.subr.bf16.mxu0 %v9911_v24  ;;  %v264_v14 = vld [vmem:[#allocation2 + $0x3f8] sm:$0xff] }
 0x10b   :  { %4276 = vmatpush1.bf16.msra.mxu0 %v9910_v25  ;;  %v9701_v25 = vcombine.high %v156_v22, %v160_v23 }
 0x10c   :  { %1017 = vmatpush1.bf16.msra.mxu1 %v9792_v32  ;;  %v9919_v32 = vcombine.high %v1247_v28, %v1251_v29 }
 0x10d   :  { %1018 = vmatprep.subr.bf16.mxu1 %v9801_v33  ;;  %v9918_v33 = vcombine.low %v1247_v28, %v1251_v29  ;;  %v9700_v28 = vcombine.low %v156_v22, %v160_v23  ;;  %v1144_v22 = vld [vmem:[#allocation6 + $0x48] sm:$0xff] }
 0x10e   :  { %4277 = vmatprep.subr.bf16.mxu0 %v9919_v32  ;;  %v1148_v23 = vld [vmem:[#allocation6 + $0x68] sm:$0xff] }
 0x10f   :  { %4278 = vmatpush1.bf16.msra.mxu0 %v9918_v33  ;;  %v9717_v33 = vcombine.high %v172_v30, %v176_v31 }
 0x110   :  { %1019 = vmatpush1.bf16.msra.mxu1 %v9800_v40  ;;  %v9927_v40 = vcombine.high %v1255_v36, %v1259_v37 }
 0x111   :  { %1029 = vmatprep.subr.bf16.mxu1 %v9683_v41  ;;  %v9926_v41 = vcombine.low %v1255_v36, %v1259_v37  ;;  %v9716_v36 = vcombine.low %v172_v30, %v176_v31  ;;  %v188_v37 = vld [vmem:[#allocation2 + $0x198] sm:$0xff]  ;;  %v1160_v30 = vld [vmem:[#allocation6 + $0xc8] sm:$0xff] }
 0x112   :  { %4279 = vmatprep.subr.bf16.mxu0 %v9927_v40  ;;  %v9733_v40 = vcombine.high %v188_v37, %v192_v38  ;;  %v1164_v31 = vld [vmem:[#allocation6 + $0xe8] sm:$0xff] }
 0x113   :  { %1021 = vmatmul.mubr.bf16.vlgmr.msra.gmra.mrb[4].mxu1 %v11666_v8  ;;  %4280 = vmatpush1.bf16.msra.mxu0 %v9926_v41  ;;  %v196_v41 = vld [vmem:[#allocation2 + $0x1d8] sm:$0xff] }
 0x114   :  { %1030 = vmatpush1.bf16.msra.mxu1 %v9682_v48  ;;  %1061 = vmatprep.mubr.bf16.mxu1 %v11660_v18  ;;  %v9935_v48 = vcombine.high %v11672_v44, %v11674_v45 }
 0x115   :  { %1031 = vmatprep.subr.bf16.mxu1 %v9691_v49  ;;  %v9934_v49 = vcombine.low %v11672_v44, %v11674_v45  ;;  %v1295_v45 = vld [vmem:[#allocation6 + $0x500] sm:$0xff] }
 0x116   :  { %4290 = vmatprep.subr.bf16.mxu0 %v9935_v48  ;;  %v208_v48 = vld [vmem:[#allocation2 + $0x238] sm:$0xff] }
 0x118   :  { %1032 = vmatpush1.bf16.msra.mxu1 %v9690_v56  ;;  %v227_v56 = vld [vmem:[#allocation2 + $0x2d0] sm:$0xff] }
 0x119   :  { %1033 = vmatprep.subr.bf16.mxu1 %v9699_v57  ;;  %v231_v57 = vld [vmem:[#allocation2 + $0x2f0] sm:$0xff] }
 0x11a   :  { %v9771_v59 = vcombine.high %v227_v56, %v231_v57  ;;  %v9770_v62 = vcombine.low %v227_v56, %v231_v57  ;;  %v220_v56 = vld [vmem:[#allocation2 + $0x298] sm:$0xff] }
 0x11b   :  { %v224_v57 = vld [vmem:[#allocation2 + $0x2b8] sm:$0xff] }
 0x11c   :  { %1034 = vmatpush1.bf16.msra.mxu1 %v9698_v0  ;;  %v243_v0 = vld [vmem:[#allocation2 + $0x350] sm:$0xff] }
 0x11d   :  { %1035 = vmatprep.subr.bf16.mxu1 %v9707_v1  ;;  %v247_v1 = vld [vmem:[#allocation2 + $0x370] sm:$0xff] }
 0x11e   :  { %v9787_v3 = vcombine.high %v243_v0, %v247_v1  ;;  %v9786_v6 = vcombine.low %v243_v0, %v247_v1  ;;  %v236_v0 = vld [vmem:[#allocation2 + $0x318] sm:$0xff] }
 0x11f   :  { %v240_v1 = vld [vmem:[#allocation2 + $0x338] sm:$0xff] }
 0x120   :  { %1036 = vmatpush1.bf16.msra.mxu1 %v9706_v9  ;;  %v259_v9 = vld [vmem:[#allocation2 + $0x3d0] sm:$0xff] }
 0x121   :  { %1037 = vmatprep.subr.bf16.mxu1 %v9715_v10  ;;  %v263_v10 = vld [vmem:[#allocation2 + $0x3f0] sm:$0xff] }
 0x122   :  { %v9803_v12 = vcombine.high %v259_v9, %v263_v10  ;;  %v9802_v15 = vcombine.low %v259_v9, %v263_v10  ;;  %v252_v9 = vld [vmem:[#allocation2 + $0x398] sm:$0xff] }
 0x123   :  { %v256_v10 = vld [vmem:[#allocation2 + $0x3b8] sm:$0xff] }
 0x124   :  { %1038 = vmatpush1.bf16.msra.mxu1 %v9714_v17  ;;  %v148_v17 = vld [vmem:[#allocation2 + $0x58] sm:$0xff] }
 0x125   :  { %1039 = vmatprep.subr.bf16.mxu1 %v9723_v19  ;;  %v152_v19 = vld [vmem:[#allocation2 + $0x78] sm:$0xff] }
 0x126   :  { %v9693_v21 = vcombine.high %v148_v17, %v152_v19  ;;  %v9692_v24 = vcombine.low %v148_v17, %v152_v19  ;;  %v1136_v17 = vld [vmem:[#allocation6 + $0x8] sm:$0xff] }
 0x127   :  { %v1140_v19 = vld [vmem:[#allocation6 + $0x28] sm:$0xff] }
 0x128   :  { %1040 = vmatpush1.bf16.msra.mxu1 %v9722_v26  ;;  %v164_v26 = vld [vmem:[#allocation2 + $0xd8] sm:$0xff] }
 0x129   :  { %1041 = vmatprep.subr.bf16.mxu1 %v9731_v27  ;;  %v168_v27 = vld [vmem:[#allocation2 + $0xf8] sm:$0xff] }
 0x12a   :  { %v9709_v29 = vcombine.high %v164_v26, %v168_v27  ;;  %v9708_v32 = vcombine.low %v164_v26, %v168_v27  ;;  %v1152_v26 = vld [vmem:[#allocation6 + $0x88] sm:$0xff] }
 0x12b   :  { %v1156_v27 = vld [vmem:[#allocation6 + $0xa8] sm:$0xff] }
 0x12c   :  { %1042 = vmatpush1.bf16.msra.mxu1 %v9730_v34  ;;  %v180_v34 = vld [vmem:[#allocation2 + $0x158] sm:$0xff] }
 0x12d   :  { %1043 = vmatprep.subr.bf16.mxu1 %v9739_v35  ;;  %v184_v35 = vld [vmem:[#allocation2 + $0x178] sm:$0xff] }
 0x12e   :  { %v9724_v39 = vcombine.low %v180_v34, %v184_v35 }
 0x130   :  { %1044 = vmatpush1.bf16.msra.mxu1 %v9738_v42  ;;  %v200_v42 = vld [vmem:[#allocation2 + $0x1f8] sm:$0xff] }
 0x131   :  { %1045 = vmatprep.subr.bf16.mxu1 %v9747_v43  ;;  %v9732_v43 = vcombine.low %v188_v37, %v192_v38  ;;  %v9741_v46 = vcombine.high %v196_v41, %v200_v42  ;;  %v9832_v37 = vcombine.low %v1160_v30, %v1164_v31 }
 0x134   :  { %1046 = vmatpush1.bf16.msra.mxu1 %v9746_v50  ;;  %v9740_v50 = vcombine.low %v196_v41, %v200_v42  ;;  %v11688_v42 = vld [vmem:[#allocation4] sm:$0xff] }
 0x135   :  { %1047 = vmatprep.subr.bf16.mxu1 %v9755_v51  ;;  %v9749_v51 = vcombine.high %v204_v47, %v208_v48 }
 0x138   :  { %1048 = vmatpush1.bf16.msra.mxu1 %v9754_v54  ;;  %v9748_v54 = vcombine.low %v204_v47, %v208_v48  ;;  %v1184_v47 = vld [vmem:[#allocation6 + $0x188] sm:$0xff] }
 0x139   :  { %1049 = vmatprep.subr.bf16.mxu1 %v9763_v55  ;;  %v9757_v55 = vcombine.high %v212_v52, %v216_v53  ;;  %v1188_v48 = vld [vmem:[#allocation6 + $0x1a8] sm:$0xff] }
 0x13c   :  { %1050 = vmatpush1.bf16.msra.mxu1 %v9762_v58  ;;  %v9756_v58 = vcombine.low %v212_v52, %v216_v53  ;;  %v9857_v53 = vcombine.high %v1184_v47, %v1188_v48 }
 0x13d   :  { %1051 = vmatprep.subr.bf16.mxu1 %v9771_v59  ;;  %v9765_v59 = vcombine.high %v220_v56, %v224_v57 }
 0x140   :  { %1052 = vmatpush1.bf16.msra.mxu1 %v9770_v62  ;;  %v9764_v62 = vcombine.low %v220_v56, %v224_v57  ;;  %v1196_v56 = vld [vmem:[#allocation6 + $0x1e8] sm:$0xff] }
 0x141   :  { %1053 = vmatprep.subr.bf16.mxu1 %v9779_v63  ;;  %v9773_v63 = vcombine.high %v228_v60, %v232_v61 }
 0x144   :  { %1054 = vmatpush1.bf16.msra.mxu1 %v9778_v2  ;;  %v9772_v2 = vcombine.low %v228_v60, %v232_v61  ;;  %v9856_v61 = vcombine.low %v1184_v47, %v1188_v48  ;;  %v1240_v47 = vld [vmem:[#allocation6 + $0x348] sm:$0xff] }
 0x145   :  { %1055 = vmatprep.subr.bf16.mxu1 %v9787_v3  ;;  %v9781_v3 = vcombine.high %v236_v0, %v240_v1  ;;  %v1244_v48 = vld [vmem:[#allocation6 + $0x368] sm:$0xff] }
 0x148   :  { %1056 = vmatpush1.bf16.msra.mxu1 %v9786_v6  ;;  %v9780_v6 = vcombine.low %v236_v0, %v240_v1 }
 0x149   :  { %1057 = vmatprep.subr.bf16.mxu1 %v9795_v7  ;;  %v9789_v7 = vcombine.high %v244_v4, %v248_v5 }
 0x14c   :  { %1058 = vmatpush1.bf16.msra.mxu1 %v9794_v11  ;;  %v9788_v11 = vcombine.low %v244_v4, %v248_v5  ;;  %v1204_v4 = vld [vmem:[#allocation6 + $0x228] sm:$0xff] }
 0x14d   :  { %1059 = vmatprep.subr.bf16.mxu1 %v9803_v12  ;;  %v9797_v12 = vcombine.high %v252_v9, %v256_v10 }
 0x150   :  { %1060 = vmatpush1.bf16.msra.mxu1 %v9802_v15  ;;  %v9796_v15 = vcombine.low %v252_v9, %v256_v10  ;;  %v1275_v9 = vld [vmem:[#allocation6 + $0x460] sm:$0xff] }
 0x151   :  { %1070 = vmatprep.subr.bf16.mxu1 %v9685_v16  ;;  %v9805_v16 = vcombine.high %v260_v13, %v264_v14 }
 0x153   :  { %1062 = vmatmul.mubr.bf16.vlgmr.msra.gmra.mrb[8].mxu1 %v11666_v8 }
 0x154   :  { %1071 = vmatpush1.bf16.msra.mxu1 %v9684_v20  ;;  %1102 = vmatprep.mubr.bf16.mxu1 %v11660_v18  ;;  %v9725_v18 = vcombine.high %v180_v34, %v184_v35  ;;  %v9804_v20 = vcombine.low %v260_v13, %v264_v14  ;;  %v9833_v34 = vcombine.high %v1160_v30, %v1164_v31  ;;  %v1168_v35 = vld [vmem:[#allocation6 + $0x108] sm:$0xff] }
 0x155   :  { %1072 = vmatprep.subr.bf16.mxu1 %v9693_v21  ;;  %v9809_v21 = vcombine.high %v1136_v17, %v1140_v19  ;;  %v1212_v13 = vld [vmem:[#allocation6 + $0x268] sm:$0xff] }
 0x156   :  { %v1224_v30 = vld [vmem:[#allocation6 + $0x2c8] sm:$0xff] }
 0x157   :  { %v1228_v31 = vld [vmem:[#allocation6 + $0x2e8] sm:$0xff] }
 0x158   :  { %1073 = vmatpush1.bf16.msra.mxu1 %v9692_v24  ;;  %v9808_v24 = vcombine.low %v1136_v17, %v1140_v19  ;;  %v1279_v17 = vld [vmem:[#allocation6 + $0x480] sm:$0xff] }
 0x159   :  { %1074 = vmatprep.subr.bf16.mxu1 %v9701_v25  ;;  %v9817_v25 = vcombine.high %v1144_v22, %v1148_v23  ;;  %v1283_v19 = vld [vmem:[#allocation6 + $0x4a0] sm:$0xff] }
 0x15c   :  { %1075 = vmatpush1.bf16.msra.mxu1 %v9700_v28  ;;  %v9816_v28 = vcombine.low %v1144_v22, %v1148_v23  ;;  %v1216_v22 = vld [vmem:[#allocation6 + $0x288] sm:$0xff] }
 0x15d   :  { %1076 = vmatprep.subr.bf16.mxu1 %v9709_v29  ;;  %v9825_v29 = vcombine.high %v1152_v26, %v1156_v27  ;;  %v1220_v23 = vld [vmem:[#allocation6 + $0x2a8] sm:$0xff] }
 0x15e   :  { %v9888_v44 = vcombine.low %v1216_v22, %v1220_v23 }
 0x160   :  { %1077 = vmatpush1.bf16.msra.mxu1 %v9708_v32  ;;  %v267_v32 = vlaneseq }
 0x161   :  { %1078 = vmatprep.subr.bf16.mxu1 %v9717_v33  ;;  %v9824_v33 = vcombine.low %v1152_v26, %v1156_v27  ;;  %v1287_v26 = vld [vmem:[#allocation6 + $0x4c0] sm:$0xff] }
 0x162   :  { %v1291_v27 = vld [vmem:[#allocation6 + $0x4e0] sm:$0xff] }
 0x164   :  { %1079 = vmatpush1.bf16.msra.mxu1 %v9716_v36  ;;  %v1172_v36 = vld [vmem:[#allocation6 + $0x128] sm:$0xff] }
 0x165   :  { %1080 = vmatprep.subr.bf16.mxu1 %v9725_v18  ;;  %v11683_v18 = vshrl.u32 %v267_v32, 7  ;;  %v9841_v38 = vcombine.high %v1168_v35, %v1172_v36  ;;  %v9840_v41 = vcombine.low %v1168_v35, %v1172_v36  ;;  %v9959_v32 = vcombine.high %v1287_v26, %v1291_v27  ;;  %v1232_v35 = vld [vmem:[#allocation6 + $0x308] sm:$0xff] }
 0x166   :  { %v1236_v36 = vld [vmem:[#allocation6 + $0x328] sm:$0xff] }
 0x168   :  { %1081 = vmatpush1.bf16.msra.mxu1 %v9724_v39  ;;  %v1180_v39 = vld [vmem:[#allocation6 + $0x168] sm:$0xff] }
 0x169   :  { %1082 = vmatprep.subr.bf16.mxu1 %v9733_v40  ;;  %v11686_v40 = vsub.s32 0, %v11683_v18 }
 0x16c   :  { %1083 = vmatpush1.bf16.msra.mxu1 %v9732_v43  ;;  %v11691_v43 = vsub.s32 1, %v11683_v18 }
 0x16d   :  { %1084 = vmatprep.subr.bf16.mxu1 %v9741_v46 }
 0x170   :  { %1085 = vmatpush1.bf16.msra.mxu1 %v9740_v50  ;;  %v270_v50 = vrot.slane %v11688_v42, %v11686_v40 }
 0x171   :  { %1086 = vmatprep.subr.bf16.mxu1 %v9749_v51  ;;  %v274_v51 = vrot.slane %v11688_v42, %v11691_v43 }
 0x174   :  { %1087 = vmatpush1.bf16.msra.mxu1 %v9748_v54 }
 0x175   :  { %1088 = vmatprep.subr.bf16.mxu1 %v9757_v55  ;;  %v1192_v55 = vld [vmem:[#allocation6 + $0x1c8] sm:$0xff] }
 0x176   :  { %v9865_v0 = vcombine.high %v1192_v55, %v1196_v56 }
 0x178   :  { %1089 = vmatpush1.bf16.msra.mxu1 %v9756_v58 }
 0x179   :  { %1090 = vmatprep.subr.bf16.mxu1 %v9765_v59 }
 0x17c   :  { %1091 = vmatpush1.bf16.msra.mxu1 %v9764_v62 }
 0x17d   :  { %1092 = vmatprep.subr.bf16.mxu1 %v9773_v63 }
 0x180   :  { %1093 = vmatpush1.bf16.msra.mxu1 %v9772_v2 }
 0x181   :  { %1094 = vmatprep.subr.bf16.mxu1 %v9781_v3  ;;  %v1200_v3 = vld [vmem:[#allocation6 + $0x208] sm:$0xff] }
 0x184   :  { %1095 = vmatpush1.bf16.msra.mxu1 %v9780_v6  ;;  %v9864_v6 = vcombine.low %v1192_v55, %v1196_v56  ;;  %v1248_v56 = vld [vmem:[#allocation6 + $0x388] sm:$0xff] }
 0x185   :  { %1096 = vmatprep.subr.bf16.mxu1 %v9789_v7  ;;  %v1271_v7 = vld [vmem:[#allocation6 + $0x440] sm:$0xff] }
 0x188   :  { %1097 = vmatpush1.bf16.msra.mxu1 %v9788_v11  ;;  %v9873_v11 = vcombine.high %v1200_v3, %v1204_v4 }
 0x189   :  { %1098 = vmatprep.subr.bf16.mxu1 %v9797_v12  ;;  %v1208_v12 = vld [vmem:[#allocation6 + $0x248] sm:$0xff] }
 0x18c   :  { %1099 = vmatpush1.bf16.msra.mxu1 %v9796_v15  ;;  %v9943_v15 = vcombine.high %v1271_v7, %v1275_v9 }
 0x18d   :  { %1100 = vmatprep.subr.bf16.mxu1 %v9805_v16  ;;  %v9872_v16 = vcombine.low %v1200_v3, %v1204_v4  ;;  %v1327_v4 = vld [vmem:[#allocation6 + $0x600] sm:$0xff] }
 0x190   :  { %1101 = vmatpush1.bf16.msra.mxu1 %v9804_v20  ;;  %v9881_v20 = vcombine.high %v1208_v12, %v1212_v13 }
 0x191   :  { %4413 = vmatprep.subr.bf16.mxu1 %v9809_v21  ;;  %v9942_v21 = vcombine.low %v1271_v7, %v1275_v9  ;;  %v1264_v9 = vld [vmem:[#allocation6 + $0x408] sm:$0xff] }
 0x193   :  { %1103 = vmatmul.mubr.bf16.vlgmr.msra.gmra.mrb[12].mxu1 %v11666_v8  ;;  %v1176_v8 = vld [vmem:[#allocation6 + $0x148] sm:$0xff] }
 0x194   :  { %4414 = vmatpush1.bf16.msra.mxu1 %v9808_v24  ;;  %v9849_v46 = vcombine.high %v1176_v8, %v1180_v39  ;;  %v9848_v52 = vcombine.low %v1176_v8, %v1180_v39  ;;  %v9951_v24 = vcombine.high %v1279_v17, %v1283_v19  ;;  %v1303_v8 = vld [vmem:[#allocation6 + $0x540] sm:$0xff] }
 0x195   :  { %4415 = vmatprep.subr.bf16.mxu1 %v9817_v25  ;;  %v9880_v25 = vcombine.low %v1208_v12, %v1212_v13  ;;  %v1307_v39 = vld [vmem:[#allocation6 + $0x560] sm:$0xff] }
 0x196   :  { %v9974_v55 = vcombine.low %v1303_v8, %v1307_v39 }
 0x198   :  { %4416 = vmatpush1.bf16.msra.mxu1 %v9816_v28  ;;  %v9889_v28 = vcombine.high %v1216_v22, %v1220_v23 }
 0x199   :  { %4417 = vmatprep.subr.bf16.mxu1 %v9825_v29  ;;  %v9950_v29 = vcombine.low %v1279_v17, %v1283_v19 }
 0x19c   :  { %4418 = vmatpush1.bf16.msra.mxu1 %v9824_v33  ;;  %v9897_v33 = vcombine.high %v1224_v30, %v1228_v31 }
 0x19d   :  { %4419 = vmatprep.subr.bf16.mxu1 %v9833_v34  ;;  %v9958_v34 = vcombine.low %v1287_v26, %v1291_v27 }
 0x1a0   :  { %4420 = vmatpush1.bf16.msra.mxu1 %v9832_v37 }
 0x1a1   :  { %4421 = vmatprep.subr.bf16.mxu1 %v9841_v38  ;;  %v9896_v38 = vcombine.low %v1224_v30, %v1228_v31 }
 0x1a4   :  { %4422 = vmatpush1.bf16.msra.mxu1 %v9840_v41  ;;  %v9905_v41 = vcombine.high %v1232_v35, %v1236_v36 }
 0x1a5   :  { %4423 = vmatprep.subr.bf16.mxu1 %v9849_v46 }
 0x1a6   :  { %v981_v54 = vpop.f32.mrb[0].mxu1 }
 0x1a7   :  { %v982_v57 = vadd.f32 %v981_v54, %v270_v50  ;;  %v983_v58 = vpop.f32.mrb[1].mxu1  ;;  %v9975_v50 = vcombine.high %v1303_v8, %v1307_v39  ;;  %v9913_v54 = vcombine.high %v1240_v47, %v1244_v48 }
 0x1a8   :  { %v984_v59 = vadd.f32 %v983_v58, %v274_v51  ;;  %v985_v60 = vpop.f32.mrb[2].mxu1  ;;  %4424 = vmatpush1.bf16.msra.mxu1 %v9848_v52  ;;  %v9904_v51 = vcombine.low %v1232_v35, %v1236_v36  ;;  %v1311_v52 = vld [vmem:[#allocation6 + $0x580] sm:$0xff] }
 0x1a9   :  { %v1111_v62 = vmul.f32 0.01, %v982_v57  ;;  %v986_v63 = vpop.f32.mrb[3].mxu1  ;;  %4425 = vmatprep.subr.bf16.mxu1 %v9857_v53  ;;  %v1315_v53 = vld [vmem:[#allocation6 + $0x5a0] sm:$0xff] }
 0x1aa   :  { %v1112_v1 = vmul.f32 0.01, %v984_v59  ;;  %v9983_v58 = vcombine.high %v1311_v52, %v1315_v53  ;;  %v1319_v60 = vld [vmem:[#allocation6 + $0x5c0] sm:$0xff]  ;;  %v9982_v63 = vcombine.low %v1311_v52, %v1315_v53 }
 0x1ab   :  { %v1119_v2 = vmax.f32 %v982_v57, %v1111_v62  ;;  %v1252_v57 = vld [vmem:[#allocation6 + $0x3a8] sm:$0xff] }
 0x1ac   :  { %v1120_v5 = vmax.f32 %v984_v59, %v1112_v1  ;;  %4426 = vmatpush1.bf16.msra.mxu1 %v9856_v61  ;;  %v9912_v59 = vcombine.low %v1240_v47, %v1244_v48  ;;  %v1323_v61 = vld [vmem:[#allocation6 + $0x5e0] sm:$0xff]  ;;  %v9921_v62 = vcombine.high %v1248_v56, %v1252_v57  ;;  %v1260_v1 = vld [vmem:[#allocation6 + $0x3e8] sm:$0xff]  ;;  %v9920_v3 = vcombine.low %v1248_v56, %v1252_v57 }
 0x1ad   :  { %4427 = vmatprep.subr.bf16.mxu1 %v9865_v0  ;;  %v11699_v14 = vpack.c.bf16 %v1119_v2, %v1119_v2  ;;  %v1256_v0 = vld [vmem:[#allocation6 + $0x3c8] sm:$0xff]  ;;  %v9991_v2 = vcombine.high %v1319_v60, %v1323_v61  ;;  %v9990_v7 = vcombine.low %v1319_v60, %v1323_v61  ;;  %v11709_v57 = vsub.s32 2, %v11683_v18  ;;  %v1375_v60 = vld [vmem:[#allocation6 + $0x780] sm:$0xff] }
 0x1ae   :  { %v11697_v10 = vpack.c.bf16 %v1120_v5, %v1120_v5  ;;  %v1331_v5 = vld [vmem:[#allocation6 + $0x620] sm:$0xff]  ;;  %v9928_v13 = vcombine.low %v1256_v0, %v1260_v1 }
 0x1af   :  { %v9999_v12 = vcombine.high %v1327_v4, %v1331_v5  ;;  %v9998_v19 = vcombine.low %v1327_v4, %v1331_v5  ;;  %v1379_v61 = vld [vmem:[#allocation6 + $0x7a0] sm:$0xff] }
 0x1b0   :  { %4281 = vmatprep.mubr.bf16.mxu0 %v11697_v10  ;;  %4428 = vmatpush1.bf16.msra.mxu1 %v9864_v6  ;;  %v9929_v6 = vcombine.high %v1256_v0, %v1260_v1  ;;  %v1312_v0 = vld [vmem:[#allocation6 + $0x588] sm:$0xff] }
 0x1b1   :  { %4445 = vmatprep.mubr.bf16.mxu1 %v11697_v10  ;;  %4282 = vmatmul.mubr.bf16.vlgmr.msra.gmra.mrb[0].mxu0 %v11699_v14  ;;  %v1316_v1 = vld [vmem:[#allocation6 + $0x5a8] sm:$0xff] }
 0x1b2   :  { %4291 = vmatpush1.bf16.msra.mxu0 %v9934_v49  ;;  %4429 = vmatprep.subr.bf16.mxu1 %v9873_v11  ;;  %v1299_v49 = vld [vmem:[#allocation6 + $0x520] sm:$0xff]  ;;  %v1268_v11 = vld [vmem:[#allocation6 + $0x428] sm:$0xff] }
 0x1b3   :  { %4292 = vmatprep.subr.bf16.mxu0 %v9943_v15  ;;  %v9967_v37 = vcombine.high %v1295_v45, %v1299_v49  ;;  %v9966_v46 = vcombine.low %v1295_v45, %v1299_v49  ;;  %v1335_v15 = vld [vmem:[#allocation6 + $0x640] sm:$0xff]  ;;  %v9937_v17 = vcombine.high %v1264_v9, %v1268_v11  ;;  %v9936_v23 = vcombine.low %v1264_v9, %v1268_v11 }
 0x1b4   :  { %4430 = vmatpush1.bf16.msra.mxu1 %v9872_v16  ;;  %v1339_v16 = vld [vmem:[#allocation6 + $0x660] sm:$0xff]  ;;  %v9985_v9 = vcombine.high %v1312_v0, %v1316_v1 }
 0x1b5   :  { %4431 = vmatprep.subr.bf16.mxu1 %v9881_v20  ;;  %v1272_v20 = vld [vmem:[#allocation6 + $0x448] sm:$0xff]  ;;  %v10007_v22 = vcombine.high %v1335_v15, %v1339_v16  ;;  %v10006_v27 = vcombine.low %v1335_v15, %v1339_v16 }
 0x1b6   :  { %4293 = vmatpush1.bf16.msra.mxu0 %v9942_v21  ;;  %v1276_v21 = vld [vmem:[#allocation6 + $0x468] sm:$0xff] }
 0x1b7   :  { %4294 = vmatprep.subr.bf16.mxu0 %v9951_v24  ;;  %v1343_v24 = vld [vmem:[#allocation6 + $0x680] sm:$0xff]  ;;  %v9945_v26 = vcombine.high %v1272_v20, %v1276_v21  ;;  %v9944_v31 = vcombine.low %v1272_v20, %v1276_v21  ;;  %v1324_v15 = vld [vmem:[#allocation6 + $0x5e8] sm:$0xff] }
 0x1b8   :  { %4432 = vmatpush1.bf16.msra.mxu1 %v9880_v25  ;;  %v1347_v25 = vld [vmem:[#allocation6 + $0x6a0] sm:$0xff] }
 0x1b9   :  { %4433 = vmatprep.subr.bf16.mxu1 %v9889_v28  ;;  %v1280_v28 = vld [vmem:[#allocation6 + $0x488] sm:$0xff]  ;;  %v10015_v30 = vcombine.high %v1343_v24, %v1347_v25  ;;  %v10014_v49 = vcombine.low %v1343_v24, %v1347_v25  ;;  %v1395_v24 = vld [vmem:[#allocation6 + $0x820] sm:$0xff] }
 0x1ba   :  { %4295 = vmatpush1.bf16.msra.mxu0 %v9950_v29  ;;  %v1284_v29 = vld [vmem:[#allocation6 + $0x4a8] sm:$0xff] }
 0x1bb   :  { %4296 = vmatprep.subr.bf16.mxu0 %v9959_v32  ;;  %v1351_v32 = vld [vmem:[#allocation6 + $0x6c0] sm:$0xff]  ;;  %v9953_v45 = vcombine.high %v1280_v28, %v1284_v29  ;;  %v9952_v36 = vcombine.low %v1280_v28, %v1284_v29 }
 0x1bc   :  { %4434 = vmatpush1.bf16.msra.mxu1 %v9888_v44  ;;  %v1355_v44 = vld [vmem:[#allocation6 + $0x6e0] sm:$0xff] }
 0x1bd   :  { %4435 = vmatprep.subr.bf16.mxu1 %v9897_v33  ;;  %v1288_v33 = vld [vmem:[#allocation6 + $0x4c8] sm:$0xff]  ;;  %v10023_v35 = vcombine.high %v1351_v32, %v1355_v44  ;;  %v10022_v39 = vcombine.low %v1351_v32, %v1355_v44 }
 0x1be   :  { %4297 = vmatpush1.bf16.msra.mxu0 %v9958_v34  ;;  %v1292_v34 = vld [vmem:[#allocation6 + $0x4e8] sm:$0xff] }
 0x1bf   :  { %4298 = vmatprep.subr.bf16.mxu0 %v9967_v37  ;;  %v1359_v37 = vld [vmem:[#allocation6 + $0x700] sm:$0xff]  ;;  %v9961_v8 = vcombine.high %v1288_v33, %v1292_v34  ;;  %v9960_v48 = vcombine.low %v1288_v33, %v1292_v34  ;;  %v1328_v32 = vld [vmem:[#allocation6 + $0x608] sm:$0xff] }
 0x1c0   :  { %4436 = vmatpush1.bf16.msra.mxu1 %v9896_v38  ;;  %v1363_v38 = vld [vmem:[#allocation6 + $0x720] sm:$0xff]  ;;  %v1332_v44 = vld [vmem:[#allocation6 + $0x628] sm:$0xff] }
 0x1c1   :  { %4437 = vmatprep.subr.bf16.mxu1 %v9905_v41  ;;  %v1296_v41 = vld [vmem:[#allocation6 + $0x508] sm:$0xff]  ;;  %v10031_v47 = vcombine.high %v1359_v37, %v1363_v38  ;;  %v10030_v53 = vcombine.low %v1359_v37, %v1363_v38  ;;  %v1399_v33 = vld [vmem:[#allocation6 + $0x840] sm:$0xff]  ;;  %v10001_v37 = vcombine.high %v1328_v32, %v1332_v44 }
 0x1c2   :  { %4299 = vmatpush1.bf16.msra.mxu0 %v9966_v46  ;;  %v1300_v46 = vld [vmem:[#allocation6 + $0x528] sm:$0xff]  ;;  %v1403_v34 = vld [vmem:[#allocation6 + $0x860] sm:$0xff] }
 0x1c3   :  { %4300 = vmatprep.subr.bf16.mxu0 %v9975_v50  ;;  %v1367_v50 = vld [vmem:[#allocation6 + $0x740] sm:$0xff]  ;;  %v9969_v52 = vcombine.high %v1296_v41, %v1300_v46  ;;  %v1336_v38 = vld [vmem:[#allocation6 + $0x648] sm:$0xff] }
 0x1c4   :  { %4438 = vmatpush1.bf16.msra.mxu1 %v9904_v51  ;;  %v1371_v51 = vld [vmem:[#allocation6 + $0x760] sm:$0xff] }
 0x1c5   :  { %4439 = vmatprep.subr.bf16.mxu1 %v9913_v54  ;;  %v1304_v54 = vld [vmem:[#allocation6 + $0x548] sm:$0xff]  ;;  %v10039_v56 = vcombine.high %v1367_v50, %v1371_v51 }
 0x1c6   :  { %4301 = vmatpush1.bf16.msra.mxu0 %v9974_v55  ;;  %v1308_v55 = vld [vmem:[#allocation6 + $0x568] sm:$0xff] }
 0x1c7   :  { %4302 = vmatprep.subr.bf16.mxu0 %v9983_v58  ;;  %v9968_v58 = vcombine.low %v1296_v41, %v1300_v46  ;;  %v9976_v5 = vcombine.low %v1304_v54, %v1308_v55  ;;  %v10071_v41 = vcombine.high %v1399_v33, %v1403_v34  ;;  %v10000_v46 = vcombine.low %v1328_v32, %v1332_v44 }
 0x1c8   :  { %4440 = vmatpush1.bf16.msra.mxu1 %v9912_v59  ;;  %v11712_v59 = vsub.s32 3, %v11683_v18 }
 0x1c9   :  { %4441 = vmatprep.subr.bf16.mxu1 %v9921_v62  ;;  %v9977_v62 = vcombine.high %v1304_v54, %v1308_v55 }
 0x1ca   :  { %4303 = vmatpush1.bf16.msra.mxu0 %v9982_v63  ;;  %v10038_v63 = vcombine.low %v1367_v50, %v1371_v51  ;;  %v282_v4 = vrot.slane %v11688_v42, %v11712_v59  ;;  %v10070_v51 = vcombine.low %v1399_v33, %v1403_v34 }
 0x1cb   :  { %4304 = vmatprep.subr.bf16.mxu0 %v9991_v2  ;;  %v278_v2 = vrot.slane %v11688_v42, %v11709_v57 }
 0x1cc   :  { %4442 = vmatpush1.bf16.msra.mxu1 %v9920_v3  ;;  %v10047_v3 = vcombine.high %v1375_v60, %v1379_v61 }
 0x1cd   :  { %4443 = vmatprep.subr.bf16.mxu1 %v9929_v6  ;;  %v1383_v6 = vld [vmem:[#allocation6 + $0x7c0] sm:$0xff] }
 0x1ce   :  { %4305 = vmatpush1.bf16.msra.mxu0 %v9990_v7  ;;  %v1387_v7 = vld [vmem:[#allocation6 + $0x7e0] sm:$0xff] }
 0x1cf   :  { %4306 = vmatprep.subr.bf16.mxu0 %v9999_v12  ;;  %v10046_v12 = vcombine.low %v1375_v60, %v1379_v61  ;;  %v10054_v29 = vcombine.low %v1383_v6, %v1387_v7 }
 0x1d0   :  { %4444 = vmatpush1.bf16.msra.mxu1 %v9928_v13  ;;  %v1320_v13 = vld [vmem:[#allocation6 + $0x5c8] sm:$0xff] }
 0x1d1   :  { %4454 = vmatprep.subr.bf16.mxu1 %v9937_v17 }
 0x1d2   :  { %4307 = vmatpush1.bf16.msra.mxu0 %v9998_v19  ;;  %v10055_v19 = vcombine.high %v1383_v6, %v1387_v7  ;;  %v1360_v6 = vld [vmem:[#allocation6 + $0x708] sm:$0xff] }
 0x1d3   :  { %4446 = vmatmul.mubr.bf16.vlgmr.msra.gmra.mrb[16].mxu1 %v11699_v14  ;;  %4308 = vmatprep.subr.bf16.mxu0 %v10007_v22  ;;  %v9984_v22 = vcombine.low %v1312_v0, %v1316_v1  ;;  %v1364_v7 = vld [vmem:[#allocation6 + $0x728] sm:$0xff] }
 0x1d4   :  { %4455 = vmatpush1.bf16.msra.mxu1 %v9936_v23  ;;  %v1391_v23 = vld [vmem:[#allocation6 + $0x800] sm:$0xff] }
 0x1d5   :  { %4456 = vmatprep.subr.bf16.mxu1 %v9945_v26 }
 0x1d6   :  { %4309 = vmatpush1.bf16.msra.mxu0 %v10006_v27  ;;  %v9993_v27 = vcombine.high %v1320_v13, %v1324_v15 }
 0x1d7   :  { %4310 = vmatprep.subr.bf16.mxu0 %v10015_v30 }
 0x1d8   :  { %4457 = vmatpush1.bf16.msra.mxu1 %v9944_v31  ;;  %v10063_v31 = vcombine.high %v1391_v23, %v1395_v24 }
 0x1d9   :  { %4458 = vmatprep.subr.bf16.mxu1 %v9953_v45 }
 0x1da   :  { %4311 = vmatpush1.bf16.msra.mxu0 %v10014_v49  ;;  %v9992_v49 = vcombine.low %v1320_v13, %v1324_v15  ;;  %v1435_v13 = vld [vmem:[#allocation6 + $0x960] sm:$0xff]  ;;  %v10033_v15 = vcombine.high %v1360_v6, %v1364_v7 }
 0x1db   :  { %4312 = vmatprep.subr.bf16.mxu0 %v10023_v35 }
 0x1dc   :  { %4459 = vmatpush1.bf16.msra.mxu1 %v9952_v36  ;;  %v10062_v36 = vcombine.low %v1391_v23, %v1395_v24  ;;  %v1443_v23 = vld [vmem:[#allocation6 + $0x9a0] sm:$0xff] }
 0x1dd   :  { %4460 = vmatprep.subr.bf16.mxu1 %v9961_v8  ;;  %v1340_v8 = vld [vmem:[#allocation6 + $0x668] sm:$0xff] }
 0x1de   :  { %4313 = vmatpush1.bf16.msra.mxu0 %v10022_v39  ;;  %v10009_v50 = vcombine.high %v1336_v38, %v1340_v8  ;;  %v10008_v55 = vcombine.low %v1336_v38, %v1340_v8 }
 0x1df   :  { %4314 = vmatprep.subr.bf16.mxu0 %v10031_v47  ;;  %v1407_v47 = vld [vmem:[#allocation6 + $0x880] sm:$0xff] }
 0x1e0   :  { %4461 = vmatpush1.bf16.msra.mxu1 %v9960_v48  ;;  %v1411_v48 = vld [vmem:[#allocation6 + $0x8a0] sm:$0xff] }
 0x1e1   :  { %4462 = vmatprep.subr.bf16.mxu1 %v9969_v52  ;;  %v1344_v52 = vld [vmem:[#allocation6 + $0x688] sm:$0xff]  ;;  %v10079_v54 = vcombine.high %v1407_v47, %v1411_v48  ;;  %v10078_v61 = vcombine.low %v1407_v47, %v1411_v48 }
 0x1e2   :  { %4315 = vmatpush1.bf16.msra.mxu0 %v10030_v53  ;;  %v1348_v53 = vld [vmem:[#allocation6 + $0x6a8] sm:$0xff] }
 0x1e3   :  { %4316 = vmatprep.subr.bf16.mxu0 %v10039_v56  ;;  %v1415_v56 = vld [vmem:[#allocation6 + $0x8c0] sm:$0xff]  ;;  %v10017_v60 = vcombine.high %v1344_v52, %v1348_v53  ;;  %v10016_v1 = vcombine.low %v1344_v52, %v1348_v53 }
 0x1e4   :  { %4463 = vmatpush1.bf16.msra.mxu1 %v9968_v58  ;;  %v1419_v58 = vld [vmem:[#allocation6 + $0x8e0] sm:$0xff] }
 0x1e5   :  { %4464 = vmatprep.subr.bf16.mxu1 %v9977_v62  ;;  %v1352_v62 = vld [vmem:[#allocation6 + $0x6c8] sm:$0xff]  ;;  %v10087_v0 = vcombine.high %v1415_v56, %v1419_v58 }
 0x1e6   :  { %4317 = vmatpush1.bf16.msra.mxu0 %v10038_v63  ;;  %v1022_v11 = vpop.f32.mrb[4].mxu1  ;;  %v1356_v63 = vld [vmem:[#allocation6 + $0x6e8] sm:$0xff] }
 0x1e7   :  { %v1023_v16 = vadd.f32 %v1022_v11, %v278_v2  ;;  %v1024_v17 = vpop.f32.mrb[5].mxu1  ;;  %4318 = vmatprep.subr.bf16.mxu0 %v10047_v3  ;;  %v1423_v2 = vld [vmem:[#allocation6 + $0x900] sm:$0xff]  ;;  %v10024_v11 = vcombine.low %v1352_v62, %v1356_v63 }
 0x1e8   :  { %v1025_v20 = vadd.f32 %v1024_v17, %v282_v4  ;;  %v1026_v21 = vpop.f32.mrb[6].mxu1  ;;  %4465 = vmatpush1.bf16.msra.mxu1 %v9976_v5  ;;  %v1427_v3 = vld [vmem:[#allocation6 + $0x920] sm:$0xff]  ;;  %v10025_v4 = vcombine.high %v1352_v62, %v1356_v63  ;;  %v10086_v5 = vcombine.low %v1415_v56, %v1419_v58  ;;  %v1368_v17 = vld [vmem:[#allocation6 + $0x748] sm:$0xff] }
 0x1e9   :  { %v1113_v25 = vmul.f32 0.01, %v1023_v16  ;;  %v1027_v26 = vpop.f32.mrb[7].mxu1  ;;  %4466 = vmatprep.subr.bf16.mxu1 %v9985_v9  ;;  %v10095_v9 = vcombine.high %v1423_v2, %v1427_v3  ;;  %v10032_v21 = vcombine.low %v1360_v6, %v1364_v7 }
 0x1ea   :  { %v1114_v28 = vmul.f32 0.01, %v1025_v20  ;;  %4319 = vmatpush1.bf16.msra.mxu0 %v10046_v12  ;;  %v1431_v12 = vld [vmem:[#allocation6 + $0x940] sm:$0xff]  ;;  %v1376_v26 = vld [vmem:[#allocation6 + $0x788] sm:$0xff] }
 0x1eb   :  { %v1121_v30 = vmax.f32 %v1023_v16, %v1113_v25  ;;  %4320 = vmatprep.subr.bf16.mxu0 %v10055_v19  ;;  %v10094_v16 = vcombine.low %v1423_v2, %v1427_v3  ;;  %v1372_v19 = vld [vmem:[#allocation6 + $0x768] sm:$0xff]  ;;  %v10102_v25 = vcombine.low %v1431_v12, %v1435_v13 }
 0x1ec   :  { %v1122_v45 = vmax.f32 %v1025_v20, %v1114_v28  ;;  %4467 = vmatpush1.bf16.msra.mxu1 %v9984_v22  ;;  %v10103_v20 = vcombine.high %v1431_v12, %v1435_v13  ;;  %v1439_v22 = vld [vmem:[#allocation6 + $0x980] sm:$0xff]  ;;  %v10041_v24 = vcombine.high %v1368_v17, %v1372_v19 }
 0x1ed   :  { %4468 = vmatprep.subr.bf16.mxu1 %v9993_v27  ;;  %v11720_v39 = vpack.c.bf16 %v1121_v30, %v1121_v30  ;;  %v1380_v27 = vld [vmem:[#allocation6 + $0x7a8] sm:$0xff]  ;;  %v10111_v28 = vcombine.high %v1439_v22, %v1443_v23  ;;  %v1447_v30 = vld [vmem:[#allocation6 + $0x9c0] sm:$0xff]  ;;  %v10110_v44 = vcombine.low %v1439_v22, %v1443_v23 }
 0x1ee   :  { %v11718_v35 = vpack.c.bf16 %v1122_v45, %v1122_v45  ;;  %4321 = vmatpush1.bf16.msra.mxu0 %v10054_v29  ;;  %v10040_v29 = vcombine.low %v1368_v17, %v1372_v19  ;;  %v10049_v32 = vcombine.high %v1376_v26, %v1380_v27  ;;  %v1384_v45 = vld [vmem:[#allocation6 + $0x7c8] sm:$0xff]  ;;  %v10048_v34 = vcombine.low %v1376_v26, %v1380_v27 }
 0x1ef   :  { %4331 = vmatprep.subr.bf16.mxu0 %v10063_v31  ;;  %v1451_v31 = vld [vmem:[#allocation6 + $0x9e0] sm:$0xff] }
 0x1f0   :  { %4322 = vmatprep.mubr.bf16.mxu0 %v11718_v35  ;;  %4469 = vmatpush1.bf16.msra.mxu1 %v9992_v49  ;;  %v1388_v49 = vld [vmem:[#allocation6 + $0x7e8] sm:$0xff]  ;;  %v10119_v33 = vcombine.high %v1447_v30, %v1451_v31  ;;  %v10118_v8 = vcombine.low %v1447_v30, %v1451_v31  ;;  %v11727_v31 = vsub.s32 4, %v11683_v18 }
 0x1f1   :  { %4486 = vmatprep.mubr.bf16.mxu1 %v11718_v35  ;;  %4323 = vmatmul.mubr.bf16.vlgmr.msra.gmra.mrb[0].mxu0 %v11720_v39  ;;  %v10057_v38 = vcombine.high %v1384_v45, %v1388_v49  ;;  %v10056_v48 = vcombine.low %v1384_v45, %v1388_v49  ;;  %v1503_v45 = vld [vmem:[#allocation6 + $0xb80] sm:$0xff] }
 0x1f2   :  { %4332 = vmatpush1.bf16.msra.mxu0 %v10062_v36  ;;  %4470 = vmatprep.subr.bf16.mxu1 %v10001_v37  ;;  %v1455_v36 = vld [vmem:[#allocation6 + $0xa00] sm:$0xff] }
 0x1f3   :  { %4333 = vmatprep.subr.bf16.mxu0 %v10071_v41  ;;  %v1459_v37 = vld [vmem:[#allocation6 + $0xa20] sm:$0xff]  ;;  %v1392_v41 = vld [vmem:[#allocation6 + $0x808] sm:$0xff] }
 0x1f4   :  { %4471 = vmatpush1.bf16.msra.mxu1 %v10000_v46  ;;  %v1396_v46 = vld [vmem:[#allocation6 + $0x828] sm:$0xff]  ;;  %v10127_v47 = vcombine.high %v1455_v36, %v1459_v37  ;;  %v10126_v53 = vcombine.low %v1455_v36, %v1459_v37  ;;  %v1507_v49 = vld [vmem:[#allocation6 + $0xba0] sm:$0xff] }
 0x1f5   :  { %4472 = vmatprep.subr.bf16.mxu1 %v10009_v50  ;;  %v1463_v50 = vld [vmem:[#allocation6 + $0xa40] sm:$0xff]  ;;  %v10065_v52 = vcombine.high %v1392_v41, %v1396_v46  ;;  %v10064_v58 = vcombine.low %v1392_v41, %v1396_v46  ;;  %v1440_v36 = vld [vmem:[#allocation6 + $0x988] sm:$0xff] }
 0x1f6   :  { %4334 = vmatpush1.bf16.msra.mxu0 %v10070_v51  ;;  %v1467_v51 = vld [vmem:[#allocation6 + $0xa60] sm:$0xff]  ;;  %v1444_v37 = vld [vmem:[#allocation6 + $0x9a8] sm:$0xff] }
 0x1f7   :  { %4335 = vmatprep.subr.bf16.mxu0 %v10079_v54  ;;  %v1400_v54 = vld [vmem:[#allocation6 + $0x848] sm:$0xff]  ;;  %v10135_v56 = vcombine.high %v1463_v50, %v1467_v51  ;;  %v10134_v63 = vcombine.low %v1463_v50, %v1467_v51  ;;  %v10113_v50 = vcombine.high %v1440_v36, %v1444_v37 }
 0x1f8   :  { %4473 = vmatpush1.bf16.msra.mxu1 %v10008_v55  ;;  %v1404_v55 = vld [vmem:[#allocation6 + $0x868] sm:$0xff] }
 0x1f9   :  { %4474 = vmatprep.subr.bf16.mxu1 %v10017_v60  ;;  %v1471_v60 = vld [vmem:[#allocation6 + $0xa80] sm:$0xff]  ;;  %v10073_v62 = vcombine.high %v1400_v54, %v1404_v55  ;;  %v10072_v3 = vcombine.low %v1400_v54, %v1404_v55  ;;  %v1452_v54 = vld [vmem:[#allocation6 + $0x9e8] sm:$0xff] }
 0x1fa   :  { %4336 = vmatpush1.bf16.msra.mxu0 %v10078_v61  ;;  %v1475_v61 = vld [vmem:[#allocation6 + $0xaa0] sm:$0xff] }
 0x1fb   :  { %4337 = vmatprep.subr.bf16.mxu0 %v10087_v0  ;;  %v1408_v0 = vld [vmem:[#allocation6 + $0x888] sm:$0xff]  ;;  %v10143_v2 = vcombine.high %v1471_v60, %v1475_v61  ;;  %v10142_v7 = vcombine.low %v1471_v60, %v1475_v61 }
 0x1fc   :  { %4475 = vmatpush1.bf16.msra.mxu1 %v10016_v1  ;;  %v1412_v1 = vld [vmem:[#allocation6 + $0x8a8] sm:$0xff] }
 0x1fd   :  { %4476 = vmatprep.subr.bf16.mxu1 %v10025_v4  ;;  %v1479_v4 = vld [vmem:[#allocation6 + $0xac0] sm:$0xff]  ;;  %v10081_v6 = vcombine.high %v1408_v0, %v1412_v1  ;;  %v10080_v13 = vcombine.low %v1408_v0, %v1412_v1 }
 0x1fe   :  { %4338 = vmatpush1.bf16.msra.mxu0 %v10086_v5  ;;  %v1483_v5 = vld [vmem:[#allocation6 + $0xae0] sm:$0xff] }
 0x1ff   :  { %4339 = vmatprep.subr.bf16.mxu0 %v10095_v9  ;;  %v1416_v9 = vld [vmem:[#allocation6 + $0x8c8] sm:$0xff]  ;;  %v10151_v12 = vcombine.high %v1479_v4, %v1483_v5  ;;  %v10150_v19 = vcombine.low %v1479_v4, %v1483_v5 }
 0x200   :  { %4477 = vmatpush1.bf16.msra.mxu1 %v10024_v11  ;;  %v1420_v11 = vld [vmem:[#allocation6 + $0x8e8] sm:$0xff] }
 0x201   :  { %4478 = vmatprep.subr.bf16.mxu1 %v10033_v15  ;;  %v1487_v15 = vld [vmem:[#allocation6 + $0xb00] sm:$0xff]  ;;  %v10089_v17 = vcombine.high %v1416_v9, %v1420_v11  ;;  %v10088_v23 = vcombine.low %v1416_v9, %v1420_v11  ;;  %v1460_v9 = vld [vmem:[#allocation6 + $0xa28] sm:$0xff] }
 0x202   :  { %4340 = vmatpush1.bf16.msra.mxu0 %v10094_v16  ;;  %v1491_v16 = vld [vmem:[#allocation6 + $0xb20] sm:$0xff] }
 0x203   :  { %4341 = vmatprep.subr.bf16.mxu0 %v10103_v20  ;;  %v1424_v20 = vld [vmem:[#allocation6 + $0x908] sm:$0xff]  ;;  %v10159_v22 = vcombine.high %v1487_v15, %v1491_v16  ;;  %v10158_v27 = vcombine.low %v1487_v15, %v1491_v16  ;;  %v1531_v15 = vld [vmem:[#allocation6 + $0xc60] sm:$0xff] }
 0x204   :  { %4479 = vmatpush1.bf16.msra.mxu1 %v10032_v21  ;;  %v1428_v21 = vld [vmem:[#allocation6 + $0x928] sm:$0xff] }
 0x205   :  { %4480 = vmatprep.subr.bf16.mxu1 %v10041_v24  ;;  %v1495_v24 = vld [vmem:[#allocation6 + $0xb40] sm:$0xff]  ;;  %v10097_v26 = vcombine.high %v1424_v20, %v1428_v21 }
 0x206   :  { %4342 = vmatpush1.bf16.msra.mxu0 %v10102_v25  ;;  %v1499_v25 = vld [vmem:[#allocation6 + $0xb60] sm:$0xff] }
 0x207   :  { %4343 = vmatprep.subr.bf16.mxu0 %v10111_v28  ;;  %v1432_v28 = vld [vmem:[#allocation6 + $0x948] sm:$0xff]  ;;  %v10167_v30 = vcombine.high %v1495_v24, %v1499_v25 }
 0x208   :  { %4481 = vmatpush1.bf16.msra.mxu1 %v10040_v29  ;;  %v1436_v29 = vld [vmem:[#allocation6 + $0x968] sm:$0xff] }
 0x209   :  { %4482 = vmatprep.subr.bf16.mxu1 %v10049_v32  ;;  %v10096_v32 = vcombine.low %v1424_v20, %v1428_v21  ;;  %v10104_v46 = vcombine.low %v1432_v28, %v1436_v29  ;;  %v1464_v20 = vld [vmem:[#allocation6 + $0xa48] sm:$0xff] }
 0x20a   :  { %4344 = vmatpush1.bf16.msra.mxu0 %v10110_v44  ;;  %v11730_v44 = vsub.s32 5, %v11683_v18  ;;  %v1468_v21 = vld [vmem:[#allocation6 + $0xa68] sm:$0xff] }
 0x20b   :  { %4345 = vmatprep.subr.bf16.mxu0 %v10119_v33  ;;  %v10105_v33 = vcombine.high %v1432_v28, %v1436_v29  ;;  %v1472_v29 = vld [vmem:[#allocation6 + $0xa88] sm:$0xff] }
 0x20c   :  { %4483 = vmatpush1.bf16.msra.mxu1 %v10048_v34  ;;  %v10166_v34 = vcombine.low %v1495_v24, %v1499_v25  ;;  %v290_v41 = vrot.slane %v11688_v42, %v11730_v44  ;;  %v1535_v25 = vld [vmem:[#allocation6 + $0xc80] sm:$0xff] }
 0x20d   :  { %4484 = vmatprep.subr.bf16.mxu1 %v10057_v38  ;;  %v286_v38 = vrot.slane %v11688_v42, %v11727_v31  ;;  %v1523_v42 = vld [vmem:[#allocation6 + $0xc20] sm:$0xff] }
 0x20e   :  { %4346 = vmatpush1.bf16.msra.mxu0 %v10118_v8  ;;  %v10175_v8 = vcombine.high %v1503_v45, %v1507_v49 }
 0x20f   :  { %4347 = vmatprep.subr.bf16.mxu0 %v10127_v47  ;;  %v1511_v47 = vld [vmem:[#allocation6 + $0xbc0] sm:$0xff] }
 0x210   :  { %4485 = vmatpush1.bf16.msra.mxu1 %v10056_v48  ;;  %v1515_v48 = vld [vmem:[#allocation6 + $0xbe0] sm:$0xff] }
 0x211   :  { %4495 = vmatprep.subr.bf16.mxu1 %v10065_v52  ;;  %v10174_v52 = vcombine.low %v1503_v45, %v1507_v49  ;;  %v10182_v4 = vcombine.low %v1511_v47, %v1515_v48  ;;  %v10136_v45 = vcombine.low %v1464_v20, %v1468_v21  ;;  %v1543_v49 = vld [vmem:[#allocation6 + $0xcc0] sm:$0xff] }
 0x212   :  { %4348 = vmatpush1.bf16.msra.mxu0 %v10126_v53  ;;  %v1448_v53 = vld [vmem:[#allocation6 + $0x9c8] sm:$0xff] }
 0x213   :  { %4487 = vmatmul.mubr.bf16.vlgmr.msra.gmra.mrb[16].mxu1 %v11720_v39  ;;  %4349 = vmatprep.subr.bf16.mxu0 %v10135_v56 }
 0x214   :  { %4496 = vmatpush1.bf16.msra.mxu1 %v10064_v58  ;;  %v10183_v58 = vcombine.high %v1511_v47, %v1515_v48  ;;  %v1555_v47 = vld [vmem:[#allocation6 + $0xd20] sm:$0xff] }
 0x215   :  { %4497 = vmatprep.subr.bf16.mxu1 %v10073_v62  ;;  %v10112_v62 = vcombine.low %v1440_v36, %v1444_v37  ;;  %v1480_v37 = vld [vmem:[#allocation6 + $0xac8] sm:$0xff] }
 0x216   :  { %4350 = vmatpush1.bf16.msra.mxu0 %v10134_v63  ;;  %v1519_v63 = vld [vmem:[#allocation6 + $0xc00] sm:$0xff] }
 0x217   :  { %4351 = vmatprep.subr.bf16.mxu0 %v10143_v2  ;;  %v10121_v2 = vcombine.high %v1448_v53, %v1452_v54 }
 0x218   :  { %4498 = vmatpush1.bf16.msra.mxu1 %v10072_v3 }
 0x219   :  { %4499 = vmatprep.subr.bf16.mxu1 %v10081_v6  ;;  %v10191_v6 = vcombine.high %v1519_v63, %v1523_v42 }
 0x21a   :  { %4352 = vmatpush1.bf16.msra.mxu0 %v10142_v7  ;;  %v1456_v7 = vld [vmem:[#allocation6 + $0xa08] sm:$0xff] }
 0x21b   :  { %4353 = vmatprep.subr.bf16.mxu0 %v10151_v12  ;;  %v10120_v12 = vcombine.low %v1448_v53, %v1452_v54  ;;  %v10128_v24 = vcombine.low %v1456_v7, %v1460_v9 }
 0x21c   :  { %4500 = vmatpush1.bf16.msra.mxu1 %v10080_v13  ;;  %v1527_v13 = vld [vmem:[#allocation6 + $0xc40] sm:$0xff] }
 0x21d   :  { %4501 = vmatprep.subr.bf16.mxu1 %v10089_v17  ;;  %v10190_v17 = vcombine.low %v1519_v63, %v1523_v42  ;;  %v10198_v28 = vcombine.low %v1527_v13, %v1531_v15 }
 0x21e   :  { %4354 = vmatpush1.bf16.msra.mxu0 %v10150_v19  ;;  %v10129_v19 = vcombine.high %v1456_v7, %v1460_v9  ;;  %v1575_v9 = vld [vmem:[#allocation6 + $0xdc0] sm:$0xff] }
 0x21f   :  { %4355 = vmatprep.subr.bf16.mxu0 %v10159_v22 }
 0x220   :  { %4502 = vmatpush1.bf16.msra.mxu1 %v10088_v23  ;;  %v10199_v23 = vcombine.high %v1527_v13, %v1531_v15  ;;  %v1512_v15 = vld [vmem:[#allocation6 + $0xbc8] sm:$0xff] }
 0x221   :  { %4503 = vmatprep.subr.bf16.mxu1 %v10097_v26  ;;  %v1539_v26 = vld [vmem:[#allocation6 + $0xca0] sm:$0xff] }
 0x222   :  { %4356 = vmatpush1.bf16.msra.mxu0 %v10158_v27  ;;  %v10137_v27 = vcombine.high %v1464_v20, %v1468_v21  ;;  %v10206_v36 = vcombine.low %v1535_v25, %v1539_v26  ;;  %v1583_v21 = vld [vmem:[#allocation6 + $0xe00] sm:$0xff] }
 0x223   :  { %4357 = vmatprep.subr.bf16.mxu0 %v10167_v30  ;;  %v1476_v30 = vld [vmem:[#allocation6 + $0xaa8] sm:$0xff] }
 0x224   :  { %4504 = vmatpush1.bf16.msra.mxu1 %v10096_v32  ;;  %v10207_v32 = vcombine.high %v1535_v25, %v1539_v26  ;;  %v1520_v26 = vld [vmem:[#allocation6 + $0xc08] sm:$0xff] }
 0x225   :  { %4505 = vmatprep.subr.bf16.mxu1 %v10105_v33  ;;  %v1547_v33 = vld [vmem:[#allocation6 + $0xce0] sm:$0xff] }
 0x226   :  { %4358 = vmatpush1.bf16.msra.mxu0 %v10166_v34  ;;  %v1063_v51 = vpop.f32.mrb[8].mxu1  ;;  %v10145_v34 = vcombine.high %v1472_v29, %v1476_v30 }
 0x227   :  { %v1064_v55 = vadd.f32 %v1063_v51, %v286_v38  ;;  %v1065_v56 = vpop.f32.mrb[9].mxu1  ;;  %4359 = vmatprep.subr.bf16.mxu0 %v10175_v8  ;;  %v1484_v38 = vld [vmem:[#allocation6 + $0xae8] sm:$0xff]  ;;  %v10215_v8 = vcombine.high %v1543_v49, %v1547_v33 }
 0x228   :  { %v1066_v60 = vadd.f32 %v1065_v56, %v290_v41  ;;  %v1067_v61 = vpop.f32.mrb[10].mxu1  ;;  %4506 = vmatpush1.bf16.msra.mxu1 %v10104_v46  ;;  %v10144_v41 = vcombine.low %v1472_v29, %v1476_v30  ;;  %v1551_v46 = vld [vmem:[#allocation6 + $0xd00] sm:$0xff]  ;;  %v10153_v48 = vcombine.high %v1480_v37, %v1484_v38  ;;  %v1488_v51 = vld [vmem:[#allocation6 + $0xb08] sm:$0xff]  ;;  %v10152_v54 = vcombine.low %v1480_v37, %v1484_v38 }
 0x229   :  { %v1115_v0 = vmul.f32 0.01, %v1064_v55  ;;  %v1068_v1 = vpop.f32.mrb[11].mxu1  ;;  %4507 = vmatprep.subr.bf16.mxu1 %v10113_v50  ;;  %v10214_v50 = vcombine.low %v1543_v49, %v1547_v33  ;;  %v10223_v53 = vcombine.high %v1551_v46, %v1555_v47  ;;  %v1563_v56 = vld [vmem:[#allocation6 + $0xd60] sm:$0xff]  ;;  %v1496_v61 = vld [vmem:[#allocation6 + $0xb48] sm:$0xff] }
 0x22a   :  { %v1116_v3 = vmul.f32 0.01, %v1066_v60  ;;  %4360 = vmatpush1.bf16.msra.mxu0 %v10174_v52  ;;  %v1492_v52 = vld [vmem:[#allocation6 + $0xb28] sm:$0xff]  ;;  %v1571_v1 = vld [vmem:[#allocation6 + $0xda0] sm:$0xff] }
 0x22b   :  { %v1123_v5 = vmax.f32 %v1064_v55, %v1115_v0  ;;  %4361 = vmatprep.subr.bf16.mxu0 %v10183_v58  ;;  %v1559_v55 = vld [vmem:[#allocation6 + $0xd40] sm:$0xff]  ;;  %v10161_v58 = vcombine.high %v1488_v51, %v1492_v52  ;;  %v10160_v42 = vcombine.low %v1488_v51, %v1492_v52  ;;  %v1528_v33 = vld [vmem:[#allocation6 + $0xc48] sm:$0xff] }
 0x22c   :  { %v1124_v11 = vmax.f32 %v1066_v60, %v1116_v3  ;;  %4508 = vmatpush1.bf16.msra.mxu1 %v10112_v62  ;;  %v10222_v60 = vcombine.low %v1551_v46, %v1555_v47  ;;  %v1500_v62 = vld [vmem:[#allocation6 + $0xb68] sm:$0xff]  ;;  %v10231_v63 = vcombine.high %v1559_v55, %v1563_v56  ;;  %v1567_v0 = vld [vmem:[#allocation6 + $0xd80] sm:$0xff]  ;;  %v10230_v3 = vcombine.low %v1559_v55, %v1563_v56 }
 0x22d   :  { %4509 = vmatprep.subr.bf16.mxu1 %v10121_v2  ;;  %v11738_v22 = vpack.c.bf16 %v1123_v5, %v1123_v5  ;;  %v10169_v2 = vcombine.high %v1496_v61, %v1500_v62  ;;  %v1508_v5 = vld [vmem:[#allocation6 + $0xba8] sm:$0xff]  ;;  %v10168_v7 = vcombine.low %v1496_v61, %v1500_v62  ;;  %v10238_v13 = vcombine.low %v1567_v0, %v1571_v1  ;;  %v1591_v30 = vld [vmem:[#allocation6 + $0xe40] sm:$0xff] }
 0x22e   :  { %v11736_v16 = vpack.c.bf16 %v1124_v11, %v1124_v11  ;;  %4362 = vmatpush1.bf16.msra.mxu0 %v10182_v4  ;;  %v1504_v4 = vld [vmem:[#allocation6 + $0xb88] sm:$0xff]  ;;  %v1579_v11 = vld [vmem:[#allocation6 + $0xde0] sm:$0xff] }
 0x22f   :  { %4372 = vmatprep.subr.bf16.mxu0 %v10191_v6  ;;  %v10239_v6 = vcombine.high %v1567_v0, %v1571_v1  ;;  %v10176_v20 = vcombine.low %v1504_v4, %v1508_v5  ;;  %v10246_v25 = vcombine.low %v1575_v9, %v1579_v11  ;;  %v1599_v38 = vld [vmem:[#allocation6 + $0xe80] sm:$0xff]  ;;  %v1536_v47 = vld [vmem:[#allocation6 + $0xc88] sm:$0xff] }
 0x230   :  { %4363 = vmatprep.mubr.bf16.mxu0 %v11736_v16  ;;  %4510 = vmatpush1.bf16.msra.mxu1 %v10120_v12  ;;  %v10177_v12 = vcombine.high %v1504_v4, %v1508_v5  ;;  %v1607_v52 = vld [vmem:[#allocation6 + $0xec0] sm:$0xff]  ;;  %v1544_v56 = vld [vmem:[#allocation6 + $0xcc8] sm:$0xff] }
 0x231   :  { %4527 = vmatprep.mubr.bf16.mxu1 %v11736_v16  ;;  %4364 = vmatmul.mubr.bf16.vlgmr.msra.gmra.mrb[0].mxu0 %v11738_v22  ;;  %v1615_v62 = vld [vmem:[#allocation6 + $0xf00] sm:$0xff]  ;;  %v1552_v1 = vld [vmem:[#allocation6 + $0xd08] sm:$0xff] }
 0x232   :  { %4373 = vmatpush1.bf16.msra.mxu0 %v10190_v17  ;;  %4511 = vmatprep.subr.bf16.mxu1 %v10129_v19  ;;  %v1516_v17 = vld [vmem:[#allocation6 + $0xbe8] sm:$0xff]  ;;  %v10247_v19 = vcombine.high %v1575_v9, %v1579_v11  ;;  %v1623_v5 = vld [vmem:[#allocation6 + $0xf40] sm:$0xff] }
 0x233   :  { %4374 = vmatprep.subr.bf16.mxu0 %v10199_v23  ;;  %v1587_v23 = vld [vmem:[#allocation6 + $0xe20] sm:$0xff]  ;;  %v10184_v29 = vcombine.low %v1512_v15, %v1516_v17  ;;  %v1560_v11 = vld [vmem:[#allocation6 + $0xd48] sm:$0xff] }
 0x234   :  { %4512 = vmatpush1.bf16.msra.mxu1 %v10128_v24  ;;  %v10185_v24 = vcombine.high %v1512_v15, %v1516_v17  ;;  %v10254_v49 = vcombine.low %v1583_v21, %v1587_v23  ;;  %v11745_v15 = vsub.s32 6, %v11683_v18 }
 0x235   :  { %4513 = vmatprep.subr.bf16.mxu1 %v10137_v27  ;;  %v1524_v27 = vld [vmem:[#allocation6 + $0xc28] sm:$0xff] }
 0x236   :  { %4375 = vmatpush1.bf16.msra.mxu0 %v10198_v28  ;;  %v10255_v28 = vcombine.high %v1583_v21, %v1587_v23  ;;  %v10192_v37 = vcombine.low %v1520_v26, %v1524_v27  ;;  %v1635_v21 = vld [vmem:[#allocation6 + $0xfa0] sm:$0xff] }
 0x237   :  { %4376 = vmatprep.subr.bf16.mxu0 %v10207_v32  ;;  %v1595_v32 = vld [vmem:[#allocation6 + $0xe60] sm:$0xff] }
 0x238   :  { %4514 = vmatpush1.bf16.msra.mxu1 %v10136_v45  ;;  %v10193_v45 = vcombine.high %v1520_v26, %v1524_v27  ;;  %v10262_v46 = vcombine.low %v1591_v30, %v1595_v32  ;;  %v1572_v26 = vld [vmem:[#allocation6 + $0xda8] sm:$0xff]  ;;  %v11288_v27 = vld [vmem:[#allocation4] sm:$0xff] }
 0x239   :  { %4515 = vmatprep.subr.bf16.mxu1 %v10145_v34  ;;  %v1532_v34 = vld [vmem:[#allocation6 + $0xc68] sm:$0xff] }
 0x23a   :  { %4377 = vmatpush1.bf16.msra.mxu0 %v10206_v36  ;;  %v10263_v36 = vcombine.high %v1591_v30, %v1595_v32  ;;  %v10200_v51 = vcombine.low %v1528_v33, %v1532_v34 }
 0x23b   :  { %4378 = vmatprep.subr.bf16.mxu0 %v10215_v8  ;;  %v1603_v8 = vld [vmem:[#allocation6 + $0xea0] sm:$0xff] }
 0x23c   :  { %4516 = vmatpush1.bf16.msra.mxu1 %v10144_v41  ;;  %v10201_v41 = vcombine.high %v1528_v33, %v1532_v34  ;;  %v10270_v55 = vcombine.low %v1599_v38, %v1603_v8 }
 0x23d   :  { %4517 = vmatprep.subr.bf16.mxu1 %v10153_v48  ;;  %v1540_v48 = vld [vmem:[#allocation6 + $0xca8] sm:$0xff] }
 0x23e   :  { %4379 = vmatpush1.bf16.msra.mxu0 %v10214_v50  ;;  %v10271_v50 = vcombine.high %v1599_v38, %v1603_v8  ;;  %v10208_v61 = vcombine.low %v1536_v47, %v1540_v48 }
 0x23f   :  { %4380 = vmatprep.subr.bf16.mxu0 %v10223_v53  ;;  %v1611_v53 = vld [vmem:[#allocation6 + $0xee0] sm:$0xff] }
 0x240   :  { %4518 = vmatpush1.bf16.msra.mxu1 %v10152_v54  ;;  %v10209_v54 = vcombine.high %v1536_v47, %v1540_v48  ;;  %v10278_v0 = vcombine.low %v1607_v52, %v1611_v53 }
 0x241   :  { %4519 = vmatprep.subr.bf16.mxu1 %v10161_v58  ;;  %v1548_v58 = vld [vmem:[#allocation6 + $0xce8] sm:$0xff] }
 0x242   :  { %4381 = vmatpush1.bf16.msra.mxu0 %v10222_v60  ;;  %v10279_v60 = vcombine.high %v1607_v52, %v1611_v53  ;;  %v10216_v4 = vcombine.low %v1544_v56, %v1548_v58 }
 0x243   :  { %4382 = vmatprep.subr.bf16.mxu0 %v10231_v63  ;;  %v1619_v63 = vld [vmem:[#allocation6 + $0xf20] sm:$0xff] }
 0x244   :  { %4520 = vmatpush1.bf16.msra.mxu1 %v10160_v42  ;;  %v10217_v42 = vcombine.high %v1544_v56, %v1548_v58  ;;  %v10286_v9 = vcombine.low %v1615_v62, %v1619_v63 }
 0x245   :  { %4521 = vmatprep.subr.bf16.mxu1 %v10169_v2  ;;  %v1556_v2 = vld [vmem:[#allocation6 + $0xd28] sm:$0xff] }
 0x246   :  { %4383 = vmatpush1.bf16.msra.mxu0 %v10230_v3  ;;  %v10287_v3 = vcombine.high %v1615_v62, %v1619_v63  ;;  %v10224_v17 = vcombine.low %v1552_v1, %v1556_v2 }
 0x247   :  { %4384 = vmatprep.subr.bf16.mxu0 %v10239_v6  ;;  %v1627_v6 = vld [vmem:[#allocation6 + $0xf60] sm:$0xff] }
 0x248   :  { %4522 = vmatpush1.bf16.msra.mxu1 %v10168_v7  ;;  %v10225_v7 = vcombine.high %v1552_v1, %v1556_v2  ;;  %v1149_v1 = vld [vmem:[#allocation6 + $0x70] sm:$0xff] }
 0x249   :  { %4523 = vmatprep.subr.bf16.mxu1 %v10177_v12  ;;  %v1564_v12 = vld [vmem:[#allocation6 + $0xd68] sm:$0xff] }
 0x24a   :  { %4385 = vmatpush1.bf16.msra.mxu0 %v10238_v13  ;;  %v10295_v13 = vcombine.high %v1623_v5, %v1627_v6  ;;  %v10233_v23 = vcombine.high %v1560_v11, %v1564_v12  ;;  %v10232_v32 = vcombine.low %v1560_v11, %v1564_v12  ;;  %v1153_v12 = vld [vmem:[#allocation6 + $0x90] sm:$0xff] }
 0x24b   :  { %4386 = vmatprep.subr.bf16.mxu0 %v10247_v19  ;;  %v11748_v19 = vsub.s32 7, %v11683_v18  ;;  %v1643_v18 = vld [vmem:[#allocation6 + $0xfe0] sm:$0xff] }
 0x24c   :  { %4524 = vmatpush1.bf16.msra.mxu1 %v10176_v20  ;;  %v1631_v20 = vld [vmem:[#allocation6 + $0xf80] sm:$0xff] }
 0x24d   :  { %4525 = vmatprep.subr.bf16.mxu1 %v10185_v24  ;;  %v10294_v24 = vcombine.low %v1623_v5, %v1627_v6  ;;  %v298_v30 = vrot.slane %v11288_v27, %v11748_v19  ;;  %v10302_v34 = vcombine.low %v1631_v20, %v1635_v21  ;;  %v1596_v5 = vld [vmem:[#allocation6 + $0xe68] sm:$0xff] }
 0x24e   :  { %4387 = vmatpush1.bf16.msra.mxu0 %v10246_v25  ;;  %v1568_v25 = vld [vmem:[#allocation6 + $0xd88] sm:$0xff] }
 0x24f   :  { %4388 = vmatprep.subr.bf16.mxu0 %v10255_v28  ;;  %v294_v28 = vrot.slane %v11288_v27, %v11745_v15  ;;  %v10240_v48 = vcombine.low %v1568_v25, %v1572_v26  ;;  %v1165_v27 = vld [vmem:[#allocation6 + $0xf0] sm:$0xff] }
 0x250   :  { %4526 = vmatpush1.bf16.msra.mxu1 %v10184_v29  ;;  %v10303_v29 = vcombine.high %v1631_v20, %v1635_v21  ;;  %v1600_v21 = vld [vmem:[#allocation6 + $0xe88] sm:$0xff] }
 0x251   :  { %4536 = vmatprep.subr.bf16.mxu1 %v10193_v45  ;;  %v1639_v45 = vld [vmem:[#allocation6 + $0xfc0] sm:$0xff] }
 0x252   :  { %4389 = vmatpush1.bf16.msra.mxu0 %v10254_v49  ;;  %v10241_v49 = vcombine.high %v1568_v25, %v1572_v26  ;;  %v10310_v56 = vcombine.low %v1639_v45, %v1643_v18  ;;  %v1161_v26 = vld [vmem:[#allocation6 + $0xd0] sm:$0xff] }
 0x253   :  { %4528 = vmatmul.mubr.bf16.vlgmr.msra.gmra.mrb[16].mxu1 %v11738_v22  ;;  %4390 = vmatprep.subr.bf16.mxu0 %v10263_v36  ;;  %v1576_v36 = vld [vmem:[#allocation6 + $0xdc8] sm:$0xff] }
 0x254   :  { %4537 = vmatpush1.bf16.msra.mxu1 %v10192_v37  ;;  %v1580_v37 = vld [vmem:[#allocation6 + $0xde8] sm:$0xff] }
 0x255   :  { %4538 = vmatprep.subr.bf16.mxu1 %v10201_v41  ;;  %v10311_v41 = vcombine.high %v1639_v45, %v1643_v18  ;;  %v10248_v63 = vcombine.low %v1576_v36, %v1580_v37  ;;  %v9835_v45 = vcombine.high %v1161_v26, %v1165_v27 }
 0x256   :  { %4391 = vmatpush1.bf16.msra.mxu0 %v10262_v46 }
 0x257   :  { %4392 = vmatprep.subr.bf16.mxu0 %v10271_v50  ;;  %v1137_v50 = vld [vmem:[#allocation6 + $0x10] sm:$0xff] }
 0x258   :  { %4539 = vmatpush1.bf16.msra.mxu1 %v10200_v51  ;;  %v1141_v51 = vld [vmem:[#allocation6 + $0x30] sm:$0xff] }
 0x259   :  { %4540 = vmatprep.subr.bf16.mxu1 %v10209_v54  ;;  %v10249_v54 = vcombine.high %v1576_v36, %v1580_v37  ;;  %v9834_v36 = vcombine.low %v1161_v26, %v1165_v27  ;;  %v1616_v37 = vld [vmem:[#allocation6 + $0xf08] sm:$0xff]  ;;  %v1209_v26 = vld [vmem:[#allocation6 + $0x250] sm:$0xff] }
 0x25a   :  { %4393 = vmatpush1.bf16.msra.mxu0 %v10270_v55  ;;  %v1213_v27 = vld [vmem:[#allocation6 + $0x270] sm:$0xff] }
 0x25b   :  { %4394 = vmatprep.subr.bf16.mxu0 %v10279_v60  ;;  %v9811_v60 = vcombine.high %v1137_v50, %v1141_v51 }
 0x25c   :  { %4541 = vmatpush1.bf16.msra.mxu1 %v10208_v61  ;;  %v1584_v61 = vld [vmem:[#allocation6 + $0xe08] sm:$0xff] }
 0x25d   :  { %4542 = vmatprep.subr.bf16.mxu1 %v10217_v42  ;;  %v1588_v42 = vld [vmem:[#allocation6 + $0xe28] sm:$0xff] }
 0x25e   :  { %4395 = vmatpush1.bf16.msra.mxu0 %v10278_v0  ;;  %v1145_v0 = vld [vmem:[#allocation6 + $0x50] sm:$0xff]  ;;  %v10256_v11 = vcombine.low %v1584_v61, %v1588_v42 }
 0x25f   :  { %4396 = vmatprep.subr.bf16.mxu0 %v10287_v3  ;;  %v9810_v3 = vcombine.low %v1137_v50, %v1141_v51  ;;  %v9818_v20 = vcombine.low %v1145_v0, %v1149_v1  ;;  %v1624_v51 = vld [vmem:[#allocation6 + $0xf48] sm:$0xff] }
 0x260   :  { %4543 = vmatpush1.bf16.msra.mxu1 %v10216_v4  ;;  %v1592_v4 = vld [vmem:[#allocation6 + $0xe48] sm:$0xff] }
 0x261   :  { %4544 = vmatprep.subr.bf16.mxu1 %v10225_v7  ;;  %v10257_v7 = vcombine.high %v1584_v61, %v1588_v42  ;;  %v10264_v25 = vcombine.low %v1592_v4, %v1596_v5  ;;  %v1632_v61 = vld [vmem:[#allocation6 + $0xf88] sm:$0xff] }
 0x262   :  { %4397 = vmatpush1.bf16.msra.mxu0 %v10286_v9  ;;  %v9819_v9 = vcombine.high %v1145_v0, %v1149_v1  ;;  %v1193_v0 = vld [vmem:[#allocation6 + $0x1d0] sm:$0xff] }
 0x263   :  { %4398 = vmatprep.subr.bf16.mxu0 %v10295_v13  ;;  %v1157_v13 = vld [vmem:[#allocation6 + $0xb0] sm:$0xff] }
 0x264   :  { %4545 = vmatpush1.bf16.msra.mxu1 %v10224_v17  ;;  %v10265_v17 = vcombine.high %v1592_v4, %v1596_v5  ;;  %v1197_v1 = vld [vmem:[#allocation6 + $0x1f0] sm:$0xff]  ;;  %v1640_v5 = vld [vmem:[#allocation6 + $0xfc8] sm:$0xff] }
 0x265   :  { %4546 = vmatprep.subr.bf16.mxu1 %v10233_v23  ;;  %v1604_v23 = vld [vmem:[#allocation6 + $0xea8] sm:$0xff] }
 0x266   :  { %4399 = vmatpush1.bf16.msra.mxu0 %v10294_v24  ;;  %v1104_v33 = vpop.f32.mrb[12].mxu1  ;;  %v9827_v24 = vcombine.high %v1153_v12, %v1157_v13  ;;  %v10272_v18 = vcombine.low %v1600_v21, %v1604_v23 }
 0x267   :  { %v1105_v38 = vadd.f32 %v1104_v33, %v294_v28  ;;  %v1106_v8 = vpop.f32.mrb[13].mxu1  ;;  %4400 = vmatprep.subr.bf16.mxu0 %v10303_v29  ;;  %v10273_v28 = vcombine.high %v1600_v21, %v1604_v23  ;;  %v9826_v29 = vcombine.low %v1153_v12, %v1157_v13  ;;  %v1173_v33 = vld [vmem:[#allocation6 + $0x130] sm:$0xff]  ;;  %v1138_v21 = vld [vmem:[#allocation6 + $0x18] sm:$0xff] }
 0x268   :  { %v1107_v46 = vadd.f32 %v1106_v8, %v298_v30  ;;  %v1108_v47 = vpop.f32.mrb[14].mxu1  ;;  %4547 = vmatpush1.bf16.msra.mxu1 %v10232_v32  ;;  %v1608_v30 = vld [vmem:[#allocation6 + $0xec8] sm:$0xff]  ;;  %v1201_v12 = vld [vmem:[#allocation6 + $0x210] sm:$0xff]  ;;  %v1142_v23 = vld [vmem:[#allocation6 + $0x38] sm:$0xff] }
 0x269   :  { %v1117_v52 = vmul.f32 0.01, %v1105_v38  ;;  %v1109_v53 = vpop.f32.mrb[15].mxu1  ;;  %4548 = vmatprep.subr.bf16.mxu1 %v10241_v49  ;;  %v1612_v32 = vld [vmem:[#allocation6 + $0xee8] sm:$0xff]  ;;  %v1169_v49 = vld [vmem:[#allocation6 + $0x110] sm:$0xff] }
 0x26a   :  { %v1118_v55 = vmul.f32 0.01, %v1107_v46  ;;  %4401 = vmatpush1.bf16.msra.mxu0 %v10302_v34  ;;  %v10281_v34 = vcombine.high %v1608_v30, %v1612_v32  ;;  %v9843_v8 = vcombine.high %v1169_v49, %v1173_v33  ;;  %v1181_v47 = vld [vmem:[#allocation6 + $0x170] sm:$0xff]  ;;  %v9842_v50 = vcombine.low %v1169_v49, %v1173_v33 }
 0x26b   :  { %v1125_v58 = vmax.f32 %v1105_v38, %v1117_v52  ;;  %4402 = vmatprep.subr.bf16.mxu0 %v10311_v41  ;;  %v1620_v38 = vld [vmem:[#allocation6 + $0xf28] sm:$0xff]  ;;  %v10280_v41 = vcombine.low %v1608_v30, %v1612_v32  ;;  %v1205_v13 = vld [vmem:[#allocation6 + $0x230] sm:$0xff]  ;;  %v1146_v30 = vld [vmem:[#allocation6 + $0x58] sm:$0xff] }
 0x26c   :  { %v1126_v62 = vmax.f32 %v1107_v46, %v1118_v55  ;;  %4549 = vmatpush1.bf16.msra.mxu1 %v10240_v48  ;;  %v1177_v46 = vld [vmem:[#allocation6 + $0x150] sm:$0xff]  ;;  %v10289_v48 = vcombine.high %v1616_v37, %v1620_v38  ;;  %v1628_v52 = vld [vmem:[#allocation6 + $0xf68] sm:$0xff]  ;;  %v1150_v32 = vld [vmem:[#allocation6 + $0x78] sm:$0xff] }
 0x26d   :  { %4550 = vmatprep.subr.bf16.mxu1 %v10249_v54  ;;  %v11754_v6 = vpack.c.bf16 %v1125_v58, %v1125_v58  ;;  %v9851_v53 = vcombine.high %v1177_v46, %v1181_v47  ;;  %v10288_v54 = vcombine.low %v1616_v37, %v1620_v38  ;;  %v1185_v55 = vld [vmem:[#allocation6 + $0x190] sm:$0xff]  ;;  %v10297_v58 = vcombine.high %v1624_v51, %v1628_v52  ;;  %v1154_v37 = vld [vmem:[#allocation6 + $0x98] sm:$0xff] }
 0x26e   :  { %v11752_v2 = vpack.c.bf16 %v1126_v62, %v1126_v62  ;;  %4403 = vmatpush1.bf16.msra.mxu0 %v10310_v56  ;;  %v1189_v56 = vld [vmem:[#allocation6 + $0x1b0] sm:$0xff]  ;;  %v1636_v62 = vld [vmem:[#allocation6 + $0xfa8] sm:$0xff]  ;;  %v10296_v42 = vcombine.low %v1624_v51, %v1628_v52  ;;  %v1158_v38 = vld [vmem:[#allocation6 + $0xb8] sm:$0xff] }
 0x26f   :  { %4577 = vmatprep.subr.bf16.mxu0 %v9811_v60  ;;  %v9850_v60 = vcombine.low %v1177_v46, %v1181_v47  ;;  %v9858_v4 = vcombine.low %v1185_v55, %v1189_v56  ;;  %v1217_v49 = vld [vmem:[#allocation6 + $0x290] sm:$0xff]  ;;  %v1162_v51 = vld [vmem:[#allocation6 + $0xd8] sm:$0xff] }
 0x270   :  { %4404 = vmatprep.mubr.bf16.mxu0 %v11752_v2  ;;  %4551 = vmatpush1.bf16.msra.mxu1 %v10248_v63  ;;  %v9859_v63 = vcombine.high %v1185_v55, %v1189_v56  ;;  %v1221_v33 = vld [vmem:[#allocation6 + $0x2b0] sm:$0xff]  ;;  %v1166_v52 = vld [vmem:[#allocation6 + $0xf8] sm:$0xff] }
 0x271   :  { %4568 = vmatprep.mubr.bf16.mxu1 %v11752_v2  ;;  %4405 = vmatmul.mubr.bf16.vlgmr.msra.gmra.mrb[0].mxu0 %v11754_v6  ;;  %v1225_v46 = vld [vmem:[#allocation6 + $0x2d0] sm:$0xff] }
 0x272   :  { %4578 = vmatpush1.bf16.msra.mxu0 %v9810_v3  ;;  %4609 = vmatprep.mubr.bf16.mxu0 %v11697_v10  ;;  %v10305_v3 = vcombine.high %v1632_v61, %v1636_v62  ;;  %v1229_v47 = vld [vmem:[#allocation6 + $0x2f0] sm:$0xff] }
 0x273   :  { %4552 = vmatprep.subr.bf16.mxu1 %v10257_v7  ;;  %4579 = vmatprep.subr.bf16.mxu0 %v9819_v9  ;;  %v1644_v7 = vld [vmem:[#allocation6 + $0xfe8] sm:$0xff]  ;;  %v9867_v9 = vcombine.high %v1193_v0, %v1197_v1  ;;  %v1233_v55 = vld [vmem:[#allocation6 + $0x310] sm:$0xff] }
 0x274   :  { %4553 = vmatpush1.bf16.msra.mxu1 %v10256_v11  ;;  %v10304_v11 = vcombine.low %v1632_v61, %v1636_v62  ;;  %v1237_v56 = vld [vmem:[#allocation6 + $0x330] sm:$0xff]  ;;  %v1174_v61 = vld [vmem:[#allocation6 + $0x138] sm:$0xff] }
 0x275   :  { %4554 = vmatprep.subr.bf16.mxu1 %v10265_v17  ;;  %v10313_v17 = vcombine.high %v1640_v5, %v1644_v7  ;;  %v9907_v62 = vcombine.high %v1233_v55, %v1237_v56 }
 0x276   :  { %4580 = vmatpush1.bf16.msra.mxu0 %v9818_v20  ;;  %v9866_v20 = vcombine.low %v1193_v0, %v1197_v1  ;;  %v1245_v0 = vld [vmem:[#allocation6 + $0x370] sm:$0xff] }
 0x277   :  { %4581 = vmatprep.subr.bf16.mxu0 %v9827_v24  ;;  %v9875_v24 = vcombine.high %v1201_v12, %v1205_v13 }
 0x278   :  { %4555 = vmatpush1.bf16.msra.mxu1 %v10264_v25  ;;  %v10312_v25 = vcombine.low %v1640_v5, %v1644_v7  ;;  %v1182_v5 = vld [vmem:[#allocation6 + $0x178] sm:$0xff] }
 0x279   :  { %4556 = vmatprep.subr.bf16.mxu1 %v10273_v28  ;;  %v9813_v28 = vcombine.high %v1138_v21, %v1142_v23 }
 0x27a   :  { %4582 = vmatpush1.bf16.msra.mxu0 %v9826_v29  ;;  %v9874_v29 = vcombine.low %v1201_v12, %v1205_v13  ;;  %v1253_v12 = vld [vmem:[#allocation6 + $0x3b0] sm:$0xff] }
 0x27b   :  { %4583 = vmatprep.subr.bf16.mxu0 %v9835_v45  ;;  %v9883_v45 = vcombine.high %v1209_v26, %v1213_v27 }
 0x27c   :  { %4557 = vmatpush1.bf16.msra.mxu1 %v10272_v18  ;;  %v9812_v18 = vcombine.low %v1138_v21, %v1142_v23  ;;  %v1190_v21 = vld [vmem:[#allocation6 + $0x1b8] sm:$0xff] }
 0x27d   :  { %4558 = vmatprep.subr.bf16.mxu1 %v10281_v34  ;;  %v9821_v34 = vcombine.high %v1146_v30, %v1150_v32 }
 0x27e   :  { %4584 = vmatpush1.bf16.msra.mxu0 %v9834_v36  ;;  %v9882_v36 = vcombine.low %v1209_v26, %v1213_v27  ;;  %v1261_v26 = vld [vmem:[#allocation6 + $0x3f0] sm:$0xff] }
 0x27f   :  { %4585 = vmatprep.subr.bf16.mxu0 %v9843_v8  ;;  %v9891_v8 = vcombine.high %v1217_v49, %v1221_v33 }
 0x280   :  { %4559 = vmatpush1.bf16.msra.mxu1 %v10280_v41  ;;  %v9820_v41 = vcombine.low %v1146_v30, %v1150_v32  ;;  %v1198_v30 = vld [vmem:[#allocation6 + $0x1f8] sm:$0xff] }
 0x281   :  { %4560 = vmatprep.subr.bf16.mxu1 %v10289_v48  ;;  %v9829_v48 = vcombine.high %v1154_v37, %v1158_v38 }
 0x282   :  { %4586 = vmatpush1.bf16.msra.mxu0 %v9842_v50  ;;  %v9890_v50 = vcombine.low %v1217_v49, %v1221_v33  ;;  %v1269_v49 = vld [vmem:[#allocation6 + $0x430] sm:$0xff] }
 0x283   :  { %4587 = vmatprep.subr.bf16.mxu0 %v9851_v53  ;;  %v9899_v53 = vcombine.high %v1225_v46, %v1229_v47 }
 0x284   :  { %4561 = vmatpush1.bf16.msra.mxu1 %v10288_v54  ;;  %v9828_v54 = vcombine.low %v1154_v37, %v1158_v38  ;;  %v1206_v37 = vld [vmem:[#allocation6 + $0x238] sm:$0xff] }
 0x285   :  { %4562 = vmatprep.subr.bf16.mxu1 %v10297_v58  ;;  %v9837_v58 = vcombine.high %v1162_v51, %v1166_v52 }
 0x286   :  { %4588 = vmatpush1.bf16.msra.mxu0 %v9850_v60  ;;  %v9898_v60 = vcombine.low %v1225_v46, %v1229_v47  ;;  %v1277_v46 = vld [vmem:[#allocation6 + $0x470] sm:$0xff] }
 0x287   :  { %4589 = vmatprep.subr.bf16.mxu0 %v9859_v63  ;;  %v9836_v63 = vcombine.low %v1162_v51, %v1166_v52  ;;  %v1214_v51 = vld [vmem:[#allocation6 + $0x278] sm:$0xff] }
 0x288   :  { %4563 = vmatpush1.bf16.msra.mxu1 %v10296_v42  ;;  %v1241_v42 = vld [vmem:[#allocation6 + $0x350] sm:$0xff] }
 0x289   :  { %4564 = vmatprep.subr.bf16.mxu1 %v10305_v3  ;;  %v9906_v3 = vcombine.low %v1233_v55, %v1237_v56  ;;  %v9915_v7 = vcombine.high %v1241_v42, %v1245_v0  ;;  %v1285_v55 = vld [vmem:[#allocation6 + $0x4b0] sm:$0xff] }
 0x28a   :  { %4590 = vmatpush1.bf16.msra.mxu0 %v9858_v4  ;;  %v1178_v4 = vld [vmem:[#allocation6 + $0x158] sm:$0xff] }
 0x28b   :  { %4591 = vmatprep.subr.bf16.mxu0 %v9867_v9  ;;  %v9853_v13 = vcombine.high %v1178_v4, %v1182_v5 }
 0x28c   :  { %4565 = vmatpush1.bf16.msra.mxu1 %v10304_v11  ;;  %v1249_v11 = vld [vmem:[#allocation6 + $0x390] sm:$0xff] }
 0x28d   :  { %4566 = vmatprep.subr.bf16.mxu1 %v10313_v17  ;;  %v9914_v17 = vcombine.low %v1241_v42, %v1245_v0  ;;  %v9923_v23 = vcombine.high %v1249_v11, %v1253_v12  ;;  %v1293_v42 = vld [vmem:[#allocation6 + $0x4f0] sm:$0xff] }
 0x28e   :  { %4592 = vmatpush1.bf16.msra.mxu0 %v9866_v20  ;;  %v1186_v20 = vld [vmem:[#allocation6 + $0x198] sm:$0xff] }
 0x28f   :  { %4593 = vmatprep.subr.bf16.mxu0 %v9875_v24  ;;  %v9852_v24 = vcombine.low %v1178_v4, %v1182_v5  ;;  %v9861_v27 = vcombine.high %v1186_v20, %v1190_v21  ;;  %v1230_v4 = vld [vmem:[#allocation6 + $0x2f8] sm:$0xff] }
 0x290   :  { %4567 = vmatpush1.bf16.msra.mxu1 %v10312_v25  ;;  %v1257_v25 = vld [vmem:[#allocation6 + $0x3d0] sm:$0xff] }
 0x291   :  { %4741 = vmatprep.subr.bf16.mxu1 %v9813_v28  ;;  %v9922_v28 = vcombine.low %v1249_v11, %v1253_v12  ;;  %v9931_v32 = vcombine.high %v1257_v25, %v1261_v26  ;;  %v1301_v11 = vld [vmem:[#allocation6 + $0x530] sm:$0xff] }
 0x292   :  { %4594 = vmatpush1.bf16.msra.mxu0 %v9874_v29  ;;  %v1194_v29 = vld [vmem:[#allocation6 + $0x1d8] sm:$0xff] }
 0x293   :  { %4569 = vmatmul.mubr.bf16.vlgmr.msra.gmra.mrb[16].mxu1 %v11754_v6  ;;  %4595 = vmatprep.subr.bf16.mxu0 %v9883_v45  ;;  %v9860_v45 = vcombine.low %v1186_v20, %v1190_v21  ;;  %v9869_v33 = vcombine.high %v1194_v29, %v1198_v30  ;;  %v1238_v20 = vld [vmem:[#allocation6 + $0x338] sm:$0xff] }
 0x294   :  { %4742 = vmatpush1.bf16.msra.mxu1 %v9812_v18  ;;  %4773 = vmatprep.mubr.bf16.mxu1 %v11697_v10  ;;  %v1170_v10 = vld [vmem:[#allocation6 + $0x118] sm:$0xff]  ;;  %v1265_v18 = vld [vmem:[#allocation6 + $0x410] sm:$0xff] }
 0x295   :  { %4743 = vmatprep.subr.bf16.mxu1 %v9821_v34  ;;  %v9845_v1 = vcombine.high %v1170_v10, %v1174_v61  ;;  %v9844_v9 = vcombine.low %v1170_v10, %v1174_v61  ;;  %v9930_v34 = vcombine.low %v1257_v25, %v1261_v26  ;;  %v9939_v38 = vcombine.high %v1265_v18, %v1269_v49  ;;  %v1222_v10 = vld [vmem:[#allocation6 + $0x2b8] sm:$0xff]  ;;  %v1309_v25 = vld [vmem:[#allocation6 + $0x570] sm:$0xff] }
 0x296   :  { %4596 = vmatpush1.bf16.msra.mxu0 %v9882_v36  ;;  %v1202_v36 = vld [vmem:[#allocation6 + $0x218] sm:$0xff] }
 0x297   :  { %4597 = vmatprep.subr.bf16.mxu0 %v9891_v8  ;;  %v9868_v8 = vcombine.low %v1194_v29, %v1198_v30  ;;  %v9877_v47 = vcombine.high %v1202_v36, %v1206_v37  ;;  %v1246_v29 = vld [vmem:[#allocation6 + $0x378] sm:$0xff] }
 0x298   :  { %4744 = vmatpush1.bf16.msra.mxu1 %v9820_v41  ;;  %v1273_v41 = vld [vmem:[#allocation6 + $0x450] sm:$0xff] }
 0x299   :  { %4745 = vmatprep.subr.bf16.mxu1 %v9829_v48  ;;  %v9938_v48 = vcombine.low %v1265_v18, %v1269_v49  ;;  %v9947_v52 = vcombine.high %v1273_v41, %v1277_v46  ;;  %v1317_v18 = vld [vmem:[#allocation6 + $0x5b0] sm:$0xff] }
 0x29a   :  { %4598 = vmatpush1.bf16.msra.mxu0 %v9890_v50  ;;  %v1210_v50 = vld [vmem:[#allocation6 + $0x258] sm:$0xff] }
 0x29b   :  { %4599 = vmatprep.subr.bf16.mxu0 %v9899_v53  ;;  %v9876_v53 = vcombine.low %v1202_v36, %v1206_v37  ;;  %v9885_v56 = vcombine.high %v1210_v50, %v1214_v51  ;;  %v1254_v36 = vld [vmem:[#allocation6 + $0x3b8] sm:$0xff] }
 0x29c   :  { %4746 = vmatpush1.bf16.msra.mxu1 %v9828_v54  ;;  %v1281_v54 = vld [vmem:[#allocation6 + $0x490] sm:$0xff] }
 0x29d   :  { %4747 = vmatprep.subr.bf16.mxu1 %v9837_v58  ;;  %v9946_v58 = vcombine.low %v1273_v41, %v1277_v46  ;;  %v9955_v61 = vcombine.high %v1281_v54, %v1285_v55  ;;  %v1325_v41 = vld [vmem:[#allocation6 + $0x5f0] sm:$0xff] }
 0x29e   :  { %4600 = vmatpush1.bf16.msra.mxu0 %v9898_v60  ;;  %v1218_v60 = vld [vmem:[#allocation6 + $0x298] sm:$0xff] }
 0x29f   :  { %4601 = vmatprep.subr.bf16.mxu0 %v9907_v62  ;;  %v9884_v62 = vcombine.low %v1210_v50, %v1214_v51  ;;  %v9893_v0 = vcombine.high %v1218_v60, %v1222_v10  ;;  %v1262_v50 = vld [vmem:[#allocation6 + $0x3f8] sm:$0xff] }
 0x2a0   :  { %4748 = vmatpush1.bf16.msra.mxu1 %v9836_v63  ;;  %v1289_v63 = vld [vmem:[#allocation6 + $0x4d0] sm:$0xff] }
 0x2a1   :  { %4749 = vmatprep.subr.bf16.mxu1 %v9845_v1  ;;  %v9954_v1 = vcombine.low %v1281_v54, %v1285_v55  ;;  %v9963_v5 = vcombine.high %v1289_v63, %v1293_v42  ;;  %v1333_v54 = vld [vmem:[#allocation6 + $0x630] sm:$0xff] }
 0x2a2   :  { %4602 = vmatpush1.bf16.msra.mxu0 %v9906_v3  ;;  %v1226_v3 = vld [vmem:[#allocation6 + $0x2d8] sm:$0xff] }
 0x2a3   :  { %4603 = vmatprep.subr.bf16.mxu0 %v9915_v7  ;;  %v9892_v7 = vcombine.low %v1218_v60, %v1222_v10  ;;  %v9901_v12 = vcombine.high %v1226_v3, %v1230_v4  ;;  %v1270_v60 = vld [vmem:[#allocation6 + $0x438] sm:$0xff] }
 0x2a4   :  { %4750 = vmatpush1.bf16.msra.mxu1 %v9844_v9  ;;  %v1297_v9 = vld [vmem:[#allocation6 + $0x510] sm:$0xff] }
 0x2a5   :  { %4751 = vmatprep.subr.bf16.mxu1 %v9853_v13  ;;  %v9962_v13 = vcombine.low %v1289_v63, %v1293_v42  ;;  %v9971_v21 = vcombine.high %v1297_v9, %v1301_v11  ;;  %v1341_v63 = vld [vmem:[#allocation6 + $0x670] sm:$0xff] }
 0x2a6   :  { %4604 = vmatpush1.bf16.msra.mxu0 %v9914_v17  ;;  %v1234_v17 = vld [vmem:[#allocation6 + $0x318] sm:$0xff] }
 0x2a7   :  { %4605 = vmatprep.subr.bf16.mxu0 %v9923_v23  ;;  %v9900_v23 = vcombine.low %v1226_v3, %v1230_v4  ;;  %v9909_v26 = vcombine.high %v1234_v17, %v1238_v20  ;;  %v1278_v3 = vld [vmem:[#allocation6 + $0x478] sm:$0xff] }
 0x2a8   :  { %4752 = vmatpush1.bf16.msra.mxu1 %v9852_v24  ;;  %v1305_v24 = vld [vmem:[#allocation6 + $0x550] sm:$0xff] }
 0x2a9   :  { %4753 = vmatprep.subr.bf16.mxu1 %v9861_v27  ;;  %v9970_v27 = vcombine.low %v1297_v9, %v1301_v11  ;;  %v9979_v30 = vcombine.high %v1305_v24, %v1309_v25  ;;  %v1349_v9 = vld [vmem:[#allocation6 + $0x6b0] sm:$0xff] }
 0x2aa   :  { %4606 = vmatpush1.bf16.msra.mxu0 %v9922_v28  ;;  %v1242_v28 = vld [vmem:[#allocation6 + $0x358] sm:$0xff] }
 0x2ab   :  { %4607 = vmatprep.subr.bf16.mxu0 %v9931_v32  ;;  %v9908_v32 = vcombine.low %v1234_v17, %v1238_v20  ;;  %v9917_v49 = vcombine.high %v1242_v28, %v1246_v29  ;;  %v1286_v17 = vld [vmem:[#allocation6 + $0x4b8] sm:$0xff] }
 0x2ac   :  { %4754 = vmatpush1.bf16.msra.mxu1 %v9860_v45  ;;  %v1313_v45 = vld [vmem:[#allocation6 + $0x590] sm:$0xff] }
 0x2ad   :  { %4755 = vmatprep.subr.bf16.mxu1 %v9869_v33  ;;  %v9978_v33 = vcombine.low %v1305_v24, %v1309_v25  ;;  %v9987_v37 = vcombine.high %v1313_v45, %v1317_v18  ;;  %v1357_v24 = vld [vmem:[#allocation6 + $0x6f0] sm:$0xff] }
 0x2ae   :  { %4608 = vmatpush1.bf16.msra.mxu0 %v9930_v34  ;;  %v1250_v34 = vld [vmem:[#allocation6 + $0x398] sm:$0xff] }
 0x2af   :  { %4618 = vmatprep.subr.bf16.mxu0 %v9939_v38  ;;  %v9916_v38 = vcombine.low %v1242_v28, %v1246_v29  ;;  %v9925_v46 = vcombine.high %v1250_v34, %v1254_v36  ;;  %v1294_v28 = vld [vmem:[#allocation6 + $0x4f8] sm:$0xff] }
 0x2b0   :  { %4756 = vmatpush1.bf16.msra.mxu1 %v9868_v8  ;;  %v1321_v8 = vld [vmem:[#allocation6 + $0x5d0] sm:$0xff] }
 0x2b1   :  { %4610 = vmatmul.mubr.bf16.vlgmr.msra.gmra.mrb[4].mxu0 %v11699_v14  ;;  %4757 = vmatprep.subr.bf16.mxu1 %v9877_v47  ;;  %v9986_v47 = vcombine.low %v1313_v45, %v1317_v18  ;;  %v9995_v51 = vcombine.high %v1321_v8, %v1325_v41 }
 0x2b2   :  { %4619 = vmatpush1.bf16.msra.mxu0 %v9938_v48  ;;  %4650 = vmatprep.mubr.bf16.mxu0 %v11718_v35  ;;  %v1258_v48 = vld [vmem:[#allocation6 + $0x3d8] sm:$0xff] }
 0x2b3   :  { %4620 = vmatprep.subr.bf16.mxu0 %v9947_v52  ;;  %v9924_v52 = vcombine.low %v1250_v34, %v1254_v36  ;;  %v9933_v55 = vcombine.high %v1258_v48, %v1262_v50  ;;  %v1369_v36 = vld [vmem:[#allocation6 + $0x750] sm:$0xff] }
 0x2b4   :  { %4758 = vmatpush1.bf16.msra.mxu1 %v9876_v53  ;;  %v1329_v53 = vld [vmem:[#allocation6 + $0x610] sm:$0xff] }
 0x2b5   :  { %4759 = vmatprep.subr.bf16.mxu1 %v9885_v56  ;;  %v9994_v56 = vcombine.low %v1321_v8, %v1325_v41  ;;  %v10003_v10 = vcombine.high %v1329_v53, %v1333_v54  ;;  %v1306_v41 = vld [vmem:[#allocation6 + $0x558] sm:$0xff] }
 0x2b6   :  { %4621 = vmatpush1.bf16.msra.mxu0 %v9946_v58  ;;  %v1266_v58 = vld [vmem:[#allocation6 + $0x418] sm:$0xff] }
 0x2b7   :  { %4622 = vmatprep.subr.bf16.mxu0 %v9955_v61  ;;  %v9932_v61 = vcombine.low %v1258_v48, %v1262_v50  ;;  %v9941_v42 = vcombine.high %v1266_v58, %v1270_v60  ;;  %v1377_v50 = vld [vmem:[#allocation6 + $0x790] sm:$0xff] }
 0x2b8   :  { %4760 = vmatpush1.bf16.msra.mxu1 %v9884_v62  ;;  %v1337_v62 = vld [vmem:[#allocation6 + $0x650] sm:$0xff] }
 0x2b9   :  { %4761 = vmatprep.subr.bf16.mxu1 %v9893_v0  ;;  %v10002_v0 = vcombine.low %v1329_v53, %v1333_v54  ;;  %v10011_v4 = vcombine.high %v1337_v62, %v1341_v63  ;;  %v1314_v54 = vld [vmem:[#allocation6 + $0x598] sm:$0xff] }
 0x2ba   :  { %4623 = vmatpush1.bf16.msra.mxu0 %v9954_v1  ;;  %v1274_v1 = vld [vmem:[#allocation6 + $0x458] sm:$0xff] }
 0x2bb   :  { %4624 = vmatprep.subr.bf16.mxu0 %v9963_v5  ;;  %v9940_v5 = vcombine.low %v1266_v58, %v1270_v60  ;;  %v9949_v11 = vcombine.high %v1274_v1, %v1278_v3  ;;  %v1385_v60 = vld [vmem:[#allocation6 + $0x7d0] sm:$0xff] }
 0x2bc   :  { %4762 = vmatpush1.bf16.msra.mxu1 %v9892_v7  ;;  %v1345_v7 = vld [vmem:[#allocation6 + $0x690] sm:$0xff] }
 0x2bd   :  { %4763 = vmatprep.subr.bf16.mxu1 %v9901_v12  ;;  %v10010_v12 = vcombine.low %v1337_v62, %v1341_v63  ;;  %v10019_v20 = vcombine.high %v1345_v7, %v1349_v9  ;;  %v1322_v63 = vld [vmem:[#allocation6 + $0x5d8] sm:$0xff] }
 0x2be   :  { %4625 = vmatpush1.bf16.msra.mxu0 %v9962_v13  ;;  %v1282_v13 = vld [vmem:[#allocation6 + $0x498] sm:$0xff] }
 0x2bf   :  { %4626 = vmatprep.subr.bf16.mxu0 %v9971_v21  ;;  %v9948_v21 = vcombine.low %v1274_v1, %v1278_v3  ;;  %v9957_v25 = vcombine.high %v1282_v13, %v1286_v17  ;;  %v1393_v3 = vld [vmem:[#allocation6 + $0x810] sm:$0xff] }
 0x2c0   :  { %4764 = vmatpush1.bf16.msra.mxu1 %v9900_v23  ;;  %v1353_v23 = vld [vmem:[#allocation6 + $0x6d0] sm:$0xff] }
 0x2c1   :  { %4765 = vmatprep.subr.bf16.mxu1 %v9909_v26  ;;  %v10018_v26 = vcombine.low %v1345_v7, %v1349_v9  ;;  %v10027_v29 = vcombine.high %v1353_v23, %v1357_v24  ;;  %v10026_v18 = vcombine.low %v1353_v23, %v1357_v24  ;;  %v1330_v9 = vld [vmem:[#allocation6 + $0x618] sm:$0xff] }
 0x2c2   :  { %4627 = vmatpush1.bf16.msra.mxu0 %v9970_v27  ;;  %v1290_v27 = vld [vmem:[#allocation6 + $0x4d8] sm:$0xff] }
 0x2c3   :  { %4628 = vmatprep.subr.bf16.mxu0 %v9979_v30  ;;  %v9956_v30 = vcombine.low %v1282_v13, %v1286_v17  ;;  %v9965_v45 = vcombine.high %v1290_v27, %v1294_v28  ;;  %v9964_v34 = vcombine.low %v1290_v27, %v1294_v28  ;;  %v1401_v17 = vld [vmem:[#allocation6 + $0x850] sm:$0xff]  ;;  %v1338_v24 = vld [vmem:[#allocation6 + $0x658] sm:$0xff] }
 0x2c4   :  { %4766 = vmatpush1.bf16.msra.mxu1 %v9908_v32  ;;  %v1361_v32 = vld [vmem:[#allocation6 + $0x710] sm:$0xff] }
 0x2c5   :  { %4767 = vmatprep.subr.bf16.mxu1 %v9917_v49  ;;  %v1302_v49 = vld [vmem:[#allocation6 + $0x538] sm:$0xff]  ;;  %v1409_v28 = vld [vmem:[#allocation6 + $0x890] sm:$0xff] }
 0x2c6   :  { %4629 = vmatpush1.bf16.msra.mxu0 %v9978_v33 }
 0x2c7   :  { %4630 = vmatprep.subr.bf16.mxu0 %v9987_v37  ;;  %v1373_v37 = vld [vmem:[#allocation6 + $0x770] sm:$0xff] }
 0x2c8   :  { %4768 = vmatpush1.bf16.msra.mxu1 %v9916_v38  ;;  %v10042_v53 = vcombine.low %v1369_v36, %v1373_v37 }
 0x2c9   :  { %4769 = vmatprep.subr.bf16.mxu1 %v9925_v46  ;;  %v1310_v46 = vld [vmem:[#allocation6 + $0x578] sm:$0xff] }
 0x2ca   :  { %4631 = vmatpush1.bf16.msra.mxu0 %v9986_v47  ;;  %v10043_v47 = vcombine.high %v1369_v36, %v1373_v37  ;;  %v9980_v58 = vcombine.low %v1306_v41, %v1310_v46  ;;  %v1354_v37 = vld [vmem:[#allocation6 + $0x6d8] sm:$0xff] }
 0x2cb   :  { %4632 = vmatprep.subr.bf16.mxu0 %v9995_v51  ;;  %v1381_v51 = vld [vmem:[#allocation6 + $0x7b0] sm:$0xff] }
 0x2cc   :  { %4770 = vmatpush1.bf16.msra.mxu1 %v9924_v52  ;;  %v9981_v52 = vcombine.high %v1306_v41, %v1310_v46  ;;  %v10050_v62 = vcombine.low %v1377_v50, %v1381_v51  ;;  %v1425_v46 = vld [vmem:[#allocation6 + $0x910] sm:$0xff] }
 0x2cd   :  { %4771 = vmatprep.subr.bf16.mxu1 %v9933_v55  ;;  %v1318_v55 = vld [vmem:[#allocation6 + $0x5b8] sm:$0xff] }
 0x2ce   :  { %4633 = vmatpush1.bf16.msra.mxu0 %v9994_v56  ;;  %v10051_v56 = vcombine.high %v1377_v50, %v1381_v51  ;;  %v9988_v1 = vcombine.low %v1314_v54, %v1318_v55  ;;  %v1362_v51 = vld [vmem:[#allocation6 + $0x718] sm:$0xff] }
 0x2cf   :  { %4634 = vmatprep.subr.bf16.mxu0 %v10003_v10  ;;  %v1389_v10 = vld [vmem:[#allocation6 + $0x7f0] sm:$0xff] }
 0x2d0   :  { %4772 = vmatpush1.bf16.msra.mxu1 %v9932_v61  ;;  %v9989_v61 = vcombine.high %v1314_v54, %v1318_v55  ;;  %v10058_v7 = vcombine.low %v1385_v60, %v1389_v10  ;;  %v1433_v55 = vld [vmem:[#allocation6 + $0x950] sm:$0xff] }
 0x2d1   :  { %4782 = vmatprep.subr.bf16.mxu1 %v9941_v42  ;;  %v1326_v42 = vld [vmem:[#allocation6 + $0x5f8] sm:$0xff] }
 0x2d2   :  { %4635 = vmatpush1.bf16.msra.mxu0 %v10002_v0  ;;  %v10059_v0 = vcombine.high %v1385_v60, %v1389_v10  ;;  %v9996_v13 = vcombine.low %v1322_v63, %v1326_v42  ;;  %v1370_v10 = vld [vmem:[#allocation6 + $0x758] sm:$0xff] }
 0x2d3   :  { %4774 = vmatmul.mubr.bf16.vlgmr.msra.gmra.mrb[20].mxu1 %v11699_v14  ;;  %4636 = vmatprep.subr.bf16.mxu0 %v10011_v4  ;;  %v1365_v14 = vld [vmem:[#allocation6 + $0x730] sm:$0xff] }
 0x2d4   :  { %4783 = vmatpush1.bf16.msra.mxu1 %v9940_v5  ;;  %4814 = vmatprep.mubr.bf16.mxu1 %v11718_v35  ;;  %v1298_v35 = vld [vmem:[#allocation6 + $0x518] sm:$0xff]  ;;  %v10035_v33 = vcombine.high %v1361_v32, %v1365_v14  ;;  %v10034_v8 = vcombine.low %v1361_v32, %v1365_v14  ;;  %v1397_v4 = vld [vmem:[#allocation6 + $0x830] sm:$0xff]  ;;  %v9997_v5 = vcombine.high %v1322_v63, %v1326_v42 }
 0x2d5   :  { %4784 = vmatprep.subr.bf16.mxu1 %v9949_v11  ;;  %v9973_v38 = vcombine.high %v1298_v35, %v1302_v49  ;;  %v9972_v48 = vcombine.low %v1298_v35, %v1302_v49  ;;  %v1334_v11 = vld [vmem:[#allocation6 + $0x638] sm:$0xff]  ;;  %v10066_v23 = vcombine.low %v1393_v3, %v1397_v4  ;;  %v1417_v49 = vld [vmem:[#allocation6 + $0x8d0] sm:$0xff] }
 0x2d6   :  { %4637 = vmatpush1.bf16.msra.mxu0 %v10010_v12  ;;  %v10067_v12 = vcombine.high %v1393_v3, %v1397_v4  ;;  %v10004_v27 = vcombine.low %v1330_v9, %v1334_v11  ;;  %v1346_v14 = vld [vmem:[#allocation6 + $0x698] sm:$0xff]  ;;  %v1441_v42 = vld [vmem:[#allocation6 + $0x990] sm:$0xff] }
 0x2d7   :  { %4638 = vmatprep.subr.bf16.mxu0 %v10019_v20  ;;  %v1405_v20 = vld [vmem:[#allocation6 + $0x870] sm:$0xff]  ;;  %v1378_v4 = vld [vmem:[#allocation6 + $0x798] sm:$0xff] }
 0x2d8   :  { %4785 = vmatpush1.bf16.msra.mxu1 %v9948_v21  ;;  %v10005_v21 = vcombine.high %v1330_v9, %v1334_v11  ;;  %v10074_v32 = vcombine.low %v1401_v17, %v1405_v20  ;;  %v1449_v11 = vld [vmem:[#allocation6 + $0x9d0] sm:$0xff] }
 0x2d9   :  { %4786 = vmatprep.subr.bf16.mxu1 %v9957_v25  ;;  %v1342_v25 = vld [vmem:[#allocation6 + $0x678] sm:$0xff] }
 0x2da   :  { %4639 = vmatpush1.bf16.msra.mxu0 %v10018_v26  ;;  %v10075_v26 = vcombine.high %v1401_v17, %v1405_v20  ;;  %v10012_v35 = vcombine.low %v1338_v24, %v1342_v25  ;;  %v1386_v20 = vld [vmem:[#allocation6 + $0x7d8] sm:$0xff] }
 0x2db   :  { %4640 = vmatprep.subr.bf16.mxu0 %v10027_v29  ;;  %v1413_v29 = vld [vmem:[#allocation6 + $0x8b0] sm:$0xff] }
 0x2dc   :  { %4787 = vmatpush1.bf16.msra.mxu1 %v9956_v30  ;;  %v10013_v30 = vcombine.high %v1338_v24, %v1342_v25  ;;  %v10082_v36 = vcombine.low %v1409_v28, %v1413_v29  ;;  %v1457_v25 = vld [vmem:[#allocation6 + $0xa10] sm:$0xff] }
 0x2dd   :  { %4788 = vmatprep.subr.bf16.mxu1 %v9965_v45  ;;  %v1350_v45 = vld [vmem:[#allocation6 + $0x6b8] sm:$0xff] }
 0x2de   :  { %4641 = vmatpush1.bf16.msra.mxu0 %v10026_v18  ;;  %v10083_v18 = vcombine.high %v1409_v28, %v1413_v29  ;;  %v10020_v41 = vcombine.low %v1346_v14, %v1350_v45  ;;  %v1394_v29 = vld [vmem:[#allocation6 + $0x818] sm:$0xff] }
 0x2df   :  { %4642 = vmatprep.subr.bf16.mxu0 %v10035_v33  ;;  %v1421_v33 = vld [vmem:[#allocation6 + $0x8f0] sm:$0xff] }
 0x2e0   :  { %4789 = vmatpush1.bf16.msra.mxu1 %v9964_v34  ;;  %v10021_v34 = vcombine.high %v1346_v14, %v1350_v45  ;;  %v10090_v50 = vcombine.low %v1417_v49, %v1421_v33  ;;  %v1465_v45 = vld [vmem:[#allocation6 + $0xa50] sm:$0xff] }
 0x2e1   :  { %4790 = vmatprep.subr.bf16.mxu1 %v9973_v38  ;;  %v1358_v38 = vld [vmem:[#allocation6 + $0x6f8] sm:$0xff] }
 0x2e2   :  { %4643 = vmatpush1.bf16.msra.mxu0 %v10034_v8  ;;  %v10091_v8 = vcombine.high %v1417_v49, %v1421_v33  ;;  %v10028_v54 = vcombine.low %v1354_v37, %v1358_v38  ;;  %v1402_v33 = vld [vmem:[#allocation6 + $0x858] sm:$0xff] }
 0x2e3   :  { %4644 = vmatprep.subr.bf16.mxu0 %v10043_v47  ;;  %v1429_v47 = vld [vmem:[#allocation6 + $0x930] sm:$0xff] }
 0x2e4   :  { %4791 = vmatpush1.bf16.msra.mxu1 %v9972_v48  ;;  %v10029_v48 = vcombine.high %v1354_v37, %v1358_v38  ;;  %v10098_v60 = vcombine.low %v1425_v46, %v1429_v47  ;;  %v1473_v38 = vld [vmem:[#allocation6 + $0xa90] sm:$0xff] }
 0x2e5   :  { %4792 = vmatprep.subr.bf16.mxu1 %v9981_v52  ;;  %v1366_v52 = vld [vmem:[#allocation6 + $0x738] sm:$0xff] }
 0x2e6   :  { %4645 = vmatpush1.bf16.msra.mxu0 %v10042_v53  ;;  %v10099_v53 = vcombine.high %v1425_v46, %v1429_v47  ;;  %v10036_v63 = vcombine.low %v1362_v51, %v1366_v52  ;;  %v1410_v47 = vld [vmem:[#allocation6 + $0x898] sm:$0xff] }
 0x2e7   :  { %4646 = vmatprep.subr.bf16.mxu0 %v10051_v56  ;;  %v1437_v56 = vld [vmem:[#allocation6 + $0x970] sm:$0xff] }
 0x2e8   :  { %4793 = vmatpush1.bf16.msra.mxu1 %v9980_v58  ;;  %v10037_v58 = vcombine.high %v1362_v51, %v1366_v52  ;;  %v10106_v3 = vcombine.low %v1433_v55, %v1437_v56  ;;  %v1481_v52 = vld [vmem:[#allocation6 + $0xad0] sm:$0xff] }
 0x2e9   :  { %4794 = vmatprep.subr.bf16.mxu1 %v9989_v61  ;;  %v1374_v61 = vld [vmem:[#allocation6 + $0x778] sm:$0xff] }
 0x2ea   :  { %4647 = vmatpush1.bf16.msra.mxu0 %v10050_v62  ;;  %v10107_v62 = vcombine.high %v1433_v55, %v1437_v56  ;;  %v10044_v9 = vcombine.low %v1370_v10, %v1374_v61  ;;  %v1418_v56 = vld [vmem:[#allocation6 + $0x8d8] sm:$0xff] }
 0x2eb   :  { %4648 = vmatprep.subr.bf16.mxu0 %v10059_v0  ;;  %v1445_v0 = vld [vmem:[#allocation6 + $0x9b0] sm:$0xff] }
 0x2ec   :  { %4795 = vmatpush1.bf16.msra.mxu1 %v9988_v1  ;;  %v10045_v1 = vcombine.high %v1370_v10, %v1374_v61  ;;  %v10114_v17 = vcombine.low %v1441_v42, %v1445_v0  ;;  %v1489_v61 = vld [vmem:[#allocation6 + $0xb10] sm:$0xff] }
 0x2ed   :  { %4796 = vmatprep.subr.bf16.mxu1 %v9997_v5  ;;  %v1382_v5 = vld [vmem:[#allocation6 + $0x7b8] sm:$0xff] }
 0x2ee   :  { %4649 = vmatpush1.bf16.msra.mxu0 %v10058_v7  ;;  %v10115_v7 = vcombine.high %v1441_v42, %v1445_v0  ;;  %v10052_v24 = vcombine.low %v1378_v4, %v1382_v5  ;;  %v1430_v42 = vld [vmem:[#allocation6 + $0x938] sm:$0xff] }
 0x2ef   :  { %4659 = vmatprep.subr.bf16.mxu0 %v10067_v12  ;;  %v1453_v12 = vld [vmem:[#allocation6 + $0x9f0] sm:$0xff] }
 0x2f0   :  { %4797 = vmatpush1.bf16.msra.mxu1 %v9996_v13  ;;  %v10053_v13 = vcombine.high %v1378_v4, %v1382_v5  ;;  %v10122_v28 = vcombine.low %v1449_v11, %v1453_v12  ;;  %v1501_v4 = vld [vmem:[#allocation6 + $0xb70] sm:$0xff] }
 0x2f1   :  { %4651 = vmatmul.mubr.bf16.vlgmr.msra.gmra.mrb[4].mxu0 %v11720_v39  ;;  %4798 = vmatprep.subr.bf16.mxu1 %v10005_v21  ;;  %v1390_v21 = vld [vmem:[#allocation6 + $0x7f8] sm:$0xff] }
 0x2f2   :  { %4660 = vmatpush1.bf16.msra.mxu0 %v10066_v23  ;;  %4691 = vmatprep.mubr.bf16.mxu0 %v11736_v16  ;;  %v10123_v23 = vcombine.high %v1449_v11, %v1453_v12  ;;  %v10060_v14 = vcombine.low %v1386_v20, %v1390_v21  ;;  %v1438_v11 = vld [vmem:[#allocation6 + $0x978] sm:$0xff] }
 0x2f3   :  { %4661 = vmatprep.subr.bf16.mxu0 %v10075_v26  ;;  %v1461_v26 = vld [vmem:[#allocation6 + $0xa30] sm:$0xff] }
 0x2f4   :  { %4799 = vmatpush1.bf16.msra.mxu1 %v10004_v27  ;;  %v10061_v27 = vcombine.high %v1386_v20, %v1390_v21  ;;  %v10130_v49 = vcombine.low %v1457_v25, %v1461_v26  ;;  %v1509_v20 = vld [vmem:[#allocation6 + $0xbb0] sm:$0xff] }
 0x2f5   :  { %4800 = vmatprep.subr.bf16.mxu1 %v10013_v30  ;;  %v1398_v30 = vld [vmem:[#allocation6 + $0x838] sm:$0xff] }
 0x2f6   :  { %4662 = vmatpush1.bf16.msra.mxu0 %v10074_v32  ;;  %v10131_v32 = vcombine.high %v1457_v25, %v1461_v26  ;;  %v10068_v37 = vcombine.low %v1394_v29, %v1398_v30  ;;  %v1446_v25 = vld [vmem:[#allocation6 + $0x9b8] sm:$0xff] }
 0x2f7   :  { %4663 = vmatprep.subr.bf16.mxu0 %v10083_v18  ;;  %v1469_v18 = vld [vmem:[#allocation6 + $0xa70] sm:$0xff] }
 0x2f8   :  { %4801 = vmatpush1.bf16.msra.mxu1 %v10012_v35  ;;  %v10069_v35 = vcombine.high %v1394_v29, %v1398_v30  ;;  %v10138_v46 = vcombine.low %v1465_v45, %v1469_v18  ;;  %v1517_v29 = vld [vmem:[#allocation6 + $0xbf0] sm:$0xff] }
 0x2f9   :  { %4802 = vmatprep.subr.bf16.mxu1 %v10021_v34  ;;  %v1406_v34 = vld [vmem:[#allocation6 + $0x878] sm:$0xff] }
 0x2fa   :  { %4664 = vmatpush1.bf16.msra.mxu0 %v10082_v36  ;;  %v10139_v36 = vcombine.high %v1465_v45, %v1469_v18  ;;  %v10076_v51 = vcombine.low %v1402_v33, %v1406_v34  ;;  %v1454_v45 = vld [vmem:[#allocation6 + $0x9f8] sm:$0xff] }
 0x2fb   :  { %4665 = vmatprep.subr.bf16.mxu0 %v10091_v8  ;;  %v1477_v8 = vld [vmem:[#allocation6 + $0xab0] sm:$0xff] }
 0x2fc   :  { %4803 = vmatpush1.bf16.msra.mxu1 %v10020_v41  ;;  %v10077_v41 = vcombine.high %v1402_v33, %v1406_v34  ;;  %v10146_v55 = vcombine.low %v1473_v38, %v1477_v8  ;;  %v1525_v33 = vld [vmem:[#allocation6 + $0xc30] sm:$0xff] }
 0x2fd   :  { %4804 = vmatprep.subr.bf16.mxu1 %v10029_v48  ;;  %v1414_v48 = vld [vmem:[#allocation6 + $0x8b8] sm:$0xff] }
 0x2fe   :  { %4666 = vmatpush1.bf16.msra.mxu0 %v10090_v50  ;;  %v10147_v50 = vcombine.high %v1473_v38, %v1477_v8  ;;  %v10084_v10 = vcombine.low %v1410_v47, %v1414_v48  ;;  %v1462_v38 = vld [vmem:[#allocation6 + $0xa38] sm:$0xff] }
 0x2ff   :  { %4667 = vmatprep.subr.bf16.mxu0 %v10099_v53  ;;  %v1485_v53 = vld [vmem:[#allocation6 + $0xaf0] sm:$0xff] }
 0x300   :  { %4805 = vmatpush1.bf16.msra.mxu1 %v10028_v54  ;;  %v10085_v54 = vcombine.high %v1410_v47, %v1414_v48  ;;  %v1533_v47 = vld [vmem:[#allocation6 + $0xc70] sm:$0xff] }
 0x301   :  { %4806 = vmatprep.subr.bf16.mxu1 %v10037_v58  ;;  %v1422_v58 = vld [vmem:[#allocation6 + $0x8f8] sm:$0xff] }
 0x302   :  { %4668 = vmatpush1.bf16.msra.mxu0 %v10098_v60  ;;  %v10155_v60 = vcombine.high %v1481_v52, %v1485_v53 }
 0x303   :  { %4669 = vmatprep.subr.bf16.mxu0 %v10107_v62  ;;  %v10093_v62 = vcombine.high %v1418_v56, %v1422_v58 }
 0x304   :  { %4807 = vmatpush1.bf16.msra.mxu1 %v10036_v63  ;;  %v10154_v63 = vcombine.low %v1481_v52, %v1485_v53  ;;  %v1470_v52 = vld [vmem:[#allocation6 + $0xa78] sm:$0xff] }
 0x305   :  { %4808 = vmatprep.subr.bf16.mxu1 %v10045_v1  ;;  %v10092_v1 = vcombine.low %v1418_v56, %v1422_v58  ;;  %v1541_v56 = vld [vmem:[#allocation6 + $0xcb0] sm:$0xff] }
 0x306   :  { %4670 = vmatpush1.bf16.msra.mxu0 %v10106_v3  ;;  %v1497_v3 = vld [vmem:[#allocation6 + $0xb50] sm:$0xff] }
 0x307   :  { %4671 = vmatprep.subr.bf16.mxu0 %v10115_v7  ;;  %v10171_v12 = vcombine.high %v1497_v3, %v1501_v4 }
 0x308   :  { %4809 = vmatpush1.bf16.msra.mxu1 %v10044_v9  ;;  %v1434_v9 = vld [vmem:[#allocation6 + $0x958] sm:$0xff] }
 0x309   :  { %4810 = vmatprep.subr.bf16.mxu1 %v10053_v13  ;;  %v10109_v21 = vcombine.high %v1434_v9, %v1438_v11 }
 0x30a   :  { %4672 = vmatpush1.bf16.msra.mxu0 %v10114_v17  ;;  %v1505_v17 = vld [vmem:[#allocation6 + $0xb90] sm:$0xff] }
 0x30b   :  { %4673 = vmatprep.subr.bf16.mxu0 %v10123_v23  ;;  %v10170_v23 = vcombine.low %v1497_v3, %v1501_v4  ;;  %v10179_v26 = vcombine.high %v1505_v17, %v1509_v20  ;;  %v1486_v3 = vld [vmem:[#allocation6 + $0xaf8] sm:$0xff] }
 0x30c   :  { %4811 = vmatpush1.bf16.msra.mxu1 %v10052_v24  ;;  %v1442_v24 = vld [vmem:[#allocation6 + $0x998] sm:$0xff] }
 0x30d   :  { %4812 = vmatprep.subr.bf16.mxu1 %v10061_v27  ;;  %v10108_v27 = vcombine.low %v1434_v9, %v1438_v11  ;;  %v10117_v30 = vcombine.high %v1442_v24, %v1446_v25  ;;  %v1557_v9 = vld [vmem:[#allocation6 + $0xd30] sm:$0xff] }
 0x30e   :  { %4674 = vmatpush1.bf16.msra.mxu0 %v10122_v28  ;;  %v1513_v28 = vld [vmem:[#allocation6 + $0xbd0] sm:$0xff] }
 0x30f   :  { %4675 = vmatprep.subr.bf16.mxu0 %v10131_v32  ;;  %v10178_v32 = vcombine.low %v1505_v17, %v1509_v20  ;;  %v10187_v18 = vcombine.high %v1513_v28, %v1517_v29  ;;  %v1494_v17 = vld [vmem:[#allocation6 + $0xb38] sm:$0xff] }
 0x310   :  { %4813 = vmatpush1.bf16.msra.mxu1 %v10060_v14  ;;  %v1450_v14 = vld [vmem:[#allocation6 + $0x9d8] sm:$0xff] }
 0x311   :  { %4823 = vmatprep.subr.bf16.mxu1 %v10069_v35  ;;  %v10116_v35 = vcombine.low %v1442_v24, %v1446_v25  ;;  %v10125_v34 = vcombine.high %v1450_v14, %v1454_v45  ;;  %v1565_v24 = vld [vmem:[#allocation6 + $0xd70] sm:$0xff] }
 0x312   :  { %4676 = vmatpush1.bf16.msra.mxu0 %v10130_v49  ;;  %v1521_v49 = vld [vmem:[#allocation6 + $0xc10] sm:$0xff] }
 0x313   :  { %4815 = vmatmul.mubr.bf16.vlgmr.msra.gmra.mrb[20].mxu1 %v11720_v39  ;;  %4677 = vmatprep.subr.bf16.mxu0 %v10139_v36  ;;  %v1493_v39 = vld [vmem:[#allocation6 + $0xb30] sm:$0xff]  ;;  %v10186_v36 = vcombine.low %v1513_v28, %v1517_v29  ;;  %v10195_v8 = vcombine.high %v1521_v49, %v1525_v33  ;;  %v1502_v28 = vld [vmem:[#allocation6 + $0xb78] sm:$0xff] }
 0x314   :  { %4824 = vmatpush1.bf16.msra.mxu1 %v10068_v37  ;;  %4855 = vmatprep.mubr.bf16.mxu1 %v11736_v16  ;;  %v1426_v16 = vld [vmem:[#allocation6 + $0x918] sm:$0xff]  ;;  %v10163_v0 = vcombine.high %v1489_v61, %v1493_v39  ;;  %v10162_v7 = vcombine.low %v1489_v61, %v1493_v39 }
 0x315   :  { %4825 = vmatprep.subr.bf16.mxu1 %v10077_v41  ;;  %v10101_v5 = vcombine.high %v1426_v16, %v1430_v42  ;;  %v10100_v13 = vcombine.low %v1426_v16, %v1430_v42  ;;  %v1458_v37 = vld [vmem:[#allocation6 + $0xa18] sm:$0xff]  ;;  %v10124_v41 = vcombine.low %v1450_v14, %v1454_v45  ;;  %v1549_v16 = vld [vmem:[#allocation6 + $0xcf0] sm:$0xff] }
 0x316   :  { %4678 = vmatpush1.bf16.msra.mxu0 %v10138_v46  ;;  %v1529_v46 = vld [vmem:[#allocation6 + $0xc50] sm:$0xff]  ;;  %v10133_v48 = vcombine.high %v1458_v37, %v1462_v38  ;;  %v1478_v61 = vld [vmem:[#allocation6 + $0xab8] sm:$0xff] }
 0x317   :  { %4679 = vmatprep.subr.bf16.mxu0 %v10147_v50  ;;  %v10194_v50 = vcombine.low %v1521_v49, %v1525_v33  ;;  %v10203_v53 = vcombine.high %v1529_v46, %v1533_v47  ;;  %v1573_v14 = vld [vmem:[#allocation6 + $0xdb0] sm:$0xff]  ;;  %v1510_v49 = vld [vmem:[#allocation6 + $0xbb8] sm:$0xff] }
 0x318   :  { %4826 = vmatpush1.bf16.msra.mxu1 %v10076_v51  ;;  %v1466_v51 = vld [vmem:[#allocation6 + $0xa58] sm:$0xff] }
 0x319   :  { %4827 = vmatprep.subr.bf16.mxu1 %v10085_v54  ;;  %v10132_v54 = vcombine.low %v1458_v37, %v1462_v38  ;;  %v10141_v58 = vcombine.high %v1466_v51, %v1470_v52  ;;  %v1577_v37 = vld [vmem:[#allocation6 + $0xdd0] sm:$0xff] }
 0x31a   :  { %4680 = vmatpush1.bf16.msra.mxu0 %v10146_v55  ;;  %v1537_v55 = vld [vmem:[#allocation6 + $0xc90] sm:$0xff] }
 0x31b   :  { %4681 = vmatprep.subr.bf16.mxu0 %v10155_v60  ;;  %v10202_v60 = vcombine.low %v1529_v46, %v1533_v47  ;;  %v10211_v39 = vcombine.high %v1537_v55, %v1541_v56  ;;  %v1581_v38 = vld [vmem:[#allocation6 + $0xdf0] sm:$0xff] }
 0x31c   :  { %4828 = vmatpush1.bf16.msra.mxu1 %v10084_v10  ;;  %v1474_v10 = vld [vmem:[#allocation6 + $0xa98] sm:$0xff] }
 0x31d   :  { %4829 = vmatprep.subr.bf16.mxu1 %v10093_v62  ;;  %v10140_v62 = vcombine.low %v1466_v51, %v1470_v52  ;;  %v10149_v42 = vcombine.high %v1474_v10, %v1478_v61  ;;  %v10251_v52 = vcombine.high %v1577_v37, %v1581_v38 }
 0x31e   :  { %4682 = vmatpush1.bf16.msra.mxu0 %v10154_v63  ;;  %v1545_v63 = vld [vmem:[#allocation6 + $0xcd0] sm:$0xff] }
 0x31f   :  { %4683 = vmatprep.subr.bf16.mxu0 %v10163_v0  ;;  %v10210_v0 = vcombine.low %v1537_v55, %v1541_v56  ;;  %v10219_v4 = vcombine.high %v1545_v63, %v1549_v16  ;;  %v1589_v55 = vld [vmem:[#allocation6 + $0xe30] sm:$0xff] }
 0x320   :  { %4830 = vmatpush1.bf16.msra.mxu1 %v10092_v1  ;;  %v1482_v1 = vld [vmem:[#allocation6 + $0xad8] sm:$0xff] }
 0x321   :  { %4831 = vmatprep.subr.bf16.mxu1 %v10101_v5  ;;  %v10148_v5 = vcombine.low %v1474_v10, %v1478_v61  ;;  %v10157_v11 = vcombine.high %v1482_v1, %v1486_v3  ;;  %v1526_v10 = vld [vmem:[#allocation6 + $0xc38] sm:$0xff] }
 0x322   :  { %4684 = vmatpush1.bf16.msra.mxu0 %v10162_v7  ;;  %v1553_v7 = vld [vmem:[#allocation6 + $0xd10] sm:$0xff] }
 0x323   :  { %4685 = vmatprep.subr.bf16.mxu0 %v10171_v12  ;;  %v10218_v12 = vcombine.low %v1545_v63, %v1549_v16  ;;  %v10227_v20 = vcombine.high %v1553_v7, %v1557_v9  ;;  %v1597_v63 = vld [vmem:[#allocation6 + $0xe70] sm:$0xff] }
 0x324   :  { %4832 = vmatpush1.bf16.msra.mxu1 %v10100_v13  ;;  %v1490_v13 = vld [vmem:[#allocation6 + $0xb18] sm:$0xff] }
 0x325   :  { %4833 = vmatprep.subr.bf16.mxu1 %v10109_v21  ;;  %v10156_v21 = vcombine.low %v1482_v1, %v1486_v3  ;;  %v10165_v25 = vcombine.high %v1490_v13, %v1494_v17  ;;  %v1534_v1 = vld [vmem:[#allocation6 + $0xc78] sm:$0xff] }
 0x326   :  { %4686 = vmatpush1.bf16.msra.mxu0 %v10170_v23  ;;  %v1561_v23 = vld [vmem:[#allocation6 + $0xd50] sm:$0xff] }
 0x327   :  { %4687 = vmatprep.subr.bf16.mxu0 %v10179_v26  ;;  %v10226_v26 = vcombine.low %v1553_v7, %v1557_v9  ;;  %v10235_v29 = vcombine.high %v1561_v23, %v1565_v24  ;;  %v1605_v7 = vld [vmem:[#allocation6 + $0xeb0] sm:$0xff] }
 0x328   :  { %4834 = vmatpush1.bf16.msra.mxu1 %v10108_v27  ;;  %v1498_v27 = vld [vmem:[#allocation6 + $0xb58] sm:$0xff] }
 0x329   :  { %4835 = vmatprep.subr.bf16.mxu1 %v10117_v30  ;;  %v10164_v30 = vcombine.low %v1490_v13, %v1494_v17  ;;  %v10173_v45 = vcombine.high %v1498_v27, %v1502_v28  ;;  %v1542_v13 = vld [vmem:[#allocation6 + $0xcb8] sm:$0xff] }
 0x32a   :  { %4688 = vmatpush1.bf16.msra.mxu0 %v10178_v32  ;;  %v1569_v32 = vld [vmem:[#allocation6 + $0xd90] sm:$0xff] }
 0x32b   :  { %4689 = vmatprep.subr.bf16.mxu0 %v10187_v18  ;;  %v10234_v18 = vcombine.low %v1561_v23, %v1565_v24  ;;  %v10243_v33 = vcombine.high %v1569_v32, %v1573_v14  ;;  %v10242_v47 = vcombine.low %v1569_v32, %v1573_v14  ;;  %v1613_v23 = vld [vmem:[#allocation6 + $0xef0] sm:$0xff] }
 0x32c   :  { %4836 = vmatpush1.bf16.msra.mxu1 %v10116_v35  ;;  %v1506_v35 = vld [vmem:[#allocation6 + $0xb98] sm:$0xff] }
 0x32d   :  { %4837 = vmatprep.subr.bf16.mxu1 %v10125_v34 }
 0x32e   :  { %4690 = vmatpush1.bf16.msra.mxu0 %v10186_v36  ;;  %v10172_v36 = vcombine.low %v1498_v27, %v1502_v28  ;;  %v1550_v27 = vld [vmem:[#allocation6 + $0xcf8] sm:$0xff] }
 0x32f   :  { %4700 = vmatprep.subr.bf16.mxu0 %v10195_v8 }
 0x330   :  { %4838 = vmatpush1.bf16.msra.mxu1 %v10124_v41  ;;  %v10181_v41 = vcombine.high %v1506_v35, %v1510_v49 }
 0x331   :  { %4692 = vmatmul.mubr.bf16.vlgmr.msra.gmra.mrb[4].mxu0 %v11738_v22  ;;  %4839 = vmatprep.subr.bf16.mxu1 %v10133_v48  ;;  %v1514_v48 = vld [vmem:[#allocation6 + $0xbd8] sm:$0xff] }
 0x332   :  { %4701 = vmatpush1.bf16.msra.mxu0 %v10194_v50  ;;  %4732 = vmatprep.mubr.bf16.mxu0 %v11752_v2  ;;  %v1518_v50 = vld [vmem:[#allocation6 + $0xbf8] sm:$0xff] }
 0x333   :  { %4702 = vmatprep.subr.bf16.mxu0 %v10203_v53  ;;  %v10180_v53 = vcombine.low %v1506_v35, %v1510_v49  ;;  %v10189_v56 = vcombine.high %v1514_v48, %v1518_v50  ;;  %v1625_v49 = vld [vmem:[#allocation6 + $0xf50] sm:$0xff] }
 0x334   :  { %4840 = vmatpush1.bf16.msra.mxu1 %v10132_v54  ;;  %v1585_v54 = vld [vmem:[#allocation6 + $0xe10] sm:$0xff] }
 0x335   :  { %4841 = vmatprep.subr.bf16.mxu1 %v10141_v58  ;;  %v10250_v58 = vcombine.low %v1577_v37, %v1581_v38  ;;  %v10259_v61 = vcombine.high %v1585_v54, %v1589_v55 }
 0x336   :  { %4703 = vmatpush1.bf16.msra.mxu0 %v10202_v60  ;;  %v1522_v60 = vld [vmem:[#allocation6 + $0xc18] sm:$0xff] }
 0x337   :  { %4704 = vmatprep.subr.bf16.mxu0 %v10211_v39  ;;  %v10188_v39 = vcombine.low %v1514_v48, %v1518_v50  ;;  %v10197_v16 = vcombine.high %v1522_v60, %v1526_v10 }
 0x338   :  { %4842 = vmatpush1.bf16.msra.mxu1 %v10140_v62  ;;  %v1593_v62 = vld [vmem:[#allocation6 + $0xe50] sm:$0xff] }
 0x339   :  { %4843 = vmatprep.subr.bf16.mxu1 %v10149_v42  ;;  %v10258_v42 = vcombine.low %v1585_v54, %v1589_v55  ;;  %v10267_v3 = vcombine.high %v1593_v62, %v1597_v63  ;;  %v1570_v55 = vld [vmem:[#allocation6 + $0xd98] sm:$0xff] }
 0x33a   :  { %4705 = vmatpush1.bf16.msra.mxu0 %v10210_v0  ;;  %v1530_v0 = vld [vmem:[#allocation6 + $0xc58] sm:$0xff] }
 0x33b   :  { %4706 = vmatprep.subr.bf16.mxu0 %v10219_v4  ;;  %v10196_v4 = vcombine.low %v1522_v60, %v1526_v10  ;;  %v10205_v9 = vcombine.high %v1530_v0, %v1534_v1 }
 0x33c   :  { %4844 = vmatpush1.bf16.msra.mxu1 %v10148_v5  ;;  %v1601_v5 = vld [vmem:[#allocation6 + $0xe90] sm:$0xff] }
 0x33d   :  { %4845 = vmatprep.subr.bf16.mxu1 %v10157_v11  ;;  %v10266_v11 = vcombine.low %v1593_v62, %v1597_v63  ;;  %v10275_v17 = vcombine.high %v1601_v5, %v1605_v7 }
 0x33e   :  { %4707 = vmatpush1.bf16.msra.mxu0 %v10218_v12  ;;  %v1538_v12 = vld [vmem:[#allocation6 + $0xc98] sm:$0xff] }
 0x33f   :  { %4708 = vmatprep.subr.bf16.mxu0 %v10227_v20  ;;  %v10204_v20 = vcombine.low %v1530_v0, %v1534_v1  ;;  %v10213_v24 = vcombine.high %v1538_v12, %v1542_v13  ;;  %v1582_v0 = vld [vmem:[#allocation6 + $0xdf8] sm:$0xff] }
 0x340   :  { %4846 = vmatpush1.bf16.msra.mxu1 %v10156_v21  ;;  %v1609_v21 = vld [vmem:[#allocation6 + $0xed0] sm:$0xff] }
 0x341   :  { %4847 = vmatprep.subr.bf16.mxu1 %v10165_v25  ;;  %v10274_v25 = vcombine.low %v1601_v5, %v1605_v7  ;;  %v10283_v28 = vcombine.high %v1609_v21, %v1613_v23  ;;  %v10282_v14 = vcombine.low %v1609_v21, %v1613_v23  ;;  %v4929_v7 = vld [vmem:[#allocation9] sm:$0xff] }
 0x342   :  { %4709 = vmatpush1.bf16.msra.mxu0 %v10226_v26  ;;  %v1546_v26 = vld [vmem:[#allocation6 + $0xcd8] sm:$0xff] }
 0x343   :  { %4710 = vmatprep.subr.bf16.mxu0 %v10235_v29  ;;  %v10212_v29 = vcombine.low %v1538_v12, %v1542_v13  ;;  %v10221_v32 = vcombine.high %v1546_v26, %v1550_v27  ;;  %v10220_v35 = vcombine.low %v1546_v26, %v1550_v27  ;;  %v4941_v26 = vld [vmem:[#allocation9 + $0x60] sm:$0xff] }
 0x344   :  { %v11772_v34 = vpop.f32.mrb[0].mxu0  ;;  %4848 = vmatpush1.bf16.msra.mxu1 %v10164_v30  ;;  %v1617_v30 = vld [vmem:[#allocation6 + $0xf10] sm:$0xff] }
 0x345   :  { %v11774_v8 = vpop.f32.mrb[1].mxu0  ;;  %4849 = vmatprep.subr.bf16.mxu1 %v10173_v45  ;;  %v1558_v45 = vld [vmem:[#allocation6 + $0xd38] sm:$0xff] }
 0x346   :  { %4711 = vmatpush1.bf16.msra.mxu0 %v10234_v18  ;;  %v4410_v46 = vpop.f32.mrb[2].mxu0 }
 0x347   :  { %v4411_v51 = vpop.f32.mrb[3].mxu0  ;;  %4712 = vmatprep.subr.bf16.mxu0 %v10243_v33  ;;  %v1629_v33 = vld [vmem:[#allocation6 + $0xf70] sm:$0xff]  ;;  %v1566_v46 = vld [vmem:[#allocation6 + $0xd78] sm:$0xff] }
 0x348   :  { %4850 = vmatpush1.bf16.msra.mxu1 %v10172_v36  ;;  %v11778_v36 = vld [vmem:[#allocation7] sm:$0xff]  ;;  %v1633_v51 = vld [vmem:[#allocation6 + $0xf90] sm:$0xff]  ;;  %v10298_v54 = vcombine.low %v1625_v49, %v1629_v33 }
 0x349   :  { %4851 = vmatprep.subr.bf16.mxu1 %v10181_v41  ;;  %v1562_v41 = vld [vmem:[#allocation6 + $0xd58] sm:$0xff]  ;;  %v1656_v48 = vrot.slane %v11778_v36, %v11691_v43 }
 0x34a   :  { %4713 = vmatpush1.bf16.msra.mxu0 %v10242_v47  ;;  %v10299_v47 = vcombine.high %v1625_v49, %v1629_v33  ;;  %v10236_v10 = vcombine.low %v1562_v41, %v1566_v46  ;;  %v1602_v49 = vld [vmem:[#allocation6 + $0xe98] sm:$0xff] }
 0x34b   :  { %4714 = vmatprep.subr.bf16.mxu0 %v10251_v52  ;;  %v1637_v52 = vld [vmem:[#allocation6 + $0xfb0] sm:$0xff]  ;;  %v10959_v60 = vadd.f32 %v11774_v8, %v1656_v48  ;;  %v1606_v33 = vld [vmem:[#allocation6 + $0xeb8] sm:$0xff] }
 0x34c   :  { %4852 = vmatpush1.bf16.msra.mxu1 %v10180_v53  ;;  %v10237_v53 = vcombine.high %v1562_v41, %v1566_v46  ;;  %v4953_v41 = vld [vmem:[#allocation9 + $0xc0] sm:$0xff] }
 0x34d   :  { %4853 = vmatprep.subr.bf16.mxu1 %v10189_v56  ;;  %v1574_v56 = vld [vmem:[#allocation6 + $0xdb8] sm:$0xff]  ;;  %v4957_v46 = vld [vmem:[#allocation9 + $0xe0] sm:$0xff] }
 0x34e   :  { %4715 = vmatpush1.bf16.msra.mxu0 %v10250_v58  ;;  %v10307_v58 = vcombine.high %v1633_v51, %v1637_v52  ;;  %v10245_v62 = vcombine.high %v1570_v55, %v1574_v56  ;;  %v10244_v8 = vcombine.low %v1570_v55, %v1574_v56  ;;  %v4965_v55 = vld [vmem:[#allocation9 + $0x120] sm:$0xff] }
 0x34f   :  { %4716 = vmatprep.subr.bf16.mxu0 %v10259_v61  ;;  %v1641_v61 = vld [vmem:[#allocation6 + $0xfd0] sm:$0xff] }
 0x350   :  { %4854 = vmatpush1.bf16.msra.mxu1 %v10188_v39  ;;  %v1645_v39 = vld [vmem:[#allocation6 + $0xff0] sm:$0xff] }
 0x351   :  { %4864 = vmatprep.subr.bf16.mxu1 %v10197_v16  ;;  %v10306_v16 = vcombine.low %v1633_v51, %v1637_v52  ;;  %v10314_v13 = vcombine.low %v1641_v61, %v1645_v39  ;;  %v1614_v51 = vld [vmem:[#allocation6 + $0xef8] sm:$0xff]  ;;  %v10343_v52 = vcombine.high %v4953_v41, %v4957_v46 }
 0x352   :  { %4717 = vmatpush1.bf16.msra.mxu0 %v10258_v42  ;;  %v1578_v42 = vld [vmem:[#allocation6 + $0xdd8] sm:$0xff] }
 0x353   :  { %4856 = vmatmul.mubr.bf16.vlgmr.msra.gmra.mrb[20].mxu1 %v11738_v22  ;;  %4718 = vmatprep.subr.bf16.mxu0 %v10267_v3  ;;  %v1621_v22 = vld [vmem:[#allocation6 + $0xf30] sm:$0xff]  ;;  %v10315_v3 = vcombine.high %v1641_v61, %v1645_v39  ;;  %v10253_v12 = vcombine.high %v1578_v42, %v1582_v0 }
 0x354   :  { %4865 = vmatpush1.bf16.msra.mxu1 %v10196_v4  ;;  %4896 = vmatprep.mubr.bf16.mxu1 %v11752_v2  ;;  %v1554_v2 = vld [vmem:[#allocation6 + $0xd18] sm:$0xff]  ;;  %v10291_v18 = vcombine.high %v1617_v30, %v1621_v22  ;;  %v10290_v38 = vcombine.low %v1617_v30, %v1621_v22  ;;  %v4906_v4 = vmul.f32 0.01, %v10959_v60 }
 0x355   :  { %4866 = vmatprep.subr.bf16.mxu1 %v10205_v9  ;;  %v10229_v37 = vcombine.high %v1554_v2, %v1558_v45  ;;  %v10228_v50 = vcombine.low %v1554_v2, %v1558_v45  ;;  %v4933_v9 = vld [vmem:[#allocation9 + $0x20] sm:$0xff]  ;;  %v1598_v30 = vld [vmem:[#allocation6 + $0xe78] sm:$0xff] }
 0x356   :  { %4719 = vmatpush1.bf16.msra.mxu0 %v10266_v11  ;;  %v10319_v21 = vcombine.high %v4929_v7, %v4933_v9  ;;  %v4914_v23 = vmax.f32 %v10959_v60, %v4906_v4  ;;  %v4945_v2 = vld [vmem:[#allocation9 + $0x80] sm:$0xff]  ;;  %v1618_v60 = vld [vmem:[#allocation6 + $0xf18] sm:$0xff] }
 0x357   :  { %4720 = vmatprep.subr.bf16.mxu0 %v10275_v17  ;;  %v1586_v17 = vld [vmem:[#allocation6 + $0xe18] sm:$0xff]  ;;  %v4949_v45 = vld [vmem:[#allocation9 + $0xa0] sm:$0xff] }
 0x358   :  { %4867 = vmatpush1.bf16.msra.mxu1 %v10204_v20  ;;  %v1590_v20 = vld [vmem:[#allocation6 + $0xe38] sm:$0xff]  ;;  %v10334_v48 = vcombine.low %v4945_v2, %v4949_v45 }
 0x359   :  { %4868 = vmatprep.subr.bf16.mxu1 %v10213_v24  ;;  %v10252_v24 = vcombine.low %v1578_v42, %v1582_v0  ;;  %v10261_v27 = vcombine.high %v1586_v17, %v1590_v20  ;;  %v1630_v4 = vld [vmem:[#allocation6 + $0xf78] sm:$0xff] }
 0x35a   :  { %4721 = vmatpush1.bf16.msra.mxu0 %v10274_v25  ;;  %v4937_v25 = vld [vmem:[#allocation9 + $0x40] sm:$0xff] }
 0x35b   :  { %4722 = vmatprep.subr.bf16.mxu0 %v10283_v28  ;;  %v10318_v28 = vcombine.low %v4929_v7, %v4933_v9  ;;  %v10327_v22 = vcombine.high %v4937_v25, %v4941_v26  ;;  %v4977_v7 = vld [vmem:[#allocation9 + $0x180] sm:$0xff] }
 0x35c   :  { %4869 = vmatpush1.bf16.msra.mxu1 %v10212_v29  ;;  %v1594_v29 = vld [vmem:[#allocation6 + $0xe58] sm:$0xff]  ;;  %v4981_v9 = vld [vmem:[#allocation9 + $0x1a0] sm:$0xff] }
 0x35d   :  { %4870 = vmatprep.subr.bf16.mxu1 %v10221_v32  ;;  %v11787_v32 = vpack.c.bf16 %v4914_v23, %v4914_v23  ;;  %v4985_v23 = vld [vmem:[#allocation9 + $0x1c0] sm:$0xff] }
 0x35e   :  { %4723 = vmatpush1.bf16.msra.mxu0 %v10282_v14  ;;  %v10260_v14 = vcombine.low %v1586_v17, %v1590_v20  ;;  %v1638_v17 = vld [vmem:[#allocation6 + $0xfb8] sm:$0xff]  ;;  %v10367_v20 = vcombine.high %v4977_v7, %v4981_v9 }
 0x35f   :  { %4724 = vmatprep.subr.bf16.mxu0 %v10291_v18  ;;  %v10269_v18 = vcombine.high %v1594_v29, %v1598_v30 }
 0x360   :  { %4871 = vmatpush1.bf16.msra.mxu1 %v10220_v35  ;;  %v10326_v35 = vcombine.low %v4937_v25, %v4941_v26  ;;  %v10366_v26 = vcombine.low %v4977_v7, %v4981_v9  ;;  %v4962_v9 = vld [vmem:[#allocation9 + $0x108] sm:$0xff] }
 0x361   :  { %4872 = vmatprep.subr.bf16.mxu1 %v10229_v37  ;;  %v10335_v37 = vcombine.high %v4945_v2, %v4949_v45 }
 0x362   :  { %4725 = vmatpush1.bf16.msra.mxu0 %v10290_v38  ;;  %v10268_v38 = vcombine.low %v1594_v29, %v1598_v30 }
 0x363   :  { %4726 = vmatprep.subr.bf16.mxu0 %v10299_v47  ;;  %v10277_v47 = vcombine.high %v1602_v49, %v1606_v33 }
 0x364   :  { %4873 = vmatpush1.bf16.msra.mxu1 %v10228_v50  ;;  %v1610_v50 = vld [vmem:[#allocation6 + $0xed8] sm:$0xff] }
 0x365   :  { %4874 = vmatprep.subr.bf16.mxu1 %v10237_v53  ;;  %v10276_v53 = vcombine.low %v1602_v49, %v1606_v33  ;;  %v10285_v56 = vcombine.high %v1610_v50, %v1614_v51  ;;  %v10284_v39 = vcombine.low %v1610_v50, %v1614_v51 }
 0x366   :  { %4727 = vmatpush1.bf16.msra.mxu0 %v10298_v54  ;;  %v11783_v63 = vpop.f32.mrb[16].mxu1  ;;  %v4961_v54 = vld [vmem:[#allocation9 + $0x100] sm:$0xff] }
 0x367   :  { %v11785_v1 = vpop.f32.mrb[17].mxu1  ;;  %4728 = vmatprep.subr.bf16.mxu0 %v10307_v58  ;;  %v10342_v58 = vcombine.low %v4953_v41, %v4957_v46  ;;  %v10351_v61 = vcombine.high %v4961_v54, %v4965_v55  ;;  %v10350_v0 = vcombine.low %v4961_v54, %v4965_v55 }
 0x368   :  { %v4574_v5 = vpop.f32.mrb[18].mxu1  ;;  %4875 = vmatpush1.bf16.msra.mxu1 %v10236_v10  ;;  %v1622_v10 = vld [vmem:[#allocation6 + $0xf38] sm:$0xff] }
 0x369   :  { %v4575_v11 = vpop.f32.mrb[19].mxu1  ;;  %4876 = vmatprep.subr.bf16.mxu1 %v10245_v62  ;;  %v4969_v62 = vld [vmem:[#allocation9 + $0x140] sm:$0xff]  ;;  %v10293_v42 = vcombine.high %v1618_v60, %v1622_v10 }
 0x36a   :  { %4729 = vmatpush1.bf16.msra.mxu0 %v10306_v16  ;;  %v4973_v16 = vld [vmem:[#allocation9 + $0x160] sm:$0xff] }
 0x36b   :  { %4730 = vmatprep.subr.bf16.mxu0 %v10315_v3  ;;  %v1626_v3 = vld [vmem:[#allocation6 + $0xf58] sm:$0xff]  ;;  %v10359_v5 = vcombine.high %v4969_v62, %v4973_v16 }
 0x36c   :  { %4877 = vmatpush1.bf16.msra.mxu1 %v10244_v8  ;;  %v10292_v8 = vcombine.low %v1618_v60, %v1622_v10  ;;  %v10301_v11 = vcombine.high %v1626_v3, %v1630_v4 }
 0x36d   :  { %4878 = vmatprep.subr.bf16.mxu1 %v10253_v12  ;;  %v10358_v12 = vcombine.low %v4969_v62, %v4973_v16 }
 0x36e   :  { %4731 = vmatpush1.bf16.msra.mxu0 %v10314_v13  ;;  %v1634_v13 = vld [vmem:[#allocation6 + $0xf98] sm:$0xff] }
 0x36f   :  { %8043 = vmatprep.subr.bf16.mxu0 %v10319_v21  ;;  %v10300_v21 = vcombine.low %v1626_v3, %v1630_v4  ;;  %v10309_v25 = vcombine.high %v1634_v13, %v1638_v17  ;;  %v10308_v30 = vcombine.low %v1634_v13, %v1638_v17  ;;  %v5033_v17 = vld [vmem:[#allocation9 + $0x340] sm:$0xff] }
 0x370   :  { %4879 = vmatpush1.bf16.msra.mxu1 %v10252_v24  ;;  %v4989_v24 = vld [vmem:[#allocation9 + $0x1e0] sm:$0xff] }
 0x371   :  { %4733 = vmatmul.mubr.bf16.vlgmr.msra.gmra.mrb[4].mxu0 %v11754_v6  ;;  %4880 = vmatprep.subr.bf16.mxu1 %v10261_v27  ;;  %v1642_v27 = vld [vmem:[#allocation6 + $0xfd8] sm:$0xff]  ;;  %v10375_v29 = vcombine.high %v4985_v23, %v4989_v24  ;;  %v10374_v45 = vcombine.low %v4985_v23, %v4989_v24  ;;  %v4970_v24 = vld [vmem:[#allocation9 + $0x148] sm:$0xff] }
 0x372   :  { %8044 = vmatpush1.bf16.msra.mxu0 %v10318_v28  ;;  %8075 = vmatprep.mubr.bf16.mxu0 %v11787_v32  ;;  %v1646_v28 = vld [vmem:[#allocation6 + $0xff8] sm:$0xff] }
 0x373   :  { %8045 = vmatprep.subr.bf16.mxu0 %v10327_v22  ;;  %v4993_v22 = vld [vmem:[#allocation9 + $0x200] sm:$0xff]  ;;  %v10317_v2 = vcombine.high %v1642_v27, %v1646_v28  ;;  %v10316_v33 = vcombine.low %v1642_v27, %v1646_v28  ;;  %v1664_v28 = vrot.slane %v11778_v36, %v11712_v59 }
 0x374   :  { %4881 = vmatpush1.bf16.msra.mxu1 %v10260_v14  ;;  %v4997_v14 = vld [vmem:[#allocation9 + $0x220] sm:$0xff] }
 0x375   :  { %4882 = vmatprep.subr.bf16.mxu1 %v10269_v18  ;;  %v4930_v18 = vld [vmem:[#allocation9 + $0x8] sm:$0xff]  ;;  %v10383_v49 = vcombine.high %v4993_v22, %v4997_v14  ;;  %v10382_v46 = vcombine.low %v4993_v22, %v4997_v14  ;;  %v5045_v22 = vld [vmem:[#allocation9 + $0x3a0] sm:$0xff] }
 0x376   :  { %8046 = vmatpush1.bf16.msra.mxu0 %v10326_v35  ;;  %v4934_v35 = vld [vmem:[#allocation9 + $0x28] sm:$0xff] }
 0x377   :  { %8047 = vmatprep.subr.bf16.mxu0 %v10335_v37  ;;  %v5001_v37 = vld [vmem:[#allocation9 + $0x240] sm:$0xff]  ;;  %v10321_v41 = vcombine.high %v4930_v18, %v4934_v35  ;;  %v10320_v51 = vcombine.low %v4930_v18, %v4934_v35  ;;  %v4982_v18 = vld [vmem:[#allocation9 + $0x1a8] sm:$0xff] }
 0x378   :  { %4883 = vmatpush1.bf16.msra.mxu1 %v10268_v38  ;;  %v5005_v38 = vld [vmem:[#allocation9 + $0x260] sm:$0xff] }
 0x379   :  { %4884 = vmatprep.subr.bf16.mxu1 %v10277_v47  ;;  %v4938_v47 = vld [vmem:[#allocation9 + $0x48] sm:$0xff]  ;;  %v10391_v50 = vcombine.high %v5001_v37, %v5005_v38  ;;  %v10390_v55 = vcombine.low %v5001_v37, %v5005_v38  ;;  %v5049_v38 = vld [vmem:[#allocation9 + $0x3c0] sm:$0xff] }
 0x37a   :  { %8048 = vmatpush1.bf16.msra.mxu0 %v10334_v48  ;;  %v4942_v48 = vld [vmem:[#allocation9 + $0x68] sm:$0xff] }
 0x37b   :  { %8049 = vmatprep.subr.bf16.mxu0 %v10343_v52  ;;  %v5009_v52 = vld [vmem:[#allocation9 + $0x280] sm:$0xff]  ;;  %v10329_v54 = vcombine.high %v4938_v47, %v4942_v48  ;;  %v10328_v10 = vcombine.low %v4938_v47, %v4942_v48  ;;  %v4986_v48 = vld [vmem:[#allocation9 + $0x1c8] sm:$0xff] }
 0x37c   :  { %4885 = vmatpush1.bf16.msra.mxu1 %v10276_v53  ;;  %v5013_v53 = vld [vmem:[#allocation9 + $0x2a0] sm:$0xff] }
 0x37d   :  { %4886 = vmatprep.subr.bf16.mxu1 %v10285_v56  ;;  %v4946_v56 = vld [vmem:[#allocation9 + $0x88] sm:$0xff]  ;;  %v10399_v60 = vcombine.high %v5009_v52, %v5013_v53  ;;  %v10398_v16 = vcombine.low %v5009_v52, %v5013_v53 }
 0x37e   :  { %8050 = vmatpush1.bf16.msra.mxu0 %v10342_v58  ;;  %v4950_v58 = vld [vmem:[#allocation9 + $0xa8] sm:$0xff] }
 0x37f   :  { %8051 = vmatprep.subr.bf16.mxu0 %v10351_v61  ;;  %v5017_v61 = vld [vmem:[#allocation9 + $0x2c0] sm:$0xff]  ;;  %v10337_v62 = vcombine.high %v4946_v56, %v4950_v58  ;;  %v10336_v4 = vcombine.low %v4946_v56, %v4950_v58  ;;  %v4994_v58 = vld [vmem:[#allocation9 + $0x208] sm:$0xff] }
 0x380   :  { %4887 = vmatpush1.bf16.msra.mxu1 %v10284_v39  ;;  %v5021_v39 = vld [vmem:[#allocation9 + $0x2e0] sm:$0xff] }
 0x381   :  { %4888 = vmatprep.subr.bf16.mxu1 %v10293_v42  ;;  %v4954_v42 = vld [vmem:[#allocation9 + $0xc8] sm:$0xff]  ;;  %v10407_v3 = vcombine.high %v5017_v61, %v5021_v39  ;;  %v10406_v7 = vcombine.low %v5017_v61, %v5021_v39 }
 0x382   :  { %8052 = vmatpush1.bf16.msra.mxu0 %v10350_v0  ;;  %v4958_v0 = vld [vmem:[#allocation9 + $0xe8] sm:$0xff] }
 0x383   :  { %8053 = vmatprep.subr.bf16.mxu0 %v10359_v5  ;;  %v5025_v5 = vld [vmem:[#allocation9 + $0x300] sm:$0xff]  ;;  %v10344_v13 = vcombine.low %v4954_v42, %v4958_v0 }
 0x384   :  { %4889 = vmatpush1.bf16.msra.mxu1 %v10292_v8  ;;  %v10345_v8 = vcombine.high %v4954_v42, %v4958_v0  ;;  %v5069_v42 = vld [vmem:[#allocation9 + $0x460] sm:$0xff] }
 0x385   :  { %4890 = vmatprep.subr.bf16.mxu1 %v10301_v11  ;;  %v4966_v11 = vld [vmem:[#allocation9 + $0x128] sm:$0xff] }
 0x386   :  { %8054 = vmatpush1.bf16.msra.mxu0 %v10358_v12 }
 0x387   :  { %8055 = vmatprep.subr.bf16.mxu0 %v10367_v20  ;;  %v5037_v20 = vld [vmem:[#allocation9 + $0x360] sm:$0xff] }
 0x388   :  { %4891 = vmatpush1.bf16.msra.mxu1 %v10300_v21  ;;  %v10353_v21 = vcombine.high %v4962_v9, %v4966_v11  ;;  %v10423_v27 = vcombine.high %v5033_v17, %v5037_v20 }
 0x389   :  { %4892 = vmatprep.subr.bf16.mxu1 %v10309_v25  ;;  %v4974_v25 = vld [vmem:[#allocation9 + $0x168] sm:$0xff] }
 0x38a   :  { %8056 = vmatpush1.bf16.msra.mxu0 %v10366_v26  ;;  %v1652_v26 = vrot.slane %v11778_v36, %v11686_v40  ;;  %v10361_v14 = vcombine.high %v4970_v24, %v4974_v25  ;;  %v10360_v37 = vcombine.low %v4970_v24, %v4974_v25  ;;  %v5081_v25 = vld [vmem:[#allocation9 + $0x4c0] sm:$0xff] }
 0x38b   :  { %8057 = vmatprep.subr.bf16.mxu0 %v10375_v29  ;;  %v10352_v29 = vcombine.low %v4962_v9, %v4966_v11  ;;  %v5073_v11 = vld [vmem:[#allocation9 + $0x480] sm:$0xff] }
 0x38c   :  { %4893 = vmatpush1.bf16.msra.mxu1 %v10308_v30  ;;  %v5041_v30 = vld [vmem:[#allocation9 + $0x380] sm:$0xff]  ;;  %v10958_v35 = vadd.f32 %v11772_v34, %v1652_v26 }
 0x38d   :  { %4894 = vmatprep.subr.bf16.mxu1 %v10317_v2  ;;  %v10422_v2 = vcombine.low %v5033_v17, %v5037_v20  ;;  %v10430_v47 = vcombine.low %v5041_v30, %v5045_v22  ;;  %v5010_v20 = vld [vmem:[#allocation9 + $0x288] sm:$0xff]  ;;  %v5085_v26 = vld [vmem:[#allocation9 + $0x4e0] sm:$0xff] }
 0x38e   :  { %8058 = vmatpush1.bf16.msra.mxu0 %v10374_v45  ;;  %v4978_v45 = vld [vmem:[#allocation9 + $0x188] sm:$0xff] }
 0x38f   :  { %8059 = vmatprep.subr.bf16.mxu0 %v10383_v49  ;;  %v10431_v49 = vcombine.high %v5041_v30, %v5045_v22  ;;  %v10368_v34 = vcombine.low %v4978_v45, %v4982_v18  ;;  %v5022_v30 = vld [vmem:[#allocation9 + $0x2e8] sm:$0xff]  ;;  %v10471_v22 = vcombine.high %v5081_v25, %v5085_v26 }
 0x390   :  { %4895 = vmatpush1.bf16.msra.mxu1 %v10316_v33  ;;  %v10961_v33 = vadd.f32 %v11785_v1, %v1664_v28 }
 0x391   :  { %8207 = vmatprep.subr.bf16.mxu1 %v10321_v41  ;;  %v5053_v41 = vld [vmem:[#allocation9 + $0x3e0] sm:$0xff] }
 0x392   :  { %8060 = vmatpush1.bf16.msra.mxu0 %v10382_v46  ;;  %v10369_v46 = vcombine.high %v4978_v45, %v4982_v18  ;;  %v10439_v52 = vcombine.high %v5049_v38, %v5053_v41  ;;  %v4908_v53 = vmul.f32 0.01, %v10961_v33  ;;  %v10438_v56 = vcombine.low %v5049_v38, %v5053_v41  ;;  %v5093_v45 = vld [vmem:[#allocation9 + $0x520] sm:$0xff] }
 0x393   :  { %4897 = vmatmul.mubr.bf16.vlgmr.msra.gmra.mrb[20].mxu1 %v11754_v6  ;;  %8061 = vmatprep.subr.bf16.mxu0 %v10391_v50  ;;  %v5029_v6 = vld [vmem:[#allocation9 + $0x320] sm:$0xff]  ;;  %v4990_v50 = vld [vmem:[#allocation9 + $0x1e8] sm:$0xff] }
 0x394   :  { %8208 = vmatpush1.bf16.msra.mxu1 %v10320_v51  ;;  %8239 = vmatprep.mubr.bf16.mxu1 %v11787_v32  ;;  %v10415_v12 = vcombine.high %v5025_v5, %v5029_v6  ;;  %v10414_v23 = vcombine.low %v5025_v5, %v5029_v6  ;;  %v4905_v51 = vmul.f32 0.01, %v10958_v35  ;;  %v10377_v1 = vcombine.high %v4986_v48, %v4990_v50  ;;  %v5006_v5 = vld [vmem:[#allocation9 + $0x268] sm:$0xff]  ;;  %v5097_v41 = vld [vmem:[#allocation9 + $0x540] sm:$0xff] }
 0x395   :  { %8209 = vmatprep.subr.bf16.mxu1 %v10329_v54  ;;  %v5057_v54 = vld [vmem:[#allocation9 + $0x400] sm:$0xff]  ;;  %v4916_v39 = vmax.f32 %v10961_v33, %v4908_v53  ;;  %v5030_v33 = vld [vmem:[#allocation9 + $0x328] sm:$0xff] }
 0x396   :  { %8062 = vmatpush1.bf16.msra.mxu0 %v10390_v55  ;;  %v5061_v55 = vld [vmem:[#allocation9 + $0x420] sm:$0xff] }
 0x397   :  { %8063 = vmatprep.subr.bf16.mxu0 %v10399_v60  ;;  %v4998_v60 = vld [vmem:[#allocation9 + $0x228] sm:$0xff]  ;;  %v10447_v61 = vcombine.high %v5057_v54, %v5061_v55 }
 0x398   :  { %8210 = vmatpush1.bf16.msra.mxu1 %v10328_v10  ;;  %v4913_v10 = vmax.f32 %v10958_v35, %v4905_v51  ;;  %v10385_v0 = vcombine.high %v4994_v58, %v4998_v60  ;;  %v10384_v9 = vcombine.low %v4994_v58, %v4998_v60  ;;  %v10470_v35 = vcombine.low %v5081_v25, %v5085_v26  ;;  %v5038_v51 = vld [vmem:[#allocation9 + $0x368] sm:$0xff] }
 0x399   :  { %8211 = vmatprep.subr.bf16.mxu1 %v10337_v62  ;;  %v10376_v62 = vcombine.low %v4986_v48, %v4990_v50  ;;  %v5034_v50 = vld [vmem:[#allocation9 + $0x348] sm:$0xff] }
 0x39a   :  { %8064 = vmatpush1.bf16.msra.mxu0 %v10398_v16  ;;  %v5065_v16 = vld [vmem:[#allocation9 + $0x440] sm:$0xff]  ;;  %v11799_v6 = vpack.c.bf16 %v4913_v10, %v4913_v10  ;;  %v5046_v58 = vld [vmem:[#allocation9 + $0x3a8] sm:$0xff]  ;;  %v10424_v10 = vcombine.low %v5034_v50, %v5038_v51 }
 0x39b   :  { %8065 = vmatprep.subr.bf16.mxu0 %v10407_v3  ;;  %v10446_v3 = vcombine.low %v5057_v54, %v5061_v55  ;;  %v10454_v17 = vcombine.low %v5065_v16, %v5069_v42  ;;  %v5109_v54 = vld [vmem:[#allocation9 + $0x5a0] sm:$0xff]  ;;  %v10425_v55 = vcombine.high %v5034_v50, %v5038_v51  ;;  %v5066_v26 = vld [vmem:[#allocation9 + $0x448] sm:$0xff] }
 0x39c   :  { %8212 = vmatpush1.bf16.msra.mxu1 %v10336_v4  ;;  %v5002_v4 = vld [vmem:[#allocation9 + $0x248] sm:$0xff]  ;;  %v5153_v51 = vld [vmem:[#allocation9 + $0x700] sm:$0xff] }
 0x39d   :  { %8213 = vmatprep.subr.bf16.mxu1 %v10345_v8  ;;  %v10455_v8 = vcombine.high %v5065_v16, %v5069_v42  ;;  %v10392_v24 = vcombine.low %v5002_v4, %v5006_v5  ;;  %v5050_v42 = vld [vmem:[#allocation9 + $0x3c8] sm:$0xff] }
 0x39e   :  { %8066 = vmatpush1.bf16.msra.mxu0 %v10406_v7  ;;  %v11801_v7 = vpack.c.bf16 %v4916_v39, %v4916_v39  ;;  %v5117_v39 = vld [vmem:[#allocation9 + $0x5e0] sm:$0xff] }
 0x39f   :  { %8067 = vmatprep.subr.bf16.mxu0 %v10415_v12  ;;  %v5077_v12 = vld [vmem:[#allocation9 + $0x4a0] sm:$0xff] }
 0x3a0   :  { %8214 = vmatpush1.bf16.msra.mxu1 %v10344_v13  ;;  %v10393_v13 = vcombine.high %v5002_v4, %v5006_v5  ;;  %v10462_v28 = vcombine.low %v5073_v11, %v5077_v12  ;;  %v5121_v5 = vld [vmem:[#allocation9 + $0x600] sm:$0xff] }
 0x3a1   :  { %8215 = vmatprep.subr.bf16.mxu1 %v10353_v21  ;;  %v5014_v21 = vld [vmem:[#allocation9 + $0x2a8] sm:$0xff] }
 0x3a2   :  { %8068 = vmatpush1.bf16.msra.mxu0 %v10414_v23  ;;  %v10463_v23 = vcombine.high %v5073_v11, %v5077_v12  ;;  %v5058_v12 = vld [vmem:[#allocation9 + $0x408] sm:$0xff] }
 0x3a3   :  { %8069 = vmatprep.subr.bf16.mxu0 %v10423_v27  ;;  %v10401_v27 = vcombine.high %v5010_v20, %v5014_v21 }
 0x3a4   :  { %8216 = vmatpush1.bf16.msra.mxu1 %v10352_v29  ;;  %v5018_v29 = vld [vmem:[#allocation9 + $0x2c8] sm:$0xff] }
 0x3a5   :  { %8217 = vmatprep.subr.bf16.mxu1 %v10361_v14  ;;  %v10400_v14 = vcombine.low %v5010_v20, %v5014_v21  ;;  %v10409_v18 = vcombine.high %v5018_v29, %v5022_v30  ;;  %v10408_v38 = vcombine.low %v5018_v29, %v5022_v30  ;;  %v5129_v21 = vld [vmem:[#allocation9 + $0x640] sm:$0xff] }
 0x3a6   :  { %8070 = vmatpush1.bf16.msra.mxu0 %v10422_v2  ;;  %v5089_v2 = vld [vmem:[#allocation9 + $0x500] sm:$0xff] }
 0x3a7   :  { %8071 = vmatprep.subr.bf16.mxu0 %v10431_v49  ;;  %v5026_v49 = vld [vmem:[#allocation9 + $0x308] sm:$0xff]  ;;  %v10478_v48 = vcombine.low %v5089_v2, %v5093_v45  ;;  %v5137_v30 = vld [vmem:[#allocation9 + $0x680] sm:$0xff] }
 0x3a8   :  { %8218 = vmatpush1.bf16.msra.mxu1 %v10360_v37  ;;  %v10479_v37 = vcombine.high %v5089_v2, %v5093_v45  ;;  %v10416_v53 = vcombine.low %v5026_v49, %v5030_v33  ;;  %v5074_v45 = vld [vmem:[#allocation9 + $0x488] sm:$0xff] }
 0x3a9   :  { %8219 = vmatprep.subr.bf16.mxu1 %v10369_v46  ;;  %v5101_v46 = vld [vmem:[#allocation9 + $0x560] sm:$0xff] }
 0x3aa   :  { %8072 = vmatpush1.bf16.msra.mxu0 %v10430_v47  ;;  %v10417_v47 = vcombine.high %v5026_v49, %v5030_v33  ;;  %v5145_v33 = vld [vmem:[#allocation9 + $0x6c0] sm:$0xff] }
 0x3ab   :  { %8073 = vmatprep.subr.bf16.mxu0 %v10439_v52  ;;  %v10487_v52 = vcombine.high %v5097_v41, %v5101_v46 }
 0x3ac   :  { %8220 = vmatpush1.bf16.msra.mxu1 %v10368_v34  ;;  %v5105_v34 = vld [vmem:[#allocation9 + $0x580] sm:$0xff] }
 0x3ad   :  { %8221 = vmatprep.subr.bf16.mxu1 %v10377_v1  ;;  %v10486_v1 = vcombine.low %v5097_v41, %v5101_v46  ;;  %v10495_v60 = vcombine.high %v5105_v34, %v5109_v54  ;;  %v10494_v16 = vcombine.low %v5105_v34, %v5109_v54  ;;  %v5082_v46 = vld [vmem:[#allocation9 + $0x4c8] sm:$0xff] }
 0x3ae   :  { %8074 = vmatpush1.bf16.msra.mxu0 %v10438_v56  ;;  %v5042_v56 = vld [vmem:[#allocation9 + $0x388] sm:$0xff] }
 0x3af   :  { %8084 = vmatprep.subr.bf16.mxu0 %v10447_v61  ;;  %v5113_v61 = vld [vmem:[#allocation9 + $0x5c0] sm:$0xff]  ;;  %v10432_v4 = vcombine.low %v5042_v56, %v5046_v58  ;;  %v5090_v54 = vld [vmem:[#allocation9 + $0x508] sm:$0xff] }
 0x3b0   :  { %8222 = vmatpush1.bf16.msra.mxu1 %v10376_v62  ;;  %v10433_v62 = vcombine.high %v5042_v56, %v5046_v58  ;;  %v10502_v11 = vcombine.low %v5113_v61, %v5117_v39  ;;  %v5161_v58 = vld [vmem:[#allocation9 + $0x740] sm:$0xff] }
 0x3b1   :  { %8076 = vmatmul.mubr.bf16.vlgmr.msra.gmra.mrb[8].mxu0 %v11799_v6  ;;  %8223 = vmatprep.subr.bf16.mxu1 %v10385_v0  ;;  %v5054_v0 = vld [vmem:[#allocation9 + $0x3e8] sm:$0xff] }
 0x3b2   :  { %8085 = vmatpush1.bf16.msra.mxu0 %v10446_v3  ;;  %8116 = vmatprep.mubr.bf16.mxu0 %v11801_v7  ;;  %v10503_v3 = vcombine.high %v5113_v61, %v5117_v39  ;;  %v10440_v20 = vcombine.low %v5050_v42, %v5054_v0  ;;  %v5098_v39 = vld [vmem:[#allocation9 + $0x548] sm:$0xff] }
 0x3b3   :  { %8086 = vmatprep.subr.bf16.mxu0 %v10455_v8  ;;  %v5125_v8 = vld [vmem:[#allocation9 + $0x620] sm:$0xff] }
 0x3b4   :  { %8224 = vmatpush1.bf16.msra.mxu1 %v10384_v9  ;;  %v10441_v9 = vcombine.high %v5050_v42, %v5054_v0  ;;  %v10510_v25 = vcombine.low %v5121_v5, %v5125_v8 }
 0x3b5   :  { %8225 = vmatprep.subr.bf16.mxu1 %v10393_v13  ;;  %v5062_v13 = vld [vmem:[#allocation9 + $0x428] sm:$0xff] }
 0x3b6   :  { %8087 = vmatpush1.bf16.msra.mxu0 %v10454_v17  ;;  %v10511_v17 = vcombine.high %v5121_v5, %v5125_v8  ;;  %v10448_v29 = vcombine.low %v5058_v12, %v5062_v13 }
 0x3b7   :  { %8088 = vmatprep.subr.bf16.mxu0 %v10463_v23  ;;  %v5133_v23 = vld [vmem:[#allocation9 + $0x660] sm:$0xff] }
 0x3b8   :  { %8226 = vmatpush1.bf16.msra.mxu1 %v10392_v24  ;;  %v10449_v24 = vcombine.high %v5058_v12, %v5062_v13  ;;  %v10518_v2 = vcombine.low %v5129_v21, %v5133_v23 }
 0x3b9   :  { %8227 = vmatprep.subr.bf16.mxu1 %v10401_v27  ;;  %v5070_v27 = vld [vmem:[#allocation9 + $0x468] sm:$0xff] }
 0x3ba   :  { %8089 = vmatpush1.bf16.msra.mxu0 %v10462_v28  ;;  %v10519_v28 = vcombine.high %v5129_v21, %v5133_v23  ;;  %v10456_v49 = vcombine.low %v5066_v26, %v5070_v27 }
 0x3bb   :  { %8090 = vmatprep.subr.bf16.mxu0 %v10471_v22  ;;  %v5141_v22 = vld [vmem:[#allocation9 + $0x6a0] sm:$0xff] }
 0x3bc   :  { %8228 = vmatpush1.bf16.msra.mxu1 %v10400_v14  ;;  %v10457_v14 = vcombine.high %v5066_v26, %v5070_v27  ;;  %v10526_v41 = vcombine.low %v5137_v30, %v5141_v22 }
 0x3bd   :  { %8229 = vmatprep.subr.bf16.mxu1 %v10409_v18  ;;  %v5078_v18 = vld [vmem:[#allocation9 + $0x4a8] sm:$0xff] }
 0x3be   :  { %8091 = vmatpush1.bf16.msra.mxu0 %v10470_v35  ;;  %v10527_v35 = vcombine.high %v5137_v30, %v5141_v22  ;;  %v10464_v50 = vcombine.low %v5074_v45, %v5078_v18  ;;  %v5189_v30 = vld [vmem:[#allocation9 + $0x820] sm:$0xff] }
 0x3bf   :  { %8092 = vmatprep.subr.bf16.mxu0 %v10479_v37  ;;  %v5149_v37 = vld [vmem:[#allocation9 + $0x6e0] sm:$0xff] }
 0x3c0   :  { %8230 = vmatpush1.bf16.msra.mxu1 %v10408_v38  ;;  %v10465_v38 = vcombine.high %v5074_v45, %v5078_v18  ;;  %v10534_v34 = vcombine.low %v5145_v33, %v5149_v37 }
 0x3c1   :  { %8231 = vmatprep.subr.bf16.mxu1 %v10417_v47  ;;  %v5086_v47 = vld [vmem:[#allocation9 + $0x4e8] sm:$0xff] }
 0x3c2   :  { %8093 = vmatpush1.bf16.msra.mxu0 %v10478_v48  ;;  %v10535_v48 = vcombine.high %v5145_v33, %v5149_v37  ;;  %v10472_v56 = vcombine.low %v5082_v46, %v5086_v47  ;;  %v5197_v33 = vld [vmem:[#allocation9 + $0x860] sm:$0xff] }
 0x3c3   :  { %8094 = vmatprep.subr.bf16.mxu0 %v10487_v52  ;;  %v5157_v52 = vld [vmem:[#allocation9 + $0x720] sm:$0xff] }
 0x3c4   :  { %8232 = vmatpush1.bf16.msra.mxu1 %v10416_v53  ;;  %v10473_v53 = vcombine.high %v5082_v46, %v5086_v47  ;;  %v10542_v61 = vcombine.low %v5153_v51, %v5157_v52 }
 0x3c5   :  { %8233 = vmatprep.subr.bf16.mxu1 %v10425_v55  ;;  %v5094_v55 = vld [vmem:[#allocation9 + $0x528] sm:$0xff] }
 0x3c6   :  { %8095 = vmatpush1.bf16.msra.mxu0 %v10486_v1  ;;  %v10543_v1 = vcombine.high %v5153_v51, %v5157_v52  ;;  %v10480_v0 = vcombine.low %v5090_v54, %v5094_v55  ;;  %v5201_v51 = vld [vmem:[#allocation9 + $0x880] sm:$0xff] }
 0x3c7   :  { %8096 = vmatprep.subr.bf16.mxu0 %v10495_v60  ;;  %v5165_v60 = vld [vmem:[#allocation9 + $0x760] sm:$0xff] }
 0x3c8   :  { %8234 = vmatpush1.bf16.msra.mxu1 %v10424_v10  ;;  %v10481_v10 = vcombine.high %v5090_v54, %v5094_v55  ;;  %v10551_v42 = vcombine.high %v5161_v58, %v5165_v60  ;;  %v10550_v8 = vcombine.low %v5161_v58, %v5165_v60  ;;  %v5205_v52 = vld [vmem:[#allocation9 + $0x8a0] sm:$0xff]  ;;  %v5142_v54 = vld [vmem:[#allocation9 + $0x6a8] sm:$0xff] }
 0x3c9   :  { %8235 = vmatprep.subr.bf16.mxu1 %v10433_v62  ;;  %v5102_v62 = vld [vmem:[#allocation9 + $0x568] sm:$0xff]  ;;  %v5209_v58 = vld [vmem:[#allocation9 + $0x8c0] sm:$0xff] }
 0x3ca   :  { %8097 = vmatpush1.bf16.msra.mxu0 %v10494_v16  ;;  %v1660_v16 = vrot.slane %v11778_v36, %v11709_v57  ;;  %v10489_v5 = vcombine.high %v5098_v39, %v5102_v62  ;;  %v5181_v36 = vld [vmem:[#allocation9 + $0x7e0] sm:$0xff] }
 0x3cb   :  { %8098 = vmatprep.subr.bf16.mxu0 %v10503_v3  ;;  %v5169_v3 = vld [vmem:[#allocation9 + $0x780] sm:$0xff] }
 0x3cc   :  { %8236 = vmatpush1.bf16.msra.mxu1 %v10432_v4  ;;  %v5173_v4 = vld [vmem:[#allocation9 + $0x7a0] sm:$0xff]  ;;  %v10960_v12 = vadd.f32 %v11783_v63, %v1660_v16 }
 0x3cd   :  { %8237 = vmatprep.subr.bf16.mxu1 %v10441_v9  ;;  %v5106_v9 = vld [vmem:[#allocation9 + $0x588] sm:$0xff]  ;;  %v10559_v13 = vcombine.high %v5169_v3, %v5173_v4  ;;  %v10558_v23 = vcombine.low %v5169_v3, %v5173_v4  ;;  %v5213_v60 = vld [vmem:[#allocation9 + $0x8e0] sm:$0xff] }
 0x3ce   :  { %8099 = vmatpush1.bf16.msra.mxu0 %v10502_v11  ;;  %v5110_v11 = vld [vmem:[#allocation9 + $0x5a8] sm:$0xff]  ;;  %v4907_v26 = vmul.f32 0.01, %v10960_v12  ;;  %v10599_v16 = vcombine.high %v5209_v58, %v5213_v60  ;;  %v5221_v3 = vld [vmem:[#allocation9 + $0x920] sm:$0xff] }
 0x3cf   :  { %8100 = vmatprep.subr.bf16.mxu0 %v10511_v17  ;;  %v10488_v17 = vcombine.low %v5098_v39, %v5102_v62  ;;  %v10497_v21 = vcombine.high %v5106_v9, %v5110_v11  ;;  %v5150_v39 = vld [vmem:[#allocation9 + $0x6e8] sm:$0xff]  ;;  %v10590_v62 = vcombine.low %v5201_v51, %v5205_v52 }
 0x3d0   :  { %8238 = vmatpush1.bf16.msra.mxu1 %v10440_v20  ;;  %v5177_v20 = vld [vmem:[#allocation9 + $0x7c0] sm:$0xff]  ;;  %v4915_v45 = vmax.f32 %v10960_v12, %v4907_v26 }
 0x3d1   :  { %8248 = vmatprep.subr.bf16.mxu1 %v10449_v24  ;;  %v5114_v24 = vld [vmem:[#allocation9 + $0x5c8] sm:$0xff]  ;;  %v10567_v27 = vcombine.high %v5177_v20, %v5181_v36  ;;  %v10566_v22 = vcombine.low %v5177_v20, %v5181_v36  ;;  %v5233_v26 = vld [vmem:[#allocation9 + $0x980] sm:$0xff] }
 0x3d2   :  { %8101 = vmatpush1.bf16.msra.mxu0 %v10510_v25  ;;  %v5118_v25 = vld [vmem:[#allocation9 + $0x5e8] sm:$0xff]  ;;  %v11810_v47 = vpack.c.bf16 %v4915_v45, %v4915_v45  ;;  %v5245_v45 = vld [vmem:[#allocation9 + $0x9e0] sm:$0xff] }
 0x3d3   :  { %8240 = vmatmul.mubr.bf16.vlgmr.msra.gmra.mrb[24].mxu1 %v11799_v6  ;;  %8102 = vmatprep.subr.bf16.mxu0 %v10519_v28  ;;  %v10496_v28 = vcombine.low %v5106_v9, %v5110_v11  ;;  %v10505_v63 = vcombine.high %v5114_v24, %v5118_v25  ;;  %v10598_v9 = vcombine.low %v5209_v58, %v5213_v60  ;;  %v5162_v36 = vld [vmem:[#allocation9 + $0x748] sm:$0xff] }
 0x3d4   :  { %8249 = vmatpush1.bf16.msra.mxu1 %v10448_v29  ;;  %8280 = vmatprep.mubr.bf16.mxu1 %v11801_v7  ;;  %v5185_v29 = vld [vmem:[#allocation9 + $0x800] sm:$0xff]  ;;  %v5198_v58 = vld [vmem:[#allocation9 + $0x868] sm:$0xff] }
 0x3d5   :  { %8250 = vmatprep.subr.bf16.mxu1 %v10457_v14  ;;  %v5122_v14 = vld [vmem:[#allocation9 + $0x608] sm:$0xff]  ;;  %v10575_v18 = vcombine.high %v5185_v29, %v5189_v30  ;;  %v10574_v46 = vcombine.low %v5185_v29, %v5189_v30 }
 0x3d6   :  { %8103 = vmatpush1.bf16.msra.mxu0 %v10518_v2  ;;  %v5126_v2 = vld [vmem:[#allocation9 + $0x628] sm:$0xff] }
 0x3d7   :  { %8104 = vmatprep.subr.bf16.mxu0 %v10527_v35  ;;  %v10504_v35 = vcombine.low %v5114_v24, %v5118_v25  ;;  %v10513_v37 = vcombine.high %v5122_v14, %v5126_v2  ;;  %v5170_v29 = vld [vmem:[#allocation9 + $0x788] sm:$0xff] }
 0x3d8   :  { %8251 = vmatpush1.bf16.msra.mxu1 %v10456_v49  ;;  %v5193_v49 = vld [vmem:[#allocation9 + $0x840] sm:$0xff]  ;;  %v5174_v30 = vld [vmem:[#allocation9 + $0x7a8] sm:$0xff] }
 0x3d9   :  { %8252 = vmatprep.subr.bf16.mxu1 %v10465_v38  ;;  %v5130_v38 = vld [vmem:[#allocation9 + $0x648] sm:$0xff]  ;;  %v10582_v55 = vcombine.low %v5193_v49, %v5197_v33 }
 0x3da   :  { %8105 = vmatpush1.bf16.msra.mxu0 %v10526_v41  ;;  %v5134_v41 = vld [vmem:[#allocation9 + $0x668] sm:$0xff] }
 0x3db   :  { %8106 = vmatprep.subr.bf16.mxu0 %v10535_v48  ;;  %v10583_v48 = vcombine.high %v5193_v49, %v5197_v33  ;;  %v5182_v49 = vld [vmem:[#allocation9 + $0x7e8] sm:$0xff] }
 0x3dc   :  { %8253 = vmatpush1.bf16.msra.mxu1 %v10464_v50  ;;  %v10512_v50 = vcombine.low %v5122_v14, %v5126_v2  ;;  %v5241_v2 = vld [vmem:[#allocation9 + $0x9c0] sm:$0xff] }
 0x3dd   :  { %8254 = vmatprep.subr.bf16.mxu1 %v10473_v53  ;;  %v10521_v53 = vcombine.high %v5130_v38, %v5134_v41 }
 0x3de   :  { %8107 = vmatpush1.bf16.msra.mxu0 %v10534_v34  ;;  %v5138_v34 = vld [vmem:[#allocation9 + $0x688] sm:$0xff] }
 0x3df   :  { %8108 = vmatprep.subr.bf16.mxu0 %v10543_v1  ;;  %v10591_v1 = vcombine.high %v5201_v51, %v5205_v52  ;;  %v5190_v51 = vld [vmem:[#allocation9 + $0x828] sm:$0xff]  ;;  %v10630_v52 = vcombine.low %v5241_v2, %v5245_v45 }
 0x3e0   :  { %8255 = vmatpush1.bf16.msra.mxu1 %v10472_v56  ;;  %v10520_v56 = vcombine.low %v5130_v38, %v5134_v41  ;;  %v10560_v38 = vcombine.low %v5170_v29, %v5174_v30  ;;  %v5249_v41 = vld [vmem:[#allocation9 + $0xa00] sm:$0xff] }
 0x3e1   :  { %8256 = vmatprep.subr.bf16.mxu1 %v10481_v10  ;;  %v10529_v10 = vcombine.high %v5138_v34, %v5142_v54 }
 0x3e2   :  { %8109 = vmatpush1.bf16.msra.mxu0 %v10542_v61  ;;  %v5146_v61 = vld [vmem:[#allocation9 + $0x6c8] sm:$0xff] }
 0x3e3   :  { %8110 = vmatprep.subr.bf16.mxu0 %v10551_v42  ;;  %v10528_v42 = vcombine.low %v5138_v34, %v5142_v54  ;;  %v10537_v4 = vcombine.high %v5146_v61, %v5150_v39  ;;  %v10536_v12 = vcombine.low %v5146_v61, %v5150_v39  ;;  %v5257_v54 = vld [vmem:[#allocation9 + $0xa40] sm:$0xff] }
 0x3e4   :  { %8257 = vmatpush1.bf16.msra.mxu1 %v10480_v0  ;;  %v5217_v0 = vld [vmem:[#allocation9 + $0x900] sm:$0xff] }
 0x3e5   :  { %8258 = vmatprep.subr.bf16.mxu1 %v10489_v5  ;;  %v5154_v5 = vld [vmem:[#allocation9 + $0x708] sm:$0xff]  ;;  %v10607_v11 = vcombine.high %v5217_v0, %v5221_v3  ;;  %v5265_v39 = vld [vmem:[#allocation9 + $0xa80] sm:$0xff] }
 0x3e6   :  { %8111 = vmatpush1.bf16.msra.mxu0 %v10550_v8  ;;  %v5158_v8 = vld [vmem:[#allocation9 + $0x728] sm:$0xff] }
 0x3e7   :  { %8112 = vmatprep.subr.bf16.mxu0 %v10559_v13  ;;  %v5225_v13 = vld [vmem:[#allocation9 + $0x940] sm:$0xff]  ;;  %v10545_v20 = vcombine.high %v5154_v5, %v5158_v8  ;;  %v10544_v25 = vcombine.low %v5154_v5, %v5158_v8 }
 0x3e8   :  { %8259 = vmatpush1.bf16.msra.mxu1 %v10488_v17  ;;  %v5229_v17 = vld [vmem:[#allocation9 + $0x960] sm:$0xff] }
 0x3e9   :  { %8260 = vmatprep.subr.bf16.mxu1 %v10497_v21  ;;  %v5166_v21 = vld [vmem:[#allocation9 + $0x768] sm:$0xff]  ;;  %v10615_v24 = vcombine.high %v5225_v13, %v5229_v17  ;;  %v5273_v8 = vld [vmem:[#allocation9 + $0xac0] sm:$0xff] }
 0x3ea   :  { %8113 = vmatpush1.bf16.msra.mxu0 %v10558_v23  ;;  %v10606_v23 = vcombine.low %v5217_v0, %v5221_v3  ;;  %v10552_v14 = vcombine.low %v5162_v36, %v5166_v21  ;;  %v5206_v0 = vld [vmem:[#allocation9 + $0x8a8] sm:$0xff] }
 0x3eb   :  { %8114 = vmatprep.subr.bf16.mxu0 %v10567_v27  ;;  %v5237_v27 = vld [vmem:[#allocation9 + $0x9a0] sm:$0xff] }
 0x3ec   :  { %8261 = vmatpush1.bf16.msra.mxu1 %v10496_v28  ;;  %v10553_v28 = vcombine.high %v5162_v36, %v5166_v21  ;;  %v10622_v33 = vcombine.low %v5233_v26, %v5237_v27  ;;  %v5281_v21 = vld [vmem:[#allocation9 + $0xb00] sm:$0xff] }
 0x3ed   :  { %8262 = vmatprep.subr.bf16.mxu1 %v10505_v63  ;;  %v10614_v63 = vcombine.low %v5225_v13, %v5229_v17  ;;  %v5214_v13 = vld [vmem:[#allocation9 + $0x8e8] sm:$0xff] }
 0x3ee   :  { %8115 = vmatpush1.bf16.msra.mxu0 %v10566_v22  ;;  %v10623_v22 = vcombine.high %v5233_v26, %v5237_v27  ;;  %v5222_v26 = vld [vmem:[#allocation9 + $0x928] sm:$0xff] }
 0x3ef   :  { %8125 = vmatprep.subr.bf16.mxu0 %v10575_v18  ;;  %v10561_v18 = vcombine.high %v5170_v29, %v5174_v30  ;;  %v5289_v30 = vld [vmem:[#allocation9 + $0xb40] sm:$0xff] }
 0x3f0   :  { %8263 = vmatpush1.bf16.msra.mxu1 %v10504_v35  ;;  %v5178_v35 = vld [vmem:[#allocation9 + $0x7c8] sm:$0xff] }
 0x3f1   :  { %8117 = vmatmul.mubr.bf16.vlgmr.msra.gmra.mrb[8].mxu0 %v11810_v47  ;;  %8264 = vmatprep.subr.bf16.mxu1 %v10513_v37  ;;  %v10631_v37 = vcombine.high %v5241_v2, %v5245_v45  ;;  %v10568_v34 = vcombine.low %v5178_v35, %v5182_v49  ;;  %v5230_v2 = vld [vmem:[#allocation9 + $0x968] sm:$0xff] }
 0x3f2   :  { %8126 = vmatpush1.bf16.msra.mxu0 %v10574_v46  ;;  %v5253_v46 = vld [vmem:[#allocation9 + $0xa20] sm:$0xff] }
 0x3f3   :  { %8127 = vmatprep.subr.bf16.mxu0 %v10583_v48  ;;  %v10569_v48 = vcombine.high %v5178_v35, %v5182_v49  ;;  %v10638_v60 = vcombine.low %v5249_v41, %v5253_v46  ;;  %v5297_v49 = vld [vmem:[#allocation9 + $0xb80] sm:$0xff] }
 0x3f4   :  { %8265 = vmatpush1.bf16.msra.mxu1 %v10512_v50  ;;  %v5186_v50 = vld [vmem:[#allocation9 + $0x808] sm:$0xff] }
 0x3f5   :  { %8266 = vmatprep.subr.bf16.mxu1 %v10521_v53  ;;  %v10639_v53 = vcombine.high %v5249_v41, %v5253_v46  ;;  %v10576_v61 = vcombine.low %v5186_v50, %v5190_v51  ;;  %v5238_v41 = vld [vmem:[#allocation9 + $0x9a8] sm:$0xff] }
 0x3f6   :  { %8128 = vmatpush1.bf16.msra.mxu0 %v10582_v55  ;;  %v5261_v55 = vld [vmem:[#allocation9 + $0xa60] sm:$0xff] }
 0x3f7   :  { %8129 = vmatprep.subr.bf16.mxu0 %v10591_v1  ;;  %v10577_v1 = vcombine.high %v5186_v50, %v5190_v51  ;;  %v10646_v3 = vcombine.low %v5257_v54, %v5261_v55  ;;  %v5305_v51 = vld [vmem:[#allocation9 + $0xbc0] sm:$0xff] }
 0x3f8   :  { %8267 = vmatpush1.bf16.msra.mxu1 %v10520_v56  ;;  %v5194_v56 = vld [vmem:[#allocation9 + $0x848] sm:$0xff] }
 0x3f9   :  { %8268 = vmatprep.subr.bf16.mxu1 %v10529_v10  ;;  %v10647_v10 = vcombine.high %v5257_v54, %v5261_v55  ;;  %v10584_v5 = vcombine.low %v5194_v56, %v5198_v58  ;;  %v5246_v54 = vld [vmem:[#allocation9 + $0x9e8] sm:$0xff] }
 0x3fa   :  { %8130 = vmatpush1.bf16.msra.mxu0 %v10590_v62  ;;  %v5269_v62 = vld [vmem:[#allocation9 + $0xaa0] sm:$0xff] }
 0x3fb   :  { %8131 = vmatprep.subr.bf16.mxu0 %v10599_v16  ;;  %v10585_v16 = vcombine.high %v5194_v56, %v5198_v58  ;;  %v10654_v17 = vcombine.low %v5265_v39, %v5269_v62  ;;  %v11814_v58 = vld [vmem:[#allocation9 + $0xc00] sm:$0xff] }
 0x3fc   :  { %8269 = vmatpush1.bf16.msra.mxu1 %v10528_v42  ;;  %v5202_v42 = vld [vmem:[#allocation9 + $0x888] sm:$0xff] }
 0x3fd   :  { %8270 = vmatprep.subr.bf16.mxu1 %v10537_v4  ;;  %v10655_v4 = vcombine.high %v5265_v39, %v5269_v62  ;;  %v10592_v36 = vcombine.low %v5202_v42, %v5206_v0  ;;  %v5254_v39 = vld [vmem:[#allocation9 + $0xa28] sm:$0xff] }
 0x3fe   :  { %8132 = vmatpush1.bf16.msra.mxu0 %v10598_v9  ;;  %v5277_v9 = vld [vmem:[#allocation9 + $0xae0] sm:$0xff] }
 0x3ff   :  { %8133 = vmatprep.subr.bf16.mxu0 %v10607_v11  ;;  %v10593_v11 = vcombine.high %v5202_v42, %v5206_v0  ;;  %v10662_v27 = vcombine.low %v5273_v8, %v5277_v9 }
 0x400   :  { %8271 = vmatpush1.bf16.msra.mxu1 %v10536_v12  ;;  %v5210_v12 = vld [vmem:[#allocation9 + $0x8c8] sm:$0xff] }
 0x401   :  { %8272 = vmatprep.subr.bf16.mxu1 %v10545_v20  ;;  %v10663_v20 = vcombine.high %v5273_v8, %v5277_v9  ;;  %v10600_v29 = vcombine.low %v5210_v12, %v5214_v13  ;;  %v5266_v9 = vld [vmem:[#allocation9 + $0xa88] sm:$0xff] }
 0x402   :  { %8134 = vmatpush1.bf16.msra.mxu0 %v10606_v23  ;;  %v5285_v23 = vld [vmem:[#allocation9 + $0xb20] sm:$0xff] }
 0x403   :  { %8135 = vmatprep.subr.bf16.mxu0 %v10615_v24  ;;  %v10601_v24 = vcombine.high %v5210_v12, %v5214_v13  ;;  %v10670_v45 = vcombine.low %v5281_v21, %v5285_v23 }
 0x404   :  { %8273 = vmatpush1.bf16.msra.mxu1 %v10544_v25  ;;  %v5218_v25 = vld [vmem:[#allocation9 + $0x908] sm:$0xff] }
 0x405   :  { %8274 = vmatprep.subr.bf16.mxu1 %v10553_v28  ;;  %v10671_v28 = vcombine.high %v5281_v21, %v5285_v23  ;;  %v10608_v35 = vcombine.low %v5218_v25, %v5222_v26  ;;  %v5282_v23 = vld [vmem:[#allocation9 + $0xb08] sm:$0xff] }
 0x406   :  { %8136 = vmatpush1.bf16.msra.mxu0 %v10614_v63  ;;  %v5293_v63 = vld [vmem:[#allocation9 + $0xb60] sm:$0xff] }
 0x407   :  { %8137 = vmatprep.subr.bf16.mxu0 %v10623_v22  ;;  %v10609_v22 = vcombine.high %v5218_v25, %v5222_v26  ;;  %v10678_v46 = vcombine.low %v5289_v30, %v5293_v63 }
 0x408   :  { %8275 = vmatpush1.bf16.msra.mxu1 %v10552_v14  ;;  %v5226_v14 = vld [vmem:[#allocation9 + $0x948] sm:$0xff] }
 0x409   :  { %8276 = vmatprep.subr.bf16.mxu1 %v10561_v18  ;;  %v10679_v18 = vcombine.high %v5289_v30, %v5293_v63  ;;  %v10616_v50 = vcombine.low %v5226_v14, %v5230_v2  ;;  %v11820_v30 = vld [vmem:[#allocation7] sm:$0xff] }
 0x40a   :  { %8138 = vmatpush1.bf16.msra.mxu0 %v10622_v33  ;;  %v5301_v33 = vld [vmem:[#allocation9 + $0xba0] sm:$0xff]  ;;  %v1668_v63 = vrot.slane %v11820_v30, %v11727_v31 }
 0x40b   :  { %8139 = vmatprep.subr.bf16.mxu0 %v10631_v37  ;;  %v10617_v37 = vcombine.high %v5226_v14, %v5230_v2  ;;  %v10686_v55 = vcombine.low %v5297_v49, %v5301_v33  ;;  %v1672_v14 = vrot.slane %v11820_v30, %v11730_v44  ;;  %v5298_v2 = vld [vmem:[#allocation9 + $0xb88] sm:$0xff] }
 0x40c   :  { %8277 = vmatpush1.bf16.msra.mxu1 %v10560_v38  ;;  %v5234_v38 = vld [vmem:[#allocation9 + $0x988] sm:$0xff] }
 0x40d   :  { %8278 = vmatprep.subr.bf16.mxu1 %v10569_v48  ;;  %v10687_v48 = vcombine.high %v5297_v49, %v5301_v33  ;;  %v10624_v56 = vcombine.low %v5234_v38, %v5238_v41 }
 0x40e   :  { %8140 = vmatpush1.bf16.msra.mxu0 %v10630_v52  ;;  %v5309_v52 = vld [vmem:[#allocation9 + $0xbe0] sm:$0xff] }
 0x40f   :  { %8141 = vmatprep.subr.bf16.mxu0 %v10639_v53  ;;  %v10625_v53 = vcombine.high %v5234_v38, %v5238_v41  ;;  %v10694_v62 = vcombine.low %v5305_v51, %v5309_v52 }
 0x410   :  { %8279 = vmatpush1.bf16.msra.mxu1 %v10568_v34  ;;  %v5242_v34 = vld [vmem:[#allocation9 + $0x9c8] sm:$0xff] }
 0x411   :  { %8289 = vmatprep.subr.bf16.mxu1 %v10577_v1  ;;  %v10695_v1 = vcombine.high %v5305_v51, %v5309_v52  ;;  %v10632_v42 = vcombine.low %v5242_v34, %v5246_v54 }
 0x412   :  { %8142 = vmatpush1.bf16.msra.mxu0 %v10638_v60  ;;  %v11816_v60 = vld [vmem:[#allocation9 + $0xc20] sm:$0xff] }
 0x413   :  { %8281 = vmatmul.mubr.bf16.vlgmr.msra.gmra.mrb[24].mxu1 %v11810_v47  ;;  %8143 = vmatprep.subr.bf16.mxu0 %v10647_v10  ;;  %v10633_v10 = vcombine.high %v5242_v34, %v5246_v54 }
 0x414   :  { %8290 = vmatpush1.bf16.msra.mxu1 %v10576_v61  ;;  %v5250_v61 = vld [vmem:[#allocation9 + $0xa08] sm:$0xff] }
 0x415   :  { %8291 = vmatprep.subr.bf16.mxu1 %v10585_v16  ;;  %v10703_v16 = vcombine.high %v11814_v58, %v11816_v60  ;;  %v10641_v0 = vcombine.high %v5250_v61, %v5254_v39 }
 0x416   :  { %8144 = vmatpush1.bf16.msra.mxu0 %v10646_v3  ;;  %v5258_v3 = vld [vmem:[#allocation9 + $0xa48] sm:$0xff] }
 0x417   :  { %8145 = vmatprep.subr.bf16.mxu0 %v10655_v4  ;;  %v5262_v4 = vld [vmem:[#allocation9 + $0xa68] sm:$0xff] }
 0x418   :  { %8292 = vmatpush1.bf16.msra.mxu1 %v10584_v5  ;;  %v10640_v5 = vcombine.low %v5250_v61, %v5254_v39  ;;  %v10649_v8 = vcombine.high %v5258_v3, %v5262_v4  ;;  %v10648_v12 = vcombine.low %v5258_v3, %v5262_v4  ;;  %v5318_v61 = vld [vmem:[#allocation9 + $0xc28] sm:$0xff]  ;;  %v5329_v4 = vld [vmem:[#allocation9 + $0xc80] sm:$0xff] }
 0x419   :  { %8293 = vmatprep.subr.bf16.mxu1 %v10593_v11  ;;  %v5270_v11 = vld [vmem:[#allocation9 + $0xaa8] sm:$0xff] }
 0x41a   :  { %8146 = vmatpush1.bf16.msra.mxu0 %v10654_v17  ;;  %v10657_v13 = vcombine.high %v5266_v9, %v5270_v11  ;;  %v5274_v17 = vld [vmem:[#allocation9 + $0xac8] sm:$0xff] }
 0x41b   :  { %8147 = vmatprep.subr.bf16.mxu0 %v10663_v20  ;;  %v5278_v20 = vld [vmem:[#allocation9 + $0xae8] sm:$0xff] }
 0x41c   :  { %8294 = vmatpush1.bf16.msra.mxu1 %v10592_v36  ;;  %v10656_v36 = vcombine.low %v5266_v9, %v5270_v11  ;;  %v10665_v21 = vcombine.high %v5274_v17, %v5278_v20  ;;  %v10664_v25 = vcombine.low %v5274_v17, %v5278_v20  ;;  %v5326_v9 = vld [vmem:[#allocation9 + $0xc68] sm:$0xff]  ;;  %v5341_v17 = vld [vmem:[#allocation9 + $0xce0] sm:$0xff] }
 0x41d   :  { %8295 = vmatprep.subr.bf16.mxu1 %v10601_v24  ;;  %v5286_v24 = vld [vmem:[#allocation9 + $0xb28] sm:$0xff] }
 0x41e   :  { %8148 = vmatpush1.bf16.msra.mxu0 %v10662_v27  ;;  %v10673_v26 = vcombine.high %v5282_v23, %v5286_v24  ;;  %v5290_v27 = vld [vmem:[#allocation9 + $0xb48] sm:$0xff] }
 0x41f   :  { %8149 = vmatprep.subr.bf16.mxu0 %v10671_v28  ;;  %v5294_v28 = vld [vmem:[#allocation9 + $0xb68] sm:$0xff] }
 0x420   :  { %8296 = vmatpush1.bf16.msra.mxu1 %v10600_v29  ;;  %v10672_v29 = vcombine.low %v5282_v23, %v5286_v24  ;;  %v5330_v20 = vld [vmem:[#allocation9 + $0xc88] sm:$0xff] }
 0x421   :  { %8297 = vmatprep.subr.bf16.mxu1 %v10609_v22  ;;  %v10681_v22 = vcombine.high %v5290_v27, %v5294_v28 }
 0x422   :  { %8150 = vmatpush1.bf16.msra.mxu0 %v10670_v45  ;;  %v5302_v45 = vld [vmem:[#allocation9 + $0xba8] sm:$0xff] }
 0x423   :  { %8151 = vmatprep.subr.bf16.mxu0 %v10679_v18 }
 0x424   :  { %8298 = vmatpush1.bf16.msra.mxu1 %v10608_v35  ;;  %v10680_v35 = vcombine.low %v5290_v27, %v5294_v28  ;;  %v5349_v27 = vld [vmem:[#allocation9 + $0xd20] sm:$0xff]  ;;  %v5338_v28 = vld [vmem:[#allocation9 + $0xcc8] sm:$0xff] }
 0x425   :  { %8299 = vmatprep.subr.bf16.mxu1 %v10617_v37  ;;  %v10689_v37 = vcombine.high %v5298_v2, %v5302_v45 }
 0x426   :  { %8152 = vmatpush1.bf16.msra.mxu0 %v10678_v46  ;;  %v5306_v46 = vld [vmem:[#allocation9 + $0xbc8] sm:$0xff] }
 0x427   :  { %8153 = vmatprep.subr.bf16.mxu0 %v10687_v48  ;;  %v5310_v48 = vld [vmem:[#allocation9 + $0xbe8] sm:$0xff] }
 0x428   :  { %8300 = vmatpush1.bf16.msra.mxu1 %v10616_v50  ;;  %v10697_v54 = vcombine.high %v5306_v46, %v5310_v48 }
 0x429   :  { %8301 = vmatprep.subr.bf16.mxu1 %v10625_v53  ;;  %v10688_v53 = vcombine.low %v5298_v2, %v5302_v45  ;;  %v5353_v45 = vld [vmem:[#allocation9 + $0xd40] sm:$0xff] }
 0x42a   :  { %8154 = vmatpush1.bf16.msra.mxu0 %v10686_v55  ;;  %v5321_v55 = vld [vmem:[#allocation9 + $0xc40] sm:$0xff] }
 0x42b   :  { %8155 = vmatprep.subr.bf16.mxu0 %v10695_v1 }
 0x42c   :  { %8302 = vmatpush1.bf16.msra.mxu1 %v10624_v56  ;;  %v5325_v56 = vld [vmem:[#allocation9 + $0xc60] sm:$0xff] }
 0x42d   :  { %8303 = vmatprep.subr.bf16.mxu1 %v10633_v10  ;;  %v5314_v10 = vld [vmem:[#allocation9 + $0xc08] sm:$0xff]  ;;  %v10710_v11 = vcombine.low %v5321_v55, %v5325_v56 }
 0x42e   :  { %8156 = vmatpush1.bf16.msra.mxu0 %v10694_v62  ;;  %v10702_v62 = vcombine.low %v11814_v58, %v11816_v60  ;;  %v10705_v3 = vcombine.high %v5314_v10, %v5318_v61  ;;  %v10704_v58 = vcombine.low %v5314_v10, %v5318_v61  ;;  %v5366_v10 = vld [vmem:[#allocation9 + $0xda8] sm:$0xff] }
 0x42f   :  { %8166 = vmatprep.subr.bf16.mxu0 %v10703_v16  ;;  %v10696_v16 = vcombine.low %v5306_v46, %v5310_v48  ;;  %v5361_v46 = vld [vmem:[#allocation9 + $0xd80] sm:$0xff] }
 0x430   :  { %8304 = vmatpush1.bf16.msra.mxu1 %v10632_v42  ;;  %v5365_v48 = vld [vmem:[#allocation9 + $0xda0] sm:$0xff] }
 0x431   :  { %8305 = vmatprep.subr.bf16.mxu1 %v10641_v0  ;;  %v10711_v0 = vcombine.high %v5321_v55, %v5325_v56  ;;  %v5369_v55 = vld [vmem:[#allocation9 + $0xdc0] sm:$0xff]  ;;  %v5362_v56 = vld [vmem:[#allocation9 + $0xd88] sm:$0xff]  ;;  %v10750_v61 = vcombine.low %v5361_v46, %v5365_v48 }
 0x434   :  { %8306 = vmatpush1.bf16.msra.mxu1 %v10640_v5  ;;  %v5333_v5 = vld [vmem:[#allocation9 + $0xca0] sm:$0xff] }
 0x435   :  { %8307 = vmatprep.subr.bf16.mxu1 %v10649_v8  ;;  %v5322_v8 = vld [vmem:[#allocation9 + $0xc48] sm:$0xff]  ;;  %v10719_v60 = vcombine.high %v5329_v4, %v5333_v5 }
 0x436   :  { %v10712_v23 = vcombine.low %v5322_v8, %v5326_v9 }
 0x438   :  { %8308 = vmatpush1.bf16.msra.mxu1 %v10648_v12  ;;  %v10713_v12 = vcombine.high %v5322_v8, %v5326_v9  ;;  %v5381_v8 = vld [vmem:[#allocation9 + $0xe20] sm:$0xff]  ;;  %v5370_v9 = vld [vmem:[#allocation9 + $0xdc8] sm:$0xff] }
 0x439   :  { %8309 = vmatprep.subr.bf16.mxu1 %v10657_v13  ;;  %v5337_v13 = vld [vmem:[#allocation9 + $0xcc0] sm:$0xff] }
 0x43a   :  { %v10727_v24 = vcombine.high %v5337_v13, %v5341_v17 }
 0x43c   :  { %8310 = vmatpush1.bf16.msra.mxu1 %v10656_v36  ;;  %v5334_v36 = vld [vmem:[#allocation9 + $0xca8] sm:$0xff] }
 0x43d   :  { %8311 = vmatprep.subr.bf16.mxu1 %v10665_v21  ;;  %v10718_v21 = vcombine.low %v5329_v4, %v5333_v5  ;;  %v5377_v4 = vld [vmem:[#allocation9 + $0xe00] sm:$0xff] }
 0x440   :  { %8312 = vmatpush1.bf16.msra.mxu1 %v10664_v25  ;;  %v10721_v25 = vcombine.high %v5330_v20, %v5334_v36 }
 0x441   :  { %8313 = vmatprep.subr.bf16.mxu1 %v10673_v26  ;;  %v5345_v26 = vld [vmem:[#allocation9 + $0xd00] sm:$0xff] }
 0x444   :  { %v4734_v18 = vpop.f32.mrb[4].mxu0  ;;  %8314 = vmatpush1.bf16.msra.mxu1 %v10672_v29  ;;  %v5342_v29 = vld [vmem:[#allocation9 + $0xce8] sm:$0xff] }
 0x445   :  { %v10962_v49 = vadd.f32 %v4734_v18, %v1668_v63  ;;  %v4736_v33 = vpop.f32.mrb[5].mxu0  ;;  %8315 = vmatprep.subr.bf16.mxu1 %v10681_v22  ;;  %v10726_v63 = vcombine.low %v5337_v13, %v5341_v17  ;;  %v10720_v22 = vcombine.low %v5330_v20, %v5334_v36  ;;  %v10729_v2 = vcombine.high %v5338_v28, %v5342_v29  ;;  %v5357_v18 = vld [vmem:[#allocation9 + $0xd60] sm:$0xff] }
 0x446   :  { %v10963_v38 = vadd.f32 %v4736_v33, %v1672_v14  ;;  %v4738_v41 = vpop.f32.mrb[6].mxu0  ;;  %v10735_v14 = vcombine.high %v5345_v26, %v5349_v27  ;;  %v10734_v33 = vcombine.low %v5345_v26, %v5349_v27  ;;  %v10752_v17 = vcombine.low %v5362_v56, %v5366_v10  ;;  %v5378_v26 = vld [vmem:[#allocation9 + $0xe08] sm:$0xff] }
 0x447   :  { %v4909_v50 = vmul.f32 0.01, %v10962_v49  ;;  %v4739_v51 = vpop.f32.mrb[7].mxu0  ;;  %v10767_v36 = vcombine.high %v5377_v4, %v5381_v8  ;;  %v5382_v27 = vld [vmem:[#allocation9 + $0xe28] sm:$0xff] }
 0x448   :  { %v4910_v52 = vmul.f32 0.01, %v10963_v38  ;;  %8316 = vmatpush1.bf16.msra.mxu1 %v10680_v35  ;;  %v5346_v35 = vld [vmem:[#allocation9 + $0xd08] sm:$0xff] }
 0x449   :  { %v4917_v34 = vmax.f32 %v10962_v49, %v4909_v50  ;;  %8317 = vmatprep.subr.bf16.mxu1 %v10689_v37  ;;  %v5350_v49 = vld [vmem:[#allocation9 + $0xd28] sm:$0xff]  ;;  %v10728_v37 = vcombine.low %v5338_v28, %v5342_v29  ;;  %v10766_v29 = vcombine.low %v5377_v4, %v5381_v8  ;;  %v5421_v4 = vld [vmem:[#allocation9 + $0xf60] sm:$0xff] }
 0x44a   :  { %v4918_v1 = vmax.f32 %v10963_v38, %v4910_v52  ;;  %v10743_v38 = vcombine.high %v5353_v45, %v5357_v18  ;;  %v10737_v41 = vcombine.high %v5346_v35, %v5350_v49  ;;  %v5354_v50 = vld [vmem:[#allocation9 + $0xd48] sm:$0xff]  ;;  %v10742_v52 = vcombine.low %v5353_v45, %v5357_v18  ;;  %v5393_v45 = vld [vmem:[#allocation9 + $0xe80] sm:$0xff] }
 0x44b   :  { %v11830_v42 = vpack.c.bf16 %v4917_v34, %v4917_v34  ;;  %v5358_v51 = vld [vmem:[#allocation9 + $0xd68] sm:$0xff]  ;;  %v10751_v34 = vcombine.high %v5361_v46, %v5365_v48  ;;  %v5397_v18 = vld [vmem:[#allocation9 + $0xea0] sm:$0xff] }
 0x44c   :  { %v11826_v39 = vpack.c.bf16 %v4918_v1, %v4918_v1  ;;  %8318 = vmatpush1.bf16.msra.mxu1 %v10688_v53  ;;  %v10736_v53 = vcombine.low %v5346_v35, %v5350_v49  ;;  %v5373_v1 = vld [vmem:[#allocation9 + $0xde0] sm:$0xff]  ;;  %v5386_v35 = vld [vmem:[#allocation9 + $0xe48] sm:$0xff] }
 0x44d   :  { %8319 = vmatprep.subr.bf16.mxu1 %v10697_v54  ;;  %v10745_v54 = vcombine.high %v5354_v50, %v5358_v51  ;;  %v10758_v13 = vcombine.low %v5369_v55, %v5373_v1  ;;  %v5390_v49 = vld [vmem:[#allocation9 + $0xe68] sm:$0xff]  ;;  %v5401_v46 = vld [vmem:[#allocation9 + $0xec0] sm:$0xff] }
 0x44e   :  { %8157 = vmatprep.mubr.bf16.mxu0 %v11826_v39  ;;  %8321 = vmatprep.mubr.bf16.mxu1 %v11826_v39  ;;  %v5405_v48 = vld [vmem:[#allocation9 + $0xee0] sm:$0xff]  ;;  %v5410_v8 = vld [vmem:[#allocation9 + $0xf08] sm:$0xff] }
 0x44f   :  { %8158 = vmatmul.mubr.bf16.vlgmr.msra.gmra.mrb[8].mxu0 %v11830_v42 }
 0x450   :  { %8167 = vmatpush1.bf16.msra.mxu0 %v10702_v62  ;;  %8320 = vmatpush1.bf16.msra.mxu1 %v10696_v16  ;;  %v1680_v62 = vrot.slane %v11820_v30, %v11748_v19  ;;  %v10744_v16 = vcombine.low %v5354_v50, %v5358_v51  ;;  %v5394_v50 = vld [vmem:[#allocation9 + $0xe88] sm:$0xff] }
 0x451   :  { %8168 = vmatprep.subr.bf16.mxu0 %v10711_v0  ;;  %8330 = vmatprep.subr.bf16.mxu1 %v10705_v3  ;;  %v10759_v0 = vcombine.high %v5369_v55, %v5373_v1  ;;  %v10753_v3 = vcombine.high %v5362_v56, %v5366_v10  ;;  %v5398_v51 = vld [vmem:[#allocation9 + $0xea8] sm:$0xff]  ;;  %v5409_v55 = vld [vmem:[#allocation9 + $0xf00] sm:$0xff] }
 0x452   :  { %v5413_v1 = vld [vmem:[#allocation9 + $0xf20] sm:$0xff]  ;;  %v5402_v56 = vld [vmem:[#allocation9 + $0xec8] sm:$0xff] }
 0x453   :  { %8322 = vmatmul.mubr.bf16.vlgmr.msra.gmra.mrb[24].mxu1 %v11830_v42  ;;  %v5406_v10 = vld [vmem:[#allocation9 + $0xee8] sm:$0xff] }
 0x454   :  { %8169 = vmatpush1.bf16.msra.mxu0 %v10710_v11  ;;  %8331 = vmatpush1.bf16.msra.mxu1 %v10704_v58  ;;  %v5374_v11 = vld [vmem:[#allocation9 + $0xde8] sm:$0xff] }
 0x455   :  { %8170 = vmatprep.subr.bf16.mxu0 %v10719_v60  ;;  %8332 = vmatprep.subr.bf16.mxu1 %v10713_v12 }
 0x458   :  { %8171 = vmatpush1.bf16.msra.mxu0 %v10718_v21  ;;  %8333 = vmatpush1.bf16.msra.mxu1 %v10712_v23  ;;  %v10761_v21 = vcombine.high %v5370_v9, %v5374_v11 }
 0x459   :  { %8172 = vmatprep.subr.bf16.mxu0 %v10727_v24  ;;  %8334 = vmatprep.subr.bf16.mxu1 %v10721_v25  ;;  %v5385_v24 = vld [vmem:[#allocation9 + $0xe40] sm:$0xff] }
 0x45a   :  { %v5389_v25 = vld [vmem:[#allocation9 + $0xe60] sm:$0xff] }
 0x45c   :  { %8173 = vmatpush1.bf16.msra.mxu0 %v10726_v63  ;;  %8335 = vmatpush1.bf16.msra.mxu1 %v10720_v22  ;;  %v10760_v63 = vcombine.low %v5370_v9, %v5374_v11  ;;  %v5414_v9 = vld [vmem:[#allocation9 + $0xf28] sm:$0xff]  ;;  %v10798_v11 = vcombine.low %v5409_v55, %v5413_v1 }
 0x45d   :  { %8174 = vmatprep.subr.bf16.mxu0 %v10735_v14  ;;  %8336 = vmatprep.subr.bf16.mxu1 %v10729_v2  ;;  %v10775_v14 = vcombine.high %v5385_v24, %v5389_v25  ;;  %v10769_v2 = vcombine.high %v5378_v26, %v5382_v27 }
 0x460   :  { %8175 = vmatpush1.bf16.msra.mxu0 %v10734_v33  ;;  %8337 = vmatpush1.bf16.msra.mxu1 %v10728_v37  ;;  %v10774_v33 = vcombine.low %v5385_v24, %v5389_v25  ;;  %v10768_v37 = vcombine.low %v5378_v26, %v5382_v27  ;;  %v10800_v25 = vcombine.low %v5410_v8, %v5414_v9  ;;  %v5433_v27 = vld [vmem:[#allocation9 + $0xfc0] sm:$0xff] }
 0x461   :  { %8176 = vmatprep.subr.bf16.mxu0 %v10743_v38  ;;  %8338 = vmatprep.subr.bf16.mxu1 %v10737_v41  ;;  %v10783_v38 = vcombine.high %v5393_v45, %v5397_v18  ;;  %v10777_v41 = vcombine.high %v5386_v35, %v5390_v49 }
 0x464   :  { %8177 = vmatpush1.bf16.msra.mxu0 %v10742_v52  ;;  %8339 = vmatpush1.bf16.msra.mxu1 %v10736_v53  ;;  %v10782_v52 = vcombine.low %v5393_v45, %v5397_v18  ;;  %v10776_v53 = vcombine.low %v5386_v35, %v5390_v49  ;;  %v4935_v49 = vld [vmem:[#allocation9 + $0x30] sm:$0xff] }
 0x465   :  { %8178 = vmatprep.subr.bf16.mxu0 %v10751_v34  ;;  %8340 = vmatprep.subr.bf16.mxu1 %v10745_v54  ;;  %v10791_v34 = vcombine.high %v5401_v46, %v5405_v48  ;;  %v10785_v54 = vcombine.high %v5394_v50, %v5398_v51 }
 0x466   :  { %v11838_v5 = vpop.f32.mrb[20].mxu1 }
 0x467   :  { %v4900_v58 = vpop.f32.mrb[21].mxu1 }
 0x468   :  { %8179 = vmatpush1.bf16.msra.mxu0 %v10750_v61  ;;  %v10965_v60 = vadd.f32 %v4900_v58, %v1680_v62  ;;  %v4902_v12 = vpop.f32.mrb[22].mxu1  ;;  %8341 = vmatpush1.bf16.msra.mxu1 %v10744_v16  ;;  %v10790_v61 = vcombine.low %v5401_v46, %v5405_v48  ;;  %v10784_v62 = vcombine.low %v5394_v50, %v5398_v51  ;;  %v4939_v51 = vld [vmem:[#allocation9 + $0x50] sm:$0xff] }
 0x469   :  { %v4903_v20 = vpop.f32.mrb[23].mxu1  ;;  %8180 = vmatprep.subr.bf16.mxu0 %v10759_v0  ;;  %8342 = vmatprep.subr.bf16.mxu1 %v10753_v3  ;;  %v10799_v16 = vcombine.high %v5409_v55, %v5413_v1  ;;  %v10793_v0 = vcombine.high %v5402_v56, %v5406_v10  ;;  %v5417_v3 = vld [vmem:[#allocation9 + $0xf40] sm:$0xff]  ;;  %v1676_v58 = vrot.slane %v11820_v30, %v11745_v15 }
 0x46a   :  { %v4912_v23 = vmul.f32 0.01, %v10965_v60  ;;  %v10807_v12 = vcombine.high %v5417_v3, %v5421_v4  ;;  %v5429_v20 = vld [vmem:[#allocation9 + $0xfa0] sm:$0xff] }
 0x46b   :  { %v10964_v24 = vadd.f32 %v11838_v5, %v1676_v58  ;;  %v4931_v5 = vld [vmem:[#allocation9 + $0x10] sm:$0xff] }
 0x46c   :  { %v4920_v28 = vmax.f32 %v10965_v60, %v4912_v23  ;;  %8181 = vmatpush1.bf16.msra.mxu0 %v10758_v13  ;;  %8343 = vmatpush1.bf16.msra.mxu1 %v10752_v17  ;;  %v10792_v60 = vcombine.low %v5402_v56, %v5406_v10  ;;  %v10801_v13 = vcombine.high %v5410_v8, %v5414_v9  ;;  %v5425_v17 = vld [vmem:[#allocation9 + $0xf80] sm:$0xff]  ;;  %v4959_v58 = vld [vmem:[#allocation9 + $0xf0] sm:$0xff] }
 0x46d   :  { %8182 = vmatprep.subr.bf16.mxu0 %v10767_v36  ;;  %8344 = vmatprep.subr.bf16.mxu1 %v10761_v21  ;;  %v5418_v36 = vld [vmem:[#allocation9 + $0xf48] sm:$0xff]  ;;  %v10806_v23 = vcombine.low %v5417_v3, %v5421_v4  ;;  %v10815_v26 = vcombine.high %v5425_v17, %v5429_v20  ;;  %v10323_v48 = vcombine.high %v4931_v5, %v4935_v49 }
 0x46e   :  { %v11840_v22 = vpack.c.bf16 %v4920_v28, %v4920_v28  ;;  %v5422_v21 = vld [vmem:[#allocation9 + $0xf68] sm:$0xff]  ;;  %v5437_v28 = vld [vmem:[#allocation9 + $0xfe0] sm:$0xff] }
 0x46f   :  { %v10809_v30 = vcombine.high %v5418_v36, %v5422_v21  ;;  %v10808_v45 = vcombine.low %v5418_v36, %v5422_v21  ;;  %v10823_v18 = vcombine.high %v5433_v27, %v5437_v28  ;;  %v4963_v21 = vld [vmem:[#allocation9 + $0x110] sm:$0xff] }
 0x470   :  { %8183 = vmatpush1.bf16.msra.mxu0 %v10766_v29  ;;  %8198 = vmatprep.mubr.bf16.mxu0 %v11840_v22  ;;  %v5426_v29 = vld [vmem:[#allocation9 + $0xf88] sm:$0xff] }
 0x471   :  { %8345 = vmatpush1.bf16.msra.mxu1 %v10760_v63  ;;  %8362 = vmatprep.mubr.bf16.mxu1 %v11840_v22  ;;  %v5430_v63 = vld [vmem:[#allocation9 + $0xfa8] sm:$0xff] }
 0x472   :  { %8184 = vmatprep.subr.bf16.mxu0 %v10775_v14  ;;  %8346 = vmatprep.subr.bf16.mxu1 %v10769_v2  ;;  %v10814_v14 = vcombine.low %v5425_v17, %v5429_v20  ;;  %v4911_v2 = vmul.f32 0.01, %v10964_v24  ;;  %v10817_v35 = vcombine.high %v5426_v29, %v5430_v63  ;;  %v10816_v46 = vcombine.low %v5426_v29, %v5430_v63  ;;  %v4971_v29 = vld [vmem:[#allocation9 + $0x150] sm:$0xff] }
 0x473   :  { %v4975_v63 = vld [vmem:[#allocation9 + $0x170] sm:$0xff] }
 0x474   :  { %8185 = vmatpush1.bf16.msra.mxu0 %v10774_v33  ;;  %v5434_v33 = vld [vmem:[#allocation9 + $0xfc8] sm:$0xff] }
 0x475   :  { %8347 = vmatpush1.bf16.msra.mxu1 %v10768_v37  ;;  %8186 = vmatprep.subr.bf16.mxu0 %v10783_v38  ;;  %v5438_v37 = vld [vmem:[#allocation9 + $0xfe8] sm:$0xff]  ;;  %v10822_v38 = vcombine.low %v5433_v27, %v5437_v28 }
 0x476   :  { %8348 = vmatprep.subr.bf16.mxu1 %v10777_v41  ;;  %v4919_v41 = vmax.f32 %v10964_v24, %v4911_v2  ;;  %v10825_v50 = vcombine.high %v5434_v33, %v5438_v37  ;;  %v10824_v1 = vcombine.low %v5434_v33, %v5438_v37  ;;  %v4956_v24 = vld [vmem:[#allocation9 + $0xd8] sm:$0xff] }
 0x477   :  { %v4972_v33 = vld [vmem:[#allocation9 + $0x158] sm:$0xff] }
 0x478   :  { %8187 = vmatpush1.bf16.msra.mxu0 %v10782_v52  ;;  %v4943_v52 = vld [vmem:[#allocation9 + $0x70] sm:$0xff]  ;;  %v11847_v55 = vpack.c.bf16 %v4919_v41, %v4919_v41  ;;  %v4976_v37 = vld [vmem:[#allocation9 + $0x178] sm:$0xff] }
 0x479   :  { %8349 = vmatpush1.bf16.msra.mxu1 %v10776_v53  ;;  %8188 = vmatprep.subr.bf16.mxu0 %v10791_v34  ;;  %v4932_v53 = vld [vmem:[#allocation9 + $0x18] sm:$0xff]  ;;  %v10331_v56 = vcombine.high %v4939_v51, %v4943_v52  ;;  %v10330_v3 = vcombine.low %v4939_v51, %v4943_v52  ;;  %v4991_v51 = vld [vmem:[#allocation9 + $0x1f0] sm:$0xff] }
 0x47a   :  { %8350 = vmatprep.subr.bf16.mxu1 %v10785_v54  ;;  %v4936_v34 = vld [vmem:[#allocation9 + $0x38] sm:$0xff]  ;;  %v10322_v54 = vcombine.low %v4931_v5, %v4935_v49  ;;  %v4979_v5 = vld [vmem:[#allocation9 + $0x190] sm:$0xff] }
 0x47b   :  { %v10325_v10 = vcombine.high %v4932_v53, %v4936_v34  ;;  %v10324_v4 = vcombine.low %v4932_v53, %v4936_v34  ;;  %v4983_v49 = vld [vmem:[#allocation9 + $0x1b0] sm:$0xff]  ;;  %v4980_v52 = vld [vmem:[#allocation9 + $0x198] sm:$0xff] }
 0x47c   :  { %8189 = vmatpush1.bf16.msra.mxu0 %v10790_v61  ;;  %v4947_v61 = vld [vmem:[#allocation9 + $0x90] sm:$0xff]  ;;  %v4984_v53 = vld [vmem:[#allocation9 + $0x1b8] sm:$0xff]  ;;  %v10370_v34 = vcombine.low %v4979_v5, %v4983_v49 }
 0x47d   :  { %8351 = vmatpush1.bf16.msra.mxu1 %v10784_v62  ;;  %8190 = vmatprep.subr.bf16.mxu0 %v10799_v16  ;;  %v4951_v62 = vld [vmem:[#allocation9 + $0xb0] sm:$0xff]  ;;  %v4940_v16 = vld [vmem:[#allocation9 + $0x58] sm:$0xff] }
 0x47e   :  { %8352 = vmatprep.subr.bf16.mxu1 %v10793_v0  ;;  %v4944_v0 = vld [vmem:[#allocation9 + $0x78] sm:$0xff]  ;;  %v10339_v8 = vcombine.high %v4947_v61, %v4951_v62 }
 0x47f   :  { %v10333_v9 = vcombine.high %v4940_v16, %v4944_v0  ;;  %v10332_v17 = vcombine.low %v4940_v16, %v4944_v0  ;;  %v4992_v16 = vld [vmem:[#allocation9 + $0x1f8] sm:$0xff] }
 0x480   :  { %8191 = vmatpush1.bf16.msra.mxu0 %v10798_v11  ;;  %v4955_v11 = vld [vmem:[#allocation9 + $0xd0] sm:$0xff] }
 0x481   :  { %8353 = vmatpush1.bf16.msra.mxu1 %v10792_v60  ;;  %8192 = vmatprep.subr.bf16.mxu0 %v10807_v12  ;;  %v4948_v60 = vld [vmem:[#allocation9 + $0x98] sm:$0xff]  ;;  %v10347_v20 = vcombine.high %v4955_v11, %v4959_v58 }
 0x482   :  { %8354 = vmatprep.subr.bf16.mxu1 %v10801_v13  ;;  %v4952_v12 = vld [vmem:[#allocation9 + $0xb8] sm:$0xff]  ;;  %v10338_v13 = vcombine.low %v4947_v61, %v4951_v62  ;;  %v4999_v61 = vld [vmem:[#allocation9 + $0x230] sm:$0xff] }
 0x483   :  { %v10341_v36 = vcombine.high %v4948_v60, %v4952_v12  ;;  %v4988_v62 = vld [vmem:[#allocation9 + $0x1d8] sm:$0xff] }
 0x484   :  { %8193 = vmatpush1.bf16.msra.mxu0 %v10806_v23  ;;  %v4967_v23 = vld [vmem:[#allocation9 + $0x130] sm:$0xff] }
 0x485   :  { %8355 = vmatpush1.bf16.msra.mxu1 %v10800_v25  ;;  %8194 = vmatprep.subr.bf16.mxu0 %v10815_v26  ;;  %v4960_v25 = vld [vmem:[#allocation9 + $0xf8] sm:$0xff]  ;;  %v10346_v26 = vcombine.low %v4955_v11, %v4959_v58  ;;  %v10355_v27 = vcombine.high %v4963_v21, %v4967_v23  ;;  %v10354_v2 = vcombine.low %v4963_v21, %v4967_v23  ;;  %v5007_v11 = vld [vmem:[#allocation9 + $0x270] sm:$0xff] }
 0x486   :  { %8356 = vmatprep.subr.bf16.mxu1 %v10809_v30  ;;  %v10340_v30 = vcombine.low %v4948_v60, %v4952_v12  ;;  %v10349_v28 = vcombine.high %v4956_v24, %v4960_v25  ;;  %v4996_v58 = vld [vmem:[#allocation9 + $0x218] sm:$0xff]  ;;  %v5015_v21 = vld [vmem:[#allocation9 + $0x2b0] sm:$0xff] }
 0x487   :  { %v5000_v60 = vld [vmem:[#allocation9 + $0x238] sm:$0xff] }
 0x488   :  { %8195 = vmatpush1.bf16.msra.mxu0 %v10814_v14  ;;  %v4968_v14 = vld [vmem:[#allocation9 + $0x138] sm:$0xff] }
 0x489   :  { %8357 = vmatpush1.bf16.msra.mxu1 %v10808_v45  ;;  %8196 = vmatprep.subr.bf16.mxu0 %v10823_v18  ;;  %v10348_v45 = vcombine.low %v4956_v24, %v4960_v25  ;;  %v10363_v18 = vcombine.high %v4971_v29, %v4975_v63  ;;  %v5004_v23 = vld [vmem:[#allocation9 + $0x258] sm:$0xff] }
 0x48a   :  { %8358 = vmatprep.subr.bf16.mxu1 %v10817_v35  ;;  %v5008_v24 = vld [vmem:[#allocation9 + $0x278] sm:$0xff] }
 0x48c   :  { %8197 = vmatpush1.bf16.msra.mxu0 %v10822_v38  ;;  %v10362_v38 = vcombine.low %v4971_v29, %v4975_v63  ;;  %v5023_v29 = vld [vmem:[#allocation9 + $0x2f0] sm:$0xff]  ;;  %v5012_v63 = vld [vmem:[#allocation9 + $0x298] sm:$0xff] }
 0x48d   :  { %8359 = vmatpush1.bf16.msra.mxu1 %v10816_v46  ;;  %8371 = vmatprep.subr.bf16.mxu0 %v10323_v48  ;;  %v10371_v46 = vcombine.high %v4979_v5, %v4983_v49  ;;  %v10365_v48 = vcombine.high %v4972_v33, %v4976_v37  ;;  %v5031_v5 = vld [vmem:[#allocation9 + $0x330] sm:$0xff]  ;;  %v5020_v49 = vld [vmem:[#allocation9 + $0x2d8] sm:$0xff] }
 0x48e   :  { %8360 = vmatprep.subr.bf16.mxu1 %v10825_v50  ;;  %v4987_v50 = vld [vmem:[#allocation9 + $0x1d0] sm:$0xff] }
 0x48f   :  { %8199 = vmatmul.mubr.bf16.vlgmr.msra.gmra.mrb[8].mxu0 %v11847_v55  ;;  %v10378_v0 = vcombine.low %v4987_v50, %v4991_v51 }
 0x490   :  { %8372 = vmatpush1.bf16.msra.mxu0 %v10322_v54  ;;  %8403 = vmatprep.mubr.bf16.mxu0 %v11787_v32  ;;  %v10364_v54 = vcombine.low %v4972_v33, %v4976_v37  ;;  %v5024_v33 = vld [vmem:[#allocation9 + $0x2f8] sm:$0xff] }
 0x491   :  { %8361 = vmatpush1.bf16.msra.mxu1 %v10824_v1  ;;  %8373 = vmatprep.subr.bf16.mxu0 %v10331_v56  ;;  %v10379_v1 = vcombine.high %v4987_v50, %v4991_v51  ;;  %v10373_v56 = vcombine.high %v4980_v52, %v4984_v53  ;;  %v5039_v50 = vld [vmem:[#allocation9 + $0x370] sm:$0xff]  ;;  %v5028_v51 = vld [vmem:[#allocation9 + $0x318] sm:$0xff] }
 0x492   :  { %8535 = vmatprep.subr.bf16.mxu1 %v10325_v10  ;;  %v4995_v10 = vld [vmem:[#allocation9 + $0x210] sm:$0xff] }
 0x493   :  { %v10386_v12 = vcombine.low %v4995_v10, %v4999_v61 }
 0x494   :  { %8374 = vmatpush1.bf16.msra.mxu0 %v10330_v3  ;;  %8363 = vmatmul.mubr.bf16.vlgmr.msra.gmra.mrb[24].mxu1 %v11847_v55  ;;  %v10372_v3 = vcombine.low %v4980_v52, %v4984_v53  ;;  %v5032_v52 = vld [vmem:[#allocation9 + $0x338] sm:$0xff] }
 0x495   :  { %8536 = vmatpush1.bf16.msra.mxu1 %v10324_v4  ;;  %8567 = vmatprep.mubr.bf16.mxu1 %v11787_v32  ;;  %v4964_v32 = vld [vmem:[#allocation9 + $0x118] sm:$0xff]  ;;  %v10387_v4 = vcombine.high %v4995_v10, %v4999_v61  ;;  %v5047_v10 = vld [vmem:[#allocation9 + $0x3b0] sm:$0xff] }
 0x496   :  { %8375 = vmatprep.subr.bf16.mxu0 %v10339_v8  ;;  %8537 = vmatprep.subr.bf16.mxu1 %v10333_v9  ;;  %v10357_v35 = vcombine.high %v4964_v32, %v4968_v14  ;;  %v10356_v41 = vcombine.low %v4964_v32, %v4968_v14  ;;  %v10381_v8 = vcombine.high %v4988_v62, %v4992_v16  ;;  %v5003_v9 = vld [vmem:[#allocation9 + $0x250] sm:$0xff]  ;;  %v5016_v32 = vld [vmem:[#allocation9 + $0x2b8] sm:$0xff] }
 0x497   :  { %v10394_v25 = vcombine.low %v5003_v9, %v5007_v11  ;;  %v5036_v61 = vld [vmem:[#allocation9 + $0x358] sm:$0xff] }
 0x498   :  { %8376 = vmatpush1.bf16.msra.mxu0 %v10338_v13  ;;  %v10380_v13 = vcombine.low %v4988_v62, %v4992_v16  ;;  %v5040_v62 = vld [vmem:[#allocation9 + $0x378] sm:$0xff] }
 0x499   :  { %8538 = vmatpush1.bf16.msra.mxu1 %v10332_v17  ;;  %8377 = vmatprep.subr.bf16.mxu0 %v10347_v20  ;;  %v10395_v17 = vcombine.high %v5003_v9, %v5007_v11  ;;  %v10389_v20 = vcombine.high %v4996_v58, %v5000_v60  ;;  %v5055_v9 = vld [vmem:[#allocation9 + $0x3f0] sm:$0xff]  ;;  %v5044_v11 = vld [vmem:[#allocation9 + $0x398] sm:$0xff] }
 0x49a   :  { %8539 = vmatprep.subr.bf16.mxu1 %v10341_v36  ;;  %v5011_v36 = vld [vmem:[#allocation9 + $0x290] sm:$0xff] }
 0x49b   :  { %v10402_v14 = vcombine.low %v5011_v36, %v5015_v21 }
 0x49c   :  { %8378 = vmatpush1.bf16.msra.mxu0 %v10346_v26  ;;  %v10388_v26 = vcombine.low %v4996_v58, %v5000_v60  ;;  %v5048_v58 = vld [vmem:[#allocation9 + $0x3b8] sm:$0xff] }
 0x49d   :  { %8540 = vmatpush1.bf16.msra.mxu1 %v10340_v30  ;;  %8379 = vmatprep.subr.bf16.mxu0 %v10355_v27  ;;  %v10403_v30 = vcombine.high %v5011_v36, %v5015_v21  ;;  %v10397_v27 = vcombine.high %v5004_v23, %v5008_v24  ;;  %v5063_v36 = vld [vmem:[#allocation9 + $0x430] sm:$0xff]  ;;  %v5052_v21 = vld [vmem:[#allocation9 + $0x3d8] sm:$0xff] }
 0x49e   :  { %8541 = vmatprep.subr.bf16.mxu1 %v10349_v28  ;;  %v5019_v28 = vld [vmem:[#allocation9 + $0x2d0] sm:$0xff] }
 0x49f   :  { %v10410_v37 = vcombine.low %v5019_v28, %v5023_v29 }
 0x4a0   :  { %8380 = vmatpush1.bf16.msra.mxu0 %v10354_v2  ;;  %v10396_v2 = vcombine.low %v5004_v23, %v5008_v24  ;;  %v5056_v23 = vld [vmem:[#allocation9 + $0x3f8] sm:$0xff] }
 0x4a1   :  { %8542 = vmatpush1.bf16.msra.mxu1 %v10348_v45  ;;  %8381 = vmatprep.subr.bf16.mxu0 %v10363_v18  ;;  %v10411_v45 = vcombine.high %v5019_v28, %v5023_v29  ;;  %v10405_v18 = vcombine.high %v5012_v63, %v5016_v32  ;;  %v5071_v28 = vld [vmem:[#allocation9 + $0x470] sm:$0xff]  ;;  %v5060_v29 = vld [vmem:[#allocation9 + $0x418] sm:$0xff] }
 0x4a2   :  { %8543 = vmatprep.subr.bf16.mxu1 %v10357_v35  ;;  %v5027_v35 = vld [vmem:[#allocation9 + $0x310] sm:$0xff] }
 0x4a3   :  { %v10418_v53 = vcombine.low %v5027_v35, %v5031_v5 }
 0x4a4   :  { %8382 = vmatpush1.bf16.msra.mxu0 %v10362_v38  ;;  %v10404_v38 = vcombine.low %v5012_v63, %v5016_v32  ;;  %v5064_v63 = vld [vmem:[#allocation9 + $0x438] sm:$0xff] }
 0x4a5   :  { %8544 = vmatpush1.bf16.msra.mxu1 %v10356_v41  ;;  %8383 = vmatprep.subr.bf16.mxu0 %v10371_v46  ;;  %v10419_v41 = vcombine.high %v5027_v35, %v5031_v5  ;;  %v10413_v46 = vcombine.high %v5020_v49, %v5024_v33  ;;  %v5079_v35 = vld [vmem:[#allocation9 + $0x4b0] sm:$0xff]  ;;  %v5068_v5 = vld [vmem:[#allocation9 + $0x458] sm:$0xff] }
 0x4a6   :  { %8545 = vmatprep.subr.bf16.mxu1 %v10365_v48  ;;  %v5035_v48 = vld [vmem:[#allocation9 + $0x350] sm:$0xff] }
 0x4a7   :  { %v10426_v16 = vcombine.low %v5035_v48, %v5039_v50 }
 0x4a8   :  { %8384 = vmatpush1.bf16.msra.mxu0 %v10370_v34  ;;  %v10412_v34 = vcombine.low %v5020_v49, %v5024_v33  ;;  %v5072_v49 = vld [vmem:[#allocation9 + $0x478] sm:$0xff] }
 0x4a9   :  { %8546 = vmatpush1.bf16.msra.mxu1 %v10364_v54  ;;  %8385 = vmatprep.subr.bf16.mxu0 %v10379_v1  ;;  %v10427_v54 = vcombine.high %v5035_v48, %v5039_v50  ;;  %v10421_v1 = vcombine.high %v5028_v51, %v5032_v52  ;;  %v5087_v48 = vld [vmem:[#allocation9 + $0x4f0] sm:$0xff]  ;;  %v5076_v50 = vld [vmem:[#allocation9 + $0x498] sm:$0xff] }
 0x4aa   :  { %8547 = vmatprep.subr.bf16.mxu1 %v10373_v56  ;;  %v5043_v56 = vld [vmem:[#allocation9 + $0x390] sm:$0xff] }
 0x4ab   :  { %v10434_v60 = vcombine.low %v5043_v56, %v5047_v10 }
 0x4ac   :  { %8386 = vmatpush1.bf16.msra.mxu0 %v10378_v0  ;;  %v10420_v0 = vcombine.low %v5028_v51, %v5032_v52  ;;  %v5080_v51 = vld [vmem:[#allocation9 + $0x4b8] sm:$0xff] }
 0x4ad   :  { %8548 = vmatpush1.bf16.msra.mxu1 %v10372_v3  ;;  %8387 = vmatprep.subr.bf16.mxu0 %v10387_v4  ;;  %v10435_v3 = vcombine.high %v5043_v56, %v5047_v10  ;;  %v10429_v4 = vcombine.high %v5036_v61, %v5040_v62  ;;  %v5095_v56 = vld [vmem:[#allocation9 + $0x530] sm:$0xff]  ;;  %v5084_v10 = vld [vmem:[#allocation9 + $0x4d8] sm:$0xff] }
 0x4ae   :  { %8549 = vmatprep.subr.bf16.mxu1 %v10381_v8  ;;  %v5051_v8 = vld [vmem:[#allocation9 + $0x3d0] sm:$0xff] }
 0x4af   :  { %v10442_v24 = vcombine.low %v5051_v8, %v5055_v9 }
 0x4b0   :  { %8388 = vmatpush1.bf16.msra.mxu0 %v10386_v12  ;;  %v10428_v12 = vcombine.low %v5036_v61, %v5040_v62  ;;  %v5088_v61 = vld [vmem:[#allocation9 + $0x4f8] sm:$0xff] }
 0x4b1   :  { %8550 = vmatpush1.bf16.msra.mxu1 %v10380_v13  ;;  %8389 = vmatprep.subr.bf16.mxu0 %v10395_v17  ;;  %v10443_v13 = vcombine.high %v5051_v8, %v5055_v9  ;;  %v10437_v17 = vcombine.high %v5044_v11, %v5048_v58  ;;  %v5096_v8 = vld [vmem:[#allocation9 + $0x538] sm:$0xff] }
 0x4b2   :  { %8551 = vmatprep.subr.bf16.mxu1 %v10389_v20  ;;  %v5059_v20 = vld [vmem:[#allocation9 + $0x410] sm:$0xff] }
 0x4b3   :  { %v10450_v32 = vcombine.low %v5059_v20, %v5063_v36 }
 0x4b4   :  { %8390 = vmatpush1.bf16.msra.mxu0 %v10394_v25  ;;  %v10436_v25 = vcombine.low %v5044_v11, %v5048_v58  ;;  %v10476_v11 = vcombine.low %v5084_v10, %v5088_v61 }
 0x4b5   :  { %8552 = vmatpush1.bf16.msra.mxu1 %v10388_v26  ;;  %8391 = vmatprep.subr.bf16.mxu0 %v10403_v30  ;;  %v10451_v26 = vcombine.high %v5059_v20, %v5063_v36  ;;  %v10445_v30 = vcombine.high %v5052_v21, %v5056_v23  ;;  %v5104_v20 = vld [vmem:[#allocation9 + $0x578] sm:$0xff] }
 0x4b6   :  { %8553 = vmatprep.subr.bf16.mxu1 %v10397_v27  ;;  %v5067_v27 = vld [vmem:[#allocation9 + $0x450] sm:$0xff] }
 0x4b7   :  { %v10458_v33 = vcombine.low %v5067_v27, %v5071_v28 }
 0x4b8   :  { %8392 = vmatpush1.bf16.msra.mxu0 %v10402_v14  ;;  %v10444_v14 = vcombine.low %v5052_v21, %v5056_v23 }
 0x4b9   :  { %8554 = vmatpush1.bf16.msra.mxu1 %v10396_v2  ;;  %8393 = vmatprep.subr.bf16.mxu0 %v10411_v45  ;;  %v10459_v2 = vcombine.high %v5067_v27, %v5071_v28  ;;  %v10453_v45 = vcombine.high %v5060_v29, %v5064_v63  ;;  %v5112_v27 = vld [vmem:[#allocation9 + $0x5b8] sm:$0xff] }
 0x4ba   :  { %8555 = vmatprep.subr.bf16.mxu1 %v10405_v18  ;;  %v5075_v18 = vld [vmem:[#allocation9 + $0x490] sm:$0xff] }
 0x4bb   :  { %v10466_v52 = vcombine.low %v5075_v18, %v5079_v35 }
 0x4bc   :  { %8394 = vmatpush1.bf16.msra.mxu0 %v10410_v37  ;;  %v10452_v37 = vcombine.low %v5060_v29, %v5064_v63 }
 0x4bd   :  { %8556 = vmatpush1.bf16.msra.mxu1 %v10404_v38  ;;  %8395 = vmatprep.subr.bf16.mxu0 %v10419_v41  ;;  %v10467_v38 = vcombine.high %v5075_v18, %v5079_v35  ;;  %v10461_v41 = vcombine.high %v5068_v5, %v5072_v49  ;;  %v5120_v18 = vld [vmem:[#allocation9 + $0x5f8] sm:$0xff] }
 0x4be   :  { %8557 = vmatprep.subr.bf16.mxu1 %v10413_v46  ;;  %v5083_v46 = vld [vmem:[#allocation9 + $0x4d0] sm:$0xff] }
 0x4bf   :  { %v10474_v62 = vcombine.low %v5083_v46, %v5087_v48 }
 0x4c0   :  { %8396 = vmatpush1.bf16.msra.mxu0 %v10418_v53  ;;  %v10460_v53 = vcombine.low %v5068_v5, %v5072_v49 }
 0x4c1   :  { %8558 = vmatpush1.bf16.msra.mxu1 %v10412_v34  ;;  %8397 = vmatprep.subr.bf16.mxu0 %v10427_v54  ;;  %v10475_v34 = vcombine.high %v5083_v46, %v5087_v48  ;;  %v10469_v54 = vcombine.high %v5076_v50, %v5080_v51  ;;  %v5128_v46 = vld [vmem:[#allocation9 + $0x638] sm:$0xff] }
 0x4c2   :  { %8559 = vmatprep.subr.bf16.mxu1 %v10421_v1  ;;  %v5091_v1 = vld [vmem:[#allocation9 + $0x510] sm:$0xff] }
 0x4c3   :  { %v10482_v9 = vcombine.low %v5091_v1, %v5095_v56 }
 0x4c4   :  { %8398 = vmatpush1.bf16.msra.mxu0 %v10426_v16  ;;  %v10468_v16 = vcombine.low %v5076_v50, %v5080_v51 }
 0x4c5   :  { %8560 = vmatpush1.bf16.msra.mxu1 %v10420_v0  ;;  %8399 = vmatprep.subr.bf16.mxu0 %v10435_v3  ;;  %v10483_v0 = vcombine.high %v5091_v1, %v5095_v56  ;;  %v5099_v3 = vld [vmem:[#allocation9 + $0x550] sm:$0xff]  ;;  %v5136_v1 = vld [vmem:[#allocation9 + $0x678] sm:$0xff] }
 0x4c6   :  { %8561 = vmatprep.subr.bf16.mxu1 %v10429_v4  ;;  %v5103_v4 = vld [vmem:[#allocation9 + $0x570] sm:$0xff] }
 0x4c7   :  { %v10491_v58 = vcombine.high %v5099_v3, %v5103_v4  ;;  %v10490_v36 = vcombine.low %v5099_v3, %v5103_v4  ;;  %v5144_v3 = vld [vmem:[#allocation9 + $0x6b8] sm:$0xff] }
 0x4c8   :  { %8400 = vmatpush1.bf16.msra.mxu0 %v10434_v60 }
 0x4c9   :  { %8562 = vmatpush1.bf16.msra.mxu1 %v10428_v12  ;;  %8401 = vmatprep.subr.bf16.mxu0 %v10443_v13  ;;  %v5107_v12 = vld [vmem:[#allocation9 + $0x590] sm:$0xff] }
 0x4ca   :  { %8563 = vmatprep.subr.bf16.mxu1 %v10437_v17  ;;  %v5111_v13 = vld [vmem:[#allocation9 + $0x5b0] sm:$0xff]  ;;  %v5100_v17 = vld [vmem:[#allocation9 + $0x558] sm:$0xff] }
 0x4cb   :  { %v10499_v23 = vcombine.high %v5107_v12, %v5111_v13  ;;  %v10498_v28 = vcombine.low %v5107_v12, %v5111_v13  ;;  %v10492_v29 = vcombine.low %v5100_v17, %v5104_v20  ;;  %v5152_v12 = vld [vmem:[#allocation9 + $0x6f8] sm:$0xff] }
 0x4cc   :  { %8402 = vmatpush1.bf16.msra.mxu0 %v10442_v24  ;;  %v10493_v24 = vcombine.high %v5100_v17, %v5104_v20 }
 0x4cd   :  { %8564 = vmatpush1.bf16.msra.mxu1 %v10436_v25  ;;  %8412 = vmatprep.subr.bf16.mxu0 %v10451_v26  ;;  %v5115_v25 = vld [vmem:[#allocation9 + $0x5d0] sm:$0xff] }
 0x4ce   :  { %8565 = vmatprep.subr.bf16.mxu1 %v10445_v30  ;;  %v5119_v26 = vld [vmem:[#allocation9 + $0x5f0] sm:$0xff]  ;;  %v5108_v30 = vld [vmem:[#allocation9 + $0x598] sm:$0xff] }
 0x4cf   :  { %8404 = vmatmul.mubr.bf16.vlgmr.msra.gmra.mrb[12].mxu0 %v11799_v6  ;;  %v10507_v63 = vcombine.high %v5115_v25, %v5119_v26  ;;  %v10506_v35 = vcombine.low %v5115_v25, %v5119_v26  ;;  %v10500_v5 = vcombine.low %v5108_v30, %v5112_v27  ;;  %v5160_v25 = vld [vmem:[#allocation9 + $0x738] sm:$0xff] }
 0x4d0   :  { %8413 = vmatpush1.bf16.msra.mxu0 %v10450_v32  ;;  %8444 = vmatprep.mubr.bf16.mxu0 %v11801_v7  ;;  %v10501_v32 = vcombine.high %v5108_v30, %v5112_v27 }
 0x4d1   :  { %8566 = vmatpush1.bf16.msra.mxu1 %v10444_v14  ;;  %8414 = vmatprep.subr.bf16.mxu0 %v10459_v2  ;;  %v5123_v14 = vld [vmem:[#allocation9 + $0x610] sm:$0xff] }
 0x4d2   :  { %8576 = vmatprep.subr.bf16.mxu1 %v10453_v45  ;;  %v5127_v2 = vld [vmem:[#allocation9 + $0x630] sm:$0xff]  ;;  %v5116_v45 = vld [vmem:[#allocation9 + $0x5d8] sm:$0xff] }
 0x4d3   :  { %v10515_v49 = vcombine.high %v5123_v14, %v5127_v2  ;;  %v10514_v48 = vcombine.low %v5123_v14, %v5127_v2  ;;  %v10508_v50 = vcombine.low %v5116_v45, %v5120_v18  ;;  %v5168_v14 = vld [vmem:[#allocation9 + $0x778] sm:$0xff] }
 0x4d4   :  { %8415 = vmatpush1.bf16.msra.mxu0 %v10458_v33  ;;  %8568 = vmatmul.mubr.bf16.vlgmr.msra.gmra.mrb[28].mxu1 %v11799_v6  ;;  %v10477_v6 = vcombine.high %v5084_v10, %v5088_v61  ;;  %v10509_v33 = vcombine.high %v5116_v45, %v5120_v18 }
 0x4d5   :  { %8577 = vmatpush1.bf16.msra.mxu1 %v10452_v37  ;;  %8608 = vmatprep.mubr.bf16.mxu1 %v11801_v7  ;;  %v5092_v7 = vld [vmem:[#allocation9 + $0x518] sm:$0xff]  ;;  %v5131_v37 = vld [vmem:[#allocation9 + $0x650] sm:$0xff] }
 0x4d6   :  { %8416 = vmatprep.subr.bf16.mxu0 %v10467_v38  ;;  %8578 = vmatprep.subr.bf16.mxu1 %v10461_v41  ;;  %v10485_v60 = vcombine.high %v5092_v7, %v5096_v8  ;;  %v10484_v21 = vcombine.low %v5092_v7, %v5096_v8  ;;  %v5135_v38 = vld [vmem:[#allocation9 + $0x670] sm:$0xff]  ;;  %v5124_v41 = vld [vmem:[#allocation9 + $0x618] sm:$0xff] }
 0x4d7   :  { %v10523_v51 = vcombine.high %v5131_v37, %v5135_v38  ;;  %v10522_v56 = vcombine.low %v5131_v37, %v5135_v38  ;;  %v10516_v10 = vcombine.low %v5124_v41, %v5128_v46  ;;  %v5176_v37 = vld [vmem:[#allocation9 + $0x7b8] sm:$0xff] }
 0x4d8   :  { %8417 = vmatpush1.bf16.msra.mxu0 %v10466_v52  ;;  %v10517_v52 = vcombine.high %v5124_v41, %v5128_v46 }
 0x4d9   :  { %8579 = vmatpush1.bf16.msra.mxu1 %v10460_v53  ;;  %8418 = vmatprep.subr.bf16.mxu0 %v10475_v34  ;;  %v5139_v53 = vld [vmem:[#allocation9 + $0x690] sm:$0xff] }
 0x4da   :  { %8580 = vmatprep.subr.bf16.mxu1 %v10469_v54  ;;  %v5143_v34 = vld [vmem:[#allocation9 + $0x6b0] sm:$0xff]  ;;  %v5132_v54 = vld [vmem:[#allocation9 + $0x658] sm:$0xff] }
 0x4db   :  { %v10531_v61 = vcombine.high %v5139_v53, %v5143_v34  ;;  %v10530_v4 = vcombine.low %v5139_v53, %v5143_v34  ;;  %v10524_v7 = vcombine.low %v5132_v54, %v5136_v1  ;;  %v5184_v53 = vld [vmem:[#allocation9 + $0x7f8] sm:$0xff] }
 0x4dc   :  { %8419 = vmatpush1.bf16.msra.mxu0 %v10474_v62  ;;  %v10525_v62 = vcombine.high %v5132_v54, %v5136_v1 }
 0x4dd   :  { %8581 = vmatpush1.bf16.msra.mxu1 %v10468_v16  ;;  %8420 = vmatprep.subr.bf16.mxu0 %v10483_v0  ;;  %v5147_v16 = vld [vmem:[#allocation9 + $0x6d0] sm:$0xff] }
 0x4de   :  { %8582 = vmatprep.subr.bf16.mxu1 %v10477_v6  ;;  %v5151_v0 = vld [vmem:[#allocation9 + $0x6f0] sm:$0xff]  ;;  %v5140_v6 = vld [vmem:[#allocation9 + $0x698] sm:$0xff] }
 0x4df   :  { %v10539_v8 = vcombine.high %v5147_v16, %v5151_v0  ;;  %v10538_v13 = vcombine.low %v5147_v16, %v5151_v0  ;;  %v10532_v17 = vcombine.low %v5140_v6, %v5144_v3  ;;  %v5192_v16 = vld [vmem:[#allocation9 + $0x838] sm:$0xff] }
 0x4e0   :  { %8421 = vmatpush1.bf16.msra.mxu0 %v10482_v9  ;;  %v10533_v9 = vcombine.high %v5140_v6, %v5144_v3 }
 0x4e1   :  { %8583 = vmatpush1.bf16.msra.mxu1 %v10476_v11  ;;  %8422 = vmatprep.subr.bf16.mxu0 %v10491_v58  ;;  %v5155_v11 = vld [vmem:[#allocation9 + $0x710] sm:$0xff] }
 0x4e2   :  { %8584 = vmatprep.subr.bf16.mxu1 %v10485_v60  ;;  %v5159_v58 = vld [vmem:[#allocation9 + $0x730] sm:$0xff]  ;;  %v5148_v60 = vld [vmem:[#allocation9 + $0x6d8] sm:$0xff] }
 0x4e3   :  { %v10547_v20 = vcombine.high %v5155_v11, %v5159_v58  ;;  %v10546_v26 = vcombine.low %v5155_v11, %v5159_v58  ;;  %v10540_v30 = vcombine.low %v5148_v60, %v5152_v12  ;;  %v5200_v11 = vld [vmem:[#allocation9 + $0x878] sm:$0xff] }
 0x4e4   :  { %8423 = vmatpush1.bf16.msra.mxu0 %v10490_v36  ;;  %v10541_v36 = vcombine.high %v5148_v60, %v5152_v12 }
 0x4e5   :  { %8585 = vmatpush1.bf16.msra.mxu1 %v10484_v21  ;;  %8424 = vmatprep.subr.bf16.mxu0 %v10499_v23  ;;  %v5163_v21 = vld [vmem:[#allocation9 + $0x750] sm:$0xff] }
 0x4e6   :  { %8586 = vmatprep.subr.bf16.mxu1 %v10493_v24  ;;  %v5167_v23 = vld [vmem:[#allocation9 + $0x770] sm:$0xff]  ;;  %v5156_v24 = vld [vmem:[#allocation9 + $0x718] sm:$0xff] }
 0x4e7   :  { %v10555_v27 = vcombine.high %v5163_v21, %v5167_v23  ;;  %v10554_v2 = vcombine.low %v5163_v21, %v5167_v23  ;;  %v10548_v45 = vcombine.low %v5156_v24, %v5160_v25  ;;  %v5208_v21 = vld [vmem:[#allocation9 + $0x8b8] sm:$0xff] }
 0x4e8   :  { %8425 = vmatpush1.bf16.msra.mxu0 %v10498_v28  ;;  %v10549_v28 = vcombine.high %v5156_v24, %v5160_v25 }
 0x4e9   :  { %8587 = vmatpush1.bf16.msra.mxu1 %v10492_v29  ;;  %8426 = vmatprep.subr.bf16.mxu0 %v10507_v63  ;;  %v5171_v29 = vld [vmem:[#allocation9 + $0x790] sm:$0xff] }
 0x4ea   :  { %8588 = vmatprep.subr.bf16.mxu1 %v10501_v32  ;;  %v5175_v63 = vld [vmem:[#allocation9 + $0x7b0] sm:$0xff]  ;;  %v5164_v32 = vld [vmem:[#allocation9 + $0x758] sm:$0xff] }
 0x4eb   :  { %v10563_v18 = vcombine.high %v5171_v29, %v5175_v63  ;;  %v10562_v38 = vcombine.low %v5171_v29, %v5175_v63  ;;  %v10556_v41 = vcombine.low %v5164_v32, %v5168_v14  ;;  %v5216_v29 = vld [vmem:[#allocation9 + $0x8f8] sm:$0xff] }
 0x4ec   :  { %8427 = vmatpush1.bf16.msra.mxu0 %v10506_v35  ;;  %v10557_v35 = vcombine.high %v5164_v32, %v5168_v14 }
 0x4ed   :  { %8589 = vmatpush1.bf16.msra.mxu1 %v10500_v5  ;;  %8428 = vmatprep.subr.bf16.mxu0 %v10515_v49  ;;  %v5179_v5 = vld [vmem:[#allocation9 + $0x7d0] sm:$0xff] }
 0x4ee   :  { %8590 = vmatprep.subr.bf16.mxu1 %v10509_v33  ;;  %v5183_v49 = vld [vmem:[#allocation9 + $0x7f0] sm:$0xff]  ;;  %v5172_v33 = vld [vmem:[#allocation9 + $0x798] sm:$0xff] }
 0x4ef   :  { %v10571_v46 = vcombine.high %v5179_v5, %v5183_v49  ;;  %v10570_v34 = vcombine.low %v5179_v5, %v5183_v49  ;;  %v10564_v54 = vcombine.low %v5172_v33, %v5176_v37 }
 0x4f0   :  { %8429 = vmatpush1.bf16.msra.mxu0 %v10514_v48  ;;  %v10565_v48 = vcombine.high %v5172_v33, %v5176_v37  ;;  %v5235_v37 = vld [vmem:[#allocation9 + $0x990] sm:$0xff] }
 0x4f1   :  { %8591 = vmatpush1.bf16.msra.mxu1 %v10508_v50  ;;  %8430 = vmatprep.subr.bf16.mxu0 %v10523_v51  ;;  %v5187_v50 = vld [vmem:[#allocation9 + $0x810] sm:$0xff] }
 0x4f2   :  { %8592 = vmatprep.subr.bf16.mxu1 %v10517_v52  ;;  %v5191_v51 = vld [vmem:[#allocation9 + $0x830] sm:$0xff]  ;;  %v5180_v52 = vld [vmem:[#allocation9 + $0x7d8] sm:$0xff] }
 0x4f3   :  { %v10579_v1 = vcombine.high %v5187_v50, %v5191_v51  ;;  %v10578_v0 = vcombine.low %v5187_v50, %v5191_v51  ;;  %v10572_v6 = vcombine.low %v5180_v52, %v5184_v53 }
 0x4f4   :  { %8431 = vmatpush1.bf16.msra.mxu0 %v10522_v56  ;;  %v10573_v56 = vcombine.high %v5180_v52, %v5184_v53  ;;  %v5243_v53 = vld [vmem:[#allocation9 + $0x9d0] sm:$0xff] }
 0x4f5   :  { %8593 = vmatpush1.bf16.msra.mxu1 %v10516_v10  ;;  %8432 = vmatprep.subr.bf16.mxu0 %v10531_v61  ;;  %v5195_v10 = vld [vmem:[#allocation9 + $0x850] sm:$0xff] }
 0x4f6   :  { %8594 = vmatprep.subr.bf16.mxu1 %v10525_v62  ;;  %v5199_v61 = vld [vmem:[#allocation9 + $0x870] sm:$0xff]  ;;  %v5188_v62 = vld [vmem:[#allocation9 + $0x818] sm:$0xff] }
 0x4f7   :  { %v10587_v3 = vcombine.high %v5195_v10, %v5199_v61  ;;  %v10586_v58 = vcombine.low %v5195_v10, %v5199_v61  ;;  %v10580_v60 = vcombine.low %v5188_v62, %v5192_v16 }
 0x4f8   :  { %8433 = vmatpush1.bf16.msra.mxu0 %v10530_v4  ;;  %v10581_v4 = vcombine.high %v5188_v62, %v5192_v16  ;;  %v5251_v16 = vld [vmem:[#allocation9 + $0xa10] sm:$0xff] }
 0x4f9   :  { %8595 = vmatpush1.bf16.msra.mxu1 %v10524_v7  ;;  %8434 = vmatprep.subr.bf16.mxu0 %v10539_v8  ;;  %v5203_v7 = vld [vmem:[#allocation9 + $0x890] sm:$0xff] }
 0x4fa   :  { %8596 = vmatprep.subr.bf16.mxu1 %v10533_v9  ;;  %v5207_v8 = vld [vmem:[#allocation9 + $0x8b0] sm:$0xff]  ;;  %v5196_v9 = vld [vmem:[#allocation9 + $0x858] sm:$0xff] }
 0x4fb   :  { %v10595_v12 = vcombine.high %v5203_v7, %v5207_v8  ;;  %v10594_v23 = vcombine.low %v5203_v7, %v5207_v8  ;;  %v10588_v24 = vcombine.low %v5196_v9, %v5200_v11 }
 0x4fc   :  { %8435 = vmatpush1.bf16.msra.mxu0 %v10538_v13  ;;  %v10589_v13 = vcombine.high %v5196_v9, %v5200_v11  ;;  %v5259_v11 = vld [vmem:[#allocation9 + $0xa50] sm:$0xff] }
 0x4fd   :  { %8597 = vmatpush1.bf16.msra.mxu1 %v10532_v17  ;;  %8436 = vmatprep.subr.bf16.mxu0 %v10547_v20  ;;  %v5211_v17 = vld [vmem:[#allocation9 + $0x8d0] sm:$0xff] }
 0x4fe   :  { %8598 = vmatprep.subr.bf16.mxu1 %v10541_v36  ;;  %v5215_v20 = vld [vmem:[#allocation9 + $0x8f0] sm:$0xff]  ;;  %v5204_v36 = vld [vmem:[#allocation9 + $0x898] sm:$0xff] }
 0x4ff   :  { %v10603_v25 = vcombine.high %v5211_v17, %v5215_v20  ;;  %v10602_v63 = vcombine.low %v5211_v17, %v5215_v20  ;;  %v10596_v32 = vcombine.low %v5204_v36, %v5208_v21 }
 0x500   :  { %8437 = vmatpush1.bf16.msra.mxu0 %v10546_v26  ;;  %v10597_v26 = vcombine.high %v5204_v36, %v5208_v21  ;;  %v5267_v21 = vld [vmem:[#allocation9 + $0xa90] sm:$0xff] }
 0x501   :  { %8599 = vmatpush1.bf16.msra.mxu1 %v10540_v30  ;;  %8438 = vmatprep.subr.bf16.mxu0 %v10555_v27  ;;  %v5219_v30 = vld [vmem:[#allocation9 + $0x910] sm:$0xff] }
 0x502   :  { %8600 = vmatprep.subr.bf16.mxu1 %v10549_v28  ;;  %v5223_v27 = vld [vmem:[#allocation9 + $0x930] sm:$0xff]  ;;  %v5212_v28 = vld [vmem:[#allocation9 + $0x8d8] sm:$0xff] }
 0x503   :  { %v10611_v14 = vcombine.high %v5219_v30, %v5223_v27  ;;  %v10604_v5 = vcombine.low %v5212_v28, %v5216_v29 }
 0x504   :  { %8439 = vmatpush1.bf16.msra.mxu0 %v10554_v2  ;;  %v5227_v2 = vld [vmem:[#allocation9 + $0x950] sm:$0xff] }
 0x505   :  { %8601 = vmatpush1.bf16.msra.mxu1 %v10548_v45  ;;  %8440 = vmatprep.subr.bf16.mxu0 %v10563_v18  ;;  %v5231_v45 = vld [vmem:[#allocation9 + $0x970] sm:$0xff]  ;;  %v5224_v18 = vld [vmem:[#allocation9 + $0x938] sm:$0xff] }
 0x506   :  { %8602 = vmatprep.subr.bf16.mxu1 %v10557_v35  ;;  %v10610_v35 = vcombine.low %v5219_v30, %v5223_v27  ;;  %v10619_v49 = vcombine.high %v5227_v2, %v5231_v45 }
 0x508   :  { %8441 = vmatpush1.bf16.msra.mxu0 %v10562_v38  ;;  %v5239_v38 = vld [vmem:[#allocation9 + $0x9b0] sm:$0xff] }
 0x509   :  { %8603 = vmatpush1.bf16.msra.mxu1 %v10556_v41  ;;  %8442 = vmatprep.subr.bf16.mxu0 %v10571_v46  ;;  %v5228_v41 = vld [vmem:[#allocation9 + $0x958] sm:$0xff]  ;;  %v10627_v51 = vcombine.high %v5235_v37, %v5239_v38 }
 0x50a   :  { %8604 = vmatprep.subr.bf16.mxu1 %v10565_v48  ;;  %v5232_v46 = vld [vmem:[#allocation9 + $0x978] sm:$0xff]  ;;  %v10618_v48 = vcombine.low %v5227_v2, %v5231_v45 }
 0x50b   :  { %v10621_v52 = vcombine.high %v5228_v41, %v5232_v46  ;;  %v10620_v10 = vcombine.low %v5228_v41, %v5232_v46  ;;  %v5291_v46 = vld [vmem:[#allocation9 + $0xb50] sm:$0xff] }
 0x50c   :  { %8443 = vmatpush1.bf16.msra.mxu0 %v10570_v34  ;;  %v5247_v34 = vld [vmem:[#allocation9 + $0x9f0] sm:$0xff] }
 0x50d   :  { %8605 = vmatpush1.bf16.msra.mxu1 %v10564_v54  ;;  %8453 = vmatprep.subr.bf16.mxu0 %v10579_v1  ;;  %v5236_v54 = vld [vmem:[#allocation9 + $0x998] sm:$0xff]  ;;  %v10635_v61 = vcombine.high %v5243_v53, %v5247_v34 }
 0x50e   :  { %8606 = vmatprep.subr.bf16.mxu1 %v10573_v56  ;;  %v5240_v1 = vld [vmem:[#allocation9 + $0x9b8] sm:$0xff]  ;;  %v10626_v56 = vcombine.low %v5235_v37, %v5239_v38 }
 0x50f   :  { %8445 = vmatmul.mubr.bf16.vlgmr.msra.gmra.mrb[12].mxu0 %v11810_v47  ;;  %v10629_v62 = vcombine.high %v5236_v54, %v5240_v1  ;;  %v10628_v7 = vcombine.low %v5236_v54, %v5240_v1  ;;  %v5299_v1 = vld [vmem:[#allocation9 + $0xb90] sm:$0xff] }
 0x510   :  { %8454 = vmatpush1.bf16.msra.mxu0 %v10578_v0  ;;  %8485 = vmatprep.mubr.bf16.mxu0 %v11826_v39  ;;  %v5255_v0 = vld [vmem:[#allocation9 + $0xa30] sm:$0xff] }
 0x511   :  { %8607 = vmatpush1.bf16.msra.mxu1 %v10572_v6  ;;  %8455 = vmatprep.subr.bf16.mxu0 %v10587_v3  ;;  %v5244_v6 = vld [vmem:[#allocation9 + $0x9d8] sm:$0xff]  ;;  %v10643_v8 = vcombine.high %v5251_v16, %v5255_v0 }
 0x512   :  { %8617 = vmatprep.subr.bf16.mxu1 %v10581_v4  ;;  %v5248_v3 = vld [vmem:[#allocation9 + $0x9f8] sm:$0xff]  ;;  %v10634_v4 = vcombine.low %v5243_v53, %v5247_v34 }
 0x513   :  { %v10637_v9 = vcombine.high %v5244_v6, %v5248_v3  ;;  %v10636_v17 = vcombine.low %v5244_v6, %v5248_v3  ;;  %v5307_v3 = vld [vmem:[#allocation9 + $0xbd0] sm:$0xff] }
 0x514   :  { %8456 = vmatpush1.bf16.msra.mxu0 %v10586_v58  ;;  %8609 = vmatmul.mubr.bf16.vlgmr.msra.gmra.mrb[28].mxu1 %v11810_v47  ;;  %v10605_v47 = vcombine.high %v5212_v28, %v5216_v29  ;;  %v5263_v58 = vld [vmem:[#allocation9 + $0xa70] sm:$0xff] }
 0x515   :  { %8618 = vmatpush1.bf16.msra.mxu1 %v10580_v60  ;;  %8649 = vmatprep.mubr.bf16.mxu1 %v11826_v39  ;;  %v5220_v39 = vld [vmem:[#allocation9 + $0x918] sm:$0xff]  ;;  %v10651_v20 = vcombine.high %v5259_v11, %v5263_v58  ;;  %v5275_v29 = vld [vmem:[#allocation9 + $0xad0] sm:$0xff] }
 0x516   :  { %8457 = vmatprep.subr.bf16.mxu0 %v10595_v12  ;;  %8619 = vmatprep.subr.bf16.mxu1 %v10589_v13  ;;  %v10613_v33 = vcombine.high %v5220_v39, %v5224_v18  ;;  %v10612_v50 = vcombine.low %v5220_v39, %v5224_v18  ;;  %v5252_v60 = vld [vmem:[#allocation9 + $0xa18] sm:$0xff]  ;;  %v10642_v13 = vcombine.low %v5251_v16, %v5255_v0  ;;  %v5283_v18 = vld [vmem:[#allocation9 + $0xb10] sm:$0xff] }
 0x517   :  { %v5256_v12 = vld [vmem:[#allocation9 + $0xa38] sm:$0xff] }
 0x518   :  { %8458 = vmatpush1.bf16.msra.mxu0 %v10594_v23  ;;  %v10645_v36 = vcombine.high %v5252_v60, %v5256_v12  ;;  %v5271_v23 = vld [vmem:[#allocation9 + $0xab0] sm:$0xff]  ;;  %v10644_v30 = vcombine.low %v5252_v60, %v5256_v12 }
 0x519   :  { %8620 = vmatpush1.bf16.msra.mxu1 %v10588_v24  ;;  %8459 = vmatprep.subr.bf16.mxu0 %v10603_v25  ;;  %v5260_v24 = vld [vmem:[#allocation9 + $0xa58] sm:$0xff]  ;;  %v10659_v27 = vcombine.high %v5267_v21, %v5271_v23  ;;  %v5315_v12 = vld [vmem:[#allocation9 + $0xc10] sm:$0xff] }
 0x51a   :  { %8621 = vmatprep.subr.bf16.mxu1 %v10597_v26  ;;  %v5264_v25 = vld [vmem:[#allocation9 + $0xa78] sm:$0xff]  ;;  %v10650_v26 = vcombine.low %v5259_v11, %v5263_v58 }
 0x51b   :  { %v10653_v28 = vcombine.high %v5260_v24, %v5264_v25  ;;  %v10652_v2 = vcombine.low %v5260_v24, %v5264_v25  ;;  %v5323_v25 = vld [vmem:[#allocation9 + $0xc50] sm:$0xff] }
 0x51c   :  { %8460 = vmatpush1.bf16.msra.mxu0 %v10602_v63  ;;  %v5279_v63 = vld [vmem:[#allocation9 + $0xaf0] sm:$0xff] }
 0x51d   :  { %8622 = vmatpush1.bf16.msra.mxu1 %v10596_v32  ;;  %8461 = vmatprep.subr.bf16.mxu0 %v10611_v14  ;;  %v5268_v32 = vld [vmem:[#allocation9 + $0xa98] sm:$0xff]  ;;  %v10667_v45 = vcombine.high %v5275_v29, %v5279_v63 }
 0x51e   :  { %8623 = vmatprep.subr.bf16.mxu1 %v10605_v47  ;;  %v5272_v14 = vld [vmem:[#allocation9 + $0xab8] sm:$0xff]  ;;  %v10658_v47 = vcombine.low %v5267_v21, %v5271_v23 }
 0x51f   :  { %v10661_v39 = vcombine.high %v5268_v32, %v5272_v14  ;;  %v10660_v37 = vcombine.low %v5268_v32, %v5272_v14  ;;  %v5331_v14 = vld [vmem:[#allocation9 + $0xc90] sm:$0xff] }
 0x520   :  { %8462 = vmatpush1.bf16.msra.mxu0 %v10610_v35  ;;  %v5287_v35 = vld [vmem:[#allocation9 + $0xb30] sm:$0xff] }
 0x521   :  { %8624 = vmatpush1.bf16.msra.mxu1 %v10604_v5  ;;  %8463 = vmatprep.subr.bf16.mxu0 %v10619_v49  ;;  %v5276_v5 = vld [vmem:[#allocation9 + $0xad8] sm:$0xff]  ;;  %v10675_v38 = vcombine.high %v5283_v18, %v5287_v35 }
 0x522   :  { %8625 = vmatprep.subr.bf16.mxu1 %v10613_v33  ;;  %v5280_v49 = vld [vmem:[#allocation9 + $0xaf8] sm:$0xff]  ;;  %v10666_v33 = vcombine.low %v5275_v29, %v5279_v63 }
 0x523   :  { %v10669_v41 = vcombine.high %v5276_v5, %v5280_v49  ;;  %v10668_v53 = vcombine.low %v5276_v5, %v5280_v49  ;;  %v5339_v49 = vld [vmem:[#allocation9 + $0xcd0] sm:$0xff] }
 0x524   :  { %8464 = vmatpush1.bf16.msra.mxu0 %v10618_v48  ;;  %v5295_v48 = vld [vmem:[#allocation9 + $0xb70] sm:$0xff] }
 0x525   :  { %8626 = vmatpush1.bf16.msra.mxu1 %v10612_v50  ;;  %8465 = vmatprep.subr.bf16.mxu0 %v10627_v51  ;;  %v5284_v50 = vld [vmem:[#allocation9 + $0xb18] sm:$0xff]  ;;  %v10683_v34 = vcombine.high %v5291_v46, %v5295_v48 }
 0x526   :  { %8627 = vmatprep.subr.bf16.mxu1 %v10621_v52  ;;  %v5288_v51 = vld [vmem:[#allocation9 + $0xb38] sm:$0xff]  ;;  %v10674_v52 = vcombine.low %v5283_v18, %v5287_v35 }
 0x527   :  { %v10677_v54 = vcombine.high %v5284_v50, %v5288_v51  ;;  %v10676_v16 = vcombine.low %v5284_v50, %v5288_v51  ;;  %v5347_v51 = vld [vmem:[#allocation9 + $0xd10] sm:$0xff] }
 0x528   :  { %8466 = vmatpush1.bf16.msra.mxu0 %v10626_v56  ;;  %v5303_v56 = vld [vmem:[#allocation9 + $0xbb0] sm:$0xff] }
 0x529   :  { %8628 = vmatpush1.bf16.msra.mxu1 %v10620_v10  ;;  %8467 = vmatprep.subr.bf16.mxu0 %v10635_v61  ;;  %v5292_v10 = vld [vmem:[#allocation9 + $0xb58] sm:$0xff]  ;;  %v10691_v0 = vcombine.high %v5299_v1, %v5303_v56 }
 0x52a   :  { %8629 = vmatprep.subr.bf16.mxu1 %v10629_v62  ;;  %v5296_v61 = vld [vmem:[#allocation9 + $0xb78] sm:$0xff]  ;;  %v10682_v62 = vcombine.low %v5291_v46, %v5295_v48 }
 0x52b   :  { %v10685_v6 = vcombine.high %v5292_v10, %v5296_v61  ;;  %v10684_v11 = vcombine.low %v5292_v10, %v5296_v61  ;;  %v5355_v10 = vld [vmem:[#allocation9 + $0xd50] sm:$0xff] }
 0x52c   :  { %8468 = vmatpush1.bf16.msra.mxu0 %v10634_v4  ;;  %v5311_v4 = vld [vmem:[#allocation9 + $0xbf0] sm:$0xff] }
 0x52d   :  { %8630 = vmatpush1.bf16.msra.mxu1 %v10628_v7  ;;  %8469 = vmatprep.subr.bf16.mxu0 %v10643_v8  ;;  %v5300_v7 = vld [vmem:[#allocation9 + $0xb98] sm:$0xff]  ;;  %v10699_v58 = vcombine.high %v5307_v3, %v5311_v4  ;;  %v5359_v61 = vld [vmem:[#allocation9 + $0xd70] sm:$0xff] }
 0x52e   :  { %8631 = vmatprep.subr.bf16.mxu1 %v10637_v9  ;;  %v5304_v8 = vld [vmem:[#allocation9 + $0xbb8] sm:$0xff]  ;;  %v10690_v9 = vcombine.low %v5299_v1, %v5303_v56 }
 0x52f   :  { %v10693_v60 = vcombine.high %v5300_v7, %v5304_v8  ;;  %v10692_v21 = vcombine.low %v5300_v7, %v5304_v8  ;;  %v5367_v7 = vld [vmem:[#allocation9 + $0xdb0] sm:$0xff]  ;;  %v5356_v8 = vld [vmem:[#allocation9 + $0xd58] sm:$0xff] }
 0x530   :  { %8470 = vmatpush1.bf16.msra.mxu0 %v10642_v13  ;;  %v5319_v13 = vld [vmem:[#allocation9 + $0xc30] sm:$0xff] }
 0x531   :  { %8632 = vmatpush1.bf16.msra.mxu1 %v10636_v17  ;;  %8471 = vmatprep.subr.bf16.mxu0 %v10651_v20  ;;  %v5308_v17 = vld [vmem:[#allocation9 + $0xbd8] sm:$0xff]  ;;  %v10707_v23 = vcombine.high %v5315_v12, %v5319_v13 }
 0x532   :  { %8633 = vmatprep.subr.bf16.mxu1 %v10645_v36  ;;  %v5312_v20 = vld [vmem:[#allocation9 + $0xbf8] sm:$0xff]  ;;  %v10698_v36 = vcombine.low %v5307_v3, %v5311_v4  ;;  %v5363_v4 = vld [vmem:[#allocation9 + $0xd90] sm:$0xff] }
 0x533   :  { %v10701_v24 = vcombine.high %v5308_v17, %v5312_v20  ;;  %v10700_v29 = vcombine.low %v5308_v17, %v5312_v20  ;;  %v5371_v17 = vld [vmem:[#allocation9 + $0xdd0] sm:$0xff] }
 0x534   :  { %8472 = vmatpush1.bf16.msra.mxu0 %v10650_v26  ;;  %v5327_v26 = vld [vmem:[#allocation9 + $0xc70] sm:$0xff] }
 0x535   :  { %8634 = vmatpush1.bf16.msra.mxu1 %v10644_v30  ;;  %8473 = vmatprep.subr.bf16.mxu0 %v10659_v27  ;;  %v5316_v30 = vld [vmem:[#allocation9 + $0xc18] sm:$0xff]  ;;  %v10715_v63 = vcombine.high %v5323_v25, %v5327_v26  ;;  %v5375_v20 = vld [vmem:[#allocation9 + $0xdf0] sm:$0xff] }
 0x536   :  { %8635 = vmatprep.subr.bf16.mxu1 %v10653_v28  ;;  %v5320_v27 = vld [vmem:[#allocation9 + $0xc38] sm:$0xff]  ;;  %v10706_v28 = vcombine.low %v5315_v12, %v5319_v13 }
 0x537   :  { %v10709_v32 = vcombine.high %v5316_v30, %v5320_v27  ;;  %v10708_v18 = vcombine.low %v5316_v30, %v5320_v27  ;;  %v10763_v27 = vcombine.high %v5371_v17, %v5375_v20 }
 0x538   :  { %8474 = vmatpush1.bf16.msra.mxu0 %v10658_v47  ;;  %v5335_v47 = vld [vmem:[#allocation9 + $0xcb0] sm:$0xff] }
 0x539   :  { %8636 = vmatpush1.bf16.msra.mxu1 %v10652_v2  ;;  %8475 = vmatprep.subr.bf16.mxu0 %v10667_v45  ;;  %v5324_v2 = vld [vmem:[#allocation9 + $0xc58] sm:$0xff]  ;;  %v10723_v35 = vcombine.high %v5331_v14, %v5335_v47 }
 0x53a   :  { %8637 = vmatprep.subr.bf16.mxu1 %v10661_v39  ;;  %v5328_v45 = vld [vmem:[#allocation9 + $0xc78] sm:$0xff]  ;;  %v10714_v39 = vcombine.low %v5323_v25, %v5327_v26  ;;  %v10754_v25 = vcombine.low %v5363_v4, %v5367_v7 }
 0x53b   :  { %v10717_v5 = vcombine.high %v5324_v2, %v5328_v45  ;;  %v10716_v46 = vcombine.low %v5324_v2, %v5328_v45  ;;  %v10762_v45 = vcombine.low %v5371_v17, %v5375_v20  ;;  %v5419_v20 = vld [vmem:[#allocation9 + $0xf50] sm:$0xff] }
 0x53c   :  { %8476 = vmatpush1.bf16.msra.mxu0 %v10666_v33  ;;  %v5343_v33 = vld [vmem:[#allocation9 + $0xcf0] sm:$0xff] }
 0x53d   :  { %8638 = vmatpush1.bf16.msra.mxu1 %v10660_v37  ;;  %8477 = vmatprep.subr.bf16.mxu0 %v10675_v38  ;;  %v5332_v37 = vld [vmem:[#allocation9 + $0xc98] sm:$0xff]  ;;  %v10731_v48 = vcombine.high %v5339_v49, %v5343_v33 }
 0x53e   :  { %8639 = vmatprep.subr.bf16.mxu1 %v10669_v41  ;;  %v5336_v38 = vld [vmem:[#allocation9 + $0xcb8] sm:$0xff]  ;;  %v10722_v41 = vcombine.low %v5331_v14, %v5335_v47 }
 0x53f   :  { %v10725_v50 = vcombine.high %v5332_v37, %v5336_v38  ;;  %v10724_v1 = vcombine.low %v5332_v37, %v5336_v38  ;;  %v5372_v14 = vld [vmem:[#allocation9 + $0xdd8] sm:$0xff]  ;;  %v5391_v37 = vld [vmem:[#allocation9 + $0xe70] sm:$0xff] }
 0x540   :  { %8478 = vmatpush1.bf16.msra.mxu0 %v10674_v52  ;;  %v5351_v52 = vld [vmem:[#allocation9 + $0xd30] sm:$0xff]  ;;  %v5376_v47 = vld [vmem:[#allocation9 + $0xdf8] sm:$0xff] }
 0x541   :  { %8640 = vmatpush1.bf16.msra.mxu1 %v10668_v53  ;;  %8479 = vmatprep.subr.bf16.mxu0 %v10683_v34  ;;  %v5340_v53 = vld [vmem:[#allocation9 + $0xcd8] sm:$0xff]  ;;  %v10739_v56 = vcombine.high %v5347_v51, %v5351_v52 }
 0x542   :  { %8641 = vmatprep.subr.bf16.mxu1 %v10677_v54  ;;  %v5344_v34 = vld [vmem:[#allocation9 + $0xcf8] sm:$0xff]  ;;  %v10730_v54 = vcombine.low %v5339_v49, %v5343_v33  ;;  %v10765_v49 = vcombine.high %v5372_v14, %v5376_v47  ;;  %v5387_v33 = vld [vmem:[#allocation9 + $0xe50] sm:$0xff] }
 0x543   :  { %v5380_v38 = vld [vmem:[#allocation9 + $0xe18] sm:$0xff] }
 0x544   :  { %8480 = vmatpush1.bf16.msra.mxu0 %v10682_v62  ;;  %v5352_v62 = vld [vmem:[#allocation9 + $0xd38] sm:$0xff] }
 0x545   :  { %8642 = vmatpush1.bf16.msra.mxu1 %v10676_v16  ;;  %8481 = vmatprep.subr.bf16.mxu0 %v10691_v0  ;;  %v10738_v16 = vcombine.low %v5347_v51, %v5351_v52  ;;  %v10732_v0 = vcombine.low %v5340_v53, %v5344_v34  ;;  %v5395_v52 = vld [vmem:[#allocation9 + $0xe90] sm:$0xff] }
 0x546   :  { %8643 = vmatprep.subr.bf16.mxu1 %v10685_v6  ;;  %v10747_v6 = vcombine.high %v5355_v10, %v5359_v61 }
 0x548   :  { %8482 = vmatpush1.bf16.msra.mxu0 %v10690_v9  ;;  %v5360_v9 = vld [vmem:[#allocation9 + $0xd78] sm:$0xff] }
 0x549   :  { %8644 = vmatpush1.bf16.msra.mxu1 %v10684_v11  ;;  %8483 = vmatprep.subr.bf16.mxu0 %v10699_v58  ;;  %v10746_v11 = vcombine.low %v5355_v10, %v5359_v61  ;;  %v10749_v13 = vcombine.high %v5356_v8, %v5360_v9  ;;  %v10748_v30 = vcombine.low %v5356_v8, %v5360_v9  ;;  %v5403_v61 = vld [vmem:[#allocation9 + $0xed0] sm:$0xff]  ;;  %v5404_v9 = vld [vmem:[#allocation9 + $0xed8] sm:$0xff] }
 0x54a   :  { %8645 = vmatprep.subr.bf16.mxu1 %v10693_v60  ;;  %v10755_v60 = vcombine.high %v5363_v4, %v5367_v7  ;;  %v5411_v7 = vld [vmem:[#allocation9 + $0xf10] sm:$0xff] }
 0x54b   :  { %v5415_v8 = vld [vmem:[#allocation9 + $0xf30] sm:$0xff] }
 0x54c   :  { %8484 = vmatpush1.bf16.msra.mxu0 %v10698_v36 }
 0x54d   :  { %8646 = vmatpush1.bf16.msra.mxu1 %v10692_v21  ;;  %8494 = vmatprep.subr.bf16.mxu0 %v10707_v23  ;;  %v5364_v21 = vld [vmem:[#allocation9 + $0xd98] sm:$0xff] }
 0x54e   :  { %8647 = vmatprep.subr.bf16.mxu1 %v10701_v24  ;;  %v5368_v23 = vld [vmem:[#allocation9 + $0xdb8] sm:$0xff] }
 0x54f   :  { %8486 = vmatmul.mubr.bf16.vlgmr.msra.gmra.mrb[12].mxu0 %v11830_v42 }
 0x550   :  { %8495 = vmatpush1.bf16.msra.mxu0 %v10706_v28  ;;  %8526 = vmatprep.mubr.bf16.mxu0 %v11840_v22  ;;  %v10757_v28 = vcombine.high %v5364_v21, %v5368_v23 }
 0x551   :  { %8648 = vmatpush1.bf16.msra.mxu1 %v10700_v29  ;;  %8496 = vmatprep.subr.bf16.mxu0 %v10715_v63  ;;  %v5379_v29 = vld [vmem:[#allocation9 + $0xe10] sm:$0xff] }
 0x552   :  { %8658 = vmatprep.subr.bf16.mxu1 %v10709_v32  ;;  %v5383_v63 = vld [vmem:[#allocation9 + $0xe30] sm:$0xff] }
 0x554   :  { %8497 = vmatpush1.bf16.msra.mxu0 %v10714_v39  ;;  %8650 = vmatmul.mubr.bf16.vlgmr.msra.gmra.mrb[28].mxu1 %v11830_v42  ;;  %v10733_v42 = vcombine.high %v5340_v53, %v5344_v34  ;;  %v5399_v53 = vld [vmem:[#allocation9 + $0xeb0] sm:$0xff]  ;;  %v5388_v34 = vld [vmem:[#allocation9 + $0xe58] sm:$0xff] }
 0x555   :  { %8659 = vmatpush1.bf16.msra.mxu1 %v10708_v18  ;;  %8690 = vmatprep.mubr.bf16.mxu1 %v11840_v22  ;;  %v5348_v22 = vld [vmem:[#allocation9 + $0xd18] sm:$0xff]  ;;  %v10756_v18 = vcombine.low %v5364_v21, %v5368_v23  ;;  %v5423_v21 = vld [vmem:[#allocation9 + $0xf70] sm:$0xff]  ;;  %v11873_v23 = vld [vmem:[#allocation10] sm:$0xff] }
 0x556   :  { %8498 = vmatprep.subr.bf16.mxu0 %v10723_v35  ;;  %8660 = vmatprep.subr.bf16.mxu1 %v10717_v5  ;;  %v10741_v3 = vcombine.high %v5348_v22, %v5352_v62  ;;  %v10740_v58 = vcombine.low %v5348_v22, %v5352_v62  ;;  %v10771_v35 = vcombine.high %v5379_v29, %v5383_v63  ;;  %v5407_v22 = vld [vmem:[#allocation9 + $0xef0] sm:$0xff]  ;;  %v5396_v62 = vld [vmem:[#allocation9 + $0xe98] sm:$0xff] }
 0x558   :  { %8499 = vmatpush1.bf16.msra.mxu0 %v10722_v41  ;;  %v5384_v41 = vld [vmem:[#allocation9 + $0xe38] sm:$0xff] }
 0x559   :  { %8661 = vmatpush1.bf16.msra.mxu1 %v10716_v46  ;;  %8500 = vmatprep.subr.bf16.mxu0 %v10731_v48  ;;  %v10770_v46 = vcombine.low %v5379_v29, %v5383_v63  ;;  %v10764_v48 = vcombine.low %v5372_v14, %v5376_v47  ;;  %v10773_v51 = vcombine.high %v5380_v38, %v5384_v41  ;;  %v5427_v63 = vld [vmem:[#allocation9 + $0xf90] sm:$0xff]  ;;  %v5420_v47 = vld [vmem:[#allocation9 + $0xf58] sm:$0xff] }
 0x55a   :  { %8662 = vmatprep.subr.bf16.mxu1 %v10725_v50  ;;  %v10779_v50 = vcombine.high %v5387_v33, %v5391_v37  ;;  %v5431_v14 = vld [vmem:[#allocation9 + $0xfb0] sm:$0xff] }
 0x55c   :  { %8501 = vmatpush1.bf16.msra.mxu0 %v10730_v54  ;;  %v5392_v54 = vld [vmem:[#allocation9 + $0xe78] sm:$0xff] }
 0x55d   :  { %8663 = vmatpush1.bf16.msra.mxu1 %v10724_v1  ;;  %8502 = vmatprep.subr.bf16.mxu0 %v10739_v56  ;;  %v10778_v1 = vcombine.low %v5387_v33, %v5391_v37  ;;  %v10772_v56 = vcombine.low %v5380_v38, %v5384_v41  ;;  %v10781_v10 = vcombine.high %v5388_v34, %v5392_v54  ;;  %v5435_v33 = vld [vmem:[#allocation9 + $0xfd0] sm:$0xff]  ;;  %v5428_v38 = vld [vmem:[#allocation9 + $0xf98] sm:$0xff] }
 0x55e   :  { %8664 = vmatprep.subr.bf16.mxu1 %v10733_v42  ;;  %v10787_v42 = vcombine.high %v5395_v52, %v5399_v53  ;;  %v5439_v37 = vld [vmem:[#allocation9 + $0xff0] sm:$0xff]  ;;  %v5432_v41 = vld [vmem:[#allocation9 + $0xfb8] sm:$0xff] }
 0x560   :  { %8503 = vmatpush1.bf16.msra.mxu0 %v10738_v16  ;;  %v5400_v16 = vld [vmem:[#allocation9 + $0xeb8] sm:$0xff] }
 0x561   :  { %8665 = vmatpush1.bf16.msra.mxu1 %v10732_v0  ;;  %8504 = vmatprep.subr.bf16.mxu0 %v10747_v6  ;;  %v10786_v0 = vcombine.low %v5395_v52, %v5399_v53  ;;  %v10780_v6 = vcombine.low %v5388_v34, %v5392_v54  ;;  %v10789_v4 = vcombine.high %v5396_v62, %v5400_v16  ;;  %v5436_v53 = vld [vmem:[#allocation9 + $0xfd8] sm:$0xff] }
 0x562   :  { %v11865_v12 = vpop.f32.mrb[8].mxu0  ;;  %8666 = vmatprep.subr.bf16.mxu1 %v10741_v3  ;;  %v10795_v3 = vcombine.high %v5403_v61, %v5407_v22  ;;  %v10821_v52 = vcombine.high %v5428_v38, %v5432_v41  ;;  %v5440_v34 = vld [vmem:[#allocation9 + $0xff8] sm:$0xff]  ;;  %v10826_v54 = vcombine.low %v5435_v33, %v5439_v37 }
 0x563   :  { %v11867_v36 = vpop.f32.mrb[9].mxu0 }
 0x564   :  { %v8204_v24 = vpop.f32.mrb[10].mxu0  ;;  %8505 = vmatpush1.bf16.msra.mxu0 %v10746_v11  ;;  %v5408_v11 = vld [vmem:[#allocation9 + $0xef8] sm:$0xff] }
 0x565   :  { %v8205_v26 = vpop.f32.mrb[11].mxu0  ;;  %8667 = vmatpush1.bf16.msra.mxu1 %v10740_v58  ;;  %8506 = vmatprep.subr.bf16.mxu0 %v10755_v60  ;;  %v10794_v58 = vcombine.low %v5403_v61, %v5407_v22  ;;  %v10788_v60 = vcombine.low %v5396_v62, %v5400_v16  ;;  %v10797_v17 = vcombine.high %v5404_v9, %v5408_v11  ;;  %v5412_v24 = vld [vmem:[#allocation9 + $0xf18] sm:$0xff] }
 0x566   :  { %8668 = vmatprep.subr.bf16.mxu1 %v10749_v13  ;;  %v10803_v13 = vcombine.high %v5411_v7, %v5415_v8  ;;  %v10802_v26 = vcombine.low %v5411_v7, %v5415_v8  ;;  %v10828_v61 = vcombine.low %v5436_v53, %v5440_v34  ;;  %v11101_v22 = vld [vmem:[#allocation12 + $0x14] ss:$8 sps:$4 sm:$0xff]   ;;  %v11099_v16 = vld [vmem:[#allocation12 + $0x10] ss:$8 sps:$4 sm:$0xff]   ;;  %v11110_v7 = vld [vmem:[#allocation12 + $0x44] ss:$8 sps:$4 sm:$0xff]  }
 0x567   :  { %v11869_v32 = vpop.f32.mrb[24].mxu1  ;;  %v11108_v8 = vld [vmem:[#allocation12 + $0x40] ss:$8 sps:$4 sm:$0xff]  }
 0x568   :  { %8507 = vmatpush1.bf16.msra.mxu0 %v10754_v25  ;;  %v11871_v2 = vpop.f32.mrb[25].mxu1  ;;  %v5416_v25 = vld [vmem:[#allocation9 + $0xf38] sm:$0xff] }
 0x569   :  { %v8368_v39 = vpop.f32.mrb[26].mxu1  ;;  %8669 = vmatpush1.bf16.msra.mxu1 %v10748_v30  ;;  %8508 = vmatprep.subr.bf16.mxu0 %v10763_v27  ;;  %v10796_v30 = vcombine.low %v5404_v9, %v5408_v11  ;;  %v10811_v27 = vcombine.high %v5419_v20, %v5423_v21  ;;  %v10805_v29 = vcombine.high %v5412_v24, %v5416_v25  ;;  %v11113_v9 = vld [vmem:[#allocation12 + $0x54] ss:$8 sps:$4 sm:$0xff]   ;;  %v11111_v11 = vld [vmem:[#allocation12 + $0x50] ss:$8 sps:$4 sm:$0xff]  }
 0x56a   :  { %v8369_v5 = vpop.f32.mrb[27].mxu1  ;;  %8670 = vmatprep.subr.bf16.mxu1 %v10757_v28  ;;  %v5450_v28 = vrot.slane %v11873_v23, %v11691_v43  ;;  %v10810_v39 = vcombine.low %v5419_v20, %v5423_v21  ;;  %v11120_v20 = vld [vmem:[#allocation12 + $0x80] ss:$8 sps:$4 sm:$0xff]   ;;  %v11125_v21 = vld [vmem:[#allocation12 + $0x94] ss:$8 sps:$4 sm:$0xff]  }
 0x56c   :  { %8509 = vmatpush1.bf16.msra.mxu0 %v10762_v45  ;;  %v5424_v45 = vld [vmem:[#allocation9 + $0xf78] sm:$0xff]  ;;  %v10967_v5 = vadd.f32 %v11867_v36, %v5450_v28  ;;  %v10820_v36 = vcombine.low %v5428_v38, %v5432_v41  ;;  %v11134_v28 = vld [vmem:[#allocation12 + $0xc4] ss:$8 sps:$4 sm:$0xff]  }
 0x56d   :  { %8671 = vmatpush1.bf16.msra.mxu1 %v10756_v18  ;;  %8510 = vmatprep.subr.bf16.mxu0 %v10771_v35  ;;  %v10804_v18 = vcombine.low %v5412_v24, %v5416_v25  ;;  %v10819_v35 = vcombine.high %v5427_v63, %v5431_v14  ;;  %v11123_v24 = vld [vmem:[#allocation12 + $0x90] ss:$8 sps:$4 sm:$0xff]   ;;  %v11128_v25 = vld [vmem:[#allocation12 + $0xa4] ss:$8 sps:$4 sm:$0xff]  }
 0x56e   :  { %8672 = vmatprep.subr.bf16.mxu1 %v10765_v49  ;;  %v10813_v49 = vcombine.high %v5420_v47, %v5424_v45  ;;  %v11141_v38 = vld [vmem:[#allocation12 + $0xf0] ss:$8 sps:$4 sm:$0xff]  }
 0x570   :  { %8511 = vmatpush1.bf16.msra.mxu0 %v10770_v46  ;;  %v10818_v46 = vcombine.low %v5427_v63, %v5431_v14  ;;  %v5446_v63 = vrot.slane %v11873_v23, %v11686_v40  ;;  %v11137_v14 = vld [vmem:[#allocation12 + $0xd4] ss:$8 sps:$4 sm:$0xff]  }
 0x571   :  { %8673 = vmatpush1.bf16.msra.mxu1 %v10764_v48  ;;  %8512 = vmatprep.subr.bf16.mxu0 %v10779_v50  ;;  %v10812_v48 = vcombine.low %v5420_v47, %v5424_v45  ;;  %v10827_v50 = vcombine.high %v5435_v33, %v5439_v37  ;;  %v5458_v47 = vrot.slane %v11873_v23, %v11712_v59  ;;  %v11135_v45 = vld [vmem:[#allocation12 + $0xd0] ss:$8 sps:$4 sm:$0xff]   ;;  %v11143_v33 = vld [vmem:[#allocation12 + $0xf4] ss:$8 sps:$4 sm:$0xff]  }
 0x572   :  { %8674 = vmatprep.subr.bf16.mxu1 %v10773_v51  ;;  %v8700_v51 = vmul.f32 0.01, %v10967_v5 }
 0x574   :  { %8513 = vmatpush1.bf16.msra.mxu0 %v10778_v1  ;;  %v11098_v1 = vld [vmem:[#allocation12 + $0x4] ss:$8 sps:$4 sm:$0xff]  }
 0x575   :  { %8675 = vmatpush1.bf16.msra.mxu1 %v10772_v56  ;;  %8514 = vmatprep.subr.bf16.mxu0 %v10787_v42  ;;  %v8708_v56 = vmax.f32 %v10967_v5, %v8700_v51  ;;  %v10829_v42 = vcombine.high %v5436_v53, %v5440_v34  ;;  %v11138_v5 = vld [vmem:[#allocation12 + $0xe0] ss:$8 sps:$4 sm:$0xff]   ;;  %v11155_v34 = vld [vmem:[#allocation12 + $0x134] ss:$8 sps:$4 sm:$0xff]  }
 0x576   :  { %8676 = vmatprep.subr.bf16.mxu1 %v10781_v10  ;;  %v11096_v10 = vld [vmem:[#allocation12] ss:$8 sps:$4 sm:$0xff]  }
 0x577   :  { %v8716_v62 = vpack.c.bf16 %v8708_v56, %v8708_v56  ;;  %v11150_v53 = vld [vmem:[#allocation12 + $0x120] ss:$8 sps:$4 sm:$0xff]   ;;  %v11161_v56 = vld [vmem:[#allocation12 + $0x154] ss:$8 sps:$4 sm:$0xff]  }
 0x578   :  { %8515 = vmatpush1.bf16.msra.mxu0 %v10786_v0  ;;  %v11104_v0 = vld [vmem:[#allocation12 + $0x24] ss:$8 sps:$4 sm:$0xff]  }
 0x579   :  { %8677 = vmatpush1.bf16.msra.mxu1 %v10780_v6  ;;  %8516 = vmatprep.subr.bf16.mxu0 %v10795_v3  ;;  %v11102_v6 = vld [vmem:[#allocation12 + $0x20] ss:$8 sps:$4 sm:$0xff]   ;;  %v11107_v3 = vld [vmem:[#allocation12 + $0x34] ss:$8 sps:$4 sm:$0xff]  }
 0x57a   :  { %8678 = vmatprep.subr.bf16.mxu1 %v10789_v4  ;;  %v11105_v4 = vld [vmem:[#allocation12 + $0x30] ss:$8 sps:$4 sm:$0xff]  }
 0x57c   :  { %8517 = vmatpush1.bf16.msra.mxu0 %v10794_v58  ;;  %v11116_v58 = vld [vmem:[#allocation12 + $0x64] ss:$8 sps:$4 sm:$0xff]  }
 0x57d   :  { %8679 = vmatpush1.bf16.msra.mxu1 %v10788_v60  ;;  %8518 = vmatprep.subr.bf16.mxu0 %v10803_v13  ;;  %v11114_v60 = vld [vmem:[#allocation12 + $0x60] ss:$8 sps:$4 sm:$0xff]   ;;  %v11119_v13 = vld [vmem:[#allocation12 + $0x74] ss:$8 sps:$4 sm:$0xff]  }
 0x57e   :  { %8680 = vmatprep.subr.bf16.mxu1 %v10797_v17  ;;  %v11122_v17 = vld [vmem:[#allocation12 + $0x84] ss:$8 sps:$4 sm:$0xff]  }
 0x580   :  { %8519 = vmatpush1.bf16.msra.mxu0 %v10802_v26  ;;  %v11126_v26 = vld [vmem:[#allocation12 + $0xa0] ss:$8 sps:$4 sm:$0xff]  }
 0x581   :  { %8681 = vmatpush1.bf16.msra.mxu1 %v10796_v30  ;;  %8520 = vmatprep.subr.bf16.mxu0 %v10811_v27  ;;  %v11131_v30 = vld [vmem:[#allocation12 + $0xb4] ss:$8 sps:$4 sm:$0xff]   ;;  %v11129_v27 = vld [vmem:[#allocation12 + $0xb0] ss:$8 sps:$4 sm:$0xff]  }
 0x582   :  { %8682 = vmatprep.subr.bf16.mxu1 %v10805_v29  ;;  %v11132_v29 = vld [vmem:[#allocation12 + $0xc0] ss:$8 sps:$4 sm:$0xff]  }
 0x584   :  { %8521 = vmatpush1.bf16.msra.mxu0 %v10810_v39  ;;  %v10966_v39 = vadd.f32 %v11865_v12, %v5446_v63  ;;  %v11149_v12 = vld [vmem:[#allocation12 + $0x114] ss:$8 sps:$4 sm:$0xff]   ;;  %v11200_v63 = vld [vmem:[#allocation12 + $0x224] ss:$8 sps:$4 sm:$0xff]  }
 0x585   :  { %8683 = vmatpush1.bf16.msra.mxu1 %v10804_v18  ;;  %8522 = vmatprep.subr.bf16.mxu0 %v10819_v35  ;;  %v11140_v18 = vld [vmem:[#allocation12 + $0xe4] ss:$8 sps:$4 sm:$0xff]   ;;  %v10969_v35 = vadd.f32 %v11871_v2, %v5458_v47  ;;  %v11147_v2 = vld [vmem:[#allocation12 + $0x110] ss:$8 sps:$4 sm:$0xff]   ;;  %v11203_v47 = vld [vmem:[#allocation12 + $0x234] ss:$8 sps:$4 sm:$0xff]  }
 0x586   :  { %8684 = vmatprep.subr.bf16.mxu1 %v10813_v49  ;;  %v8699_v49 = vmul.f32 0.01, %v10966_v39 }
 0x587   :  { %v8702_v37 = vmul.f32 0.01, %v10969_v35 }
 0x588   :  { %8523 = vmatpush1.bf16.msra.mxu0 %v10818_v46  ;;  %v8707_v41 = vmax.f32 %v10966_v39, %v8699_v49  ;;  %v11146_v46 = vld [vmem:[#allocation12 + $0x104] ss:$8 sps:$4 sm:$0xff]  }
 0x589   :  { %8685 = vmatpush1.bf16.msra.mxu1 %v10812_v48  ;;  %8524 = vmatprep.subr.bf16.mxu0 %v10827_v50  ;;  %v8710_v59 = vmax.f32 %v10969_v35, %v8702_v37  ;;  %v11144_v48 = vld [vmem:[#allocation12 + $0x100] ss:$8 sps:$4 sm:$0xff]   ;;  %v11206_v39 = vld [vmem:[#allocation12 + $0x244] ss:$8 sps:$4 sm:$0xff]   ;;  %v11209_v35 = vld [vmem:[#allocation12 + $0x254] ss:$8 sps:$4 sm:$0xff]  }
 0x58a   :  { %8686 = vmatprep.subr.bf16.mxu1 %v10821_v52  ;;  %v8715_v50 = vpack.c.bf16 %v8707_v41, %v8707_v41  ;;  %v11152_v52 = vld [vmem:[#allocation12 + $0x124] ss:$8 sps:$4 sm:$0xff]   ;;  %v11215_v37 = vld [vmem:[#allocation12 + $0x274] ss:$8 sps:$4 sm:$0xff]  }
 0x58b   :  { %v8718_v51 = vpack.c.bf16 %v8710_v59, %v8710_v59  ;;  %v11212_v49 = vld [vmem:[#allocation12 + $0x264] ss:$8 sps:$4 sm:$0xff]   ;;  %v11221_v59 = vld [vmem:[#allocation12 + $0x294] ss:$8 sps:$4 sm:$0xff]  }
 0x58c   :  { %8525 = vmatpush1.bf16.msra.mxu0 %v10826_v54  ;;  %v11153_v54 = vld [vmem:[#allocation12 + $0x130] ss:$8 sps:$4 sm:$0xff]   ;;  %v11218_v41 = vld [vmem:[#allocation12 + $0x284] ss:$8 sps:$4 sm:$0xff]  }
 0x58d   :  { %8687 = vmatpush1.bf16.msra.mxu1 %v10820_v36  ;;  %9503 = vmatprep.subr.bf16.mxu0 %v11098_v1  ;;  %v11158_v36 = vld [vmem:[#allocation12 + $0x144] ss:$8 sps:$4 sm:$0xff]   ;;  %v11156_v1 = vld [vmem:[#allocation12 + $0x140] ss:$8 sps:$4 sm:$0xff]  }
 0x58e   :  { %8688 = vmatprep.subr.bf16.mxu1 %v10829_v42  ;;  %v11159_v42 = vld [vmem:[#allocation12 + $0x150] ss:$8 sps:$4 sm:$0xff]  }
 0x58f   :  { %8527 = vmatmul.mubr.bf16.vlgmr.msra.gmra.mrb[12].mxu0 %v11847_v55 }
 0x590   :  { %9504 = vmatpush1.bf16.msra.mxu0 %v11096_v10  ;;  %9535 = vmatprep.mubr.bf16.mxu0 %v8716_v62  ;;  %v11164_v10 = vld [vmem:[#allocation12 + $0x164] ss:$8 sps:$4 sm:$0xff]   ;;  %v11165_v62 = vld [vmem:[#allocation12 + $0x170] ss:$8 sps:$4 sm:$0xff]  }
 0x591   :  { %8689 = vmatpush1.bf16.msra.mxu1 %v10828_v61  ;;  %9505 = vmatprep.subr.bf16.mxu0 %v11101_v22  ;;  %v11162_v61 = vld [vmem:[#allocation12 + $0x160] ss:$8 sps:$4 sm:$0xff]   ;;  %v11167_v22 = vld [vmem:[#allocation12 + $0x174] ss:$8 sps:$4 sm:$0xff]  }
 0x594   :  { %9506 = vmatpush1.bf16.msra.mxu0 %v11099_v16  ;;  %8691 = vmatmul.mubr.bf16.vlgmr.msra.gmra.mrb[28].mxu1 %v11847_v55  ;;  %v11117_v55 = vld [vmem:[#allocation12 + $0x70] ss:$8 sps:$4 sm:$0xff]   ;;  %v11170_v16 = vld [vmem:[#allocation12 + $0x184] ss:$8 sps:$4 sm:$0xff]  }
 0x595   :  { %9507 = vmatprep.subr.bf16.mxu0 %v11104_v0  ;;  %v11168_v0 = vld [vmem:[#allocation12 + $0x180] ss:$8 sps:$4 sm:$0xff]  }
 0x598   :  { %9508 = vmatpush1.bf16.msra.mxu0 %v11102_v6  ;;  %v11173_v6 = vld [vmem:[#allocation12 + $0x194] ss:$8 sps:$4 sm:$0xff]  }
 0x599   :  { %9509 = vmatprep.subr.bf16.mxu0 %v11107_v3  ;;  %v11171_v3 = vld [vmem:[#allocation12 + $0x190] ss:$8 sps:$4 sm:$0xff]  }
 0x59c   :  { %9510 = vmatpush1.bf16.msra.mxu0 %v11105_v4  ;;  %v11176_v4 = vld [vmem:[#allocation12 + $0x1a4] ss:$8 sps:$4 sm:$0xff]  }
 0x59d   :  { %9511 = vmatprep.subr.bf16.mxu0 %v11110_v7  ;;  %v11174_v7 = vld [vmem:[#allocation12 + $0x1a0] ss:$8 sps:$4 sm:$0xff]  }
 0x5a0   :  { %9512 = vmatpush1.bf16.msra.mxu0 %v11108_v8  ;;  %v11179_v8 = vld [vmem:[#allocation12 + $0x1b4] ss:$8 sps:$4 sm:$0xff]  }
 0x5a1   :  { %9513 = vmatprep.subr.bf16.mxu0 %v11113_v9  ;;  %v11177_v9 = vld [vmem:[#allocation12 + $0x1b0] ss:$8 sps:$4 sm:$0xff]  }
 0x5a4   :  { %9514 = vmatpush1.bf16.msra.mxu0 %v11111_v11  ;;  %v11182_v11 = vld [vmem:[#allocation12 + $0x1c4] ss:$8 sps:$4 sm:$0xff]  }
 0x5a5   :  { %9515 = vmatprep.subr.bf16.mxu0 %v11116_v58  ;;  %v11180_v58 = vld [vmem:[#allocation12 + $0x1c0] ss:$8 sps:$4 sm:$0xff]  }
 0x5a8   :  { %9516 = vmatpush1.bf16.msra.mxu0 %v11114_v60  ;;  %v5454_v60 = vrot.slane %v11873_v23, %v11709_v57  ;;  %v11192_v57 = vld [vmem:[#allocation12 + $0x200] ss:$8 sps:$4 sm:$0xff]  }
 0x5a9   :  { %9517 = vmatprep.subr.bf16.mxu0 %v11119_v13  ;;  %v11185_v13 = vld [vmem:[#allocation12 + $0x1d4] ss:$8 sps:$4 sm:$0xff]  }
 0x5ac   :  { %9518 = vmatpush1.bf16.msra.mxu0 %v11117_v55  ;;  %v11183_v55 = vld [vmem:[#allocation12 + $0x1d0] ss:$8 sps:$4 sm:$0xff]  }
 0x5ad   :  { %9519 = vmatprep.subr.bf16.mxu0 %v11122_v17  ;;  %v10968_v17 = vadd.f32 %v11869_v32, %v5454_v60  ;;  %v11195_v32 = vld [vmem:[#allocation12 + $0x210] ss:$8 sps:$4 sm:$0xff]  }
 0x5b0   :  { %9520 = vmatpush1.bf16.msra.mxu0 %v11120_v20  ;;  %v11188_v20 = vld [vmem:[#allocation12 + $0x1e4] ss:$8 sps:$4 sm:$0xff]  }
 0x5b1   :  { %9521 = vmatprep.subr.bf16.mxu0 %v11125_v21  ;;  %v11186_v21 = vld [vmem:[#allocation12 + $0x1e0] ss:$8 sps:$4 sm:$0xff]  }
 0x5b4   :  { %9522 = vmatpush1.bf16.msra.mxu0 %v11123_v24  ;;  %v8701_v24 = vmul.f32 0.01, %v10968_v17 }
 0x5b5   :  { %9523 = vmatprep.subr.bf16.mxu0 %v11128_v25  ;;  %v11191_v25 = vld [vmem:[#allocation12 + $0x1f4] ss:$8 sps:$4 sm:$0xff]  }
 0x5b8   :  { %9524 = vmatpush1.bf16.msra.mxu0 %v11126_v26  ;;  %v11189_v26 = vld [vmem:[#allocation12 + $0x1f0] ss:$8 sps:$4 sm:$0xff]  }
 0x5b9   :  { %9525 = vmatprep.subr.bf16.mxu0 %v11131_v30  ;;  %v8709_v30 = vmax.f32 %v10968_v17, %v8701_v24 }
 0x5bc   :  { %9526 = vmatpush1.bf16.msra.mxu0 %v11129_v27  ;;  %v11194_v27 = vld [vmem:[#allocation12 + $0x204] ss:$8 sps:$4 sm:$0xff]  }
 0x5bd   :  { %9527 = vmatprep.subr.bf16.mxu0 %v11134_v28  ;;  %v8717_v28 = vpack.c.bf16 %v8709_v30, %v8709_v30  ;;  %v11243_v30 = vld [vmem:[#allocation12 + $0x310] ss:$8 sps:$4 sm:$0xff]  }
 0x5c0   :  { %9528 = vmatpush1.bf16.msra.mxu0 %v11132_v29  ;;  %v11197_v29 = vld [vmem:[#allocation12 + $0x214] ss:$8 sps:$4 sm:$0xff]  }
 0x5c1   :  { %9529 = vmatprep.subr.bf16.mxu0 %v11137_v14  ;;  %v11198_v14 = vld [vmem:[#allocation12 + $0x220] ss:$8 sps:$4 sm:$0xff]  }
 0x5c4   :  { %9530 = vmatpush1.bf16.msra.mxu0 %v11135_v45  ;;  %v11201_v45 = vld [vmem:[#allocation12 + $0x230] ss:$8 sps:$4 sm:$0xff]  }
 0x5c5   :  { %9531 = vmatprep.subr.bf16.mxu0 %v11140_v18  ;;  %v11204_v18 = vld [vmem:[#allocation12 + $0x240] ss:$8 sps:$4 sm:$0xff]  }
 0x5c8   :  { %9532 = vmatpush1.bf16.msra.mxu0 %v11138_v5  ;;  %v11207_v5 = vld [vmem:[#allocation12 + $0x250] ss:$8 sps:$4 sm:$0xff]  }
 0x5c9   :  { %9533 = vmatprep.subr.bf16.mxu0 %v11143_v33  ;;  %v11210_v33 = vld [vmem:[#allocation12 + $0x260] ss:$8 sps:$4 sm:$0xff]  }
 0x5cc   :  { %9534 = vmatpush1.bf16.msra.mxu0 %v11141_v38  ;;  %v11213_v38 = vld [vmem:[#allocation12 + $0x270] ss:$8 sps:$4 sm:$0xff]  }
 0x5cd   :  { %9544 = vmatprep.subr.bf16.mxu0 %v11146_v46  ;;  %v11216_v46 = vld [vmem:[#allocation12 + $0x280] ss:$8 sps:$4 sm:$0xff]  }
 0x5cf   :  { %9536 = vmatmul.mubr.bf16.vlgmr.msra.gmra.mrb[16].mxu0 %v8715_v50  ;;  %v11224_v50 = vld [vmem:[#allocation12 + $0x2a4] ss:$8 sps:$4 sm:$0xff]  }
 0x5d0   :  { %9545 = vmatpush1.bf16.msra.mxu0 %v11144_v48  ;;  %9576 = vmatprep.mubr.bf16.mxu0 %v8718_v51  ;;  %v11219_v48 = vld [vmem:[#allocation12 + $0x290] ss:$8 sps:$4 sm:$0xff]   ;;  %v11227_v51 = vld [vmem:[#allocation12 + $0x2b4] ss:$8 sps:$4 sm:$0xff]  }
 0x5d1   :  { %9546 = vmatprep.subr.bf16.mxu0 %v11149_v12  ;;  %v11222_v12 = vld [vmem:[#allocation12 + $0x2a0] ss:$8 sps:$4 sm:$0xff]  }
 0x5d4   :  { %9547 = vmatpush1.bf16.msra.mxu0 %v11147_v2  ;;  %v11225_v2 = vld [vmem:[#allocation12 + $0x2b0] ss:$8 sps:$4 sm:$0xff]  }
 0x5d5   :  { %9548 = vmatprep.subr.bf16.mxu0 %v11152_v52  ;;  %v11230_v52 = vld [vmem:[#allocation12 + $0x2c4] ss:$8 sps:$4 sm:$0xff]  }
 0x5d8   :  { %9549 = vmatpush1.bf16.msra.mxu0 %v11150_v53  ;;  %v11228_v53 = vld [vmem:[#allocation12 + $0x2c0] ss:$8 sps:$4 sm:$0xff]  }
 0x5d9   :  { %9550 = vmatprep.subr.bf16.mxu0 %v11155_v34  ;;  %v11233_v34 = vld [vmem:[#allocation12 + $0x2d4] ss:$8 sps:$4 sm:$0xff]  }
 0x5dc   :  { %9551 = vmatpush1.bf16.msra.mxu0 %v11153_v54  ;;  %v11231_v54 = vld [vmem:[#allocation12 + $0x2d0] ss:$8 sps:$4 sm:$0xff]  }
 0x5dd   :  { %9552 = vmatprep.subr.bf16.mxu0 %v11158_v36  ;;  %v11236_v36 = vld [vmem:[#allocation12 + $0x2e4] ss:$8 sps:$4 sm:$0xff]  }
 0x5e0   :  { %9553 = vmatpush1.bf16.msra.mxu0 %v11156_v1  ;;  %v11234_v1 = vld [vmem:[#allocation12 + $0x2e0] ss:$8 sps:$4 sm:$0xff]  }
 0x5e1   :  { %9554 = vmatprep.subr.bf16.mxu0 %v11161_v56  ;;  %v11239_v56 = vld [vmem:[#allocation12 + $0x2f4] ss:$8 sps:$4 sm:$0xff]  }
 0x5e4   :  { %9555 = vmatpush1.bf16.msra.mxu0 %v11159_v42  ;;  %v11237_v42 = vld [vmem:[#allocation12 + $0x2f0] ss:$8 sps:$4 sm:$0xff]  }
 0x5e5   :  { %9556 = vmatprep.subr.bf16.mxu0 %v11164_v10  ;;  %v11242_v10 = vld [vmem:[#allocation12 + $0x304] ss:$8 sps:$4 sm:$0xff]  }
 0x5e8   :  { %9557 = vmatpush1.bf16.msra.mxu0 %v11162_v61  ;;  %v5462_v61 = vrot.slane %v11873_v23, %v11727_v31 }
 0x5e9   :  { %9558 = vmatprep.subr.bf16.mxu0 %v11167_v22  ;;  %v5466_v22 = vrot.slane %v11873_v23, %v11730_v44 }
 0x5ec   :  { %9559 = vmatpush1.bf16.msra.mxu0 %v11165_v62 }
 0x5ed   :  { %9560 = vmatprep.subr.bf16.mxu0 %v11170_v16 }
 0x5f0   :  { %9561 = vmatpush1.bf16.msra.mxu0 %v11168_v0 }
 0x5f1   :  { %9562 = vmatprep.subr.bf16.mxu0 %v11173_v6 }
 0x5f4   :  { %9563 = vmatpush1.bf16.msra.mxu0 %v11171_v3 }
 0x5f5   :  { %9564 = vmatprep.subr.bf16.mxu0 %v11176_v4 }
 0x5f8   :  { %9565 = vmatpush1.bf16.msra.mxu0 %v11174_v7 }
 0x5f9   :  { %9566 = vmatprep.subr.bf16.mxu0 %v11179_v8  ;;  %v5474_v8 = vrot.slane %v11873_v23, %v11748_v19 }
 0x5fc   :  { %9567 = vmatpush1.bf16.msra.mxu0 %v11177_v9 }
 0x5fd   :  { %9568 = vmatprep.subr.bf16.mxu0 %v11182_v11 }
 0x600   :  { %9569 = vmatpush1.bf16.msra.mxu0 %v11180_v58 }
 0x601   :  { %9570 = vmatprep.subr.bf16.mxu0 %v11185_v13 }
 0x604   :  { %9571 = vmatpush1.bf16.msra.mxu0 %v11183_v55 }
 0x605   :  { %9572 = vmatprep.subr.bf16.mxu0 %v11188_v20  ;;  %v11240_v20 = vld [vmem:[#allocation12 + $0x300] ss:$8 sps:$4 sm:$0xff]  }
 0x608   :  { %9573 = vmatpush1.bf16.msra.mxu0 %v11186_v21 }
 0x609   :  { %9574 = vmatprep.subr.bf16.mxu0 %v11191_v25  ;;  %v11245_v25 = vld [vmem:[#allocation12 + $0x314] ss:$8 sps:$4 sm:$0xff]  }
 0x60c   :  { %9575 = vmatpush1.bf16.msra.mxu0 %v11189_v26 }
 0x60d   :  { %9585 = vmatprep.subr.bf16.mxu0 %v11194_v27  ;;  %v11248_v27 = vld [vmem:[#allocation12 + $0x324] ss:$8 sps:$4 sm:$0xff]  }
 0x60f   :  { %9577 = vmatmul.mubr.bf16.vlgmr.msra.gmra.mrb[16].mxu0 %v8717_v28  ;;  %v11251_v28 = vld [vmem:[#allocation12 + $0x334] ss:$8 sps:$4 sm:$0xff]  }
 0x610   :  { %9586 = vmatpush1.bf16.msra.mxu0 %v11192_v57  ;;  %v11246_v57 = vld [vmem:[#allocation12 + $0x320] ss:$8 sps:$4 sm:$0xff]  }
 0x611   :  { %9587 = vmatprep.subr.bf16.mxu0 %v11197_v29  ;;  %v11249_v29 = vld [vmem:[#allocation12 + $0x330] ss:$8 sps:$4 sm:$0xff]  }
 0x614   :  { %9588 = vmatpush1.bf16.msra.mxu0 %v11195_v32  ;;  %v11254_v32 = vld [vmem:[#allocation12 + $0x344] ss:$8 sps:$4 sm:$0xff]  }
 0x615   :  { %9589 = vmatprep.subr.bf16.mxu0 %v11200_v63  ;;  %v11252_v63 = vld [vmem:[#allocation12 + $0x340] ss:$8 sps:$4 sm:$0xff]  }
 0x618   :  { %9590 = vmatpush1.bf16.msra.mxu0 %v11198_v14  ;;  %v11257_v14 = vld [vmem:[#allocation12 + $0x354] ss:$8 sps:$4 sm:$0xff]  }
 0x619   :  { %9591 = vmatprep.subr.bf16.mxu0 %v11203_v47  ;;  %v11255_v47 = vld [vmem:[#allocation12 + $0x350] ss:$8 sps:$4 sm:$0xff]  }
 0x61c   :  { %9592 = vmatpush1.bf16.msra.mxu0 %v11201_v45  ;;  %v11260_v45 = vld [vmem:[#allocation12 + $0x364] ss:$8 sps:$4 sm:$0xff]  }
 0x61d   :  { %9593 = vmatprep.subr.bf16.mxu0 %v11206_v39  ;;  %v11258_v39 = vld [vmem:[#allocation12 + $0x360] ss:$8 sps:$4 sm:$0xff]  }
 0x620   :  { %9594 = vmatpush1.bf16.msra.mxu0 %v11204_v18  ;;  %v11263_v18 = vld [vmem:[#allocation12 + $0x374] ss:$8 sps:$4 sm:$0xff]  }
 0x621   :  { %9595 = vmatprep.subr.bf16.mxu0 %v11209_v35  ;;  %v11261_v35 = vld [vmem:[#allocation12 + $0x370] ss:$8 sps:$4 sm:$0xff]  }
 0x624   :  { %9596 = vmatpush1.bf16.msra.mxu0 %v11207_v5  ;;  %v11266_v5 = vld [vmem:[#allocation12 + $0x384] ss:$8 sps:$4 sm:$0xff]  }
 0x625   :  { %9597 = vmatprep.subr.bf16.mxu0 %v11212_v49  ;;  %v11264_v49 = vld [vmem:[#allocation12 + $0x380] ss:$8 sps:$4 sm:$0xff]  }
 0x628   :  { %9598 = vmatpush1.bf16.msra.mxu0 %v11210_v33  ;;  %v11269_v33 = vld [vmem:[#allocation12 + $0x394] ss:$8 sps:$4 sm:$0xff]  }
 0x629   :  { %9599 = vmatprep.subr.bf16.mxu0 %v11215_v37  ;;  %v11267_v37 = vld [vmem:[#allocation12 + $0x390] ss:$8 sps:$4 sm:$0xff]  }
 0x62c   :  { %9600 = vmatpush1.bf16.msra.mxu0 %v11213_v38  ;;  %v11272_v38 = vld [vmem:[#allocation12 + $0x3a4] ss:$8 sps:$4 sm:$0xff]  }
 0x62d   :  { %9601 = vmatprep.subr.bf16.mxu0 %v11218_v41  ;;  %v11270_v41 = vld [vmem:[#allocation12 + $0x3a0] ss:$8 sps:$4 sm:$0xff]  }
 0x630   :  { %9602 = vmatpush1.bf16.msra.mxu0 %v11216_v46  ;;  %v11275_v46 = vld [vmem:[#allocation12 + $0x3b4] ss:$8 sps:$4 sm:$0xff]  }
 0x631   :  { %9603 = vmatprep.subr.bf16.mxu0 %v11221_v59  ;;  %v11273_v59 = vld [vmem:[#allocation12 + $0x3b0] ss:$8 sps:$4 sm:$0xff]  }
 0x634   :  { %9604 = vmatpush1.bf16.msra.mxu0 %v11219_v48  ;;  %v11278_v48 = vld [vmem:[#allocation12 + $0x3c4] ss:$8 sps:$4 sm:$0xff]  }
 0x635   :  { %9605 = vmatprep.subr.bf16.mxu0 %v11224_v50  ;;  %v11276_v50 = vld [vmem:[#allocation12 + $0x3c0] ss:$8 sps:$4 sm:$0xff]  }
 0x638   :  { %9606 = vmatpush1.bf16.msra.mxu0 %v11222_v12  ;;  %v5470_v12 = vrot.slane %v11873_v23, %v11745_v15  ;;  %v8851_v15 = vld [vmem:[#allocation13] sm:$0x3] }
 0x639   :  { %9607 = vmatprep.subr.bf16.mxu0 %v11227_v51  ;;  %v11281_v51 = vld [vmem:[#allocation12 + $0x3d4] ss:$8 sps:$4 sm:$0xff]   ;;  %v8856_v23 = vrot.slane %v8851_v15, %v11686_v40 }
 0x63c   :  { %9608 = vmatpush1.bf16.msra.mxu0 %v11225_v2  ;;  %v11279_v2 = vld [vmem:[#allocation12 + $0x3d0] ss:$8 sps:$4 sm:$0xff]  }
 0x63d   :  { %9609 = vmatprep.subr.bf16.mxu0 %v11230_v52 }
 0x640   :  { %9610 = vmatpush1.bf16.msra.mxu0 %v11228_v53  ;;  %v11284_v53 = vld [vmem:[#allocation12 + $0x3e4] ss:$8 sps:$4 sm:$0xff]  }
 0x641   :  { %9611 = vmatprep.subr.bf16.mxu0 %v11233_v34  ;;  %v11282_v34 = vld [vmem:[#allocation12 + $0x3e0] ss:$8 sps:$4 sm:$0xff]  }
 0x644   :  { %9612 = vmatpush1.bf16.msra.mxu0 %v11231_v54 }
 0x645   :  { %9613 = vmatprep.subr.bf16.mxu0 %v11236_v36  ;;  %v11287_v36 = vld [vmem:[#allocation12 + $0x3f4] ss:$8 sps:$4 sm:$0xff]  }
 0x648   :  { %9614 = vmatpush1.bf16.msra.mxu0 %v11234_v1  ;;  %v11285_v1 = vld [vmem:[#allocation12 + $0x3f0] ss:$8 sps:$4 sm:$0xff]  }
 0x649   :  { %9615 = vmatprep.subr.bf16.mxu0 %v11239_v56 }
 0x64c   :  { %9616 = vmatpush1.bf16.msra.mxu0 %v11237_v42 }
 0x64d   :  { %9626 = vmatprep.subr.bf16.mxu0 %v11242_v10  ;;  %v8860_v10 = vrot.slane %v8851_v15, %v11691_v43 }
 0x662   :  { %v8528_v62 = vpop.f32.mrb[12].mxu0 }
 0x663   :  { %v10970_v16 = vadd.f32 %v8528_v62, %v5462_v61  ;;  %v8530_v0 = vpop.f32.mrb[13].mxu0 }
 0x664   :  { %v10971_v6 = vadd.f32 %v8530_v0, %v5466_v22  ;;  %v8532_v3 = vpop.f32.mrb[14].mxu0 }
 0x665   :  { %v8703_v4 = vmul.f32 0.01, %v10970_v16  ;;  %v8533_v7 = vpop.f32.mrb[15].mxu0 }
 0x666   :  { %v8704_v9 = vmul.f32 0.01, %v10971_v6 }
 0x667   :  { %v8711_v11 = vmax.f32 %v10970_v16, %v8703_v4  ;;  %v11895_v58 = vpop.f32.mrb[28].mxu1 }
 0x668   :  { %v8712_v60 = vmax.f32 %v10971_v6, %v8704_v9  ;;  %v8694_v13 = vpop.f32.mrb[29].mxu1  ;;  %v10972_v52 = vadd.f32 %v11895_v58, %v5470_v12 }
 0x669   :  { %v10973_v31 = vadd.f32 %v8694_v13, %v5474_v8  ;;  %v8696_v55 = vpop.f32.mrb[30].mxu1  ;;  %v8719_v21 = vpack.c.bf16 %v8711_v11, %v8711_v11 }
 0x66a   :  { %v8720_v17 = vpack.c.bf16 %v8712_v60, %v8712_v60  ;;  %v8697_v44 = vpop.f32.mrb[31].mxu1  ;;  %v8705_v54 = vmul.f32 0.01, %v10972_v52 }
 0x66b   :  { %v8706_v24 = vmul.f32 0.01, %v10973_v31 }
 0x66c   :  { %9617 = vmatprep.mubr.bf16.mxu0 %v8720_v17  ;;  %v8713_v56 = vmax.f32 %v10972_v52, %v8705_v54 }
 0x66d   :  { %v8714_v26 = vmax.f32 %v10973_v31, %v8706_v24  ;;  %9618 = vmatmul.mubr.bf16.vlgmr.msra.gmra.mrb[16].mxu0 %v8719_v21 }
 0x66e   :  { %9627 = vmatpush1.bf16.msra.mxu0 %v11240_v20  ;;  %v8721_v42 = vpack.c.bf16 %v8713_v56, %v8713_v56 }
 0x66f   :  { %v8722_v19 = vpack.c.bf16 %v8714_v26, %v8714_v26  ;;  %9628 = vmatprep.subr.bf16.mxu0 %v11245_v25 }
 0x671   :  { %9658 = vmatprep.mubr.bf16.mxu0 %v8722_v19 }
 0x672   :  { %9629 = vmatpush1.bf16.msra.mxu0 %v11243_v30 }
 0x673   :  { %9630 = vmatprep.subr.bf16.mxu0 %v11248_v27 }
 0x676   :  { %9631 = vmatpush1.bf16.msra.mxu0 %v11246_v57 }
 0x677   :  { %9632 = vmatprep.subr.bf16.mxu0 %v11251_v28 }
 0x67a   :  { %9633 = vmatpush1.bf16.msra.mxu0 %v11249_v29 }
 0x67b   :  { %9634 = vmatprep.subr.bf16.mxu0 %v11254_v32 }
 0x67e   :  { %9635 = vmatpush1.bf16.msra.mxu0 %v11252_v63 }
 0x67f   :  { %9636 = vmatprep.subr.bf16.mxu0 %v11257_v14 }
 0x682   :  { %9637 = vmatpush1.bf16.msra.mxu0 %v11255_v47 }
 0x683   :  { %9638 = vmatprep.subr.bf16.mxu0 %v11260_v45 }
 0x686   :  { %9639 = vmatpush1.bf16.msra.mxu0 %v11258_v39 }
 0x687   :  { %9640 = vmatprep.subr.bf16.mxu0 %v11263_v18 }
 0x68a   :  { %9641 = vmatpush1.bf16.msra.mxu0 %v11261_v35 }
 0x68b   :  { %9642 = vmatprep.subr.bf16.mxu0 %v11266_v5 }
 0x68e   :  { %9643 = vmatpush1.bf16.msra.mxu0 %v11264_v49 }
 0x68f   :  { %9644 = vmatprep.subr.bf16.mxu0 %v11269_v33 }
 0x692   :  { %9645 = vmatpush1.bf16.msra.mxu0 %v11267_v37 }
 0x693   :  { %9646 = vmatprep.subr.bf16.mxu0 %v11272_v38 }
 0x696   :  { %9647 = vmatpush1.bf16.msra.mxu0 %v11270_v41 }
 0x697   :  { %9648 = vmatprep.subr.bf16.mxu0 %v11275_v46 }
 0x69a   :  { %9649 = vmatpush1.bf16.msra.mxu0 %v11273_v59 }
 0x69b   :  { %9650 = vmatprep.subr.bf16.mxu0 %v11278_v48 }
 0x69e   :  { %9651 = vmatpush1.bf16.msra.mxu0 %v11276_v50 }
 0x69f   :  { %9652 = vmatprep.subr.bf16.mxu0 %v11281_v51 }
 0x6a2   :  { %9653 = vmatpush1.bf16.msra.mxu0 %v11279_v2 }
 0x6a3   :  { %9654 = vmatprep.subr.bf16.mxu0 %v11284_v53 }
 0x6a6   :  { %9655 = vmatpush1.bf16.msra.mxu0 %v11282_v34 }
 0x6a7   :  { %9656 = vmatprep.subr.bf16.mxu0 %v11287_v36 }
 0x6aa   :  { %9657 = vmatpush1.bf16.msra.mxu0 %v11285_v1 }
 0x6ad   :  { %9659 = vmatmul.mubr.bf16.vlgmr.msra.gmra.mrb[16].mxu0 %v8721_v42 }
 0x780   :  { %v9660_v61 = vpop.f32.mrb[16].mxu0 }
 0x781   :  { %v10974_v22 = vadd.f32 %v9660_v61, %v8856_v23  ;;  %v9662_v62 = vpop.f32.mrb[17].mxu0 }
 0x782   :  { %v10975_v16 = vadd.f32 %v9662_v62, %v8860_v10  ;;  %v9664_v0 = vpop.f32.mrb[18].mxu0 }
 0x783   :  { %9667 = vst [vmem:[%s11917_s9] sm:$0xff] %v10974_v22  ;;  %v9665_v6 = vpop.f32.mrb[19].mxu0 }
 0x784   :  { %9668 = vst [vmem:[%s11917_s9 + $0x8] sm:$0xff] %v10975_v16 }
 0x785   :  { %9673 = vsyncpa [#allocation3], 1 }
 0x786   :  { %9674 = vsyncpa [#allocation5], 1 }
 0x787   :  { %9675 = vsyncpa [#allocation8], 1 }
 0x788   :  { %9676 = vsyncpa [#allocation11], 1 }
 0x789   :  { %9677 = vsyncpa [#allocation14], 1 }

</bundles_post_ra>
